<compile_context>
chip_gen: v7x
topology: tpu7x:2x2x1
jax: 0.10.0
libtpu: 0.0.40
codegen_flags: <defaults>
</compile_context>

<pallas_src>
import jax
import jax.numpy as jnp
from jax.experimental import pallas as pl
from jax.experimental.pallas import tpu as pltpu


def _dpm_kernel(dep_ref, x_ref, bias_ref, wco_ref, bco_ref,
                ln1w_ref, ln1b_ref, wqkv_ref, dwqkv_ref, temp_ref,
                wpo_ref, ln2w_ref, ln2b_ref, wpi_ref, dwffn_ref, wpo2_ref,
                out_ref):
    _, H, W, C = dep_ref.shape
    HW = H * W
    C3 = wqkv_ref.shape[1]            # 3*C
    hid2 = wpi_ref.shape[1]           # 2*hid
    hid = hid2 // 2
    f32 = jnp.float32
    bf16 = jnp.bfloat16

    # ---- zero-padded spatial shifts (3x3, pad=1) ------------------------------------------
    # H shift = aligned major-dim concat; W shift = sublane concat with a zero column.
    def shift_h(a, dy):
        if dy == 1:
            return a
        zero = jnp.zeros((1,) + a.shape[1:], a.dtype)
        if dy == 0:                                   # needs a(h-1)
            return jnp.concatenate([zero, a[:-1]], axis=0)
        return jnp.concatenate([a[1:], zero], axis=0)  # dy == 2, needs a(h+1)

    def shift_w(a, dx):
        if dx == 1:
            return a
        zero = jnp.zeros((a.shape[0], 1) + a.shape[2:], a.dtype)
        if dx == 0:                                   # needs a(w-1)
            return jnp.concatenate([zero, a[:, :-1]], axis=1)
        return jnp.concatenate([a[:, 1:], zero], axis=1)  # dx == 2, needs a(w+1)

    def conv3x3_im2col(z_bf, w_flat_ref):
        # z_bf: (H, W, Cin) bf16 ; w_flat_ref: (9*Cin, Cout) bf16. One deep-K MXU matmul.
        cin = z_bf.shape[-1]
        slabs = []
        for dy in range(3):
            zy = shift_h(z_bf, dy)
            for dx in range(3):
                slabs.append(shift_w(zy, dx))
        patches = jnp.concatenate(slabs, axis=-1).reshape(HW, 9 * cin)
        return jnp.dot(patches, w_flat_ref[...], preferred_element_type=f32)

    def dwconv3x3(v_hwc, w_ref):
        # depthwise 3x3, stride 1, pad 1.  v_hwc: (H, W, c) f32 ; w_ref[dy, dx] -> (1, c)
        c = v_hwc.shape[-1]
        acc = jnp.zeros_like(v_hwc)
        for dy in range(3):
            vy = shift_h(v_hwc, dy)
            for dx in range(3):
                acc = acc + shift_w(vy, dx) * w_ref[dy, dx]
        return acc.reshape(HW, c)

    def layer_norm(v, w, b):          # Restormer "WithBias" LayerNorm over channels (f32)
        mu = jnp.mean(v, axis=-1, keepdims=True)
        var = jnp.mean(jnp.square(v - mu), axis=-1, keepdims=True)
        return (v - mu) * jax.lax.rsqrt(var + 1e-5) * w + b

    def gelu_tanh(v):
        # tanh GELU: transcendental goes to the EUP slot; |diff vs erf GELU| < 1e-3 abs,
        # negligible at the magnitudes seen here.
        return 0.5 * v * (1.0 + jnp.tanh(0.7978845608028654 * (v + 0.044715 * v * v * v)))

    dep = dep_ref[0]                  # (H, W, C) f32
    x = x_ref[0]                      # (H, W, C) f32

    # dep_prompt = x * sigmoid(dep) + bias
    dep_prompt = x * jax.nn.sigmoid(dep) + bias_ref[...]

    # conv_out(concat(dep_prompt, x)) as one im2col matmul with K = 9*2C.
    z = jnp.concatenate([dep_prompt, x], axis=-1).astype(bf16)       # (H, W, 2C)
    y = conv3x3_im2col(z, wco_ref) + bco_ref[...]                    # (HW, C) f32

    # ---- TransformerBlock: y = y + Attention(LN1(y)) ---------------------------------------
    xn = layer_norm(y, ln1w_ref[...], ln1b_ref[...])
    qkv = jnp.dot(xn.astype(bf16), wqkv_ref[...], preferred_element_type=f32)   # (HW, 3C)
    qkv = dwconv3x3(qkv.reshape(H, W, C3), dwqkv_ref)                            # (HW, 3C)
    q = qkv[:, :C]
    k = qkv[:, C:2 * C]
    v = qkv[:, 2 * C:]

    def col_scale(m, g=1.0):          # F.normalize over the spatial (HW) axis, eps=1e-12
        n = jnp.sqrt(jnp.sum(m * m, axis=0, keepdims=True))
        return m * (g / jnp.maximum(n, 1e-12))

    qn = col_scale(q, temp_ref[0, 0])         # temperature folded into the norm scale
    kn = col_scale(k)
    attn = jax.lax.dot_general(qn.astype(bf16), kn.astype(bf16),
                               (((0,), (0,)), ((), ())),
                               preferred_element_type=f32)            # (C, C)
    attn = attn - jnp.max(attn, axis=-1, keepdims=True)
    attn = jnp.exp(attn)
    attn = attn / jnp.sum(attn, axis=-1, keepdims=True)
    attn_out = jax.lax.dot_general(v.astype(bf16), attn.astype(bf16),
                                   (((1,), (1,)), ((), ())),
                                   preferred_element_type=f32)        # (HW, C)
    y = y + jnp.dot(attn_out.astype(bf16), wpo_ref[...], preferred_element_type=f32)

    # ---- TransformerBlock: y = y + GatedDConvFFN(LN2(y)) -----------------------------------
    xn2 = layer_norm(y, ln2w_ref[...], ln2b_ref[...])
    x12 = jnp.dot(xn2.astype(bf16), wpi_ref[...], preferred_element_type=f32)   # (HW, 2*hid)
    x12 = dwconv3x3(x12.reshape(H, W, hid2), dwffn_ref)                          # (HW, 2*hid)
    x1 = x12[:, :hid]
    x2 = x12[:, hid:]
    g = gelu_tanh(x1) * x2
    y = y + jnp.dot(g.astype(bf16), wpo2_ref[...], preferred_element_type=f32)

    # Lane-dense store: (C, HW) with HW on lanes; wrapper only reshapes (no XLA transpose).
    out_ref[0] = jnp.transpose(y)


def depth_prompt_forward(dep, x, params):
    """dep, x: (B, C, H, W) float32 (PyTorch NCHW convention). Returns (B, C, H, W)."""
    B, C, H, W = x.shape

    dep_n = jnp.transpose(dep, (0, 2, 3, 1)).astype(jnp.float32)
    x_n = jnp.transpose(x, (0, 2, 3, 1)).astype(jnp.float32)

    f32 = lambda a: a.astype(jnp.float32)
    b16 = lambda a: a.astype(jnp.bfloat16)

    io_spec = pl.BlockSpec((1, H, W, C), lambda b: (b, 0, 0, 0))

    def vmem_full(a):
        r = a.ndim
        return pl.BlockSpec(a.shape, lambda b, r=r: (0,) * r)

    smem_scalar = pl.BlockSpec(memory_space=pltpu.MemorySpace.SMEM)

    # (array, spec-or-None) in kernel argument order.
    weight_args = [
        (f32(params["bias"]).reshape(1, 1, C), None),
        (b16(params["w_co"].reshape(9 * 2 * C, C)), None),          # im2col-flattened conv_out
        (f32(params["b_co"]).reshape(1, C), None),
        (f32(params["ln1_w"]).reshape(1, C), None),
        (f32(params["ln1_b"]).reshape(1, C), None),
        (b16(params["w_qkv"][0, 0]), None),                         # fused (C, 3C)
        (f32(params["w_qkv_dw"]), None),                            # (3, 3, 1, 3C)
        (f32(params["temperature"]).reshape(1, 1), smem_scalar),    # scalar -> SMEM
        (b16(params["w_po"][0, 0]), None),                          # (C, C)
        (f32(params["ln2_w"]).reshape(1, C), None),
        (f32(params["ln2_b"]).reshape(1, C), None),
        (b16(params["w_pi"][0, 0]), None),                          # fused (C, 2*hid)
        (f32(params["w_ffn_dw"]), None),                            # (3, 3, 1, 2*hid)
        (b16(params["w_po2"][0, 0]), None),                         # (hid, C)
    ]
    weights = [a for a, _ in weight_args]
    weight_specs = [s if s is not None else vmem_full(a) for a, s in weight_args]

    out_flat = pl.pallas_call(
        _dpm_kernel,
        out_shape=jax.ShapeDtypeStruct((B, C, H * W), jnp.float32),
        grid_spec=pltpu.PrefetchScalarGridSpec(
            num_scalar_prefetch=0,
            grid=(B,),
            in_specs=[io_spec, io_spec] + weight_specs,
            out_specs=pl.BlockSpec((1, C, H * W), lambda b: (b, 0, 0)),
        ),
        compiler_params=pltpu.CompilerParams(
            dimension_semantics=("parallel",),
            vmem_limit_bytes=64 * 1024 * 1024,
        ),
    )(dep_n, x_n, *weights)

    return out_flat.reshape(B, C, H, W)


def init_params(key, C):
    """Deterministic synthetic init (shapes from DepthPromptMoudle.__init__)."""
    hid = int(C * 2.66)
    ks = jax.random.split(key, 13)
    n = lambda k, shp, s=0.1: (s * jax.random.normal(k, shp)).astype(jnp.float32)
    return dict(
        bias=jax.random.normal(ks[0], (C,), jnp.float32),          # nn.Parameter randn (1,C,1,1)
        w_co=n(ks[1], (3, 3, 2 * C, C)),                           # Conv2d(2C, C, 3, 1, 1), HWIO
        b_co=n(ks[2], (C,)),
        ln1_w=1.0 + n(ks[3], (C,)), ln1_b=n(ks[4], (C,)),          # WithBias LayerNorm
        w_qkv=n(ks[5], (1, 1, C, 3 * C)),                          # 1x1 qkv, bias=False
        w_qkv_dw=n(ks[6], (3, 3, 1, 3 * C)),                       # 3x3 depthwise qkv
        temperature=jnp.ones((1,), jnp.float32),                   # num_heads = 1
        w_po=n(ks[7], (1, 1, C, C)),                               # attn project_out
        ln2_w=1.0 + n(ks[8], (C,)), ln2_b=n(ks[9], (C,)),
        w_pi=n(ks[10], (1, 1, C, 2 * hid)),                        # FFN project_in
        w_ffn_dw=n(ks[11], (3, 3, 1, 2 * hid)),                    # FFN depthwise
        w_po2=n(ks[12], (1, 1, hid, C)),                           # FFN project_out
    )


def reference_forward(dep, x, p):
    """Pure-JAX (XLA, f32) reference of the PyTorch forward, for validation."""
    B, C, H, W = x.shape
    dn = ("NHWC", "HWIO", "NHWC")
    conv = lambda v, w: jax.lax.conv_general_dilated(v, w, (1, 1), "SAME",
                                                     dimension_numbers=dn)
    dwconv = lambda v, w: jax.lax.conv_general_dilated(
        v, w, (1, 1), "SAME", dimension_numbers=dn, feature_group_count=v.shape[-1])

    dep_n = jnp.transpose(dep, (0, 2, 3, 1))
    x_n = jnp.transpose(x, (0, 2, 3, 1))
    dep_prompt = x_n * jax.nn.sigmoid(dep_n) + p["bias"].reshape(1, 1, 1, C)
    y = conv(jnp.concatenate([dep_prompt, x_n], -1), p["w_co"]) + p["b_co"]

    def ln(v, w, b):
        mu = jnp.mean(v, -1, keepdims=True)
        var = jnp.mean((v - mu) ** 2, -1, keepdims=True)
        return (v - mu) / jnp.sqrt(var + 1e-5) * w + b

    xn = ln(y, p["ln1_w"], p["ln1_b"])
    qkv = dwconv(conv(xn, p["w_qkv"]), p["w_qkv_dw"])
    q, k, v = jnp.split(qkv, 3, axis=-1)
    to_c_hw = lambda t: jnp.transpose(t.reshape(B, H * W, C), (0, 2, 1))
    q, k, v = to_c_hw(q), to_c_hw(k), to_c_hw(v)
    nz = lambda t: t / jnp.maximum(jnp.sqrt(jnp.sum(t * t, -1, keepdims=True)), 1e-12)
    attn = jnp.einsum("bij,bkj->bik", nz(q), nz(k)) * p["temperature"][0]
    attn = jax.nn.softmax(attn, axis=-1)
    o = jnp.einsum("bij,bjn->bin", attn, v)
    o = jnp.transpose(o, (0, 2, 1)).reshape(B, H, W, C)
    y = y + conv(o, p["w_po"])

    xn2 = ln(y, p["ln2_w"], p["ln2_b"])
    h = dwconv(conv(xn2, p["w_pi"]), p["w_ffn_dw"])
    x1, x2 = jnp.split(h, 2, axis=-1)
    g = 0.5 * x1 * (1.0 + jax.scipy.special.erf(x1 / jnp.sqrt(2.0))) * x2
    y = y + conv(g, p["w_po2"])
    return jnp.transpose(y, (0, 3, 1, 2))


if __name__ == "__main__":
    key = jax.random.PRNGKey(0)
    B, C, H, W = 2, 4, 16, 16
    kd, kx, kp = jax.random.split(key, 3)
    dep = jax.random.normal(kd, (B, C, H, W), jnp.float32)
    x = jax.random.normal(kx, (B, C, H, W), jnp.float32)
    params = init_params(kp, C)

    out = depth_prompt_forward(dep, x, params)
    out = jax.block_until_ready(out)
    assert out.shape == (B, C, H, W) and out.dtype == jnp.float32

    ref = reference_forward(dep, x, params)
    err = float(jnp.max(jnp.abs(out - ref)))
    # bf16 MXU operands (with f32 accumulation) widen the tolerance vs. the pure-f32
    # variant of this kernel (which matched the reference to < 2e-3); expected err ~1e-2.
    assert err < 5e-2, f"max abs err {err}"
    print("KERNEL_OK")
</pallas_src>

<mosaic_0001>
module attributes {stable_mosaic.version = 11 : i64} {
  func.func @_dpm_kernel(%arg0: i32, %arg1: memref<1x16x16x4xf32, #tpu.memory_space<vmem>>, %arg2: memref<1x16x16x4xf32, #tpu.memory_space<vmem>>, %arg3: memref<1x1x4xf32, #tpu.memory_space<vmem>>, %arg4: memref<72x4xbf16, #tpu.memory_space<vmem>>, %arg5: memref<1x4xf32, #tpu.memory_space<vmem>>, %arg6: memref<1x4xf32, #tpu.memory_space<vmem>>, %arg7: memref<1x4xf32, #tpu.memory_space<vmem>>, %arg8: memref<4x12xbf16, #tpu.memory_space<vmem>>, %arg9: memref<3x3x1x12xf32, #tpu.memory_space<vmem>>, %arg10: memref<1x1xf32, #tpu.memory_space<smem>>, %arg11: memref<4x4xbf16, #tpu.memory_space<vmem>>, %arg12: memref<1x4xf32, #tpu.memory_space<vmem>>, %arg13: memref<1x4xf32, #tpu.memory_space<vmem>>, %arg14: memref<4x20xbf16, #tpu.memory_space<vmem>>, %arg15: memref<3x3x1x20xf32, #tpu.memory_space<vmem>>, %arg16: memref<10x4xbf16, #tpu.memory_space<vmem>>, %arg17: memref<1x4x256xf32, #tpu.memory_space<vmem>>) attributes {dimension_semantics = [#tpu.dimension_semantics<parallel>], iteration_bounds = array<i64: 2>, scalar_prefetch = 0 : i64, scratch_operands = 0 : i64, tpu.core_type = #tpu.core_type<tc>, window_params = [{transform_indices = @transform_0, window_bounds = array<i64: 1, 16, 16, 4>}, {transform_indices = @transform_1, window_bounds = array<i64: 1, 16, 16, 4>}, {pipeline_mode = #tpu.pipeline_mode<synchronous>, transform_indices = @transform_2, window_bounds = array<i64: 1, 1, 4>}, {pipeline_mode = #tpu.pipeline_mode<synchronous>, transform_indices = @transform_3, window_bounds = array<i64: 72, 4>}, {pipeline_mode = #tpu.pipeline_mode<synchronous>, transform_indices = @transform_4, window_bounds = array<i64: 1, 4>}, {pipeline_mode = #tpu.pipeline_mode<synchronous>, transform_indices = @transform_5, window_bounds = array<i64: 1, 4>}, {pipeline_mode = #tpu.pipeline_mode<synchronous>, transform_indices = @transform_6, window_bounds = array<i64: 1, 4>}, {pipeline_mode = #tpu.pipeline_mode<synchronous>, transform_indices = @transform_7, window_bounds = array<i64: 4, 12>}, {pipeline_mode = #tpu.pipeline_mode<synchronous>, transform_indices = @transform_8, window_bounds = array<i64: 3, 3, 1, 12>}, {transform_indices = @transform_9, window_bounds = array<i64: 1, 1>}, {pipeline_mode = #tpu.pipeline_mode<synchronous>, transform_indices = @transform_10, window_bounds = array<i64: 4, 4>}, {pipeline_mode = #tpu.pipeline_mode<synchronous>, transform_indices = @transform_11, window_bounds = array<i64: 1, 4>}, {pipeline_mode = #tpu.pipeline_mode<synchronous>, transform_indices = @transform_12, window_bounds = array<i64: 1, 4>}, {pipeline_mode = #tpu.pipeline_mode<synchronous>, transform_indices = @transform_13, window_bounds = array<i64: 4, 20>}, {pipeline_mode = #tpu.pipeline_mode<synchronous>, transform_indices = @transform_14, window_bounds = array<i64: 3, 3, 1, 20>}, {pipeline_mode = #tpu.pipeline_mode<synchronous>, transform_indices = @transform_15, window_bounds = array<i64: 10, 4>}, {transform_indices = @transform_16, window_bounds = array<i64: 1, 4, 256>}]} {
    %c0 = arith.constant 0 : index
    %c0_0 = arith.constant 0 : index
    %c0_1 = arith.constant 0 : index
    %c0_2 = arith.constant 0 : index
    %0 = vector.load %arg1[%c0, %c0_0, %c0_1, %c0_2] : memref<1x16x16x4xf32, #tpu.memory_space<vmem>>, vector<1x16x16x4xf32>
    %1 = vector.shape_cast %0 : vector<1x16x16x4xf32> to vector<16x16x4xf32>
    %c0_3 = arith.constant 0 : index
    %c0_4 = arith.constant 0 : index
    %c0_5 = arith.constant 0 : index
    %c0_6 = arith.constant 0 : index
    %2 = vector.load %arg2[%c0_3, %c0_4, %c0_5, %c0_6] : memref<1x16x16x4xf32, #tpu.memory_space<vmem>>, vector<1x16x16x4xf32>
    %3 = vector.shape_cast %2 : vector<1x16x16x4xf32> to vector<16x16x4xf32>
    %4 = arith.negf %1 : vector<16x16x4xf32>
    %5 = math.exp %4 : vector<16x16x4xf32>
    %cst = arith.constant 1.000000e+00 : f32
    %6 = vector.broadcast %cst : f32 to vector<16x16x4xf32>
    %7 = arith.addf %6, %5 : vector<16x16x4xf32>
    %8 = arith.divf %6, %7 : vector<16x16x4xf32>
    %9 = arith.mulf %3, %8 : vector<16x16x4xf32>
    %c0_7 = arith.constant 0 : index
    %c0_8 = arith.constant 0 : index
    %c0_9 = arith.constant 0 : index
    %10 = vector.load %arg3[%c0_7, %c0_8, %c0_9] : memref<1x1x4xf32, #tpu.memory_space<vmem>>, vector<1x1x4xf32>
    %11 = vector.broadcast %10 : vector<1x1x4xf32> to vector<16x16x4xf32>
    %12 = arith.addf %9, %11 : vector<16x16x4xf32>
    %13 = tpu.concatenate %12, %3 in 2 : vector<16x16x4xf32>, vector<16x16x4xf32> -> vector<16x16x8xf32>
    %14 = arith.truncf %13 : vector<16x16x8xf32> to vector<16x16x8xbf16>
    %cst_10 = arith.constant 0.000000e+00 : bf16
    %15 = vector.broadcast %cst_10 : bf16 to vector<1x16x8xbf16>
    %16 = vector.extract_strided_slice %14 {offsets = [0, 0, 0], sizes = [15, 16, 8], strides = [1, 1, 1]} : vector<16x16x8xbf16> to vector<15x16x8xbf16>
    %17 = tpu.concatenate %15, %16 in 0 : vector<1x16x8xbf16>, vector<15x16x8xbf16> -> vector<16x16x8xbf16>
    %cst_11 = arith.constant 0.000000e+00 : bf16
    %18 = vector.broadcast %cst_11 : bf16 to vector<16x1x8xbf16>
    %19 = vector.extract_strided_slice %17 {offsets = [0, 0, 0], sizes = [16, 15, 8], strides = [1, 1, 1]} : vector<16x16x8xbf16> to vector<16x15x8xbf16>
    %20 = tpu.concatenate %18, %19 in 1 : vector<16x1x8xbf16>, vector<16x15x8xbf16> -> vector<16x16x8xbf16>
    %cst_12 = arith.constant 0.000000e+00 : bf16
    %21 = vector.broadcast %cst_12 : bf16 to vector<16x1x8xbf16>
    %22 = vector.extract_strided_slice %17 {offsets = [0, 1, 0], sizes = [16, 15, 8], strides = [1, 1, 1]} : vector<16x16x8xbf16> to vector<16x15x8xbf16>
    %23 = tpu.concatenate %22, %21 in 1 : vector<16x15x8xbf16>, vector<16x1x8xbf16> -> vector<16x16x8xbf16>
    %cst_13 = arith.constant 0.000000e+00 : bf16
    %24 = vector.broadcast %cst_13 : bf16 to vector<16x1x8xbf16>
    %25 = vector.extract_strided_slice %14 {offsets = [0, 0, 0], sizes = [16, 15, 8], strides = [1, 1, 1]} : vector<16x16x8xbf16> to vector<16x15x8xbf16>
    %26 = tpu.concatenate %24, %25 in 1 : vector<16x1x8xbf16>, vector<16x15x8xbf16> -> vector<16x16x8xbf16>
    %cst_14 = arith.constant 0.000000e+00 : bf16
    %27 = vector.broadcast %cst_14 : bf16 to vector<16x1x8xbf16>
    %28 = vector.extract_strided_slice %14 {offsets = [0, 1, 0], sizes = [16, 15, 8], strides = [1, 1, 1]} : vector<16x16x8xbf16> to vector<16x15x8xbf16>
    %29 = tpu.concatenate %28, %27 in 1 : vector<16x15x8xbf16>, vector<16x1x8xbf16> -> vector<16x16x8xbf16>
    %cst_15 = arith.constant 0.000000e+00 : bf16
    %30 = vector.broadcast %cst_15 : bf16 to vector<1x16x8xbf16>
    %31 = vector.extract_strided_slice %14 {offsets = [1, 0, 0], sizes = [15, 16, 8], strides = [1, 1, 1]} : vector<16x16x8xbf16> to vector<15x16x8xbf16>
    %32 = tpu.concatenate %31, %30 in 0 : vector<15x16x8xbf16>, vector<1x16x8xbf16> -> vector<16x16x8xbf16>
    %cst_16 = arith.constant 0.000000e+00 : bf16
    %33 = vector.broadcast %cst_16 : bf16 to vector<16x1x8xbf16>
    %34 = vector.extract_strided_slice %32 {offsets = [0, 0, 0], sizes = [16, 15, 8], strides = [1, 1, 1]} : vector<16x16x8xbf16> to vector<16x15x8xbf16>
    %35 = tpu.concatenate %33, %34 in 1 : vector<16x1x8xbf16>, vector<16x15x8xbf16> -> vector<16x16x8xbf16>
    %cst_17 = arith.constant 0.000000e+00 : bf16
    %36 = vector.broadcast %cst_17 : bf16 to vector<16x1x8xbf16>
    %37 = vector.extract_strided_slice %32 {offsets = [0, 1, 0], sizes = [16, 15, 8], strides = [1, 1, 1]} : vector<16x16x8xbf16> to vector<16x15x8xbf16>
    %38 = tpu.concatenate %37, %36 in 1 : vector<16x15x8xbf16>, vector<16x1x8xbf16> -> vector<16x16x8xbf16>
    %39 = tpu.concatenate %20, %17, %23, %26, %14, %29, %35, %32, %38 in 2 : vector<16x16x8xbf16>, vector<16x16x8xbf16>, vector<16x16x8xbf16>, vector<16x16x8xbf16>, vector<16x16x8xbf16>, vector<16x16x8xbf16>, vector<16x16x8xbf16>, vector<16x16x8xbf16>, vector<16x16x8xbf16> -> vector<16x16x72xbf16>
    %40 = vector.shape_cast %39 : vector<16x16x72xbf16> to vector<256x72xbf16>
    %c0_18 = arith.constant 0 : index
    %c0_19 = arith.constant 0 : index
    %41 = vector.load %arg4[%c0_18, %c0_19] : memref<72x4xbf16, #tpu.memory_space<vmem>>, vector<72x4xbf16>
    %cst_20 = arith.constant dense<0.000000e+00> : vector<256x4xf32>
    %42 = tpu.matmul %40, %41, %cst_20 {dimension_numbers = #tpu.dot_dimension_numbers<[1], [0], [0], [1], [0, 0, 1, 1], [], []>} : vector<256x72xbf16>, vector<72x4xbf16>, vector<256x4xf32> -> vector<256x4xf32>
    %c0_21 = arith.constant 0 : index
    %c0_22 = arith.constant 0 : index
    %43 = vector.load %arg5[%c0_21, %c0_22] : memref<1x4xf32, #tpu.memory_space<vmem>>, vector<1x4xf32>
    %44 = vector.broadcast %43 : vector<1x4xf32> to vector<256x4xf32>
    %45 = arith.addf %42, %44 : vector<256x4xf32>
    %c0_23 = arith.constant 0 : index
    %c0_24 = arith.constant 0 : index
    %46 = vector.load %arg6[%c0_23, %c0_24] : memref<1x4xf32, #tpu.memory_space<vmem>>, vector<1x4xf32>
    %c0_25 = arith.constant 0 : index
    %c0_26 = arith.constant 0 : index
    %47 = vector.load %arg7[%c0_25, %c0_26] : memref<1x4xf32, #tpu.memory_space<vmem>>, vector<1x4xf32>
    %cst_27 = arith.constant dense<0.000000e+00> : vector<256xf32>
    %48 = vector.multi_reduction <add>, %45, %cst_27 [1] : vector<256x4xf32> to vector<256xf32>
    %49 = vector.shape_cast %48 : vector<256xf32> to vector<256x1xf32>
    %cst_28 = arith.constant 4.000000e+00 : f32
    %50 = vector.broadcast %cst_28 : f32 to vector<256x1xf32>
    %51 = arith.divf %49, %50 : vector<256x1xf32>
    %52 = vector.broadcast %51 : vector<256x1xf32> to vector<256x4xf32>
    %53 = arith.subf %45, %52 : vector<256x4xf32>
    %54 = arith.mulf %53, %53 : vector<256x4xf32>
    %cst_29 = arith.constant dense<0.000000e+00> : vector<256xf32>
    %55 = vector.multi_reduction <add>, %54, %cst_29 [1] : vector<256x4xf32> to vector<256xf32>
    %56 = vector.shape_cast %55 : vector<256xf32> to vector<256x1xf32>
    %cst_30 = arith.constant 4.000000e+00 : f32
    %57 = vector.broadcast %cst_30 : f32 to vector<256x1xf32>
    %58 = arith.divf %56, %57 : vector<256x1xf32>
    %59 = vector.broadcast %51 : vector<256x1xf32> to vector<256x4xf32>
    %60 = arith.subf %45, %59 : vector<256x4xf32>
    %cst_31 = arith.constant 9.99999974E-6 : f32
    %61 = vector.broadcast %cst_31 : f32 to vector<256x1xf32>
    %62 = arith.addf %58, %61 : vector<256x1xf32>
    %63 = math.rsqrt %62 : vector<256x1xf32>
    %64 = vector.broadcast %63 : vector<256x1xf32> to vector<256x4xf32>
    %65 = arith.mulf %60, %64 : vector<256x4xf32>
    %66 = vector.broadcast %46 : vector<1x4xf32> to vector<256x4xf32>
    %67 = arith.mulf %65, %66 : vector<256x4xf32>
    %68 = vector.broadcast %47 : vector<1x4xf32> to vector<256x4xf32>
    %69 = arith.addf %67, %68 : vector<256x4xf32>
    %70 = arith.truncf %69 : vector<256x4xf32> to vector<256x4xbf16>
    %c0_32 = arith.constant 0 : index
    %c0_33 = arith.constant 0 : index
    %71 = vector.load %arg8[%c0_32, %c0_33] : memref<4x12xbf16, #tpu.memory_space<vmem>>, vector<4x12xbf16>
    %cst_34 = arith.constant dense<0.000000e+00> : vector<256x12xf32>
    %72 = tpu.matmul %70, %71, %cst_34 {dimension_numbers = #tpu.dot_dimension_numbers<[1], [0], [0], [1], [0, 0, 1, 1], [], []>} : vector<256x4xbf16>, vector<4x12xbf16>, vector<256x12xf32> -> vector<256x12xf32>
    %73 = vector.shape_cast %72 : vector<256x12xf32> to vector<16x16x12xf32>
    %cst_35 = arith.constant 0.000000e+00 : f32
    %74 = vector.broadcast %cst_35 : f32 to vector<16x16x12xf32>
    %cst_36 = arith.constant 0.000000e+00 : f32
    %75 = vector.broadcast %cst_36 : f32 to vector<1x16x12xf32>
    %76 = vector.extract_strided_slice %73 {offsets = [0, 0, 0], sizes = [15, 16, 12], strides = [1, 1, 1]} : vector<16x16x12xf32> to vector<15x16x12xf32>
    %77 = tpu.concatenate %75, %76 in 0 : vector<1x16x12xf32>, vector<15x16x12xf32> -> vector<16x16x12xf32>
    %cst_37 = arith.constant 0.000000e+00 : f32
    %78 = vector.broadcast %cst_37 : f32 to vector<16x1x12xf32>
    %79 = vector.extract_strided_slice %77 {offsets = [0, 0, 0], sizes = [16, 15, 12], strides = [1, 1, 1]} : vector<16x16x12xf32> to vector<16x15x12xf32>
    %80 = tpu.concatenate %78, %79 in 1 : vector<16x1x12xf32>, vector<16x15x12xf32> -> vector<16x16x12xf32>
    %c0_38 = arith.constant 0 : index
    %c0_39 = arith.constant 0 : index
    %c0_40 = arith.constant 0 : index
    %c0_41 = arith.constant 0 : index
    %81 = vector.load %arg9[%c0_38, %c0_39, %c0_40, %c0_41] : memref<3x3x1x12xf32, #tpu.memory_space<vmem>>, vector<1x1x1x12xf32>
    %82 = vector.shape_cast %81 : vector<1x1x1x12xf32> to vector<1x12xf32>
    %83 = vector.shape_cast %82 : vector<1x12xf32> to vector<1x1x12xf32>
    %84 = vector.broadcast %83 : vector<1x1x12xf32> to vector<16x16x12xf32>
    %85 = arith.mulf %80, %84 : vector<16x16x12xf32>
    %86 = arith.addf %74, %85 : vector<16x16x12xf32>
    %c0_42 = arith.constant 0 : index
    %c1 = arith.constant 1 : index
    %c0_43 = arith.constant 0 : index
    %c0_44 = arith.constant 0 : index
    %87 = vector.load %arg9[%c0_42, %c1, %c0_43, %c0_44] : memref<3x3x1x12xf32, #tpu.memory_space<vmem>>, vector<1x1x1x12xf32>
    %88 = vector.shape_cast %87 : vector<1x1x1x12xf32> to vector<1x12xf32>
    %89 = vector.shape_cast %88 : vector<1x12xf32> to vector<1x1x12xf32>
    %90 = vector.broadcast %89 : vector<1x1x12xf32> to vector<16x16x12xf32>
    %91 = arith.mulf %77, %90 : vector<16x16x12xf32>
    %92 = arith.addf %86, %91 : vector<16x16x12xf32>
    %cst_45 = arith.constant 0.000000e+00 : f32
    %93 = vector.broadcast %cst_45 : f32 to vector<16x1x12xf32>
    %94 = vector.extract_strided_slice %77 {offsets = [0, 1, 0], sizes = [16, 15, 12], strides = [1, 1, 1]} : vector<16x16x12xf32> to vector<16x15x12xf32>
    %95 = tpu.concatenate %94, %93 in 1 : vector<16x15x12xf32>, vector<16x1x12xf32> -> vector<16x16x12xf32>
    %c0_46 = arith.constant 0 : index
    %c2 = arith.constant 2 : index
    %c0_47 = arith.constant 0 : index
    %c0_48 = arith.constant 0 : index
    %96 = vector.load %arg9[%c0_46, %c2, %c0_47, %c0_48] : memref<3x3x1x12xf32, #tpu.memory_space<vmem>>, vector<1x1x1x12xf32>
    %97 = vector.shape_cast %96 : vector<1x1x1x12xf32> to vector<1x12xf32>
    %98 = vector.shape_cast %97 : vector<1x12xf32> to vector<1x1x12xf32>
    %99 = vector.broadcast %98 : vector<1x1x12xf32> to vector<16x16x12xf32>
    %100 = arith.mulf %95, %99 : vector<16x16x12xf32>
    %101 = arith.addf %92, %100 : vector<16x16x12xf32>
    %cst_49 = arith.constant 0.000000e+00 : f32
    %102 = vector.broadcast %cst_49 : f32 to vector<16x1x12xf32>
    %103 = vector.extract_strided_slice %73 {offsets = [0, 0, 0], sizes = [16, 15, 12], strides = [1, 1, 1]} : vector<16x16x12xf32> to vector<16x15x12xf32>
    %104 = tpu.concatenate %102, %103 in 1 : vector<16x1x12xf32>, vector<16x15x12xf32> -> vector<16x16x12xf32>
    %c1_50 = arith.constant 1 : index
    %c0_51 = arith.constant 0 : index
    %c0_52 = arith.constant 0 : index
    %c0_53 = arith.constant 0 : index
    %105 = vector.load %arg9[%c1_50, %c0_51, %c0_52, %c0_53] : memref<3x3x1x12xf32, #tpu.memory_space<vmem>>, vector<1x1x1x12xf32>
    %106 = vector.shape_cast %105 : vector<1x1x1x12xf32> to vector<1x12xf32>
    %107 = vector.shape_cast %106 : vector<1x12xf32> to vector<1x1x12xf32>
    %108 = vector.broadcast %107 : vector<1x1x12xf32> to vector<16x16x12xf32>
    %109 = arith.mulf %104, %108 : vector<16x16x12xf32>
    %110 = arith.addf %101, %109 : vector<16x16x12xf32>
    %c1_54 = arith.constant 1 : index
    %c1_55 = arith.constant 1 : index
    %c0_56 = arith.constant 0 : index
    %c0_57 = arith.constant 0 : index
    %111 = vector.load %arg9[%c1_54, %c1_55, %c0_56, %c0_57] : memref<3x3x1x12xf32, #tpu.memory_space<vmem>>, vector<1x1x1x12xf32>
    %112 = vector.shape_cast %111 : vector<1x1x1x12xf32> to vector<1x12xf32>
    %113 = vector.shape_cast %112 : vector<1x12xf32> to vector<1x1x12xf32>
    %114 = vector.broadcast %113 : vector<1x1x12xf32> to vector<16x16x12xf32>
    %115 = arith.mulf %73, %114 : vector<16x16x12xf32>
    %116 = arith.addf %110, %115 : vector<16x16x12xf32>
    %cst_58 = arith.constant 0.000000e+00 : f32
    %117 = vector.broadcast %cst_58 : f32 to vector<16x1x12xf32>
    %118 = vector.extract_strided_slice %73 {offsets = [0, 1, 0], sizes = [16, 15, 12], strides = [1, 1, 1]} : vector<16x16x12xf32> to vector<16x15x12xf32>
    %119 = tpu.concatenate %118, %117 in 1 : vector<16x15x12xf32>, vector<16x1x12xf32> -> vector<16x16x12xf32>
    %c1_59 = arith.constant 1 : index
    %c2_60 = arith.constant 2 : index
    %c0_61 = arith.constant 0 : index
    %c0_62 = arith.constant 0 : index
    %120 = vector.load %arg9[%c1_59, %c2_60, %c0_61, %c0_62] : memref<3x3x1x12xf32, #tpu.memory_space<vmem>>, vector<1x1x1x12xf32>
    %121 = vector.shape_cast %120 : vector<1x1x1x12xf32> to vector<1x12xf32>
    %122 = vector.shape_cast %121 : vector<1x12xf32> to vector<1x1x12xf32>
    %123 = vector.broadcast %122 : vector<1x1x12xf32> to vector<16x16x12xf32>
    %124 = arith.mulf %119, %123 : vector<16x16x12xf32>
    %125 = arith.addf %116, %124 : vector<16x16x12xf32>
    %cst_63 = arith.constant 0.000000e+00 : f32
    %126 = vector.broadcast %cst_63 : f32 to vector<1x16x12xf32>
    %127 = vector.extract_strided_slice %73 {offsets = [1, 0, 0], sizes = [15, 16, 12], strides = [1, 1, 1]} : vector<16x16x12xf32> to vector<15x16x12xf32>
    %128 = tpu.concatenate %127, %126 in 0 : vector<15x16x12xf32>, vector<1x16x12xf32> -> vector<16x16x12xf32>
    %cst_64 = arith.constant 0.000000e+00 : f32
    %129 = vector.broadcast %cst_64 : f32 to vector<16x1x12xf32>
    %130 = vector.extract_strided_slice %128 {offsets = [0, 0, 0], sizes = [16, 15, 12], strides = [1, 1, 1]} : vector<16x16x12xf32> to vector<16x15x12xf32>
    %131 = tpu.concatenate %129, %130 in 1 : vector<16x1x12xf32>, vector<16x15x12xf32> -> vector<16x16x12xf32>
    %c2_65 = arith.constant 2 : index
    %c0_66 = arith.constant 0 : index
    %c0_67 = arith.constant 0 : index
    %c0_68 = arith.constant 0 : index
    %132 = vector.load %arg9[%c2_65, %c0_66, %c0_67, %c0_68] : memref<3x3x1x12xf32, #tpu.memory_space<vmem>>, vector<1x1x1x12xf32>
    %133 = vector.shape_cast %132 : vector<1x1x1x12xf32> to vector<1x12xf32>
    %134 = vector.shape_cast %133 : vector<1x12xf32> to vector<1x1x12xf32>
    %135 = vector.broadcast %134 : vector<1x1x12xf32> to vector<16x16x12xf32>
    %136 = arith.mulf %131, %135 : vector<16x16x12xf32>
    %137 = arith.addf %125, %136 : vector<16x16x12xf32>
    %c2_69 = arith.constant 2 : index
    %c1_70 = arith.constant 1 : index
    %c0_71 = arith.constant 0 : index
    %c0_72 = arith.constant 0 : index
    %138 = vector.load %arg9[%c2_69, %c1_70, %c0_71, %c0_72] : memref<3x3x1x12xf32, #tpu.memory_space<vmem>>, vector<1x1x1x12xf32>
    %139 = vector.shape_cast %138 : vector<1x1x1x12xf32> to vector<1x12xf32>
    %140 = vector.shape_cast %139 : vector<1x12xf32> to vector<1x1x12xf32>
    %141 = vector.broadcast %140 : vector<1x1x12xf32> to vector<16x16x12xf32>
    %142 = arith.mulf %128, %141 : vector<16x16x12xf32>
    %143 = arith.addf %137, %142 : vector<16x16x12xf32>
    %cst_73 = arith.constant 0.000000e+00 : f32
    %144 = vector.broadcast %cst_73 : f32 to vector<16x1x12xf32>
    %145 = vector.extract_strided_slice %128 {offsets = [0, 1, 0], sizes = [16, 15, 12], strides = [1, 1, 1]} : vector<16x16x12xf32> to vector<16x15x12xf32>
    %146 = tpu.concatenate %145, %144 in 1 : vector<16x15x12xf32>, vector<16x1x12xf32> -> vector<16x16x12xf32>
    %c2_74 = arith.constant 2 : index
    %c2_75 = arith.constant 2 : index
    %c0_76 = arith.constant 0 : index
    %c0_77 = arith.constant 0 : index
    %147 = vector.load %arg9[%c2_74, %c2_75, %c0_76, %c0_77] : memref<3x3x1x12xf32, #tpu.memory_space<vmem>>, vector<1x1x1x12xf32>
    %148 = vector.shape_cast %147 : vector<1x1x1x12xf32> to vector<1x12xf32>
    %149 = vector.shape_cast %148 : vector<1x12xf32> to vector<1x1x12xf32>
    %150 = vector.broadcast %149 : vector<1x1x12xf32> to vector<16x16x12xf32>
    %151 = arith.mulf %146, %150 : vector<16x16x12xf32>
    %152 = arith.addf %143, %151 : vector<16x16x12xf32>
    %153 = vector.shape_cast %152 : vector<16x16x12xf32> to vector<256x12xf32>
    %154 = vector.extract_strided_slice %153 {offsets = [0, 0], sizes = [256, 4], strides = [1, 1]} : vector<256x12xf32> to vector<256x4xf32>
    %155 = vector.extract_strided_slice %153 {offsets = [0, 4], sizes = [256, 4], strides = [1, 1]} : vector<256x12xf32> to vector<256x4xf32>
    %156 = vector.extract_strided_slice %153 {offsets = [0, 8], sizes = [256, 4], strides = [1, 1]} : vector<256x12xf32> to vector<256x4xf32>
    %c0_78 = arith.constant 0 : index
    %c0_79 = arith.constant 0 : index
    %157 = memref.load %arg10[%c0_78, %c0_79] : memref<1x1xf32, #tpu.memory_space<smem>>
    %158 = arith.mulf %154, %154 : vector<256x4xf32>
    %cst_80 = arith.constant dense<0.000000e+00> : vector<4xf32>
    %159 = vector.multi_reduction <add>, %158, %cst_80 [0] : vector<256x4xf32> to vector<4xf32>
    %160 = vector.shape_cast %159 : vector<4xf32> to vector<1x4xf32>
    %161 = math.sqrt %160 : vector<1x4xf32>
    %cst_81 = arith.constant 9.99999996E-13 : f32
    %162 = vector.broadcast %cst_81 : f32 to vector<1x4xf32>
    %163 = arith.maximumf %161, %162 : vector<1x4xf32>
    %164 = vector.broadcast %157 : f32 to vector<1x4xf32>
    %165 = arith.divf %164, %163 : vector<1x4xf32>
    %166 = vector.broadcast %165 : vector<1x4xf32> to vector<256x4xf32>
    %167 = arith.mulf %154, %166 : vector<256x4xf32>
    %168 = arith.mulf %155, %155 : vector<256x4xf32>
    %cst_82 = arith.constant dense<0.000000e+00> : vector<4xf32>
    %169 = vector.multi_reduction <add>, %168, %cst_82 [0] : vector<256x4xf32> to vector<4xf32>
    %170 = vector.shape_cast %169 : vector<4xf32> to vector<1x4xf32>
    %171 = math.sqrt %170 : vector<1x4xf32>
    %cst_83 = arith.constant 9.99999996E-13 : f32
    %172 = vector.broadcast %cst_83 : f32 to vector<1x4xf32>
    %173 = arith.maximumf %171, %172 : vector<1x4xf32>
    %cst_84 = arith.constant 1.000000e+00 : f32
    %174 = vector.broadcast %cst_84 : f32 to vector<1x4xf32>
    %175 = arith.divf %174, %173 : vector<1x4xf32>
    %176 = vector.broadcast %175 : vector<1x4xf32> to vector<256x4xf32>
    %177 = arith.mulf %155, %176 : vector<256x4xf32>
    %178 = arith.truncf %167 : vector<256x4xf32> to vector<256x4xbf16>
    %179 = arith.truncf %177 : vector<256x4xf32> to vector<256x4xbf16>
    %cst_85 = arith.constant dense<0.000000e+00> : vector<4x4xf32>
    %180 = tpu.matmul %178, %179, %cst_85 {dimension_numbers = #tpu.dot_dimension_numbers<[0], [0], [1], [1], [0, 1, 1, 1], [], []>} : vector<256x4xbf16>, vector<256x4xbf16>, vector<4x4xf32> -> vector<4x4xf32>
    %cst_86 = arith.constant dense<0xFF800000> : vector<4xf32>
    %181 = vector.multi_reduction <maximumf>, %180, %cst_86 [1] : vector<4x4xf32> to vector<4xf32>
    %182 = vector.shape_cast %181 : vector<4xf32> to vector<4x1xf32>
    %183 = vector.broadcast %182 : vector<4x1xf32> to vector<4x4xf32>
    %184 = arith.subf %180, %183 : vector<4x4xf32>
    %185 = math.exp %184 : vector<4x4xf32>
    %cst_87 = arith.constant dense<0.000000e+00> : vector<4xf32>
    %186 = vector.multi_reduction <add>, %185, %cst_87 [1] : vector<4x4xf32> to vector<4xf32>
    %187 = vector.shape_cast %186 : vector<4xf32> to vector<4x1xf32>
    %188 = vector.broadcast %187 : vector<4x1xf32> to vector<4x4xf32>
    %189 = arith.divf %185, %188 : vector<4x4xf32>
    %190 = arith.truncf %156 : vector<256x4xf32> to vector<256x4xbf16>
    %191 = arith.truncf %189 : vector<4x4xf32> to vector<4x4xbf16>
    %cst_88 = arith.constant dense<0.000000e+00> : vector<256x4xf32>
    %192 = tpu.matmul %190, %191, %cst_88 {dimension_numbers = #tpu.dot_dimension_numbers<[1], [1], [0], [0], [0, 0, 1, 0], [], []>} : vector<256x4xbf16>, vector<4x4xbf16>, vector<256x4xf32> -> vector<256x4xf32>
    %193 = arith.truncf %192 : vector<256x4xf32> to vector<256x4xbf16>
    %c0_89 = arith.constant 0 : index
    %c0_90 = arith.constant 0 : index
    %194 = vector.load %arg11[%c0_89, %c0_90] : memref<4x4xbf16, #tpu.memory_space<vmem>>, vector<4x4xbf16>
    %cst_91 = arith.constant dense<0.000000e+00> : vector<256x4xf32>
    %195 = tpu.matmul %193, %194, %cst_91 {dimension_numbers = #tpu.dot_dimension_numbers<[1], [0], [0], [1], [0, 0, 1, 1], [], []>} : vector<256x4xbf16>, vector<4x4xbf16>, vector<256x4xf32> -> vector<256x4xf32>
    %196 = arith.addf %45, %195 : vector<256x4xf32>
    %c0_92 = arith.constant 0 : index
    %c0_93 = arith.constant 0 : index
    %197 = vector.load %arg12[%c0_92, %c0_93] : memref<1x4xf32, #tpu.memory_space<vmem>>, vector<1x4xf32>
    %c0_94 = arith.constant 0 : index
    %c0_95 = arith.constant 0 : index
    %198 = vector.load %arg13[%c0_94, %c0_95] : memref<1x4xf32, #tpu.memory_space<vmem>>, vector<1x4xf32>
    %cst_96 = arith.constant dense<0.000000e+00> : vector<256xf32>
    %199 = vector.multi_reduction <add>, %196, %cst_96 [1] : vector<256x4xf32> to vector<256xf32>
    %200 = vector.shape_cast %199 : vector<256xf32> to vector<256x1xf32>
    %cst_97 = arith.constant 4.000000e+00 : f32
    %201 = vector.broadcast %cst_97 : f32 to vector<256x1xf32>
    %202 = arith.divf %200, %201 : vector<256x1xf32>
    %203 = vector.broadcast %202 : vector<256x1xf32> to vector<256x4xf32>
    %204 = arith.subf %196, %203 : vector<256x4xf32>
    %205 = arith.mulf %204, %204 : vector<256x4xf32>
    %cst_98 = arith.constant dense<0.000000e+00> : vector<256xf32>
    %206 = vector.multi_reduction <add>, %205, %cst_98 [1] : vector<256x4xf32> to vector<256xf32>
    %207 = vector.shape_cast %206 : vector<256xf32> to vector<256x1xf32>
    %cst_99 = arith.constant 4.000000e+00 : f32
    %208 = vector.broadcast %cst_99 : f32 to vector<256x1xf32>
    %209 = arith.divf %207, %208 : vector<256x1xf32>
    %210 = vector.broadcast %202 : vector<256x1xf32> to vector<256x4xf32>
    %211 = arith.subf %196, %210 : vector<256x4xf32>
    %cst_100 = arith.constant 9.99999974E-6 : f32
    %212 = vector.broadcast %cst_100 : f32 to vector<256x1xf32>
    %213 = arith.addf %209, %212 : vector<256x1xf32>
    %214 = math.rsqrt %213 : vector<256x1xf32>
    %215 = vector.broadcast %214 : vector<256x1xf32> to vector<256x4xf32>
    %216 = arith.mulf %211, %215 : vector<256x4xf32>
    %217 = vector.broadcast %197 : vector<1x4xf32> to vector<256x4xf32>
    %218 = arith.mulf %216, %217 : vector<256x4xf32>
    %219 = vector.broadcast %198 : vector<1x4xf32> to vector<256x4xf32>
    %220 = arith.addf %218, %219 : vector<256x4xf32>
    %221 = arith.truncf %220 : vector<256x4xf32> to vector<256x4xbf16>
    %c0_101 = arith.constant 0 : index
    %c0_102 = arith.constant 0 : index
    %222 = vector.load %arg14[%c0_101, %c0_102] : memref<4x20xbf16, #tpu.memory_space<vmem>>, vector<4x20xbf16>
    %cst_103 = arith.constant dense<0.000000e+00> : vector<256x20xf32>
    %223 = tpu.matmul %221, %222, %cst_103 {dimension_numbers = #tpu.dot_dimension_numbers<[1], [0], [0], [1], [0, 0, 1, 1], [], []>} : vector<256x4xbf16>, vector<4x20xbf16>, vector<256x20xf32> -> vector<256x20xf32>
    %224 = vector.shape_cast %223 : vector<256x20xf32> to vector<16x16x20xf32>
    %cst_104 = arith.constant 0.000000e+00 : f32
    %225 = vector.broadcast %cst_104 : f32 to vector<16x16x20xf32>
    %cst_105 = arith.constant 0.000000e+00 : f32
    %226 = vector.broadcast %cst_105 : f32 to vector<1x16x20xf32>
    %227 = vector.extract_strided_slice %224 {offsets = [0, 0, 0], sizes = [15, 16, 20], strides = [1, 1, 1]} : vector<16x16x20xf32> to vector<15x16x20xf32>
    %228 = tpu.concatenate %226, %227 in 0 : vector<1x16x20xf32>, vector<15x16x20xf32> -> vector<16x16x20xf32>
    %cst_106 = arith.constant 0.000000e+00 : f32
    %229 = vector.broadcast %cst_106 : f32 to vector<16x1x20xf32>
    %230 = vector.extract_strided_slice %228 {offsets = [0, 0, 0], sizes = [16, 15, 20], strides = [1, 1, 1]} : vector<16x16x20xf32> to vector<16x15x20xf32>
    %231 = tpu.concatenate %229, %230 in 1 : vector<16x1x20xf32>, vector<16x15x20xf32> -> vector<16x16x20xf32>
    %c0_107 = arith.constant 0 : index
    %c0_108 = arith.constant 0 : index
    %c0_109 = arith.constant 0 : index
    %c0_110 = arith.constant 0 : index
    %232 = vector.load %arg15[%c0_107, %c0_108, %c0_109, %c0_110] : memref<3x3x1x20xf32, #tpu.memory_space<vmem>>, vector<1x1x1x20xf32>
    %233 = vector.shape_cast %232 : vector<1x1x1x20xf32> to vector<1x20xf32>
    %234 = vector.shape_cast %233 : vector<1x20xf32> to vector<1x1x20xf32>
    %235 = vector.broadcast %234 : vector<1x1x20xf32> to vector<16x16x20xf32>
    %236 = arith.mulf %231, %235 : vector<16x16x20xf32>
    %237 = arith.addf %225, %236 : vector<16x16x20xf32>
    %c0_111 = arith.constant 0 : index
    %c1_112 = arith.constant 1 : index
    %c0_113 = arith.constant 0 : index
    %c0_114 = arith.constant 0 : index
    %238 = vector.load %arg15[%c0_111, %c1_112, %c0_113, %c0_114] : memref<3x3x1x20xf32, #tpu.memory_space<vmem>>, vector<1x1x1x20xf32>
    %239 = vector.shape_cast %238 : vector<1x1x1x20xf32> to vector<1x20xf32>
    %240 = vector.shape_cast %239 : vector<1x20xf32> to vector<1x1x20xf32>
    %241 = vector.broadcast %240 : vector<1x1x20xf32> to vector<16x16x20xf32>
    %242 = arith.mulf %228, %241 : vector<16x16x20xf32>
    %243 = arith.addf %237, %242 : vector<16x16x20xf32>
    %cst_115 = arith.constant 0.000000e+00 : f32
    %244 = vector.broadcast %cst_115 : f32 to vector<16x1x20xf32>
    %245 = vector.extract_strided_slice %228 {offsets = [0, 1, 0], sizes = [16, 15, 20], strides = [1, 1, 1]} : vector<16x16x20xf32> to vector<16x15x20xf32>
    %246 = tpu.concatenate %245, %244 in 1 : vector<16x15x20xf32>, vector<16x1x20xf32> -> vector<16x16x20xf32>
    %c0_116 = arith.constant 0 : index
    %c2_117 = arith.constant 2 : index
    %c0_118 = arith.constant 0 : index
    %c0_119 = arith.constant 0 : index
    %247 = vector.load %arg15[%c0_116, %c2_117, %c0_118, %c0_119] : memref<3x3x1x20xf32, #tpu.memory_space<vmem>>, vector<1x1x1x20xf32>
    %248 = vector.shape_cast %247 : vector<1x1x1x20xf32> to vector<1x20xf32>
    %249 = vector.shape_cast %248 : vector<1x20xf32> to vector<1x1x20xf32>
    %250 = vector.broadcast %249 : vector<1x1x20xf32> to vector<16x16x20xf32>
    %251 = arith.mulf %246, %250 : vector<16x16x20xf32>
    %252 = arith.addf %243, %251 : vector<16x16x20xf32>
    %cst_120 = arith.constant 0.000000e+00 : f32
    %253 = vector.broadcast %cst_120 : f32 to vector<16x1x20xf32>
    %254 = vector.extract_strided_slice %224 {offsets = [0, 0, 0], sizes = [16, 15, 20], strides = [1, 1, 1]} : vector<16x16x20xf32> to vector<16x15x20xf32>
    %255 = tpu.concatenate %253, %254 in 1 : vector<16x1x20xf32>, vector<16x15x20xf32> -> vector<16x16x20xf32>
    %c1_121 = arith.constant 1 : index
    %c0_122 = arith.constant 0 : index
    %c0_123 = arith.constant 0 : index
    %c0_124 = arith.constant 0 : index
    %256 = vector.load %arg15[%c1_121, %c0_122, %c0_123, %c0_124] : memref<3x3x1x20xf32, #tpu.memory_space<vmem>>, vector<1x1x1x20xf32>
    %257 = vector.shape_cast %256 : vector<1x1x1x20xf32> to vector<1x20xf32>
    %258 = vector.shape_cast %257 : vector<1x20xf32> to vector<1x1x20xf32>
    %259 = vector.broadcast %258 : vector<1x1x20xf32> to vector<16x16x20xf32>
    %260 = arith.mulf %255, %259 : vector<16x16x20xf32>
    %261 = arith.addf %252, %260 : vector<16x16x20xf32>
    %c1_125 = arith.constant 1 : index
    %c1_126 = arith.constant 1 : index
    %c0_127 = arith.constant 0 : index
    %c0_128 = arith.constant 0 : index
    %262 = vector.load %arg15[%c1_125, %c1_126, %c0_127, %c0_128] : memref<3x3x1x20xf32, #tpu.memory_space<vmem>>, vector<1x1x1x20xf32>
    %263 = vector.shape_cast %262 : vector<1x1x1x20xf32> to vector<1x20xf32>
    %264 = vector.shape_cast %263 : vector<1x20xf32> to vector<1x1x20xf32>
    %265 = vector.broadcast %264 : vector<1x1x20xf32> to vector<16x16x20xf32>
    %266 = arith.mulf %224, %265 : vector<16x16x20xf32>
    %267 = arith.addf %261, %266 : vector<16x16x20xf32>
    %cst_129 = arith.constant 0.000000e+00 : f32
    %268 = vector.broadcast %cst_129 : f32 to vector<16x1x20xf32>
    %269 = vector.extract_strided_slice %224 {offsets = [0, 1, 0], sizes = [16, 15, 20], strides = [1, 1, 1]} : vector<16x16x20xf32> to vector<16x15x20xf32>
    %270 = tpu.concatenate %269, %268 in 1 : vector<16x15x20xf32>, vector<16x1x20xf32> -> vector<16x16x20xf32>
    %c1_130 = arith.constant 1 : index
    %c2_131 = arith.constant 2 : index
    %c0_132 = arith.constant 0 : index
    %c0_133 = arith.constant 0 : index
    %271 = vector.load %arg15[%c1_130, %c2_131, %c0_132, %c0_133] : memref<3x3x1x20xf32, #tpu.memory_space<vmem>>, vector<1x1x1x20xf32>
    %272 = vector.shape_cast %271 : vector<1x1x1x20xf32> to vector<1x20xf32>
    %273 = vector.shape_cast %272 : vector<1x20xf32> to vector<1x1x20xf32>
    %274 = vector.broadcast %273 : vector<1x1x20xf32> to vector<16x16x20xf32>
    %275 = arith.mulf %270, %274 : vector<16x16x20xf32>
    %276 = arith.addf %267, %275 : vector<16x16x20xf32>
    %cst_134 = arith.constant 0.000000e+00 : f32
    %277 = vector.broadcast %cst_134 : f32 to vector<1x16x20xf32>
    %278 = vector.extract_strided_slice %224 {offsets = [1, 0, 0], sizes = [15, 16, 20], strides = [1, 1, 1]} : vector<16x16x20xf32> to vector<15x16x20xf32>
    %279 = tpu.concatenate %278, %277 in 0 : vector<15x16x20xf32>, vector<1x16x20xf32> -> vector<16x16x20xf32>
    %cst_135 = arith.constant 0.000000e+00 : f32
    %280 = vector.broadcast %cst_135 : f32 to vector<16x1x20xf32>
    %281 = vector.extract_strided_slice %279 {offsets = [0, 0, 0], sizes = [16, 15, 20], strides = [1, 1, 1]} : vector<16x16x20xf32> to vector<16x15x20xf32>
    %282 = tpu.concatenate %280, %281 in 1 : vector<16x1x20xf32>, vector<16x15x20xf32> -> vector<16x16x20xf32>
    %c2_136 = arith.constant 2 : index
    %c0_137 = arith.constant 0 : index
    %c0_138 = arith.constant 0 : index
    %c0_139 = arith.constant 0 : index
    %283 = vector.load %arg15[%c2_136, %c0_137, %c0_138, %c0_139] : memref<3x3x1x20xf32, #tpu.memory_space<vmem>>, vector<1x1x1x20xf32>
    %284 = vector.shape_cast %283 : vector<1x1x1x20xf32> to vector<1x20xf32>
    %285 = vector.shape_cast %284 : vector<1x20xf32> to vector<1x1x20xf32>
    %286 = vector.broadcast %285 : vector<1x1x20xf32> to vector<16x16x20xf32>
    %287 = arith.mulf %282, %286 : vector<16x16x20xf32>
    %288 = arith.addf %276, %287 : vector<16x16x20xf32>
    %c2_140 = arith.constant 2 : index
    %c1_141 = arith.constant 1 : index
    %c0_142 = arith.constant 0 : index
    %c0_143 = arith.constant 0 : index
    %289 = vector.load %arg15[%c2_140, %c1_141, %c0_142, %c0_143] : memref<3x3x1x20xf32, #tpu.memory_space<vmem>>, vector<1x1x1x20xf32>
    %290 = vector.shape_cast %289 : vector<1x1x1x20xf32> to vector<1x20xf32>
    %291 = vector.shape_cast %290 : vector<1x20xf32> to vector<1x1x20xf32>
    %292 = vector.broadcast %291 : vector<1x1x20xf32> to vector<16x16x20xf32>
    %293 = arith.mulf %279, %292 : vector<16x16x20xf32>
    %294 = arith.addf %288, %293 : vector<16x16x20xf32>
    %cst_144 = arith.constant 0.000000e+00 : f32
    %295 = vector.broadcast %cst_144 : f32 to vector<16x1x20xf32>
    %296 = vector.extract_strided_slice %279 {offsets = [0, 1, 0], sizes = [16, 15, 20], strides = [1, 1, 1]} : vector<16x16x20xf32> to vector<16x15x20xf32>
    %297 = tpu.concatenate %296, %295 in 1 : vector<16x15x20xf32>, vector<16x1x20xf32> -> vector<16x16x20xf32>
    %c2_145 = arith.constant 2 : index
    %c2_146 = arith.constant 2 : index
    %c0_147 = arith.constant 0 : index
    %c0_148 = arith.constant 0 : index
    %298 = vector.load %arg15[%c2_145, %c2_146, %c0_147, %c0_148] : memref<3x3x1x20xf32, #tpu.memory_space<vmem>>, vector<1x1x1x20xf32>
    %299 = vector.shape_cast %298 : vector<1x1x1x20xf32> to vector<1x20xf32>
    %300 = vector.shape_cast %299 : vector<1x20xf32> to vector<1x1x20xf32>
    %301 = vector.broadcast %300 : vector<1x1x20xf32> to vector<16x16x20xf32>
    %302 = arith.mulf %297, %301 : vector<16x16x20xf32>
    %303 = arith.addf %294, %302 : vector<16x16x20xf32>
    %304 = vector.shape_cast %303 : vector<16x16x20xf32> to vector<256x20xf32>
    %305 = vector.extract_strided_slice %304 {offsets = [0, 0], sizes = [256, 10], strides = [1, 1]} : vector<256x20xf32> to vector<256x10xf32>
    %306 = vector.extract_strided_slice %304 {offsets = [0, 10], sizes = [256, 10], strides = [1, 1]} : vector<256x20xf32> to vector<256x10xf32>
    %cst_149 = arith.constant 5.000000e-01 : f32
    %307 = vector.broadcast %cst_149 : f32 to vector<256x10xf32>
    %308 = arith.mulf %307, %305 : vector<256x10xf32>
    %cst_150 = arith.constant 4.471500e-02 : f32
    %309 = vector.broadcast %cst_150 : f32 to vector<256x10xf32>
    %310 = arith.mulf %309, %305 : vector<256x10xf32>
    %311 = arith.mulf %310, %305 : vector<256x10xf32>
    %312 = arith.mulf %311, %305 : vector<256x10xf32>
    %313 = arith.addf %305, %312 : vector<256x10xf32>
    %cst_151 = arith.constant 0.797884583 : f32
    %314 = vector.broadcast %cst_151 : f32 to vector<256x10xf32>
    %315 = arith.mulf %314, %313 : vector<256x10xf32>
    %316 = math.tanh %315 : vector<256x10xf32>
    %cst_152 = arith.constant 1.000000e+00 : f32
    %317 = vector.broadcast %cst_152 : f32 to vector<256x10xf32>
    %318 = arith.addf %317, %316 : vector<256x10xf32>
    %319 = arith.mulf %308, %318 : vector<256x10xf32>
    %320 = arith.mulf %319, %306 : vector<256x10xf32>
    %321 = arith.truncf %320 : vector<256x10xf32> to vector<256x10xbf16>
    %c0_153 = arith.constant 0 : index
    %c0_154 = arith.constant 0 : index
    %322 = vector.load %arg16[%c0_153, %c0_154] : memref<10x4xbf16, #tpu.memory_space<vmem>>, vector<10x4xbf16>
    %cst_155 = arith.constant dense<0.000000e+00> : vector<256x4xf32>
    %323 = tpu.matmul %321, %322, %cst_155 {dimension_numbers = #tpu.dot_dimension_numbers<[1], [0], [0], [1], [0, 0, 1, 1], [], []>} : vector<256x10xbf16>, vector<10x4xbf16>, vector<256x4xf32> -> vector<256x4xf32>
    %324 = arith.addf %196, %323 : vector<256x4xf32>
    %325 = tpu.transpose %324, [1, 0] : vector<256x4xf32> -> vector<4x256xf32>
    %c0_156 = arith.constant 0 : index
    %c0_157 = arith.constant 0 : index
    %c0_158 = arith.constant 0 : index
    %326 = vector.load %arg17[%c0_156, %c0_157, %c0_158] : memref<1x4x256xf32, #tpu.memory_space<vmem>>, vector<1x4x256xf32>
    %327 = vector.shape_cast %326 : vector<1x4x256xf32> to vector<4x256xf32>
    %328 = vector.shape_cast %325 : vector<4x256xf32> to vector<1x4x256xf32>
    tpu.vector_store %arg17[%c0_156, %c0_157, %c0_158], %328 {strides = array<i32>} : memref<1x4x256xf32, #tpu.memory_space<vmem>>, vector<1x4x256xf32>,
    return
  }
  func.func @transform_0(%arg0: i32) -> (i32, i32, i32, i32) {
    %c0_i32 = arith.constant 0 : i32
    %c0_i32_0 = arith.constant 0 : i32
    %c0_i32_1 = arith.constant 0 : i32
    %c0_i32_2 = arith.constant 0 : i32
    return %arg0, %c0_i32, %c0_i32_0, %c0_i32_1 : i32, i32, i32, i32
  }
  func.func @transform_1(%arg0: i32) -> (i32, i32, i32, i32) {
    %c0_i32 = arith.constant 0 : i32
    %c0_i32_0 = arith.constant 0 : i32
    %c0_i32_1 = arith.constant 0 : i32
    %c0_i32_2 = arith.constant 0 : i32
    return %arg0, %c0_i32, %c0_i32_0, %c0_i32_1 : i32, i32, i32, i32
  }
  func.func @transform_2(%arg0: i32) -> (i32, i32, i32) {
    %c0_i32 = arith.constant 0 : i32
    %c0_i32_0 = arith.constant 0 : i32
    %c0_i32_1 = arith.constant 0 : i32
    %c0_i32_2 = arith.constant 0 : i32
    return %c0_i32, %c0_i32_0, %c0_i32_1 : i32, i32, i32
  }
  func.func @transform_3(%arg0: i32) -> (i32, i32) {
    %c0_i32 = arith.constant 0 : i32
    %c0_i32_0 = arith.constant 0 : i32
    %c0_i32_1 = arith.constant 0 : i32
    return %c0_i32, %c0_i32_0 : i32, i32
  }
  func.func @transform_4(%arg0: i32) -> (i32, i32) {
    %c0_i32 = arith.constant 0 : i32
    %c0_i32_0 = arith.constant 0 : i32
    %c0_i32_1 = arith.constant 0 : i32
    return %c0_i32, %c0_i32_0 : i32, i32
  }
  func.func @transform_5(%arg0: i32) -> (i32, i32) {
    %c0_i32 = arith.constant 0 : i32
    %c0_i32_0 = arith.constant 0 : i32
    %c0_i32_1 = arith.constant 0 : i32
    return %c0_i32, %c0_i32_0 : i32, i32
  }
  func.func @transform_6(%arg0: i32) -> (i32, i32) {
    %c0_i32 = arith.constant 0 : i32
    %c0_i32_0 = arith.constant 0 : i32
    %c0_i32_1 = arith.constant 0 : i32
    return %c0_i32, %c0_i32_0 : i32, i32
  }
  func.func @transform_7(%arg0: i32) -> (i32, i32) {
    %c0_i32 = arith.constant 0 : i32
    %c0_i32_0 = arith.constant 0 : i32
    %c0_i32_1 = arith.constant 0 : i32
    return %c0_i32, %c0_i32_0 : i32, i32
  }
  func.func @transform_8(%arg0: i32) -> (i32, i32, i32, i32) {
    %c0_i32 = arith.constant 0 : i32
    %c0_i32_0 = arith.constant 0 : i32
    %c0_i32_1 = arith.constant 0 : i32
    %c0_i32_2 = arith.constant 0 : i32
    %c0_i32_3 = arith.constant 0 : i32
    return %c0_i32, %c0_i32_0, %c0_i32_1, %c0_i32_2 : i32, i32, i32, i32
  }
  func.func @transform_9(%arg0: i32) -> (i32, i32) {
    %c0_i32 = arith.constant 0 : i32
    %c0_i32_0 = arith.constant 0 : i32
    %c0_i32_1 = arith.constant 0 : i32
    return %c0_i32, %c0_i32_0 : i32, i32
  }
  func.func @transform_10(%arg0: i32) -> (i32, i32) {
    %c0_i32 = arith.constant 0 : i32
    %c0_i32_0 = arith.constant 0 : i32
    %c0_i32_1 = arith.constant 0 : i32
    return %c0_i32, %c0_i32_0 : i32, i32
  }
  func.func @transform_11(%arg0: i32) -> (i32, i32) {
    %c0_i32 = arith.constant 0 : i32
    %c0_i32_0 = arith.constant 0 : i32
    %c0_i32_1 = arith.constant 0 : i32
    return %c0_i32, %c0_i32_0 : i32, i32
  }
  func.func @transform_12(%arg0: i32) -> (i32, i32) {
    %c0_i32 = arith.constant 0 : i32
    %c0_i32_0 = arith.constant 0 : i32
    %c0_i32_1 = arith.constant 0 : i32
    return %c0_i32, %c0_i32_0 : i32, i32
  }
  func.func @transform_13(%arg0: i32) -> (i32, i32) {
    %c0_i32 = arith.constant 0 : i32
    %c0_i32_0 = arith.constant 0 : i32
    %c0_i32_1 = arith.constant 0 : i32
    return %c0_i32, %c0_i32_0 : i32, i32
  }
  func.func @transform_14(%arg0: i32) -> (i32, i32, i32, i32) {
    %c0_i32 = arith.constant 0 : i32
    %c0_i32_0 = arith.constant 0 : i32
    %c0_i32_1 = arith.constant 0 : i32
    %c0_i32_2 = arith.constant 0 : i32
    %c0_i32_3 = arith.constant 0 : i32
    return %c0_i32, %c0_i32_0, %c0_i32_1, %c0_i32_2 : i32, i32, i32, i32
  }
  func.func @transform_15(%arg0: i32) -> (i32, i32) {
    %c0_i32 = arith.constant 0 : i32
    %c0_i32_0 = arith.constant 0 : i32
    %c0_i32_1 = arith.constant 0 : i32
    return %c0_i32, %c0_i32_0 : i32, i32
  }
  func.func @transform_16(%arg0: i32) -> (i32, i32, i32) {
    %c0_i32 = arith.constant 0 : i32
    %c0_i32_0 = arith.constant 0 : i32
    %c0_i32_1 = arith.constant 0 : i32
    return %arg0, %c0_i32, %c0_i32_0 : i32, i32, i32
  }
}

</mosaic_0001>

<bundles_post_ra>
// kernel: tpu_custom_call.1
= control target key start
LH: loop header
LB: loop body
LE: loop exit
PB: predicated region body
PF: predicated region fallthrough
CT: control target
= control target key end

     0   :  { %s14243_s0 = inlined_call_operand.hbm [shape: f32[2,16,16,4], index: 0, kind: input, shape index: {}]   ;;  %s14244_s1 = inlined_call_operand.hbm [shape: f32[2,16,16,4], index: 1, kind: input, shape index: {}]   ;;  %s14245_s2 = inlined_call_operand.hbm [shape: f32[1,1,4], index: 2, kind: input, shape index: {}]   ;;  %s14246_s3 = inlined_call_operand.hbm [shape: bf16[72,4], index: 3, kind: input, shape index: {}]   ;;  %s14247_s4 = inlined_call_operand.hbm [shape: f32[1,4], index: 4, kind: input, shape index: {}]   ;;  %s14248_s5 = inlined_call_operand.hbm [shape: f32[1,4], index: 5, kind: input, shape index: {}]   ;;  %s14249_s6 = inlined_call_operand.hbm [shape: f32[1,4], index: 6, kind: input, shape index: {}]   ;;  %s14250_s7 = inlined_call_operand.hbm [shape: bf16[4,12], index: 7, kind: input, shape index: {}]   ;;  %s14251_s8 = inlined_call_operand.hbm [shape: f32[3,3,1,12], index: 8, kind: input, shape index: {}]   ;;  %s14252_s9 = inlined_call_operand.<no memory space> [shape: f32[1,1], index: 9, kind: input, shape index: {}]   ;;  %s14253_s10 = inlined_call_operand.hbm [shape: bf16[4,4], index: 10, kind: input, shape index: {}]   ;;  %s14254_s11 = inlined_call_operand.hbm [shape: f32[1,4], index: 11, kind: input, shape index: {}]   ;;  %s14255_s12 = inlined_call_operand.hbm [shape: f32[1,4], index: 12, kind: input, shape index: {}]   ;;  %s14256_s13 = inlined_call_operand.hbm [shape: bf16[4,20], index: 13, kind: input, shape index: {}]   ;;  %s14257_s14 = inlined_call_operand.hbm [shape: f32[3,3,1,20], index: 14, kind: input, shape index: {}]   ;;  %s14258_s15 = inlined_call_operand.hbm [shape: bf16[10,4], index: 15, kind: input, shape index: {}]   ;;  %s14259_s16 = inlined_call_operand.hbm [shape: f32[2,4,256], index: 16, kind: output, shape index: {}]  }
   0x1   :  { %14433 = sst [smem:[#allocation100_spill]] %s14243_s0 }
   0x2   :  { %14434 = sst [smem:[#allocation101_spill]] %s14244_s1 }
   0x3   :  { %14435 = sst [smem:[#allocation102_spill]] %s14245_s2 }
   0x4   :  { %14436 = sst [smem:[#allocation103_spill]] %s14246_s3 }
   0x5   :  { %14437 = sst [smem:[#allocation104_spill]] %s14247_s4 }
   0x6   :  { %14438 = sst [smem:[#allocation105_spill]] %s14248_s5 }
   0x7   :  { %14439 = sst [smem:[#allocation106_spill]] %s14249_s6 }
   0x8   :  { %14440 = sst [smem:[#allocation107_spill]] %s14250_s7 }
   0x9   :  { %14441 = sst [smem:[#allocation108_spill]] %s14251_s8 }
   0xa   :  { %14442 = sst [smem:[#allocation109_spill]] %s14253_s10 }
   0xb   :  { %14443 = sst [smem:[#allocation110_spill]] %s14254_s11 }
   0xc   :  { %14444 = sst [smem:[#allocation111_spill]] %s14259_s16 }
   0xd   :  { %21 = sst [smem:[#allocation2]] %s14252_s9 }
   0xe   :  { %22 = vsyncpa [#allocation4], 0 }
   0xf   :  { %24 = vsyncpa [#allocation4 + $0x1], 0 }
  0x10   :  { %25 = vsyncpa [#allocation7], 0 }
  0x11   :  { %27 = vsyncpa [#allocation7 + $0x1], 0 }
  0x12   :  { %28 = vsyncpa [#allocation10], 0 }
  0x13   :  { %29 = vsyncpa [#allocation13], 0 }
  0x14   :  { %30 = vsyncpa [#allocation16], 0 }
  0x15   :  { %31 = vsyncpa [#allocation19], 0 }
  0x16   :  { %32 = vsyncpa [#allocation22], 0 }
  0x17   :  { %33 = vsyncpa [#allocation25], 0 }
  0x18   :  { %34 = vsyncpa [#allocation5], 0 }
  0x19   :  { %36 = vsyncpa [#allocation5 + $0x1], 0  ;;  %s9339_s23 = smov 0   ;;  %s9341_s24 = smov 0  }
  0x1a   :  { %s9343_s25 = smov 0   ;;  %s9345_s26 = smov 0  }
  0x1b LB: > { %s9215_s9 = smov [#allocation8]   ;;  %s9360_s28 = sadd.s32 4294967295, %s9213_s26   ;;  %s9213_s26 = sphi %s9345_s26, %s14744_s26   ;;  %s9209_s25 = sphi %s9343_s25, %s14743_s25   ;;  %s9205_s24 = sphi %s9341_s24, %s14742_s24   ;;  %s9201_s23 = sphi %s9339_s23, %s14741_s23  }
  0x1c   : > { %s432_s27 = sshll.u32 %s9215_s9, 4  ;;  %14445 = sst [smem:[#allocation38_spill]] %s9360_s28  ;;  %s9365_s27 = int_to_ptr.vmem [resolvable:$true] %s432_s27 }
  0x1d   : > { %p7503_p0 = scmp.ge.s32.totalorder %s9213_s26, 1  ;;  %p14269_p1 = scmp.eq.s32.totalorder %s9360_s28, 0 }
  0x1e   : > { %p419_p2 = scmp.lt.s32.totalorder %s9213_s26, 3  ;;  %s9216_s30 = smov [#allocation9]  }
  0x1f   : > { %s442_s0 = sshll.u32 %s9216_s30, 4  ;;  %s9217_s18 = smov [#allocation12]   ;;  %s9374_s0 = int_to_ptr.vmem [resolvable:$true] %s442_s0 }
  0x20   : > { %p9367_p3 = pnand %p7503_p0, %p419_p2  ;;  %s467_s19 = sshll.u32 %s9217_s18, 4  ;;  %s9382_s19 = int_to_ptr.vmem [resolvable:$true] %s467_s19 }
  0x21   : > { %s14449_s2 = sld [smem:[#allocation102_spill]] }
  0x22   : > { %s14446_s29 = scalar_select %p9367_p3, 1, 0 }
  0x23   : > { %p8111_p5 = pneg %p9367_p3 }
  0x24   : > { %14447 = sst [smem:[#allocation39_spill]] %s14446_s29 }
  0x25   : > { %p9378_p6 = pnand %p8111_p5, %p14269_p1 }
  0x27   : > { %s8691_s22 = scalar_lea.hbm %s14449_s2, 16  ;;  %p9392_p8 = pneg %p9378_p6 }
  0x28   : > { %p8692_p7 = scmp.ne.s32.totalorder %s14449_s2, %s8691_s22  ;;  %p8698_p11 = scmp.lt.u32.totalorder %s8691_s22, %s14449_s2 }
  0x2a   : > { %p8694_p9 = pnand %p9392_p8, %p8692_p7 }
  0x2c   : > { %p8695_p10 = pneg %p8694_p9 }
  0x2e   : > { %p8700_p12 = pnand %p8698_p11, %p8695_p10 }
  0x30   : > { %8703 = shalt.err (!%p8700_p12)
}
  0x31   : > { %s8704_s16 = scalar_lea.vmem %s9365_s27, 16  ;;  %s8711_s20 = scalar_lea.vmem %s9365_s27, 32 }
  0x32   : > { %p8705_p13 = scmp.ne.s32.totalorder %s9365_s27, %s8704_s16  ;;  %p8712_p5 = scmp.lt.s32.totalorder %s9365_s27, %s9365_s27 }
  0x33   : > { %p8713_p7 = scmp.lt.s32.totalorder %s8711_s20, %s8704_s16 }
  0x34   : > { %p8707_p0 = pnand %p8705_p13, %p9392_p8 }
  0x35   : > { %p8714_p9 = por %p8713_p7, %p8712_p5 }
  0x36   : > { %p8708_p2 = pneg %p8707_p0 }
  0x38   : > { %p8715_p4 = pnand %p8714_p9, %p8708_p2 }
  0x3a   : > { %8718 = shalt.err (!%p8715_p4)
}
  0x3b   : > { %8114 = dma.hbm_to_vmem [thread:$0]  (!%p9378_p6), %s14449_s2, 16, %s9365_s27, [#allocation7]  }
  0x3c   : > { %s14451_s3 = sld [smem:[#allocation103_spill]] }
  0x42   : > { %s8719_s18 = scalar_lea.hbm %s14451_s3, 576 }
  0x43   : > { %p8720_p10 = scmp.ne.s32.totalorder %s14451_s3, %s8719_s18  ;;  %p8726_p4 = scmp.lt.u32.totalorder %s8719_s18, %s14451_s3 }
  0x45   : > { %p8722_p11 = pnand %p8720_p10, %p9392_p8 }
  0x47   : > { %p8723_p12 = pneg %p8722_p11 }
  0x49   : > { %p8728_p13 = pnand %p8726_p4, %p8723_p12 }
  0x4b   : > { %8731 = shalt.err (!%p8728_p13)
}
  0x4c   : > { %s8732_s27 = scalar_lea.vmem %s9374_s0, 576  ;;  %p8740_p7 = scmp.lt.s32.totalorder %s9374_s0, %s9374_s0 }
  0x4d   : > { %p8733_p0 = scmp.ne.s32.totalorder %s9374_s0, %s8732_s27  ;;  %p8741_p9 = scmp.lt.s32.totalorder %s8732_s27, %s8732_s27 }
  0x4f   : > { %p8735_p2 = pnand %p8733_p0, %p9392_p8  ;;  %p8742_p10 = por %p8741_p9, %p8740_p7 }
  0x51   : > { %p8736_p5 = pneg %p8735_p2 }
  0x53   : > { %p8743_p11 = pnand %p8742_p10, %p8736_p5 }
  0x55   : > { %8746 = shalt.err (!%p8743_p11)
}
  0x56   : > { %s14267_s1 = smov 64   ;;  %s14268_s28 = smov 4  }
  0x57   : > { %8117 = dma.hbm_to_vmem [thread:$0]  (!%p9378_p6), %s14451_s3, 576, %s9374_s0, [#allocation10], %s14267_s1, %s14267_s1, %s14268_s28  }
  0x58   : > { %s14452_s5 = sld [smem:[#allocation105_spill]] }
  0x5e   : > { %s8747_s18 = scalar_lea.hbm %s14452_s5, 16 }
  0x5f   : > { %p8748_p12 = scmp.ne.s32.totalorder %s14452_s5, %s8747_s18  ;;  %p8754_p0 = scmp.lt.u32.totalorder %s8747_s18, %s14452_s5 }
  0x61   : > { %p8750_p4 = pnand %p8748_p12, %p9392_p8 }
  0x63   : > { %p8751_p13 = pneg %p8750_p4 }
  0x65   : > { %p8756_p2 = pnand %p8754_p0, %p8751_p13 }
  0x67   : > { %8759 = shalt.err (!%p8756_p2)
}
  0x68   : > { %s8760_s0 = scalar_lea.vmem %s9382_s19, 16  ;;  %s8767_s29 = scalar_lea.vmem %s9382_s19, 32 }
  0x69   : > { %p8761_p5 = scmp.ne.s32.totalorder %s9382_s19, %s8760_s0  ;;  %p8768_p10 = scmp.lt.s32.totalorder %s9382_s19, %s9382_s19 }
  0x6a   : > { %p8769_p11 = scmp.lt.s32.totalorder %s8767_s29, %s8760_s0 }
  0x6b   : > { %p8763_p7 = pnand %p8761_p5, %p9392_p8 }
  0x6c   : > { %p8770_p12 = por %p8769_p11, %p8768_p10 }
  0x6d   : > { %p8764_p9 = pneg %p8763_p7 }
  0x6f   : > { %p8771_p4 = pnand %p8770_p12, %p8764_p9 }
  0x71   : > { %8774 = shalt.err (!%p8771_p4)
}
  0x72   : > { %8123 = dma.hbm_to_vmem [thread:$0]  (!%p9378_p6), %s14452_s5, 16, %s9382_s19, [#allocation13]  }
  0x73   : > { %s9220_s22 = smov [#allocation15]   ;;  %s9221_s18 = smov [#allocation18]  }
  0x74   : > { %s489_s9 = sshll.u32 %s9220_s22, 4  ;;  %s516_s16 = sshll.u32 %s9221_s18, 4  ;;  %s490_s9 = int_to_ptr.vmem [resolvable:$true] %s489_s9  ;;  %s517_s16 = int_to_ptr.vmem [resolvable:$true] %s516_s16 }
  0x75   : > { %s14453_s7 = sld [smem:[#allocation107_spill]] }
  0x7b   : > { %s8775_s0 = scalar_lea.hbm %s14453_s7, 32 }
  0x7c   : > { %p8776_p13 = scmp.ne.s32.totalorder %s14453_s7, %s8775_s0  ;;  %p8782_p5 = scmp.lt.u32.totalorder %s8775_s0, %s14453_s7 }
  0x7e   : > { %p8778_p0 = pnand %p8776_p13, %p9392_p8 }
  0x80   : > { %p8779_p2 = pneg %p8778_p0 }
  0x82   : > { %p8784_p7 = pnand %p8782_p5, %p8779_p2 }
  0x84   : > { %8787 = shalt.err (!%p8784_p7)
}
  0x85   : > { %s8788_s19 = scalar_lea.vmem %s490_s9, 32  ;;  %p8796_p12 = scmp.lt.s32.totalorder %s490_s9, %s490_s9 }
  0x86   : > { %p8789_p9 = scmp.ne.s32.totalorder %s490_s9, %s8788_s19  ;;  %p8797_p4 = scmp.lt.s32.totalorder %s8788_s19, %s8788_s19 }
  0x88   : > { %p8791_p10 = pnand %p8789_p9, %p9392_p8  ;;  %p8798_p1 = por %p8797_p4, %p8796_p12 }
  0x8a   : > { %p8792_p11 = pneg %p8791_p10 }
  0x8c   : > { %p8799_p3 = pnand %p8798_p1, %p8792_p11 }
  0x8e   : > { %8802 = shalt.err (!%p8799_p3)
}
  0x8f   : > { %8129 = dma.hbm_to_vmem [thread:$0]  (!%p9378_p6), %s14453_s7, 32, %s490_s9, [#allocation16]  }
  0x90   : > { %s14454_s10 = sld [smem:[#allocation109_spill]] }
  0x96   : > { %s8803_s18 = scalar_lea.hbm %s14454_s10, 32 }
  0x97   : > { %p8804_p13 = scmp.ne.s32.totalorder %s14454_s10, %s8803_s18  ;;  %p8810_p3 = scmp.lt.u32.totalorder %s8803_s18, %s14454_s10 }
  0x99   : > { %p8806_p0 = pnand %p8804_p13, %p9392_p8 }
  0x9b   : > { %p8807_p1 = pneg %p8806_p0 }
  0x9d   : > { %p8812_p2 = pnand %p8810_p3, %p8807_p1 }
  0x9f   : > { %8815 = shalt.err (!%p8812_p2)
}
  0xa0   : > { %s8816_s2 = scalar_lea.vmem %s517_s16, 32  ;;  %p8824_p10 = scmp.lt.s32.totalorder %s517_s16, %s517_s16 }
  0xa1   : > { %p8817_p5 = scmp.ne.s32.totalorder %s517_s16, %s8816_s2  ;;  %p8825_p11 = scmp.lt.s32.totalorder %s8816_s2, %s8816_s2 }
  0xa3   : > { %p8819_p7 = pnand %p8817_p5, %p9392_p8  ;;  %p8826_p12 = por %p8825_p11, %p8824_p10 }
  0xa5   : > { %p8820_p9 = pneg %p8819_p7 }
  0xa7   : > { %p8827_p4 = pnand %p8826_p12, %p8820_p9 }
  0xa9   : > { %8830 = shalt.err (!%p8827_p4)
}
  0xaa   : > { %8135 = dma.hbm_to_vmem [thread:$0]  (!%p9378_p6), %s14454_s10, 32, %s517_s16, [#allocation19]  }
  0xab   : > { %s9222_s1 = smov [#allocation21]   ;;  %s8831_s18 = scalar_lea.hbm %s14255_s12, 16 }
  0xac   : > { %s538_s21 = sshll.u32 %s9222_s1, 4  ;;  %p8832_p13 = scmp.ne.s32.totalorder %s14255_s12, %s8831_s18  ;;  %s539_s21 = int_to_ptr.vmem [resolvable:$true] %s538_s21 }
  0xad   : > { %p8838_p3 = scmp.lt.u32.totalorder %s8831_s18, %s14255_s12 }
  0xae   : > { %p8834_p0 = pnand %p8832_p13, %p9392_p8 }
  0xb0   : > { %p8835_p1 = pneg %p8834_p0 }
  0xb2   : > { %p8840_p2 = pnand %p8838_p3, %p8835_p1 }
  0xb4   : > { %8843 = shalt.err (!%p8840_p2)
}
  0xb5   : > { %s8844_s16 = scalar_lea.vmem %s539_s21, 16  ;;  %s8851_s2 = scalar_lea.vmem %s539_s21, 32 }
  0xb6   : > { %p8845_p5 = scmp.ne.s32.totalorder %s539_s21, %s8844_s16  ;;  %p8852_p10 = scmp.lt.s32.totalorder %s539_s21, %s539_s21 }
  0xb7   : > { %p8853_p11 = scmp.lt.s32.totalorder %s8851_s2, %s8844_s16 }
  0xb8   : > { %p8847_p7 = pnand %p8845_p5, %p9392_p8 }
  0xb9   : > { %p8854_p12 = por %p8853_p11, %p8852_p10 }
  0xba   : > { %p8848_p9 = pneg %p8847_p7 }
  0xbc   : > { %p8855_p4 = pnand %p8854_p12, %p8848_p9 }
  0xbe   : > { %8858 = shalt.err (!%p8855_p4)
}
  0xbf   : > { %8141 = dma.hbm_to_vmem [thread:$0]  (!%p9378_p6), %s14255_s12, 16, %s539_s21, [#allocation22]  }
  0xc0   : > { %s9223_s1 = smov [#allocation24]   ;;  %s9224_s22 = smov [#allocation11]  }
  0xc1   : > { %s559_s28 = sshll.u32 %s9223_s1, 4  ;;  %s456_s18 = sshll.u32 %s9224_s22, 4  ;;  %s560_s28 = int_to_ptr.vmem [resolvable:$true] %s559_s28  ;;  %s9518_s18 = int_to_ptr.vmem [resolvable:$true] %s456_s18 }
  0xc2   : > { %s8859_s0 = scalar_lea.hbm %s14257_s14, 144 }
  0xc3   : > { %p8860_p13 = scmp.ne.s32.totalorder %s14257_s14, %s8859_s0  ;;  %p8866_p3 = scmp.lt.u32.totalorder %s8859_s0, %s14257_s14 }
  0xc5   : > { %p8862_p0 = pnand %p8860_p13, %p9392_p8 }
  0xc7   : > { %p8863_p1 = pneg %p8862_p0 }
  0xc9   : > { %p8868_p2 = pnand %p8866_p3, %p8863_p1 }
  0xcb   : > { %8871 = shalt.err (!%p8868_p2)
}
  0xcc   : > { %s8872_s9 = scalar_lea.vmem %s560_s28, 144  ;;  %s8879_s19 = scalar_lea.vmem %s560_s28, 160 }
  0xcd   : > { %p8873_p5 = scmp.ne.s32.totalorder %s560_s28, %s8872_s9  ;;  %p8880_p10 = scmp.lt.s32.totalorder %s560_s28, %s560_s28 }
  0xce   : > { %p8881_p11 = scmp.lt.s32.totalorder %s8879_s19, %s8872_s9 }
  0xcf   : > { %p8875_p7 = pnand %p8873_p5, %p9392_p8 }
  0xd0   : > { %p8882_p12 = por %p8881_p11, %p8880_p10 }
  0xd1   : > { %p8876_p9 = pneg %p8875_p7 }
  0xd3   : > { %p8883_p4 = pnand %p8882_p12, %p8876_p9 }
  0xd5   : > { %8886 = shalt.err (!%p8883_p4)
}
  0xd6   : > { %s14271_s1 = smov 16   ;;  %s9226_s22 = smov 1  }
  0xd7   : > { %8147 = dma.hbm_to_vmem [thread:$0]  (!%p9378_p6), %s14257_s14, 144, %s560_s28, [#allocation25], %s14271_s1, %s14271_s1, %s9226_s22  }
  0xd8   : > { %s14455_s4 = sld [smem:[#allocation104_spill]] }
  0xde   : > { %s8887_s16 = scalar_lea.hbm %s14455_s4, 16 }
  0xdf   : > { %p8888_p13 = scmp.ne.s32.totalorder %s14455_s4, %s8887_s16  ;;  %p8894_p3 = scmp.lt.u32.totalorder %s8887_s16, %s14455_s4 }
  0xe1   : > { %p8890_p0 = pnand %p8888_p13, %p9392_p8 }
  0xe3   : > { %p8891_p1 = pneg %p8890_p0 }
  0xe5   : > { %p8896_p2 = pnand %p8894_p3, %p8891_p1 }
  0xe7   : > { %8899 = shalt.err (!%p8896_p2)
}
  0xe8   : > { %s8900_s28 = scalar_lea.vmem %s9518_s18, 16  ;;  %s8907_s20 = scalar_lea.vmem %s9518_s18, 32 }
  0xe9   : > { %p8901_p5 = scmp.ne.s32.totalorder %s9518_s18, %s8900_s28  ;;  %p8908_p10 = scmp.lt.s32.totalorder %s9518_s18, %s9518_s18 }
  0xea   : > { %p8909_p11 = scmp.lt.s32.totalorder %s8907_s20, %s8900_s28 }
  0xeb   : > { %p8903_p7 = pnand %p8901_p5, %p9392_p8 }
  0xec   : > { %p8910_p12 = por %p8909_p11, %p8908_p10 }
  0xed   : > { %p8904_p9 = pneg %p8903_p7 }
  0xef   : > { %p8911_p4 = pnand %p8910_p12, %p8904_p9 }
  0xf1   : > { %8914 = shalt.err (!%p8911_p4)
}
  0xf2   : > { %8120 = dma.hbm_to_vmem [thread:$0]  (!%p9378_p6), %s14455_s4, 16, %s9518_s18, [#allocation10]  }
  0xf3   : > { %s9227_s29 = smov [#allocation14]   ;;  %s9228_s2 = smov [#allocation17]  }
  0xf4   : > { %s478_s16 = sshll.u32 %s9227_s29, 4  ;;  %s499_s21 = sshll.u32 %s9228_s2, 4  ;;  %s479_s16 = int_to_ptr.vmem [resolvable:$true] %s478_s16  ;;  %s9565_s21 = int_to_ptr.vmem [resolvable:$true] %s499_s21 }
  0xf5   : > { %s14456_s6 = sld [smem:[#allocation106_spill]] }
  0xfb   : > { %s8915_s28 = scalar_lea.hbm %s14456_s6, 16 }
  0xfc   : > { %p8916_p13 = scmp.ne.s32.totalorder %s14456_s6, %s8915_s28  ;;  %p8922_p3 = scmp.lt.u32.totalorder %s8915_s28, %s14456_s6 }
  0xfe   : > { %p8918_p0 = pnand %p8916_p13, %p9392_p8 }
 0x100   : > { %p8919_p1 = pneg %p8918_p0 }
 0x102   : > { %p8924_p2 = pnand %p8922_p3, %p8919_p1 }
 0x104   : > { %8927 = shalt.err (!%p8924_p2)
}
 0x105   : > { %s8928_s0 = scalar_lea.vmem %s479_s16, 16  ;;  %s8935_s29 = scalar_lea.vmem %s479_s16, 32 }
 0x106   : > { %p8929_p5 = scmp.ne.s32.totalorder %s479_s16, %s8928_s0  ;;  %p8936_p10 = scmp.lt.s32.totalorder %s479_s16, %s479_s16 }
 0x107   : > { %p8937_p11 = scmp.lt.s32.totalorder %s8935_s29, %s8928_s0 }
 0x108   : > { %p8931_p7 = pnand %p8929_p5, %p9392_p8 }
 0x109   : > { %p8938_p12 = por %p8937_p11, %p8936_p10 }
 0x10a   : > { %p8932_p9 = pneg %p8931_p7 }
 0x10c   : > { %p8939_p4 = pnand %p8938_p12, %p8932_p9 }
 0x10e   : > { %8942 = shalt.err (!%p8939_p4)
}
 0x10f   : > { %8126 = dma.hbm_to_vmem [thread:$0]  (!%p9378_p6), %s14456_s6, 16, %s479_s16, [#allocation13]  }
 0x110   : > { %s14457_s8 = sld [smem:[#allocation108_spill]] }
 0x116   : > { %s8943_s28 = scalar_lea.hbm %s14457_s8, 144 }
 0x117   : > { %p8944_p13 = scmp.ne.s32.totalorder %s14457_s8, %s8943_s28  ;;  %p8950_p3 = scmp.lt.u32.totalorder %s8943_s28, %s14457_s8 }
 0x119   : > { %p8946_p0 = pnand %p8944_p13, %p9392_p8 }
 0x11b   : > { %p8947_p1 = pneg %p8946_p0 }
 0x11d   : > { %p8952_p2 = pnand %p8950_p3, %p8947_p1 }
 0x11f   : > { %8955 = shalt.err (!%p8952_p2)
}
 0x120   : > { %s8956_s16 = scalar_lea.vmem %s9565_s21, 144  ;;  %s8963_s29 = scalar_lea.vmem %s9565_s21, 160 }
 0x121   : > { %p8957_p5 = scmp.ne.s32.totalorder %s9565_s21, %s8956_s16  ;;  %p8964_p10 = scmp.lt.s32.totalorder %s9565_s21, %s9565_s21 }
 0x122   : > { %p8965_p11 = scmp.lt.s32.totalorder %s8963_s29, %s8956_s16 }
 0x123   : > { %p8959_p7 = pnand %p8957_p5, %p9392_p8 }
 0x124   : > { %p8966_p12 = por %p8965_p11, %p8964_p10 }
 0x125   : > { %p8960_p9 = pneg %p8959_p7 }
 0x127   : > { %p8967_p4 = pnand %p8966_p12, %p8960_p9 }
 0x129   : > { %8970 = shalt.err (!%p8967_p4)
}
 0x12a   : > { %s14458_s1 = smov 16   ;;  %s9229_s19 = smov [#allocation20]  }
 0x12b   : > { %8132 = dma.hbm_to_vmem [thread:$0]  (!%p9378_p6), %s14457_s8, 144, %s9565_s21, [#allocation16], %s14458_s1, %s14458_s1, %s9226_s22  }
 0x12c   : > { %s527_s28 = sshll.u32 %s9229_s19, 4  ;;  %s9230_s20 = smov [#allocation23]   ;;  %s528_s28 = int_to_ptr.vmem [resolvable:$true] %s527_s28 }
 0x12d   : > { %s549_s27 = sshll.u32 %s9230_s20, 4  ;;  %s14459_s11 = sld [smem:[#allocation110_spill]]  ;;  %s9612_s27 = int_to_ptr.vmem [resolvable:$true] %s549_s27 }
 0x133   : > { %s8971_s16 = scalar_lea.hbm %s14459_s11, 16 }
 0x134   : > { %p8972_p13 = scmp.ne.s32.totalorder %s14459_s11, %s8971_s16  ;;  %p8978_p3 = scmp.lt.u32.totalorder %s8971_s16, %s14459_s11 }
 0x136   : > { %p8974_p0 = pnand %p8972_p13, %p9392_p8 }
 0x138   : > { %p8975_p1 = pneg %p8974_p0 }
 0x13a   : > { %p8980_p2 = pnand %p8978_p3, %p8975_p1 }
 0x13c   : > { %8983 = shalt.err (!%p8980_p2)
}
 0x13d   : > { %s8984_s21 = scalar_lea.vmem %s528_s28, 16  ;;  %s8991_s1 = scalar_lea.vmem %s528_s28, 32 }
 0x13e   : > { %p8985_p5 = scmp.ne.s32.totalorder %s528_s28, %s8984_s21  ;;  %p8992_p10 = scmp.lt.s32.totalorder %s528_s28, %s528_s28 }
 0x13f   : > { %p8993_p11 = scmp.lt.s32.totalorder %s8991_s1, %s8984_s21 }
 0x140   : > { %p8987_p7 = pnand %p8985_p5, %p9392_p8 }
 0x141   : > { %p8994_p12 = por %p8993_p11, %p8992_p10 }
 0x142   : > { %p8988_p9 = pneg %p8987_p7 }
 0x144   : > { %p8995_p4 = pnand %p8994_p12, %p8988_p9 }
 0x146   : > { %8998 = shalt.err (!%p8995_p4)
}
 0x147   : > { %8138 = dma.hbm_to_vmem [thread:$0]  (!%p9378_p6), %s14459_s11, 16, %s528_s28, [#allocation19]  }
 0x148   : > { %s8999_s18 = scalar_lea.hbm %s14256_s13, 32 }
 0x149   : > { %p9000_p13 = scmp.ne.s32.totalorder %s14256_s13, %s8999_s18  ;;  %p9006_p3 = scmp.lt.u32.totalorder %s8999_s18, %s14256_s13 }
 0x14b   : > { %p9002_p0 = pnand %p9000_p13, %p9392_p8 }
 0x14d   : > { %p9003_p1 = pneg %p9002_p0 }
 0x14f   : > { %p9008_p2 = pnand %p9006_p3, %p9003_p1 }
 0x151   : > { %9011 = shalt.err (!%p9008_p2)
}
 0x152   : > { %s9012_s28 = scalar_lea.vmem %s9612_s27, 32  ;;  %p9020_p10 = scmp.lt.s32.totalorder %s9612_s27, %s9612_s27 }
 0x153   : > { %p9013_p5 = scmp.ne.s32.totalorder %s9612_s27, %s9012_s28  ;;  %p9021_p11 = scmp.lt.s32.totalorder %s9012_s28, %s9012_s28 }
 0x155   : > { %p9015_p7 = pnand %p9013_p5, %p9392_p8  ;;  %p9022_p12 = por %p9021_p11, %p9020_p10 }
 0x157   : > { %p9016_p9 = pneg %p9015_p7 }
 0x159   : > { %p9023_p4 = pnand %p9022_p12, %p9016_p9 }
 0x15b   : > { %9026 = shalt.err (!%p9023_p4)
}
 0x15c   : > { %8144 = dma.hbm_to_vmem [thread:$0]  (!%p9378_p6), %s14256_s13, 32, %s9612_s27, [#allocation22]  }
 0x15d   : > { %s9231_s1 = smov [#allocation26]   ;;  %s9027_s20 = scalar_lea.hbm %s14258_s15, 128 }
 0x15e   : > { %s572_s3 = sshll.u32 %s9231_s1, 4  ;;  %p9028_p13 = scmp.ne.s32.totalorder %s14258_s15, %s9027_s20  ;;  %s573_s3 = int_to_ptr.vmem [resolvable:$true] %s572_s3 }
 0x15f   : > { %p9034_p3 = scmp.lt.u32.totalorder %s9027_s20, %s14258_s15 }
 0x160   : > { %p9030_p0 = pnand %p9028_p13, %p9392_p8 }
 0x162   : > { %p9031_p1 = pneg %p9030_p0 }
 0x164   : > { %p9036_p2 = pnand %p9034_p3, %p9031_p1 }
 0x166   : > { %9039 = shalt.err (!%p9036_p2)
}
 0x167   : > { %s9040_s27 = scalar_lea.vmem %s573_s3, 128  ;;  %p9048_p10 = scmp.lt.s32.totalorder %s573_s3, %s573_s3 }
 0x168   : > { %p9041_p5 = scmp.ne.s32.totalorder %s573_s3, %s9040_s27  ;;  %p9049_p11 = scmp.lt.s32.totalorder %s9040_s27, %s9040_s27 }
 0x16a   : > { %p9043_p7 = pnand %p9041_p5, %p9392_p8  ;;  %p9050_p12 = por %p9049_p11, %p9048_p10 }
 0x16c   : > { %p9044_p9 = pneg %p9043_p7 }
 0x16e   : > { %p9051_p4 = pnand %p9050_p12, %p9044_p9 }
 0x170   : > { %9054 = shalt.err (!%p9051_p4)
}
 0x171   : > { %s14460_s2 = smov 4   ;;  %s14461_s28 = smov 64  }
 0x172   : > { %s14462_s30 = sld [smem:[#allocation38_spill]]  ;;  %s7502_s17 = sadd.s32 4294967294, %s9213_s26  }
 0x173   : > { %8150 = dma.hbm_to_vmem [thread:$0]  (!%p9378_p6), %s14258_s15, 128, %s573_s3, [#allocation25], %s14461_s28, %s14461_s28, %s14460_s2  }
 0x174   : > { %s9678_s1 = sadd.s32 1, %s9213_s26   ;;  %s49_s9 = sadd.s32 1, %s9209_s25 }
 0x175   : > { %s46_s19 = ssub.s32 %s9213_s26, %s9678_s1  ;;  %p56_p8 = scmp.ne.s32.totalorder %s9209_s25, %s9205_s24 }
 0x176   : > { %p47_p13 = scmp.eq.s32.totalorder %s46_s19, 0  ;;  %p57_p0 = scmp.eq.s32.totalorder %s9213_s26, 0 }
 0x177   : > { %p62_p1 = scmp.ne.s32.totalorder %s9205_s24, %s9201_s23  ;;  %p412_p9 = scmp.eq.s32.totalorder %s7502_s17, 1 }
 0x178   : > { %p406_p3 = scmp.eq.s32.totalorder %s14462_s30, 1  ;;  %p58_p2 = por %p57_p0, %p56_p8 }
 0x179   : > { %s9690_s20 = scalar_select %p47_p13, %s9209_s25, %s49_s9  }
 0x17a   : > { %p14463_p5 = scmp.eq.s32.totalorder %s14462_s30, 0  ;;  %p9698_p6 = por %p406_p3, %p56_p8 }
 0x17b   : > { %p8175_p10 = scmp.lt.s32.totalorder %s9213_s26, 2  ;;  %s586_s0 = sand.u32 1, %s9209_s25  }
 0x17c   : > { %p9694_p7 = por %p14463_p5, %p62_p1  ;;  %p9704_p11 = por %p412_p9, %p62_p1 }
 0x17d   : > { %s14465_s18 = scalar_select %p9698_p6, 1, 0 }
 0x17e   : > { %s14466_s16 = scalar_select %p9704_p11, 1, 0 }
 0x17f   : > { %s9708_s29 = sshll.u32 %s586_s0, 8  ;;  %s14272_s27 = sshll.u32 %s9213_s26, 12 }
 0x180   : > { %s14467_s22 = sld [smem:[#allocation100_spill]]  ;;  %s590_s30 = scalar_lea.vmem [#allocation3], %s9708_s29 }
 0x181   : > { %s597_s17 = sshll.u32 %s590_s30, 4  ;;  %p9719_p12 = pnand %p8175_p10, %p58_p2  ;;  %s9723_s17 = int_to_ptr.vmem [resolvable:$true] %s597_s17 }
 0x182   : > { %s9725_s19 = scalar_lea.sflag [#allocation4], %s586_s0 }
 0x183   : > { %p9057_p8 = pneg %p9719_p12 }
 0x186   : > { %s9716_s21 = scalar_lea.hbm %s14467_s22, %s14272_s27  ;;  %s9060_s30 = scalar_lea.hbm %s14467_s22, 8192 }
 0x187   : > { %s9055_s4 = scalar_lea.hbm %s9716_s21, 4096  ;;  %p9061_p1 = scmp.lt.u32.totalorder %s9716_s21, %s14467_s22 }
 0x188   : > { %p9056_p4 = scmp.ne.s32.totalorder %s9716_s21, %s9055_s4  ;;  %p9062_p3 = scmp.lt.u32.totalorder %s9060_s30, %s9055_s4 }
 0x189   : > { %p9064_p5 = scmp.lt.u32.totalorder %s9055_s4, %s9716_s21 }
 0x18a   : > { %p9058_p13 = pnand %p9057_p8, %p9056_p4  ;;  %p9063_p2 = por %p9062_p3, %p9061_p1 }
 0x18c   : > { %p9059_p0 = pneg %p9058_p13  ;;  %p9065_p9 = por %p9064_p5, %p9063_p2 }
 0x18e   : > { %p9066_p10 = pnand %p9065_p9, %p9059_p0 }
 0x190   : > { %9069 = shalt.err (!%p9066_p10)
}
 0x191   : > { %s9070_s0 = scalar_lea.vmem %s9723_s17, 4096  ;;  %s9232_s2 = smov [#allocation3]  }
 0x192   : > { %p9071_p4 = scmp.ne.s32.totalorder %s9723_s17, %s9070_s0  ;;  %s9075_s28 = sshll.u32 %s9232_s2, 4  ;;  %s9076_s28 = int_to_ptr.vmem [resolvable:$false] %s9075_s28 }
 0x193   : > { %s9077_s5 = scalar_lea.vmem %s9076_s28, 8192  ;;  %p9078_p6 = scmp.lt.s32.totalorder %s9723_s17, %s9076_s28 }
 0x194   : > { %p9073_p13 = pnand %p9071_p4, %p9057_p8  ;;  %p9079_p1 = scmp.lt.s32.totalorder %s9077_s5, %s9070_s0 }
 0x196   : > { %p9074_p11 = pneg %p9073_p13  ;;  %p9080_p3 = por %p9079_p1, %p9078_p6 }
 0x198   : > { %p9081_p2 = pnand %p9080_p3, %p9074_p11 }
 0x19a   : > { %9084 = shalt.err (!%p9081_p2)
}
 0x19b   : > { %s9233_s4 = smov 128   ;;  %s9234_s27 = smov 8  }
 0x19c   : > { %8154 = dma.hbm_to_vmem [thread:$0]  (!%p9719_p12), %s9716_s21, 4096, %s9723_s17, %s9725_s19, %s9233_s4, %s9233_s4, %s9234_s27  }
 0x19d   : > { %s14469_s30 = sshll.u32 %s9213_s26, 12  ;;  %s14470_s28 = sld [smem:[#allocation101_spill]] }
 0x19e   : > { %s611_s6 = scalar_lea.vmem [#allocation6], %s9708_s29  ;;  %s607_s8 = sand.u32 1, %s9213_s26  }
 0x19f   : > { %s618_s7 = sshll.u32 %s611_s6, 4  ;;  %s9767_s10 = scalar_lea.sflag [#allocation7], %s607_s8  ;;  %s9765_s7 = int_to_ptr.vmem [resolvable:$true] %s618_s7 }
 0x1a3   : > { %s9761_s5 = scalar_lea.hbm %s14470_s28, %s14469_s30  ;;  %s9090_s19 = scalar_lea.hbm %s14470_s28, 8192 }
 0x1a4   : > { %s9085_s11 = scalar_lea.hbm %s9761_s5, 4096  ;;  %p9091_p5 = scmp.lt.u32.totalorder %s9761_s5, %s14470_s28 }
 0x1a5   : > { %p9086_p6 = scmp.ne.s32.totalorder %s9761_s5, %s9085_s11  ;;  %p9092_p9 = scmp.lt.u32.totalorder %s9090_s19, %s9085_s11 }
 0x1a6   : > { %p9094_p4 = scmp.lt.u32.totalorder %s9085_s11, %s9761_s5 }
 0x1a7   : > { %p9088_p11 = pnand %p9086_p6, %p9057_p8  ;;  %p9093_p10 = por %p9092_p9, %p9091_p5 }
 0x1a9   : > { %p9089_p0 = pneg %p9088_p11  ;;  %p9095_p13 = por %p9094_p4, %p9093_p10 }
 0x1ab   : > { %p9096_p1 = pnand %p9095_p13, %p9089_p0 }
 0x1ad   : > { %9099 = shalt.err (!%p9096_p1)
}
 0x1ae   : > { %s9100_s6 = scalar_lea.vmem %s9765_s7, 4096  ;;  %s9235_s8 = smov [#allocation6]  }
 0x1af   : > { %p9101_p3 = scmp.ne.s32.totalorder %s9765_s7, %s9100_s6  ;;  %s9105_s29 = sshll.u32 %s9235_s8, 4  ;;  %s9106_s29 = int_to_ptr.vmem [resolvable:$false] %s9105_s29 }
 0x1b0   : > { %s9107_s2 = scalar_lea.vmem %s9106_s29, 8192  ;;  %p9108_p11 = scmp.lt.s32.totalorder %s9765_s7, %s9106_s29 }
 0x1b1   : > { %p9103_p2 = pnand %p9101_p3, %p9057_p8  ;;  %p9109_p5 = scmp.lt.s32.totalorder %s9107_s2, %s9100_s6 }
 0x1b3   : > { %p9104_p6 = pneg %p9103_p2  ;;  %p9110_p9 = por %p9109_p5, %p9108_p11 }
 0x1b5   : > { %p9111_p10 = pnand %p9110_p9, %p9104_p6 }
 0x1b7   : > { %9114 = shalt.err (!%p9111_p10)
}
 0x1b8   : > { %8157 = dma.hbm_to_vmem [thread:$0]  (!%p9719_p12), %s9761_s5, 4096, %s9765_s7, %s9767_s10, %s9233_s4, %s9233_s4, %s9234_s27  }
 0x1b9   : > { %s14471_s11 = sld [smem:[#allocation39_spill]] }
 0x1bf   : > { %p14472_p8 = scmp.ne.s32.totalorder %s14471_s11, 0 }
 0x1c1   : > { %630 = sbr.rel (%p14472_p8) target bundleno = 4154 (0x103a), region = 84 }
 0x1c8   : > { %s9799_s21 = sand.u32 1, %s9205_s24  }
 0x1c9   : > { %s7525_s17 = sshll.u32 %s9799_s21, 8  ;;  %s633_s19 = scalar_lea.sflag [#allocation4], %s9799_s21 }
 0x1ca   : > { %s9803_s30 = scalar_lea.vmem [#allocation3], %s7525_s17 }
 0x1cb   : > { %9160 = dma.done.wait (%p9694_p7), %s633_s19, 4096  }
 0x1cc   : > { %9162 = vsyncadd (%p9694_p7), %s633_s19, 4294963200  ;;  %s14473_s9 = sld [smem:[#allocation38_spill]]  ;;  %s9810_s4 = scalar_lea.vmem [#allocation6], %s7525_s17 }
 0x1d2   : > { %s641_s7 = sand.u32 1, %s14473_s9  }
 0x1d3   : > { %s642_s10 = scalar_lea.sflag [#allocation7], %s641_s7 }
 0x1d4   : > { %9164 = dma.done.wait (%p9694_p7), %s642_s10, 4096  }
 0x1d5   : > { %9166 = vsyncadd (%p9694_p7), %s642_s10, 4294963200  ;;  %p14474_p12 = scmp.eq.s32.totalorder %s14473_s9, 0 }
 0x1d7   : > { %9168 = dma.done.wait (%p14474_p12), [#allocation7], 16   ;;  %p14475_p0 = pmov %p14474_p12 }
 0x1d9   : > { %9170 = vsyncadd (%p14475_p0), [#allocation7], 4294967280  ;;  %p14476_p4 = pmov %p14475_p0 }
 0x1da   : > { %p14477_p13 = pmov %p14475_p0 }
 0x1db   : > { %9172 = dma.done.wait (%p14476_p4), [#allocation10], 592  }
 0x1dc   : > { %9174 = vsyncadd (%p14477_p13), [#allocation10], 4294966704  ;;  %p14478_p1 = pmov %p14475_p0 }
 0x1dd   : > { %p14479_p3 = pmov %p14475_p0 }
 0x1de   : > { %9176 = dma.done.wait (%p14478_p1), [#allocation13], 32  }
 0x1df   : > { %9178 = vsyncadd (%p14479_p3), [#allocation13], 4294967264  ;;  %p14480_p7 = pmov %p14475_p0 }
 0x1e0   : > { %p14481_p2 = pmov %p14475_p0 }
 0x1e1   : > { %9180 = dma.done.wait (%p14480_p7), [#allocation16], 176  }
 0x1e2   : > { %9182 = vsyncadd (%p14481_p2), [#allocation16], 4294967120  ;;  %p14482_p6 = pmov %p14475_p0 }
 0x1e3   : > { %p14483_p11 = pmov %p14475_p0 }
 0x1e4   : > { %9184 = dma.done.wait (%p14482_p6), [#allocation19], 48  }
 0x1e5   : > { %9186 = vsyncadd (%p14483_p11), [#allocation19], 4294967248  ;;  %p14484_p5 = pmov %p14475_p0 }
 0x1e6   : > { %p14485_p9 = pmov %p14475_p0 }
 0x1e7   : > { %9188 = dma.done.wait (%p14484_p5), [#allocation22], 48  }
 0x1e8   : > { %9190 = vsyncadd (%p14485_p9), [#allocation22], 4294967248  ;;  %p14486_p10 = pmov %p14475_p0 }
 0x1e9   : > { %p14487_p8 = pmov %p14475_p0 }
 0x1ea   : > { %9192 = dma.done.wait (%p14486_p10), [#allocation25], 272  }
 0x1eb   : > { %9194 = vsyncadd (%p14487_p8), [#allocation25], 4294967024  ;;  %v9845_v0 = vld [vmem:[%s9810_s4] sm:$0xff]  ;;  %v9848_v1 = vld [vmem:[%s9810_s4 + $0x8] sm:$0xff]  ;;  %s9236_s3 = smov 4   ;;  %vm1451_vm1 = vcmask 1047552  }
 0x1ec   : > { %v8255_v2 = vpack.i.bf16 %v9848_v1, %v9845_v0  ;;  %v9853_v3 = vld [vmem:[%s9810_s4 + $0x10] sm:$0xff]  ;;  %v9856_v4 = vld [vmem:[%s9810_s4 + $0x18] sm:$0xff]  ;;  %v9862_v6 = vld [vmem:[%s9810_s4 + $0x20] sm:$0xff]  ;;  %vm1452_vm0 = vsmask.f32 7424  ;;  %v9237_v63 = vmov 0  }
 0x1ed   : > { %v8260_v5 = vpack.i.bf16 %v9856_v4, %v9853_v3  ;;  %v9865_v7 = vld [vmem:[%s9810_s4 + $0x28] sm:$0xff]  ;;  %v9870_v9 = vld [vmem:[%s9810_s4 + $0x30] sm:$0xff]  ;;  %v9873_v10 = vld [vmem:[%s9810_s4 + $0x38] sm:$0xff]  ;;  %s9238_s27 = smov 8   ;;  %s9239_s5 = smov 16   ;;  %vm1207_vm3 = vcmask 31744  }
 0x1ee   : > { %8256 = vrot.lane.b32.xlu0 %v8255_v2, %s9236_s3  ;;  %v8265_v8 = vpack.i.bf16 %v9865_v7, %v9862_v6  ;;  %v8270_v11 = vpack.i.bf16 %v9873_v10, %v9870_v9  ;;  %v9879_v12 = vld [vmem:[%s9810_s4 + $0x40] sm:$0xff]  ;;  %v9882_v13 = vld [vmem:[%s9810_s4 + $0x48] sm:$0xff]  ;;  %v9888_v15 = vld [vmem:[%s9810_s4 + $0x50] sm:$0xff]  ;;  %v1403_v2 = vrot.slane %v9237_v63, 1  ;;  %s9240_s0 = smov 32   ;;  %s9241_s6 = smov 56  }
 0x1ef   : > { %v8275_v14 = vpack.i.bf16 %v9882_v13, %v9879_v12  ;;  %v9891_v16 = vld [vmem:[%s9810_s4 + $0x58] sm:$0xff]  ;;  %v9894_v17 = vld [vmem:[%s9810_s4 + $0x60] sm:$0xff]  ;;  %v9897_v18 = vld [vmem:[%s9810_s4 + $0x68] sm:$0xff]  ;;  %vm1384_vm4 = vcmask 1040384   ;;  %vm1385_vm5 = vsmask.f32 256 }
 0x1f0   : > { %8266 = vrot.lane.b32.xlu1 %v8265_v8, %s9236_s3  ;;  %v8280_v19 = vpack.i.bf16 %v9891_v16, %v9888_v15  ;;  %v8285_v20 = vpack.i.bf16 %v9897_v18, %v9894_v17  ;;  %v9906_v21 = vld [vmem:[%s9810_s4 + $0x70] sm:$0xff]  ;;  %v9909_v22 = vld [vmem:[%s9810_s4 + $0x78] sm:$0xff]  ;;  %v9912_v23 = vld [vmem:[%s9810_s4 + $0x80] sm:$0xff]  ;;  %s9242_s8 = smov 24   ;;  %s9243_s29 = smov 40   ;;  %vm2146_vm7 = vcmask 1043456  }
 0x1f1   : > { %v9915_v24 = vld [vmem:[%s9810_s4 + $0x88] sm:$0xff]  ;;  %v8290_v25 = vpack.i.bf16 %v9909_v22, %v9906_v21  ;;  %v9924_v27 = vld [vmem:[%s9810_s4 + $0x90] sm:$0xff]  ;;  %v9927_v28 = vld [vmem:[%s9810_s4 + $0x98] sm:$0xff]  ;;  %s9244_s2 = smov 48   ;;  %s9245_s11 = smov 64   ;;  %vm1790_vm8 = vcmask 64512  }
 0x1f2   : > { %8261 = vrot.lane.b32.xlu0 %v8260_v5, %s9236_s3  ;;  %v8295_v26 = vpack.i.bf16 %v9915_v24, %v9912_v23  ;;  %v9930_v29 = vld [vmem:[%s9810_s4 + $0xa0] sm:$0xff]  ;;  %v9933_v30 = vld [vmem:[%s9810_s4 + $0xa8] sm:$0xff]  ;;  %v8300_v31 = vpack.i.bf16 %v9927_v28, %v9924_v27  ;;  %v9942_v33 = vld [vmem:[%s9810_s4 + $0xb0] sm:$0xff]  ;;  %vm1839_vm9 = vcmask 130048   ;;  %vm1872_vm10 = vcmask 195584   ;;  %s9247_s17 = smov 124  }
 0x1f3   : > { %v8305_v32 = vpack.i.bf16 %v9933_v30, %v9930_v29  ;;  %v9945_v34 = vld [vmem:[%s9810_s4 + $0xb8] sm:$0xff]  ;;  %v9948_v35 = vld [vmem:[%s9810_s4 + $0xc0] sm:$0xff]  ;;  %v9951_v36 = vld [vmem:[%s9810_s4 + $0xc8] sm:$0xff]  ;;  %vm1905_vm11 = vcmask 261120   ;;  %vm1938_vm12 = vcmask 326656   ;;  %vm1971_vm13 = vcmask 392192  }
 0x1f4   : > { %8271 = vrot.lane.b32.xlu1 %v8270_v11, %s9236_s3  ;;  %v766_v37 = vld [vmem:[%s9803_s30 + $0x70] sm:$0xff]  ;;  %v767_v38 = vld [vmem:[%s9803_s30 + $0x78] sm:$0xff]  ;;  %v8310_v39 = vpack.i.bf16 %v9945_v34, %v9942_v33  ;;  %v768_v40 = vld [vmem:[%s9803_s30 + $0x80] sm:$0xff]  ;;  %v8315_v41 = vpack.i.bf16 %v9951_v36, %v9948_v35  ;;  %vm2004_vm14 = vcmask 457728   ;;  %vm2037_vm15 = vcmask 523264   ;;  %s3918_s19 = sld [smem:[#allocation2]] }
 0x1f5   : > { %v9963_v42 = vld [vmem:[%s9810_s4 + $0xd0] sm:$0xff]  ;;  %v9966_v43 = vld [vmem:[%s9810_s4 + $0xd8] sm:$0xff]  ;;  %v769_v44 = vld [vmem:[%s9803_s30 + $0x88] sm:$0xff]  ;;  %v7555_v47 = vmul.f32 -1.442695, %v766_v37  ;;  %s9249_s7 = smov 118  }
 0x1f6   : > { %8276 = vrot.lane.b32.xlu0 %v8275_v14, %s9236_s3  ;;  %v9970_v45 = vld [vmem:[%s9810_s4 + $0xe0] sm:$0xff]  ;;  %v9973_v46 = vld [vmem:[%s9810_s4 + $0xe8] sm:$0xff]  ;;  %v7556_v48 = vmul.f32 -1.442695, %v767_v38  ;;  %v7557_v49 = vmul.f32 -1.442695, %v768_v40  ;;  %v8320_v51 = vpack.i.bf16 %v9966_v43, %v9963_v42  ;;  %vm10000_vm2 = vmand %vm1451_vm1, %vm1452_vm0 }
 0x1f7   : > { %v772_v50 = vld [vmem:[%s9803_s30 + $0xa0] sm:$0xff]  ;;  %v7558_v52 = vmul.f32 -1.442695, %v769_v44  ;;  %v773_v53 = vld [vmem:[%s9803_s30 + $0xa8] sm:$0xff]  ;;  %v8325_v54 = vpack.i.bf16 %v9973_v46, %v9970_v45  ;;  %v9984_v55 = vld [vmem:[%s9810_s4 + $0xf0] sm:$0xff]  ;;  %8341 = vpow2.f32 %v7555_v47  ;;  %vm2113_vm0 = vcmask 588800  }
 0x1f8   : > { %8281 = vrot.lane.b32.xlu1 %v8280_v19, %s9236_s3  ;;  %v9987_v56 = vld [vmem:[%s9810_s4 + $0xf8] sm:$0xff]  ;;  %v770_v57 = vld [vmem:[%s9803_s30 + $0x90] sm:$0xff]  ;;  %v7561_v59 = vmul.f32 -1.442695, %v772_v50  ;;  %8343 = vpow2.f32 %v7556_v48  ;;  %v7562_v61 = vmul.f32 -1.442695, %v773_v53  ;;  %vm10188_vm6 = vmand %vm1384_vm4, %vm1385_vm5 }
 0x1f9   : > { %v8330_v58 = vpack.i.bf16 %v9987_v56, %v9984_v55  ;;  %v771_v60 = vld [vmem:[%s9803_s30 + $0x98] sm:$0xff]  ;;  %v776_v62 = vld [vmem:[%s9803_s30 + $0xc0] sm:$0xff]  ;;  %8345 = vpow2.f32 %v7557_v49  ;;  %v7559_v5 = vmul.f32 -1.442695, %v770_v57  ;;  %v777_v8 = vld [vmem:[%s9803_s30 + $0xc8] sm:$0xff]  ;;  %vm2871_vm1 = vcmask 1041408  }
 0x1fa   : > { %8286 = vrot.lane.b32.xlu0 %v8285_v20, %s9236_s3  ;;  %8347 = vpow2.f32 %v7558_v52  ;;  %v7560_v14 = vmul.f32 -1.442695, %v771_v60  ;;  %v774_v19 = vld [vmem:[%s9803_s30 + $0xb0] sm:$0xff]  ;;  %v7565_v20 = vmul.f32 -1.442695, %v776_v62  ;;  %vm4063_vm5 = vcmask 64544  }
 0x1fb   : > { %8349 = vpow2.f32 %v7561_v59  ;;  %v780_v59 = vld [vmem:[%s9803_s30 + $0xe0] sm:$0xff]  ;;  %s7540_s10 = sshll.u32 %s9799_s21, 3  ;;  %s7706_s4 = sshll.u32 %s14473_s9, 7 }
 0x1fc   : > { %8291 = vrot.lane.b32.xlu1 %v8290_v25, %s9236_s3  ;;  %8351 = vpow2.f32 %v7562_v61  ;;  %v7566_v25 = vmul.f32 -1.442695, %v777_v8  ;;  %p14738_p0 = scmp.ne.s32.totalorder %s14465_s18, 0  ;;  %s9250_s9 = smov [#allocation27]  }
 0x1fd   : > { %8353 = vpow2.f32 %v7559_v5  ;;  %v781_v5 = vld [vmem:[%s9803_s30 + $0xe8] sm:$0xff] }
 0x1fe   : > { %8296 = vrot.lane.b32.xlu0 %v8295_v26, %s9236_s3  ;;  %v775_v26 = vld [vmem:[%s9803_s30 + $0xb8] sm:$0xff]  ;;  %8355 = vpow2.f32 %v7560_v14 }
 0x1ff   : > { %8357 = vpow2.f32 %v7565_v20  ;;  %v7564_v37 = vmul.f32 -1.442695, %v775_v26  ;;  %v778_v20 = vld [vmem:[%s9803_s30 + $0xd0] sm:$0xff]  ;;  %v779_v26 = vld [vmem:[%s9803_s30 + $0xd8] sm:$0xff] }
 0x200   : > { %8301 = vrot.lane.b32.xlu1 %v8300_v31, %s9236_s3  ;;  %v10011_v31 = vsel %vm10000_vm2, %v1403_v2, 0  ;;  %8359 = vpow2.f32 %v7566_v25 }
 0x201   : > { %v8342_v38 = vpop.eup %8341 }
 0x202   : > { %8306 = vrot.lane.b32.xlu0 %v8305_v32, %s9236_s3  ;;  %v7563_v32 = vmul.f32 -1.442695, %v774_v19  ;;  %v926_v40 = vadd.f32 1.0, %v8342_v38  ;;  %v7569_v19 = vmul.f32 -1.442695, %v780_v59  ;;  %v782_v38 = vld [vmem:[%s9803_s30 + $0xf0] sm:$0xff] }
 0x204   : > { %8311 = vrot.lane.b32.xlu1 %v8310_v39, %s9236_s3  ;;  %8361 = vpow2.f32 %v7563_v32  ;;  %v8344_v39 = vpop.eup %8343 }
 0x205   : > { %v927_v44 = vadd.f32 1.0, %v8344_v39  ;;  %8363 = vpow2.f32 %v7564_v37  ;;  %v7570_v37 = vmul.f32 -1.442695, %v781_v5 }
 0x206   : > { %8316 = vrot.lane.b32.xlu0 %v8315_v41, %s9236_s3  ;;  %v8346_v41 = vpop.eup %8345  ;;  %8365 = vrcp.f32 %v926_v40 }
 0x207   : > { %v8348_v47 = vpop.eup %8347  ;;  %v928_v48 = vadd.f32 1.0, %v8346_v41  ;;  %8367 = vrcp.f32 %v927_v44  ;;  %v7567_v41 = vmul.f32 -1.442695, %v778_v20  ;;  %v783_v44 = vld [vmem:[%s9803_s30 + $0xf8] sm:$0xff] }
 0x208   : > { %8321 = vrot.lane.b32.xlu1 %v8320_v51, %s9236_s3  ;;  %v8350_v49 = vpop.eup %8349  ;;  %v929_v50 = vadd.f32 1.0, %v8348_v47  ;;  %v7572_v59 = vmul.f32 -1.442695, %v783_v44 }
 0x209   : > { %v8352_v51 = vpop.eup %8351  ;;  %8369 = vrcp.f32 %v928_v48  ;;  %v932_v52 = vadd.f32 1.0, %v8350_v49  ;;  %v7568_v49 = vmul.f32 -1.442695, %v779_v26 }
 0x20a   : > { %8326 = vrot.lane.b32.xlu0 %v8325_v54, %s9236_s3  ;;  %v8354_v53 = vpop.eup %8353  ;;  %8371 = vrcp.f32 %v929_v50  ;;  %v933_v54 = vadd.f32 1.0, %v8352_v51  ;;  %v10022_v51 = vld [vmem:[#allocation8] ss:$0 sm:$0xff] }
 0x20b   : > { %v8356_v57 = vpop.eup %8355  ;;  %8373 = vrcp.f32 %v932_v52 }
 0x20c   : > { %8331 = vrot.lane.b32.xlu1 %v8330_v58, %s9236_s3  ;;  %v930_v58 = vadd.f32 1.0, %v8354_v53  ;;  %v8358_v60 = vpop.eup %8357  ;;  %8375 = vrcp.f32 %v933_v54  ;;  %v931_v61 = vadd.f32 1.0, %v8356_v57  ;;  %v7571_v53 = vmul.f32 -1.442695, %v782_v38  ;;  %s750_s3 = scalar_lea.vmem [#allocation27], %s7540_s10 }
 0x20d   : > { %v8360_v62 = vpop.eup %8359  ;;  %v936_v2 = vadd.f32 1.0, %v8358_v60 }
 0x20e   : > { %1499 = vrot.lane.b32.xlu0 %v9237_v63, %s9238_s27  ;;  %8377 = vrcp.f32 %v930_v58  ;;  %v8362_v8 = vpop.eup %8361  ;;  %v937_v14 = vadd.f32 1.0, %v8360_v62 }
 0x20f   : > { %8379 = vrcp.f32 %v931_v61  ;;  %v934_v25 = vadd.f32 1.0, %v8362_v8  ;;  %v8364_v32 = vpop.eup %8363 }
 0x210   : > { %8381 = vrcp.f32 %v936_v2  ;;  %v8366_v39 = vpop.eup %8365  ;;  %v935_v40 = vadd.f32 1.0, %v8364_v32 }
 0x211   : > { %8383 = vrcp.f32 %v937_v14  ;;  %v8368_v47 = vpop.eup %8367  ;;  %v1022_v48 = vmul.f32 %v8366_v39, %v9906_v21 }
 0x212   : > { %1547 = vrot.lane.b32.xlu0 %v10011_v31, %s9239_s5  ;;  %8385 = vrcp.f32 %v934_v25  ;;  %v1023_v52 = vmul.f32 %v8368_v47, %v9909_v22 }
 0x213   : > { %8387 = vpow2.f32 %v7569_v19  ;;  %v8370_v50 = vpop.eup %8369  ;;  %v10026_v57 = vadd.f32 %v10022_v51, %v1022_v48 }
 0x214   : > { %8389 = vrcp.f32 %v935_v40  ;;  %v8372_v54 = vpop.eup %8371  ;;  %v1024_v58 = vmul.f32 %v8370_v50, %v9912_v23  ;;  %v10030_v21 = vadd.f32 %v10022_v51, %v1023_v52 }
 0x215   : > { %8391 = vpow2.f32 %v7570_v37  ;;  %v8374_v60 = vpop.eup %8373  ;;  %v1025_v61 = vmul.f32 %v8372_v54, %v9915_v24 }
 0x216   : > { %8393 = vpow2.f32 %v7567_v41  ;;  %v8376_v62 = vpop.eup %8375  ;;  %v10034_v22 = vadd.f32 %v10022_v51, %v1024_v58  ;;  %v1028_v2 = vmul.f32 %v8374_v60, %v9930_v29 }
 0x217   : > { %8395 = vpow2.f32 %v7568_v49  ;;  %v10038_v8 = vadd.f32 %v10022_v51, %v1025_v61  ;;  %v1029_v23 = vmul.f32 %v8376_v62, %v9933_v30  ;;  %v753_v61 = vld [vmem:[%s9803_s30 + $0x8] sm:$0xff] }
 0x218   : > { %v8378_v5 = vpop.eup %8377  ;;  %8397 = vpow2.f32 %v7571_v53  ;;  %v10042_v19 = vadd.f32 %v10022_v51, %v1028_v2  ;;  %v754_v2 = vld [vmem:[%s9803_s30 + $0x10] sm:$0xff] }
 0x219   : > { %v8380_v14 = vpop.eup %8379  ;;  %v1026_v24 = vmul.f32 %v8378_v5, %v9924_v27  ;;  %8399 = vpow2.f32 %v7572_v59  ;;  %v10046_v25 = vadd.f32 %v10022_v51, %v1029_v23  ;;  %v755_v23 = vld [vmem:[%s9803_s30 + $0x18] sm:$0xff] }
 0x21a   : > { %v8382_v20 = vpop.eup %8381  ;;  %v1027_v29 = vmul.f32 %v8380_v14, %v9927_v28  ;;  %v7542_v14 = vmul.f32 -1.442695, %v753_v61 }
 0x21b   : > { %v8384_v26 = vpop.eup %8383  ;;  %v10050_v32 = vadd.f32 %v10022_v51, %v1026_v24  ;;  %v1032_v30 = vmul.f32 %v8382_v20, %v9948_v35  ;;  %v756_v24 = vld [vmem:[%s9803_s30 + $0x20] sm:$0xff]  ;;  %v7543_v20 = vmul.f32 -1.442695, %v754_v2  ;;  %v762_v2 = vld [vmem:[%s9803_s30 + $0x50] sm:$0xff] }
 0x21c   : > { %v8386_v37 = vpop.eup %8385  ;;  %v10054_v38 = vadd.f32 %v10022_v51, %v1027_v29  ;;  %v1033_v39 = vmul.f32 %v8384_v26, %v9951_v36  ;;  %v757_v29 = vld [vmem:[%s9803_s30 + $0x28] sm:$0xff]  ;;  %v7544_v26 = vmul.f32 -1.442695, %v755_v23 }
 0x21d   : > { %v8388_v27 = vpop.eup %8387  ;;  %v10058_v40 = vadd.f32 %v10022_v51, %v1032_v30  ;;  %v1030_v41 = vmul.f32 %v8386_v37, %v9942_v33  ;;  %v758_v30 = vld [vmem:[%s9803_s30 + $0x30] sm:$0xff] }
 0x21e   : > { %v8390_v44 = vpop.eup %8389  ;;  %v10062_v28 = vadd.f32 %v10022_v51, %v1033_v39  ;;  %v940_v47 = vadd.f32 1.0, %v8388_v27  ;;  %v7545_v39 = vmul.f32 -1.442695, %v756_v24  ;;  %v759_v27 = vld [vmem:[%s9803_s30 + $0x38] sm:$0xff] }
 0x21f   : > { %v8392_v48 = vpop.eup %8391  ;;  %v1031_v35 = vmul.f32 %v8390_v44, %v9945_v34  ;;  %v10066_v49 = vadd.f32 %v10022_v51, %v1030_v41  ;;  %v752_v34 = vld [vmem:[%s9803_s30] sm:$0xff]  ;;  %v7546_v41 = vmul.f32 -1.442695, %v757_v29  ;;  %v7551_v29 = vmul.f32 -1.442695, %v762_v2 }
 0x220   : > { %v8394_v36 = vpop.eup %8393  ;;  %v941_v50 = vadd.f32 1.0, %v8392_v48  ;;  %8401 = vrcp.f32 %v940_v47  ;;  %v7541_v5 = vmul.f32 -1.442695, %v752_v34  ;;  %v760_v44 = vld [vmem:[%s9803_s30 + $0x40] sm:$0xff] }
 0x221   : > { %v8396_v52 = vpop.eup %8395  ;;  %v10069_v33 = vadd.f32 %v10022_v51, %v1031_v35  ;;  %v938_v53 = vadd.f32 1.0, %v8394_v36  ;;  %v7547_v35 = vmul.f32 -1.442695, %v758_v30 }
 0x222   : > { %v8398_v54 = vpop.eup %8397  ;;  %8403 = vrcp.f32 %v941_v50  ;;  %v939_v58 = vadd.f32 1.0, %v8396_v52  ;;  %v7548_v50 = vmul.f32 -1.442695, %v759_v27  ;;  %v761_v52 = vld [vmem:[%s9803_s30 + $0x48] sm:$0xff] }
 0x223   : > { %v8400_v59 = vpop.eup %8399  ;;  %8405 = vrcp.f32 %v938_v53  ;;  %v942_v60 = vadd.f32 1.0, %v8398_v54 }
 0x224   : > { %8407 = vrcp.f32 %v939_v58  ;;  %v943_v62 = vadd.f32 1.0, %v8400_v59  ;;  %v7549_v59 = vmul.f32 -1.442695, %v760_v44 }
 0x225   : > { %8409 = vrcp.f32 %v942_v60 }
 0x226   : > { %8411 = vrcp.f32 %v943_v62 }
 0x227   : > { %8413 = vpow2.f32 %v7541_v5 }
 0x228   : > { %8415 = vpow2.f32 %v7542_v14 }
 0x229   : > { %8417 = vpow2.f32 %v7543_v20  ;;  %v764_v20 = vld [vmem:[%s9803_s30 + $0x60] sm:$0xff] }
 0x22a   : > { %v8402_v37 = vpop.eup %8401  ;;  %8419 = vpow2.f32 %v7544_v26  ;;  %v765_v26 = vld [vmem:[%s9803_s30 + $0x68] sm:$0xff]  ;;  %v7553_v27 = vmul.f32 -1.442695, %v764_v20 }
 0x22b   : > { %v1036_v47 = vmul.f32 %v8402_v37, %v9970_v45  ;;  %8421 = vpow2.f32 %v7545_v39  ;;  %v7554_v44 = vmul.f32 -1.442695, %v765_v26 }
 0x22c   : > { %v8404_v48 = vpop.eup %8403  ;;  %8423 = vpow2.f32 %v7546_v41 }
 0x22d   : > { %v8406_v36 = vpop.eup %8405  ;;  %v1037_v53 = vmul.f32 %v8404_v48, %v9973_v46  ;;  %v10084_v54 = vadd.f32 %v10022_v51, %v1036_v47  ;;  %8425 = vpow2.f32 %v7547_v35  ;;  %v7550_v46 = vmul.f32 -1.442695, %v761_v52 }
 0x22e   : > { %v8408_v58 = vpop.eup %8407  ;;  %v1034_v34 = vmul.f32 %v8406_v36, %v9963_v42  ;;  %8427 = vpow2.f32 %v7548_v50  ;;  %v763_v42 = vld [vmem:[%s9803_s30 + $0x58] sm:$0xff]  ;;  %s9248_s30 = smov 120  }
 0x22f   : > { %v8410_v45 = vpop.eup %8409  ;;  %v10088_v60 = vadd.f32 %v10022_v51, %v1037_v53  ;;  %v1035_v61 = vmul.f32 %v8408_v58, %v9966_v43  ;;  %8429 = vpow2.f32 %v7549_v59 }
 0x230   : > { %v8412_v62 = vpop.eup %8411  ;;  %v10093_v5 = vadd.f32 %v10022_v51, %v1034_v34  ;;  %v1038_v23 = vmul.f32 %v8410_v45, %v9984_v55  ;;  %8431 = vpow2.f32 %v7550_v46  ;;  %v7552_v55 = vmul.f32 -1.442695, %v763_v42 }
 0x231   : > { %v10098_v14 = vadd.f32 %v10022_v51, %v1035_v61  ;;  %v1039_v24 = vmul.f32 %v8412_v62, %v9987_v56  ;;  %v8414_v37 = vpop.eup %8413  ;;  %8433 = vpow2.f32 %v7551_v29 }
 0x232   : > { %v10103_v43 = vadd.f32 %v10022_v51, %v1038_v23  ;;  %v8416_v39 = vpop.eup %8415  ;;  %v912_v48 = vadd.f32 1.0, %v8414_v37  ;;  %8435 = vpow2.f32 %v7552_v55 }
 0x233   : > { %v10107_v30 = vadd.f32 %v10022_v51, %v1039_v24  ;;  %v8418_v41 = vpop.eup %8417  ;;  %v913_v35 = vadd.f32 1.0, %v8416_v39  ;;  %8437 = vpow2.f32 %v7553_v27 }
 0x234   : > { %v8420_v47 = vpop.eup %8419  ;;  %v914_v50 = vadd.f32 1.0, %v8418_v41  ;;  %8439 = vpow2.f32 %v7554_v44 }
 0x235   : > { %v8422_v56 = vpop.eup %8421  ;;  %v915_v53 = vadd.f32 1.0, %v8420_v47  ;;  %8441 = vrcp.f32 %v912_v48 }
 0x236   : > { %v8424_v36 = vpop.eup %8423  ;;  %v916_v59 = vadd.f32 1.0, %v8422_v56  ;;  %8443 = vrcp.f32 %v913_v35 }
 0x237   : > { %v8426_v52 = vpop.eup %8425  ;;  %v917_v45 = vadd.f32 1.0, %v8424_v36  ;;  %8445 = vrcp.f32 %v914_v50 }
 0x238   : > { %v8428_v58 = vpop.eup %8427  ;;  %v918_v61 = vadd.f32 1.0, %v8426_v52  ;;  %8447 = vrcp.f32 %v915_v53 }
 0x239   : > { %v8430_v34 = vpop.eup %8429  ;;  %v919_v46 = vadd.f32 1.0, %v8428_v58  ;;  %8449 = vrcp.f32 %v916_v59 }
 0x23a   : > { %v8432_v62 = vpop.eup %8431  ;;  %v920_v2 = vadd.f32 1.0, %v8430_v34  ;;  %8451 = vrcp.f32 %v917_v45 }
 0x23b   : > { %v8434_v23 = vpop.eup %8433  ;;  %8453 = vrcp.f32 %v918_v61  ;;  %v921_v42 = vadd.f32 1.0, %v8432_v62 }
 0x23c   : > { %v8436_v24 = vpop.eup %8435  ;;  %8455 = vrcp.f32 %v919_v46  ;;  %v922_v26 = vadd.f32 1.0, %v8434_v23 }
 0x23d   : > { %v8438_v20 = vpop.eup %8437  ;;  %8457 = vrcp.f32 %v920_v2  ;;  %v923_v55 = vadd.f32 1.0, %v8436_v24 }
 0x23e   : > { %v8440_v29 = vpop.eup %8439  ;;  %8459 = vrcp.f32 %v921_v42  ;;  %v924_v27 = vadd.f32 1.0, %v8438_v20 }
 0x23f   : > { %v8442_v37 = vpop.eup %8441  ;;  %v925_v44 = vadd.f32 1.0, %v8440_v29  ;;  %8461 = vrcp.f32 %v922_v26 }
 0x240   : > { %v8444_v39 = vpop.eup %8443  ;;  %8463 = vrcp.f32 %v923_v55  ;;  %v1008_v50 = vmul.f32 %v8442_v37, %v9845_v0 }
 0x241   : > { %v8446_v41 = vpop.eup %8445  ;;  %8465 = vrcp.f32 %v924_v27  ;;  %v1009_v52 = vmul.f32 %v8444_v39, %v9848_v1 }
 0x242   : > { %v8448_v47 = vpop.eup %8447  ;;  %8467 = vrcp.f32 %v925_v44  ;;  %v1010_v58 = vmul.f32 %v8446_v41, %v9853_v3  ;;  %v1047_v46 = vadd.f32 %v10022_v51, %v1008_v50 }
 0x243   : > { %v8450_v48 = vpop.eup %8449  ;;  %v1011_v34 = vmul.f32 %v8448_v47, %v9856_v4  ;;  %v1048_v2 = vadd.f32 %v10022_v51, %v1009_v52 }
 0x244   : > { %v8452_v56 = vpop.eup %8451  ;;  %v1012_v45 = vmul.f32 %v8450_v48, %v9862_v6  ;;  %v1049_v42 = vadd.f32 %v10022_v51, %v1010_v58 }
 0x245   : > { %v8454_v35 = vpop.eup %8453  ;;  %v1013_v61 = vmul.f32 %v8452_v56, %v9865_v7 }
 0x246   : > { %v8456_v36 = vpop.eup %8455  ;;  %v1014_v62 = vmul.f32 %v8454_v35, %v9870_v9  ;;  %v1050_v9 = vadd.f32 %v10022_v51, %v1011_v34  ;;  %v1051_v20 = vadd.f32 %v10022_v51, %v1012_v45 }
 0x247   : > { %v8458_v53 = vpop.eup %8457  ;;  %v1015_v0 = vmul.f32 %v8456_v36, %v9873_v10  ;;  %v1052_v29 = vadd.f32 %v10022_v51, %v1013_v61 }
 0x248   : > { %v8460_v59 = vpop.eup %8459  ;;  %v1016_v1 = vmul.f32 %v8458_v53, %v9879_v12  ;;  %v1053_v10 = vadd.f32 %v10022_v51, %v1014_v62 }
 0x249   : > { %v8462_v3 = vpop.eup %8461  ;;  %v1017_v4 = vmul.f32 %v8460_v59, %v9882_v13  ;;  %v1054_v12 = vadd.f32 %v10022_v51, %v1015_v0 }
 0x24a   : > { %v8464_v7 = vpop.eup %8463  ;;  %v1055_v37 = vadd.f32 %v10022_v51, %v1016_v1  ;;  %v1018_v41 = vmul.f32 %v8462_v3, %v9888_v15 }
 0x24b   : > { %v8466_v26 = vpop.eup %8465  ;;  %v1056_v35 = vadd.f32 %v10022_v51, %v1017_v4  ;;  %v1019_v36 = vmul.f32 %v8464_v7, %v9891_v16 }
 0x24c   : > { %v8468_v27 = vpop.eup %8467  ;;  %v1020_v53 = vmul.f32 %v8466_v26, %v9894_v17  ;;  %v1057_v0 = vadd.f32 %v10022_v51, %v1018_v41 }
 0x24d   : > { %v1021_v15 = vmul.f32 %v8468_v27, %v9897_v18  ;;  %v1058_v1 = vadd.f32 %v10022_v51, %v1019_v36 }
 0x24e   : > { %v1059_v18 = vadd.f32 %v10022_v51, %v1020_v53 }
 0x260   : > { %v8257_v23 = vpop.permute.xlu0 %8256 }
 0x261   : > { %v8259_v6 = vunpack.i.h.bf16 %v8257_v23  ;;  %v8258_v24 = vunpack.i.l.bf16 %v8257_v23 }
 0x262   : > { %v8267_v39 = vpop.permute.xlu1 %8266 }
 0x263   : > { %v1208_v55 = vsel %vm1207_vm3, %v1047_v46, %v8258_v24  ;;  %v1209_v13 = vsel %vm1207_vm3, %v1048_v2, %v8259_v6  ;;  %v8269_v47 = vunpack.i.h.bf16 %v8267_v39  ;;  %v8268_v48 = vunpack.i.l.bf16 %v8267_v39 }
 0x264   : > { %v8262_v44 = vpop.permute.xlu0 %8261  ;;  %v10131_v56 = vpack.c.bf16 %v1209_v13, %v1208_v55  ;;  %v1060_v6 = vadd.f32 %v10022_v51, %v1021_v15 }
 0x265   : > { %v8264_v50 = vunpack.i.h.bf16 %v8262_v44  ;;  %v8263_v52 = vunpack.i.l.bf16 %v8262_v44  ;;  %v1212_v58 = vsel %vm1207_vm3, %v1051_v20, %v8268_v48  ;;  %v1213_v59 = vsel %vm1207_vm3, %v1052_v29, %v8269_v47 }
 0x266   : > { %1628 = vrot.lane.b32.xlu0 %v10131_v56, %s9240_s0  ;;  %1501 = vrot.lane.b32.xlu1 %v10131_v56, %s9238_s27  ;;  %v10145_v45 = vpack.c.bf16 %v1213_v59, %v1212_v58  ;;  %v8272_v17 = vpop.permute.xlu1 %8271 }
 0x267   : > { %v1210_v34 = vsel %vm1207_vm3, %v1049_v42, %v8263_v52  ;;  %v1211_v16 = vsel %vm1207_vm3, %v1050_v9, %v8264_v50  ;;  %v8274_v62 = vunpack.i.h.bf16 %v8272_v17  ;;  %v8273_v46 = vunpack.i.l.bf16 %v8272_v17 }
 0x268   : > { %v10147_v61 = vpack.c.bf16 %v1211_v16, %v1210_v34  ;;  %v8277_v2 = vpop.permute.xlu0 %8276 }
 0x269   : > { %v8279_v23 = vunpack.i.h.bf16 %v8277_v2  ;;  %v8278_v3 = vunpack.i.l.bf16 %v8277_v2  ;;  %v1214_v42 = vsel %vm1207_vm3, %v1053_v10, %v8273_v46  ;;  %v1215_v4 = vsel %vm1207_vm3, %v1054_v12, %v8274_v62 }
 0x26a   : > { %1726 = vrot.lane.b32.xlu0 %v10147_v61, %s9241_s6  ;;  %1630 = vrot.lane.b32.xlu1 %v10147_v61, %s9240_s0  ;;  %v10159_v24 = vpack.c.bf16 %v1215_v4, %v1214_v42  ;;  %v8282_v20 = vpop.permute.xlu1 %8281  ;;  %v1264_v12 = vshrl.u32 %v10131_v56, 16  ;;  %v1271_v34 = vshrl.u32 %v10147_v61, 16 }
 0x26b   : > { %v1216_v7 = vsel %vm1207_vm3, %v1055_v37, %v8278_v3  ;;  %v1217_v9 = vsel %vm1207_vm3, %v1056_v35, %v8279_v23  ;;  %v8284_v26 = vunpack.i.h.bf16 %v8282_v20  ;;  %v8283_v55 = vunpack.i.l.bf16 %v8282_v20 }
 0x26c   : > { %v10163_v29 = vpack.c.bf16 %v1217_v9, %v1216_v7  ;;  %v8287_v13 = vpop.permute.xlu0 %8286  ;;  %v1267_v37 = vshll.u32 %v10131_v56, 16  ;;  %v1266_v50 = vrot.slane %v1264_v12, 7  ;;  %v1273_v42 = vrot.slane %v1271_v34, 7 }
 0x26d   : > { %v8289_v39 = vunpack.i.h.bf16 %v8287_v13  ;;  %v8288_v27 = vunpack.i.l.bf16 %v8287_v13  ;;  %v1218_v51 = vsel %vm1207_vm3, %v1057_v0, %v8283_v55  ;;  %v1219_v10 = vsel %vm1207_vm3, %v1058_v1, %v8284_v26 }
 0x26e   : > { %1632 = vrot.lane.b32.xlu0 %v10145_v45, %s9240_s0  ;;  %1728 = vrot.lane.b32.xlu1 %v10145_v45, %s9241_s6  ;;  %v10173_v41 = vpack.c.bf16 %v1219_v10, %v1218_v51  ;;  %v8292_v48 = vpop.permute.xlu1 %8291  ;;  %v1405_v52 = vrot.slane %v1267_v37, 1  ;;  %v1269_v58 = vor.u32 %v1267_v37, %v1266_v50  ;;  %v1274_v9 = vshll.u32 %v10147_v61, 16 }
 0x26f   : > { %v1220_v44 = vsel %vm1207_vm3, %v1059_v18, %v8288_v27  ;;  %v1221_v47 = vsel %vm1207_vm3, %v1060_v6, %v8289_v39  ;;  %v8294_v17 = vunpack.i.h.bf16 %v8292_v48  ;;  %v8293_v62 = vunpack.i.l.bf16 %v8292_v48 }
 0x270   : > { %v10177_v35 = vpack.c.bf16 %v1221_v47, %v1220_v44  ;;  %v8297_v36 = vpop.permute.xlu0 %8296  ;;  %v1406_v59 = vor.u32 %v1405_v52, %v1264_v12  ;;  %v10199_v0 = vsel %vm10188_vm6, 0, %v1269_v58  ;;  %v1281_v13 = vshll.u32 %v10145_v45, 16 }
 0x271   : > { %v8299_v46 = vunpack.i.h.bf16 %v8297_v36  ;;  %v8298_v2 = vunpack.i.l.bf16 %v8297_v36  ;;  %v1223_v23 = vsel %vm1207_vm3, %v10030_v21, %v8294_v17  ;;  %v1222_v4 = vsel %vm1207_vm3, %v10026_v57, %v8293_v62 }
 0x272   : > { %1730 = vrot.lane.b32.xlu0 %v10159_v24, %s9241_s6  ;;  %1503 = vrot.lane.b32.xlu1 %v10147_v61, %s9238_s27  ;;  %v8302_v53 = vpop.permute.xlu1 %8301  ;;  %v10203_v1 = vsel %vm10000_vm2, %v1406_v59, 0  ;;  %v10214_v20 = vpack.c.bf16 %v1223_v23, %v1222_v4  ;;  %v1276_v10 = vor.u32 %v1274_v9, %v1273_v42  ;;  %v1407_v50 = vrot.slane %v1274_v9, 1  ;;  %v8337_v9 = vld [vmem:[#allocation9 + $0x10] sm:$0xff]  }
 0x273   : > { %v1224_v6 = vsel %vm1207_vm3, %v10034_v22, %v8298_v2  ;;  %v1225_v7 = vsel %vm1207_vm3, %v10038_v8, %v8299_v46  ;;  %v8304_v57 = vunpack.i.h.bf16 %v8302_v53  ;;  %v8303_v27 = vunpack.i.l.bf16 %v8302_v53 }
 0x274   : > { %v8307_v56 = vpop.permute.xlu0 %8306  ;;  %v10216_v26 = vpack.c.bf16 %v1225_v7, %v1224_v6  ;;  %v1409_v59 = vrot.slane %v1281_v13, 1  ;;  %v10257_v17 = vsel %vm10188_vm6, 0, %v1276_v10  ;;  %v1408_v2 = vor.u32 %v1407_v50, %v1271_v34  ;;  %v8336_v7 = vld [vmem:[#allocation9 + $0x8] sm:$0xff]  }
 0x275   : > { %v8309_v3 = vunpack.i.h.bf16 %v8307_v56  ;;  %v8308_v55 = vunpack.i.l.bf16 %v8307_v56  ;;  %v1227_v37 = vsel %vm1207_vm3, %v10054_v38, %v8304_v57 }
 0x276   : > { %1636 = vrot.lane.b32.xlu0 %v10163_v29, %s9240_s0  ;;  %1505 = vrot.lane.b32.xlu1 %v10145_v45, %s9238_s27  ;;  %v8312_v16 = vpop.permute.xlu1 %8311  ;;  %v1456_v42 = vsel %vm10000_vm2, %v1408_v2, 0 }
 0x277   : > { %v1229_v39 = vsel %vm1207_vm3, %v10046_v25, %v8309_v3  ;;  %v1228_v22 = vsel %vm1207_vm3, %v10042_v19, %v8308_v55  ;;  %v8314_v51 = vunpack.i.h.bf16 %v8312_v16  ;;  %v1226_v25 = vsel %vm1207_vm3, %v10050_v32, %v8303_v27 }
 0x278   : > { %v8317_v18 = vpop.permute.xlu0 %8316  ;;  %v10227_v12 = vpack.c.bf16 %v1229_v39, %v1228_v22  ;;  %v10233_v44 = vpack.c.bf16 %v1227_v37, %v1226_v25  ;;  %v8313_v48 = vunpack.i.l.bf16 %v8312_v16  ;;  %v8338_v39 = vld [vmem:[#allocation9 + $0x18] sm:$0xff]   ;;  %v1288_v22 = vshll.u32 %v10159_v24, 16 }
 0x279   : > { %v8319_v8 = vunpack.i.h.bf16 %v8317_v18  ;;  %v8318_v61 = vunpack.i.l.bf16 %v8317_v18  ;;  %v1231_v53 = vsel %vm1207_vm3, %v10069_v33, %v8314_v51  ;;  %v1292_v37 = vshrl.u32 %v10163_v29, 16 }
 0x27a   : > { %1734 = vrot.lane.b32.xlu0 %v10173_v41, %s9241_s6  ;;  %1634 = vrot.lane.b32.xlu1 %v10159_v24, %s9240_s0  ;;  %v8322_v21 = vpop.permute.xlu1 %8321  ;;  %v1230_v38 = vsel %vm1207_vm3, %v10066_v49, %v8313_v48 }
 0x27b   : > { %v1232_v47 = vsel %vm1207_vm3, %v10058_v40, %v8318_v61  ;;  %v1233_v19 = vsel %vm1207_vm3, %v10062_v28, %v8319_v8  ;;  %v8324_v28 = vunpack.i.h.bf16 %v8322_v21  ;;  %v8323_v56 = vunpack.i.l.bf16 %v8322_v21 }
 0x27c   : > { %v8327_v36 = vpop.permute.xlu0 %8326  ;;  %v10239_v52 = vpack.c.bf16 %v1233_v19, %v1232_v47  ;;  %v10251_v16 = vpack.c.bf16 %v1231_v53, %v1230_v38  ;;  %v1285_v21 = vshrl.u32 %v10159_v24, 16  ;;  %v1411_v8 = vrot.slane %v1288_v22, 1 }
 0x27d   : > { %v8329_v32 = vunpack.i.h.bf16 %v8327_v36  ;;  %v8328_v40 = vunpack.i.l.bf16 %v8327_v36  ;;  %v1234_v49 = vsel %vm1207_vm3, %v10093_v5, %v8323_v56  ;;  %v1235_v46 = vsel %vm1207_vm3, %v10098_v14, %v8324_v28 }
 0x27e   : > { %1732 = vrot.lane.b32.xlu1 %v10163_v29, %s9241_s6  ;;  %1595 = vrot.lane.b32.xlu0 %v10199_v0, %s9242_s8  ;;  %v8332_v58 = vpop.permute.xlu1 %8331  ;;  %v10267_v3 = vpack.c.bf16 %v1235_v46, %v1234_v49  ;;  %v1278_v5 = vshrl.u32 %v10145_v45, 16  ;;  %v1287_v27 = vrot.slane %v1285_v21, 7  ;;  %v8339_v45 = vld [vmem:[#allocation9 + $0x20] ss:$0 sps:$4 sm:$0xff]   ;;  %v1295_v61 = vshll.u32 %v10163_v29, 16 }
 0x27f   : > { %v1237_v33 = vsel %vm1207_vm3, %v10088_v60, %v8329_v32  ;;  %v1236_v62 = vsel %vm1207_vm3, %v10084_v54, %v8328_v40  ;;  %v8334_v18 = vunpack.i.h.bf16 %v8332_v58  ;;  %v8333_v54 = vunpack.i.l.bf16 %v8332_v58  ;;  %v8335_v60 = vld [vmem:[#allocation9] sm:$0xff]  }
 0x280   : > { %v10265_v23 = vpack.c.bf16 %v1237_v33, %v1236_v62  ;;  %7835 = vmatprep.subr.bf16.mxu0 %v8335_v60  ;;  %v1410_v4 = vor.u32 %v1409_v59, %v1278_v5  ;;  %v1412_v10 = vor.u32 %v1411_v8, %v1285_v21  ;;  %v1413_v25 = vrot.slane %v1295_v61, 1 }
 0x281   : > { %v1239_v14 = vsel %vm1207_vm3, %v10107_v30, %v8334_v18  ;;  %v1238_v34 = vsel %vm1207_vm3, %v10103_v43, %v8333_v54  ;;  %7836 = vmatpush3.bf16.msra.mxu0 %v8335_v60  ;;  %v1280_v43 = vrot.slane %v1278_v5, 7  ;;  %v1294_v48 = vrot.slane %v1292_v37, 7 }
 0x282   : > { %1507 = vrot.lane.b32.xlu1 %v10159_v24, %s9238_s27  ;;  %1661 = vrot.lane.b32.xlu0 %v10203_v1, %s9243_s29  ;;  %v10280_v6 = vpack.c.bf16 %v1239_v14, %v1238_v34  ;;  %v1457_v30 = vsel %vm10000_vm2, %v1410_v4, 0  ;;  %v2148_v24 = vsel %vm2146_vm7, %v8339_v45, 0  ;;  %v1414_v47 = vor.u32 %v1413_v25, %v1292_v37  ;;  %v1500_v34 = vpop.permute.xlu0 %1499 }
 0x283   : > { %7837 = vmatprep.subr.bf16.mxu0 %v8336_v7  ;;  %v1283_v55 = vor.u32 %v1281_v13, %v1280_v43  ;;  %v1290_v13 = vor.u32 %v1288_v22, %v1287_v27  ;;  %v1297_v36 = vor.u32 %v1295_v61, %v1294_v48  ;;  %v1302_v32 = vshll.u32 %v10173_v41, 16 }
 0x284   : > { %v1459_v19 = vsel %vm10000_vm2, %v1414_v47, 0  ;;  %v1309_v28 = vshll.u32 %v10177_v35, 16  ;;  %v1306_v59 = vshrl.u32 %v10177_v35, 16  ;;  %v1313_v18 = vshrl.u32 %v10214_v20, 16 }
 0x285   : > { %7838 = vmatpush3.bf16.msra.mxu0 %v8336_v7  ;;  %v10298_v57 = vsel %vm10188_vm6, 0, %v1283_v55  ;;  %v10311_v51 = vsel %vm10188_vm6, 0, %v1290_v13  ;;  %v10332_v50 = vsel %vm10188_vm6, 0, %v1297_v36  ;;  %v1415_v40 = vrot.slane %v1302_v32, 1 }
 0x286   : > { %1509 = vrot.lane.b32.xlu1 %v10163_v29, %s9238_s27  ;;  %1694 = vrot.lane.b32.xlu0 %v10257_v17, %s9244_s2  ;;  %v1299_v29 = vshrl.u32 %v10173_v41, 16  ;;  %v1308_v46 = vrot.slane %v1306_v59, 7  ;;  %v1315_v60 = vrot.slane %v1313_v18, 7  ;;  %v1316_v5 = vshll.u32 %v10214_v20, 16 }
 0x287   : > { %7839 = vmatprep.subr.bf16.mxu0 %v8337_v9  ;;  %v1320_v7 = vshrl.u32 %v10216_v26, 16  ;;  %v1327_v37 = vshrl.u32 %v10233_v44, 16  ;;  %v1330_v48 = vshll.u32 %v10233_v44, 16 }
 0x288   : > { %v1301_v53 = vrot.slane %v1299_v29, 7  ;;  %v1416_v58 = vor.u32 %v1415_v40, %v1299_v29  ;;  %v1311_v2 = vor.u32 %v1309_v28, %v1308_v46  ;;  %v1318_v14 = vor.u32 %v1316_v5, %v1315_v60 }
 0x289   : > { %7840 = vmatpush3.bf16.msra.mxu0 %v8337_v9  ;;  %v1419_v4 = vrot.slane %v1316_v5, 1  ;;  %v1322_v43 = vrot.slane %v1320_v7, 7  ;;  %v1323_v9 = vshll.u32 %v10216_v26, 16  ;;  %v1337_v46 = vshll.u32 %v10227_v12, 16 }
 0x28a   : > { %1638 = vrot.lane.b32.xlu1 %v10173_v41, %s9240_s0  ;;  %1758 = vrot.lane.b32.xlu0 %v1456_v42, %s9245_s11  ;;  %v1304_v38 = vor.u32 %v1302_v32, %v1301_v53  ;;  %v1460_v33 = vsel %vm10000_vm2, %v1416_v58, 0  ;;  %v10365_v54 = vsel %vm10188_vm6, 0, %v1311_v2  ;;  %v1423_v58 = vrot.slane %v1330_v48, 1 }
 0x28b   : > { %7841 = vmatprep.subr.bf16.mxu0 %v8338_v39  ;;  %v1325_v21 = vor.u32 %v1323_v9, %v1322_v43 }
 0x28c   : > { %v10344_v56 = vsel %vm10188_vm6, 0, %v1304_v38 }
 0x28d   : > { %7842 = vmatpush3.bf16.msra.mxu0 %v8338_v39  ;;  %v1421_v39 = vrot.slane %v1323_v9, 1 }
 0x28e   : > { %1736 = vrot.lane.b32.xlu1 %v10177_v35, %s9241_s6  ;;  %1760 = vrot.lane.b32.xlu0 %v1457_v30, %s9245_s11 }
 0x28f   : > { %8047 = vmatprep.subr.msk.bf16.mxu0 %vm2146_vm7, %v8339_v45  ;;  %v10397_v45 = vsel %vm10188_vm6, 0, %v1325_v21  ;;  %v1422_v13 = vor.u32 %v1421_v39, %v1320_v7 }
 0x291   : > { %7844 = vmatpush3.bf16.msra.mxu0 %v2148_v24  ;;  %v1463_v24 = vsel %vm10000_vm2, %v1422_v13, 0 }
 0x292   : > { %1511 = vrot.lane.b32.xlu1 %v10173_v41, %s9238_s27  ;;  %1551 = vrot.lane.b32.xlu0 %v1456_v42, %s9239_s5  ;;  %v1417_v41 = vrot.slane %v1309_v28, 1 }
 0x294   : > { %v1418_v62 = vor.u32 %v1417_v41, %v1306_v59  ;;  %v1334_v41 = vshrl.u32 %v10227_v12, 16 }
 0x296   : > { %1513 = vrot.lane.b32.xlu1 %v10177_v35, %s9238_s27  ;;  %1599 = vrot.lane.b32.xlu0 %v10298_v57, %s9242_s8  ;;  %v1461_v49 = vsel %vm10000_vm2, %v1418_v62, 0  ;;  %v1424_v62 = vor.u32 %v1423_v58, %v1327_v37 }
 0x29a   : > { %1549 = vrot.lane.b32.xlu1 %v10203_v1, %s9239_s5  ;;  %1665 = vrot.lane.b32.xlu0 %v1457_v30, %s9243_s29  ;;  %v1458_v1 = vsel %vm10000_vm2, %v1412_v10, 0 }
 0x29e   : > { %1597 = vrot.lane.b32.xlu1 %v10257_v17, %s9242_s8  ;;  %1698 = vrot.lane.b32.xlu0 %v10311_v51, %s9244_s2 }
 0x2a2   : > { %1663 = vrot.lane.b32.xlu1 %v1456_v42, %s9243_s29  ;;  %1762 = vrot.lane.b32.xlu0 %v1458_v1, %s9245_s11  ;;  %v10377_v42 = vsel %vm10188_vm6, 0, %v1318_v14  ;;  %v1464_v14 = vsel %vm10000_vm2, %v1424_v62, 0 }
 0x2a6   : > { %1696 = vrot.lane.b32.xlu1 %v10298_v57, %s9244_s2  ;;  %1764 = vrot.lane.b32.xlu0 %v1459_v19, %s9245_s11 }
 0x2aa   : > { %1553 = vrot.lane.b32.xlu1 %v1457_v30, %s9239_s5  ;;  %1555 = vrot.lane.b32.xlu0 %v1458_v1, %s9239_s5  ;;  %v1420_v30 = vor.u32 %v1419_v4, %v1313_v18  ;;  %v1425_v4 = vrot.slane %v1337_v46, 1 }
 0x2ac   : > { %v1462_v55 = vsel %vm10000_vm2, %v1420_v30, 0  ;;  %v1426_v21 = vor.u32 %v1425_v4, %v1334_v41 }
 0x2ae   : > { %1601 = vrot.lane.b32.xlu1 %v10311_v51, %s9242_s8  ;;  %1603 = vrot.lane.b32.xlu0 %v10332_v50, %s9242_s8 }
 0x2b2   : > { %1667 = vrot.lane.b32.xlu1 %v1458_v1, %s9243_s29  ;;  %1669 = vrot.lane.b32.xlu0 %v1459_v19, %s9243_s29 }
 0x2b6   : > { %1700 = vrot.lane.b32.xlu1 %v10332_v50, %s9244_s2  ;;  %1702 = vrot.lane.b32.xlu0 %v10344_v56, %s9244_s2 }
 0x2ba   : > { %1557 = vrot.lane.b32.xlu1 %v1459_v19, %s9239_s5  ;;  %1766 = vrot.lane.b32.xlu0 %v1460_v33, %s9245_s11  ;;  %v1329_v19 = vrot.slane %v1327_v37, 7 }
 0x2bc   : > { %v1332_v53 = vor.u32 %v1330_v48, %v1329_v19 }
 0x2be   : > { %1605 = vrot.lane.b32.xlu1 %v10344_v56, %s9242_s8  ;;  %1768 = vrot.lane.b32.xlu0 %v1461_v49, %s9245_s11  ;;  %v10446_v28 = vsel %vm10188_vm6, 0, %v1332_v53 }
 0x2c2   : > { %1671 = vrot.lane.b32.xlu1 %v1460_v33, %s9243_s29  ;;  %1559 = vrot.lane.b32.xlu0 %v1460_v33, %s9239_s5 }
 0x2c6   : > { %1704 = vrot.lane.b32.xlu1 %v10365_v54, %s9244_s2  ;;  %1607 = vrot.lane.b32.xlu0 %v10365_v54, %s9242_s8 }
 0x2ca   : > { %1561 = vrot.lane.b32.xlu1 %v1461_v49, %s9239_s5  ;;  %1640 = vrot.lane.b32.xlu0 %v10177_v35, %s9240_s0  ;;  %v1548_v35 = vpop.permute.xlu0 %1547 }
 0x2ce   : > { %1609 = vrot.lane.b32.xlu1 %v10377_v42, %s9242_s8  ;;  %1673 = vrot.lane.b32.xlu0 %v1461_v49, %s9243_s29  ;;  %v1336_v49 = vrot.slane %v1334_v41, 7  ;;  %v1344_v41 = vshll.u32 %v10251_v16, 16 }
 0x2d2   : > { %1642 = vrot.lane.b32.xlu1 %v10214_v20, %s9240_s0  ;;  %1706 = vrot.lane.b32.xlu0 %v10377_v42, %s9244_s2 }
 0x2d6   : > { %1675 = vrot.lane.b32.xlu1 %v1462_v55, %s9243_s29  ;;  %1738 = vrot.lane.b32.xlu0 %v10214_v20, %s9241_s6 }
 0x2d8   : > { %v1629_v27 = vpop.permute.xlu0 %1628  ;;  %v10393_v22 = vpop.permute.xlu1 %1501 }
 0x2da   : > { %1708 = vrot.lane.b32.xlu1 %v10397_v45, %s9244_s2  ;;  %1770 = vrot.lane.b32.xlu0 %v1462_v55, %s9245_s11 }
 0x2dc   : > { %v10402_v8 = vpop.permute.xlu0 %1726  ;;  %v10404_v61 = vpop.permute.xlu1 %1630 }
 0x2de   : > { %1740 = vrot.lane.b32.xlu1 %v10216_v26, %s9241_s6  ;;  %1772 = vrot.lane.b32.xlu0 %v1463_v24, %s9245_s11 }
 0x2e0   : > { %v10411_v10 = vpop.permute.xlu0 %1632  ;;  %v10413_v25 = vpop.permute.xlu1 %1728 }
 0x2e2   : > { %1515 = vrot.lane.b32.xlu1 %v10214_v20, %s9238_s27  ;;  %1563 = vrot.lane.b32.xlu0 %v1462_v55, %s9239_s5  ;;  %v1259_v20 = vrot.slane %v9237_v63, 7 }
 0x2e4   : > { %v10419_v1 = vpop.permute.xlu0 %1730  ;;  %v10421_v47 = vpop.permute.xlu1 %1503  ;;  %v10442_v40 = vsel %vm10188_vm6, 0, %v1259_v20  ;;  %v1341_v20 = vshrl.u32 %v10251_v16, 16 }
 0x2e6   : > { %1517 = vrot.lane.b32.xlu1 %v10216_v26, %s9238_s27  ;;  %1611 = vrot.lane.b32.xlu0 %v10397_v45, %s9242_s8  ;;  %v1343_v58 = vrot.slane %v1341_v20, 7 }
 0x2e8   : > { %v10428_v36 = vpop.permute.xlu0 %1636  ;;  %v10430_v29 = vpop.permute.xlu1 %1505  ;;  %v1346_v62 = vor.u32 %v1344_v41, %v1343_v58 }
 0x2ea   : > { %1565 = vrot.lane.b32.xlu1 %v1463_v24, %s9239_s5  ;;  %1644 = vrot.lane.b32.xlu0 %v10216_v26, %s9240_s0  ;;  %v1793_v26 = vsel %vm1790_vm8, %v10442_v40, %v1500_v34  ;;  %v1339_v34 = vor.u32 %v1337_v46, %v1336_v49  ;;  %v10513_v46 = vsel %vm10188_vm6, 0, %v1346_v62 }
 0x2eb   : > { %v1841_v2 = vsel %vm1839_vm9, %v1793_v26, %v1548_v35 }
 0x2ec   : > { %v10436_v32 = vpop.permute.xlu0 %1734  ;;  %v10438_v38 = vpop.permute.xlu1 %1634  ;;  %v10477_v55 = vsel %vm10188_vm6, 0, %v1339_v34 }
 0x2ee   : > { %1613 = vrot.lane.b32.xlu1 %v10446_v28, %s9242_s8  ;;  %1677 = vrot.lane.b32.xlu0 %v1463_v24, %s9243_s29  ;;  %v1465_v24 = vsel %vm10000_vm2, %v1426_v21, 0 }
 0x2f0   : > { %v10454_v59 = vpop.permute.xlu1 %1732  ;;  %v1596_v33 = vpop.permute.xlu0 %1595 }
 0x2f1   : > { %v1874_v18 = vsel %vm1872_vm10, %v1841_v2, %v1596_v33  ;;  %v1427_v2 = vrot.slane %v1344_v41, 1 }
 0x2f2   : > { %1646 = vrot.lane.b32.xlu1 %v10233_v44, %s9240_s0  ;;  %1710 = vrot.lane.b32.xlu0 %v10446_v28, %s9244_s2  ;;  %v1907_v7 = vsel %vm1905_vm11, %v1874_v18, %v1629_v27  ;;  %v1348_v18 = vshrl.u32 %v10239_v52, 16 }
 0x2f3   : > { %v1428_v34 = vor.u32 %v1427_v2, %v1341_v20 }
 0x2f4   : > { %v10463_v60 = vpop.permute.xlu1 %1507  ;;  %v1662_v5 = vpop.permute.xlu0 %1661  ;;  %v1350_v4 = vrot.slane %v1348_v18, 7 }
 0x2f5   : > { %v1940_v30 = vsel %vm1938_vm12, %v1907_v7, %v1662_v5  ;;  %v1351_v7 = vshll.u32 %v10239_v52, 16 }
 0x2f6   : > { %1679 = vrot.lane.b32.xlu1 %v1464_v14, %s9243_s29  ;;  %1742 = vrot.lane.b32.xlu0 %v10233_v44, %s9241_s6 }
 0x2f8   : > { %v10472_v43 = vpop.permute.xlu1 %1509  ;;  %v1695_v9 = vpop.permute.xlu0 %1694 }
 0x2f9   : > { %v1973_v35 = vsel %vm1971_vm13, %v1940_v30, %v1695_v9  ;;  %v1796_v30 = vsel %vm1790_vm8, %v10199_v0, %v10393_v22  ;;  %v1353_v0 = vor.u32 %v1351_v7, %v1350_v4  ;;  %v1429_v22 = vrot.slane %v1351_v7, 1 }
 0x2fa   : > { %1712 = vrot.lane.b32.xlu1 %v10477_v55, %s9244_s2  ;;  %1774 = vrot.lane.b32.xlu0 %v1464_v14, %s9245_s11  ;;  %v2006_v13 = vsel %vm2004_vm14, %v1973_v35, %v10402_v8  ;;  %v1805_v4 = vsel %vm1790_vm8, %v10311_v51, %v10463_v60 }
 0x2fc   : > { %v10482_v39 = vpop.permute.xlu1 %1638  ;;  %v1759_v27 = vpop.permute.xlu0 %1758 }
 0x2fd   : > { %v2039_v37 = vsel %vm2037_vm15, %v2006_v13, %v1759_v27  ;;  %v1466_v13 = vsel %vm10000_vm2, %v1428_v34, 0  ;;  %v1802_v34 = vsel %vm1790_vm8, %v10298_v57, %v10430_v29  ;;  %v1358_v29 = vshll.u32 %v10267_v3, 16 }
 0x2fe   : > { %1744 = vrot.lane.b32.xlu1 %v10227_v12, %s9241_s6  ;;  %1776 = vrot.lane.b32.xlu0 %v1465_v24, %s9245_s11 }
 0x2ff   : > { %7845 = vmatprep.mubr.msk.bf16.mxu0 %vm2113_vm0, %v2039_v37 }
 0x300   : > { %v10493_v19 = vpop.permute.xlu1 %1736  ;;  %v1761_v48 = vpop.permute.xlu0 %1760 }
 0x302   : > { %1519 = vrot.lane.b32.xlu1 %v10233_v44, %s9238_s27  ;;  %1567 = vrot.lane.b32.xlu0 %v1464_v14, %s9239_s5 }
 0x304   : > { %v10499_v8 = vpop.permute.xlu1 %1511  ;;  %v1552_v53 = vpop.permute.xlu0 %1551 }
 0x306   : > { %1521 = vrot.lane.b32.xlu1 %v10227_v12, %s9238_s27  ;;  %1615 = vrot.lane.b32.xlu0 %v10477_v55, %s9242_s8 }
 0x308   : > { %v10506_v26 = vpop.permute.xlu1 %1513  ;;  %v1600_v33 = vpop.permute.xlu0 %1599 }
 0x30a   : > { %1569 = vrot.lane.b32.xlu1 %v1465_v24, %s9239_s5  ;;  %1648 = vrot.lane.b32.xlu0 %v10227_v12, %s9240_s0  ;;  %v1799_v12 = vsel %vm1790_vm8, %v10257_v17, %v10421_v47 }
 0x30b   : > { %v1845_v9 = vsel %vm1839_vm9, %v1799_v12, %v1552_v53 }
 0x30c   : > { %v1550_v44 = vpop.permute.xlu1 %1549  ;;  %v1666_v49 = vpop.permute.xlu0 %1665  ;;  %v1878_v35 = vsel %vm1872_vm10, %v1845_v9, %v1600_v33 }
 0x30d   : > { %v1843_v17 = vsel %vm1839_vm9, %v1796_v30, %v1550_v44  ;;  %v1430_v44 = vor.u32 %v1429_v22, %v1348_v18 }
 0x30e   : > { %1617 = vrot.lane.b32.xlu1 %v10513_v46, %s9242_s8  ;;  %1681 = vrot.lane.b32.xlu0 %v1465_v24, %s9243_s29  ;;  %v1911_v24 = vsel %vm1905_vm11, %v1878_v35, %v10411_v10  ;;  %v10549_v10 = vsel %vm10188_vm6, 0, %v1353_v0 }
 0x30f   : > { %v1944_v37 = vsel %vm1938_vm12, %v1911_v24, %v1666_v49 }
 0x310   : > { %v1598_v5 = vpop.permute.xlu1 %1597  ;;  %v1699_v14 = vpop.permute.xlu0 %1698 }
 0x311   : > { %v1876_v47 = vsel %vm1872_vm10, %v1843_v17, %v1598_v5  ;;  %v1977_v53 = vsel %vm1971_vm13, %v1944_v37, %v1699_v14 }
 0x312   : > { %1650 = vrot.lane.b32.xlu1 %v10251_v16, %s9240_s0  ;;  %1714 = vrot.lane.b32.xlu0 %v10513_v46, %s9244_s2  ;;  %v1909_v20 = vsel %vm1905_vm11, %v1876_v47, %v10404_v61  ;;  %v2010_v61 = vsel %vm2004_vm14, %v1977_v53, %v10419_v1 }
 0x314   : > { %v1664_v21 = vpop.permute.xlu1 %1663  ;;  %v1763_v27 = vpop.permute.xlu0 %1762 }
 0x315   : > { %v1942_v58 = vsel %vm1938_vm12, %v1909_v20, %v1664_v21  ;;  %v2043_v5 = vsel %vm2037_vm15, %v2010_v61, %v1763_v27  ;;  %v1808_v61 = vsel %vm1790_vm8, %v10332_v50, %v10472_v43 }
 0x316   : > { %1683 = vrot.lane.b32.xlu1 %v1466_v13, %s9243_s29  ;;  %1746 = vrot.lane.b32.xlu0 %v10251_v16, %s9241_s6 }
 0x318   : > { %v1697_v41 = vpop.permute.xlu1 %1696  ;;  %v1765_v33 = vpop.permute.xlu0 %1764 }
 0x319   : > { %v1975_v62 = vsel %vm1971_vm13, %v1942_v58, %v1697_v41 }
 0x31a   : > { %v2008_v2 = vsel %vm2004_vm14, %v1975_v62, %v10413_v25  ;;  %1716 = vrot.lane.b32.xlu1 %v10549_v10, %s9244_s2  ;;  %1778 = vrot.lane.b32.xlu0 %v1466_v13, %s9245_s11  ;;  %v1467_v25 = vsel %vm10000_vm2, %v1430_v44, 0  ;;  %v1362_v62 = vshrl.u32 %v10265_v23, 16 }
 0x31b   : > { %v2041_v49 = vsel %vm2037_vm15, %v2008_v2, %v1761_v48  ;;  %v1355_v48 = vshrl.u32 %v10267_v3, 16  ;;  %v1365_v2 = vshll.u32 %v10265_v23, 16 }
 0x31c   : > { %v1554_v14 = vpop.permute.xlu1 %1553  ;;  %v1556_v12 = vpop.permute.xlu0 %1555  ;;  %7846 = vmatmul.mubr.msk.bf16.vlgmr.msra.gmra.mrb[0].mxu0 %vm2113_vm0, %v2041_v49  ;;  %v1364_v44 = vrot.slane %v1362_v62, 7 }
 0x31d   : > { %7849 = vmatprep.mubr.msk.bf16.mxu0 %vm2113_vm0, %v2043_v5  ;;  %v1847_v7 = vsel %vm1839_vm9, %v1802_v34, %v1554_v14  ;;  %v1849_v30 = vsel %vm1839_vm9, %v1805_v4, %v1556_v12  ;;  %v1357_v57 = vrot.slane %v1355_v48, 7 }
 0x31e   : > { %1748 = vrot.lane.b32.xlu1 %v10239_v52, %s9241_s6  ;;  %1780 = vrot.lane.b32.xlu0 %v1467_v25, %s9245_s11 }
 0x31f   : > { %v1360_v24 = vor.u32 %v1358_v29, %v1357_v57 }
 0x320   : > { %v1602_v18 = vpop.permute.xlu1 %1601  ;;  %v1604_v1 = vpop.permute.xlu0 %1603 }
 0x321   : > { %v1880_v9 = vsel %vm1872_vm10, %v1847_v7, %v1602_v18  ;;  %v1882_v35 = vsel %vm1872_vm10, %v1849_v30, %v1604_v1  ;;  %v10606_v41 = vsel %vm10188_vm6, 0, %v1360_v24  ;;  %v1367_v18 = vor.u32 %v1365_v2, %v1364_v44 }
 0x322   : > { %1523 = vrot.lane.b32.xlu1 %v10251_v16, %s9238_s27  ;;  %1571 = vrot.lane.b32.xlu0 %v1466_v13, %s9239_s5  ;;  %v1913_v16 = vsel %vm1905_vm11, %v1880_v9, %v10438_v38  ;;  %v1915_v51 = vsel %vm1905_vm11, %v1882_v35, %v10428_v36  ;;  %v1433_v1 = vrot.slane %v1365_v2, 1 }
 0x323   : > { %v10634_v7 = vsel %vm10188_vm6, 0, %v1367_v18 }
 0x324   : > { %v1668_v17 = vpop.permute.xlu1 %1667  ;;  %v1670_v47 = vpop.permute.xlu0 %1669  ;;  %v1434_v30 = vor.u32 %v1433_v1, %v1362_v62 }
 0x325   : > { %v1946_v60 = vsel %vm1938_vm12, %v1913_v16, %v1668_v17  ;;  %v1948_v21 = vsel %vm1938_vm12, %v1915_v51, %v1670_v47  ;;  %v1471_v16 = vshrl.u32 %v10280_v6, 16 }
 0x326   : > { %1525 = vrot.lane.b32.xlu1 %v10239_v52, %s9238_s27  ;;  %1619 = vrot.lane.b32.xlu0 %v10549_v10, %s9242_s8  ;;  %v1469_v47 = vsel %vm10000_vm2, %v1434_v30, 0 }
 0x328   : > { %v1701_v27 = vpop.permute.xlu1 %1700  ;;  %v1703_v13 = vpop.permute.xlu0 %1702 }
 0x329   : > { %v1979_v0 = vsel %vm1971_vm13, %v1946_v60, %v1701_v27  ;;  %v1981_v22 = vsel %vm1971_vm13, %v1948_v21, %v1703_v13  ;;  %v1473_v60 = vrot.slane %v1471_v16, 7  ;;  %v1811_v21 = vsel %vm1790_vm8, %v10344_v56, %v10499_v8 }
 0x32a   : > { %v2012_v37 = vsel %vm2004_vm14, %v1979_v0, %v10454_v59  ;;  %1573 = vrot.lane.b32.xlu1 %v1467_v25, %s9239_s5  ;;  %1652 = vrot.lane.b32.xlu0 %v10239_v52, %s9240_s0  ;;  %v2014_v20 = vsel %vm2004_vm14, %v1981_v22, %v10436_v32  ;;  %v1431_v59 = vrot.slane %v1358_v29, 1  ;;  %v1474_v13 = vshll.u32 %v10280_v6, 16 }
 0x32b   : > { %v2045_v36 = vsel %vm2037_vm15, %v2012_v37, %v1765_v33  ;;  %v1814_v56 = vsel %vm1790_vm8, %v10365_v54, %v10506_v26 }
 0x32c   : > { %v1558_v38 = vpop.permute.xlu1 %1557  ;;  %v1767_v53 = vpop.permute.xlu0 %1766  ;;  %7850 = vmatmul.mubr.msk.bf16.gmra.mrb[4].mxu0 %vm2113_vm0, %v2045_v36  ;;  %v1432_v33 = vor.u32 %v1431_v59, %v1355_v48  ;;  %v1476_v37 = vor.u32 %v1474_v13, %v1473_v60 }
 0x32d   : > { %v2047_v58 = vsel %vm2037_vm15, %v2014_v20, %v1767_v53  ;;  %v1851_v49 = vsel %vm1839_vm9, %v1808_v61, %v1558_v38 }
 0x32e   : > { %1621 = vrot.lane.b32.xlu1 %v10606_v41, %s9242_s8  ;;  %1685 = vrot.lane.b32.xlu0 %v1467_v25, %s9243_s29  ;;  %v1468_v25 = vsel %vm10000_vm2, %v1432_v33, 0 }
 0x32f   : > { %7853 = vmatprep.mubr.msk.bf16.mxu0 %vm2113_vm0, %v2047_v58 }
 0x330   : > { %v1606_v52 = vpop.permute.xlu1 %1605  ;;  %v1769_v32 = vpop.permute.xlu0 %1768 }
 0x331   : > { %v1884_v5 = vsel %vm1872_vm10, %v1851_v49, %v1606_v52  ;;  %v1478_v52 = vsel %vm10188_vm6, 0, %v1476_v37 }
 0x332   : > { %1654 = vrot.lane.b32.xlu1 %v10267_v3, %s9240_s0  ;;  %1718 = vrot.lane.b32.xlu0 %v10606_v41, %s9244_s2  ;;  %v1917_v50 = vsel %vm1905_vm11, %v1884_v5, %v10482_v39 }
 0x334   : > { %v1672_v14 = vpop.permute.xlu1 %1671  ;;  %v1560_v12 = vpop.permute.xlu0 %1559 }
 0x335   : > { %v1950_v43 = vsel %vm1938_vm12, %v1917_v50, %v1672_v14  ;;  %v1853_v27 = vsel %vm1839_vm9, %v1811_v21, %v1560_v12 }
 0x336   : > { %1687 = vrot.lane.b32.xlu1 %v1468_v25, %s9243_s29  ;;  %1750 = vrot.lane.b32.xlu0 %v10267_v3, %s9241_s6 }
 0x338   : > { %v1705_v48 = vpop.permute.xlu1 %1704  ;;  %v1608_v34 = vpop.permute.xlu0 %1607 }
 0x339   : > { %v1983_v4 = vsel %vm1971_vm13, %v1950_v43, %v1705_v48 }
 0x33a   : > { %v2016_v9 = vsel %vm2004_vm14, %v1983_v4, %v10493_v19  ;;  %1720 = vrot.lane.b32.xlu1 %v10634_v7, %s9244_s2  ;;  %1782 = vrot.lane.b32.xlu0 %v1468_v25, %s9245_s11 }
 0x33b   : > { %v2049_v39 = vsel %vm2037_vm15, %v2016_v9, %v1769_v32 }
 0x33c   : > { %v1562_v35 = vpop.permute.xlu1 %1561  ;;  %v1641_v17 = vpop.permute.xlu0 %1640  ;;  %7854 = vmatmul.mubr.msk.bf16.gmra.mrb[8].mxu0 %vm2113_vm0, %v2049_v39 }
 0x33d   : > { %v1855_v38 = vsel %vm1839_vm9, %v1814_v56, %v1562_v35 }
 0x33e   : > { %1752 = vrot.lane.b32.xlu1 %v10265_v23, %s9241_s6  ;;  %1784 = vrot.lane.b32.xlu0 %v1469_v47, %s9245_s11 }
 0x340   : > { %v1610_v19 = vpop.permute.xlu1 %1609  ;;  %v1674_v57 = vpop.permute.xlu0 %1673 }
 0x341   : > { %v1888_v59 = vsel %vm1872_vm10, %v1855_v38, %v1610_v19 }
 0x342   : > { %1527 = vrot.lane.b32.xlu1 %v10267_v3, %s9238_s27  ;;  %1575 = vrot.lane.b32.xlu0 %v1468_v25, %s9239_s5  ;;  %v1886_v3 = vsel %vm1872_vm10, %v1853_v27, %v1608_v34 }
 0x343   : > { %v1919_v24 = vsel %vm1905_vm11, %v1886_v3, %v1641_v17 }
 0x344   : > { %v1643_v51 = vpop.permute.xlu1 %1642  ;;  %v1707_v29 = vpop.permute.xlu0 %1706  ;;  %v1952_v36 = vsel %vm1938_vm12, %v1919_v24, %v1674_v57 }
 0x345   : > { %v1985_v8 = vsel %vm1971_vm13, %v1952_v36, %v1707_v29  ;;  %v1921_v32 = vsel %vm1905_vm11, %v1888_v59, %v1643_v51 }
 0x346   : > { %1529 = vrot.lane.b32.xlu1 %v10265_v23, %s9238_s27  ;;  %1623 = vrot.lane.b32.xlu0 %v10634_v7, %s9242_s8  ;;  %s7286_s27 = sshll.u32 %s750_s3, 4  ;;  %s14201_s27 = int_to_ptr.vmem [resolvable:$true] %s7286_s27 }
 0x348   : > { %v1676_v0 = vpop.permute.xlu1 %1675  ;;  %v1739_v22 = vpop.permute.xlu0 %1738 }
 0x349   : > { %v2018_v20 = vsel %vm2004_vm14, %v1985_v8, %v1739_v22  ;;  %v1954_v54 = vsel %vm1938_vm12, %v1921_v32, %v1676_v0 }
 0x34a   : > { %1577 = vrot.lane.b32.xlu1 %v1469_v47, %s9239_s5  ;;  %1656 = vrot.lane.b32.xlu0 %v10265_v23, %s9240_s0  ;;  %v1479_v23 = vrot.slane %v1474_v13, 1 }
 0x34c   : > { %v1709_v53 = vpop.permute.xlu1 %1708  ;;  %v1771_v58 = vpop.permute.xlu0 %1770  ;;  %v1480_v61 = vor.u32 %v1479_v23, %v1471_v16 }
 0x34d   : > { %v2051_v62 = vsel %vm2037_vm15, %v2018_v20, %v1771_v58  ;;  %v1987_v26 = vsel %vm1971_vm13, %v1954_v54, %v1709_v53 }
 0x34e   : > { %1625 = vrot.lane.b32.xlu1 %v1478_v52, %s9242_s8  ;;  %1689 = vrot.lane.b32.xlu0 %v1469_v47, %s9243_s29  ;;  %v1482_v14 = vsel %vm10000_vm2, %v1480_v61, 0  ;;  %vm3305_vm2 = vcmask 1046528  }
 0x34f   : > { %7857 = vmatprep.mubr.msk.bf16.mxu0 %vm2113_vm0, %v2051_v62 }
 0x350   : > { %v1741_v33 = vpop.permute.xlu1 %1740  ;;  %v1773_v44 = vpop.permute.xlu0 %1772 }
 0x351   : > { %v2020_v2 = vsel %vm2004_vm14, %v1987_v26, %v1741_v33 }
 0x352   : > { %v2053_v15 = vsel %vm2037_vm15, %v2020_v2, %v1773_v44  ;;  %1658 = vrot.lane.b32.xlu1 %v10280_v6, %s9240_s0  ;;  %1722 = vrot.lane.b32.xlu0 %v1478_v52, %s9244_s2 }
 0x353   : > { %7858 = vmatmul.mubr.msk.bf16.gmra.mrb[12].mxu0 %vm2113_vm0, %v2053_v15 }
 0x354   : > { %v1516_v49 = vpop.permute.xlu1 %1515  ;;  %v1564_v5 = vpop.permute.xlu0 %1563 }
 0x356   : > { %1691 = vrot.lane.b32.xlu1 %v1482_v14, %s9243_s29  ;;  %1754 = vrot.lane.b32.xlu0 %v10280_v6, %s9241_s6  ;;  %v1817_v6 = vsel %vm1790_vm8, %v10377_v42, %v1516_v49  ;;  %s7272_s29 = scalar_lea.sflag [#allocation5], %s9799_s21 }
 0x357   : > { %v1857_v34 = vsel %vm1839_vm9, %v1817_v6, %v1564_v5 }
 0x358   : > { %v1518_v12 = vpop.permute.xlu1 %1517  ;;  %v1612_v25 = vpop.permute.xlu0 %1611 }
 0x359   : > { %v1820_v39 = vsel %vm1790_vm8, %v10397_v45, %v1518_v12 }
 0x35a   : > { %1724 = vrot.lane.b32.xlu1 %v10442_v40, %s9244_s2  ;;  %1786 = vrot.lane.b32.xlu0 %v1482_v14, %s9245_s11  ;;  %v1890_v40 = vsel %vm1872_vm10, %v1857_v34, %v1612_v25  ;;  %s9115_s2 = scalar_lea.vmem %s14201_s27, 128 }
 0x35b   : > { %p9116_p12 = scmp.ne.s32.totalorder %s14201_s27, %s9115_s2 }
 0x35c   : > { %v1566_v18 = vpop.permute.xlu1 %1565  ;;  %v1645_v1 = vpop.permute.xlu0 %1644 }
 0x35d   : > { %v1923_v9 = vsel %vm1905_vm11, %v1890_v40, %v1645_v1  ;;  %v1859_v35 = vsel %vm1839_vm9, %v1820_v39, %v1566_v18  ;;  %p9117_p4 = pnand %p9116_p12, %p14738_p0 }
 0x35e   : > { %1756 = vrot.lane.b32.xlu1 %v9237_v63, %s9241_s6  ;;  %s14737_s6 = sld [smem:[#allocation111_spill]] }
 0x35f   : > { %p9118_p13 = pneg %p9117_p4 }
 0x360   : > { %v1614_v50 = vpop.permute.xlu1 %1613  ;;  %v1678_v11 = vpop.permute.xlu0 %1677 }
 0x361   : > { %v1956_v63 = vsel %vm1938_vm12, %v1923_v9, %v1678_v11  ;;  %v1892_v19 = vsel %vm1872_vm10, %v1859_v35, %v1614_v50 }
 0x362   : > { %1788 = vrot.lane.b32.xlu1 %v10011_v31, %s9245_s11  ;;  %s9119_s11 = sshll.u32 %s9250_s9, 4  ;;  %s9120_s11 = int_to_ptr.vmem [resolvable:$false] %s9119_s11 }
 0x363   : > { %p9122_p1 = scmp.lt.s32.totalorder %s14201_s27, %s9120_s11 }
 0x364   : > { %v1647_v43 = vpop.permute.xlu1 %1646  ;;  %v1711_v48 = vpop.permute.xlu0 %1710  ;;  %s14199_s8 = scalar_lea.hbm %s14737_s6, %s7706_s4 }
 0x365   : > { %v1989_v31 = vsel %vm1971_vm13, %v1956_v63, %v1711_v48  ;;  %v1925_v16 = vsel %vm1905_vm11, %v1892_v19, %v1647_v43 }
 0x368   : > { %v1680_v4 = vpop.permute.xlu1 %1679  ;;  %v1743_v30 = vpop.permute.xlu0 %1742 }
 0x369   : > { %v2022_v42 = vsel %vm2004_vm14, %v1989_v31, %v1743_v30  ;;  %v1958_v51 = vsel %vm1938_vm12, %v1925_v16, %v1680_v4 }
 0x36c   : > { %v1713_v17 = vpop.permute.xlu1 %1712  ;;  %v1775_v47 = vpop.permute.xlu0 %1774 }
 0x36d   : > { %v2055_v57 = vsel %vm2037_vm15, %v2022_v42, %v1775_v47  ;;  %v1991_v45 = vsel %vm1971_vm13, %v1958_v51, %v1713_v17 }
 0x36e   : > { %7861 = vmatprep.mubr.msk.bf16.mxu0 %vm2113_vm0, %v2055_v57 }
 0x370   : > { %v1745_v29 = vpop.permute.xlu1 %1744  ;;  %v1777_v60 = vpop.permute.xlu0 %1776 }
 0x371   : > { %v2024_v21 = vsel %vm2004_vm14, %v1991_v45, %v1745_v29 }
 0x372   : > { %v2057_v27 = vsel %vm2037_vm15, %v2024_v21, %v1777_v60 }
 0x373   : > { %7862 = vmatmul.mubr.msk.bf16.gmra.mrb[16].mxu0 %vm2113_vm0, %v2057_v27 }
 0x374   : > { %v1520_v13 = vpop.permute.xlu1 %1519  ;;  %v1568_v3 = vpop.permute.xlu0 %1567 }
 0x375   : > { %v1823_v8 = vsel %vm1790_vm8, %v10446_v28, %v1520_v13 }
 0x376   : > { %v1861_v53 = vsel %vm1839_vm9, %v1823_v8, %v1568_v3 }
 0x378   : > { %v1522_v0 = vpop.permute.xlu1 %1521  ;;  %v1616_v22 = vpop.permute.xlu0 %1615 }
 0x379   : > { %v1894_v58 = vsel %vm1872_vm10, %v1861_v53, %v1616_v22  ;;  %v1826_v32 = vsel %vm1790_vm8, %v10477_v55, %v1522_v0 }
 0x37c   : > { %v1570_v24 = vpop.permute.xlu1 %1569  ;;  %v1649_v37 = vpop.permute.xlu0 %1648 }
 0x37d   : > { %v1927_v52 = vsel %vm1905_vm11, %v1894_v58, %v1649_v37  ;;  %v1863_v26 = vsel %vm1839_vm9, %v1826_v32, %v1570_v24 }
 0x380   : > { %v1618_v36 = vpop.permute.xlu1 %1617  ;;  %v1682_v56 = vpop.permute.xlu0 %1681 }
 0x381   : > { %v1960_v23 = vsel %vm1938_vm12, %v1927_v52, %v1682_v56  ;;  %v1896_v2 = vsel %vm1872_vm10, %v1863_v26, %v1618_v36 }
 0x384   : > { %v1651_v38 = vpop.permute.xlu1 %1650  ;;  %v1715_v20 = vpop.permute.xlu0 %1714 }
 0x385   : > { %v1993_v54 = vsel %vm1971_vm13, %v1960_v23, %v1715_v20  ;;  %v1929_v15 = vsel %vm1905_vm11, %v1896_v2, %v1651_v38 }
 0x388   : > { %v1684_v59 = vpop.permute.xlu1 %1683  ;;  %v1747_v62 = vpop.permute.xlu0 %1746 }
 0x389   : > { %v2026_v28 = vsel %vm2004_vm14, %v1993_v54, %v1747_v62  ;;  %v1962_v49 = vsel %vm1938_vm12, %v1929_v15, %v1684_v59 }
 0x38c   : > { %v1717_v33 = vpop.permute.xlu1 %1716  ;;  %v1779_v44 = vpop.permute.xlu0 %1778 }
 0x38d   : > { %v2059_v61 = vsel %vm2037_vm15, %v2026_v28, %v1779_v44  ;;  %v1995_v55 = vsel %vm1971_vm13, %v1962_v49, %v1717_v33 }
 0x38e   : > { %7865 = vmatprep.mubr.msk.bf16.mxu0 %vm2113_vm0, %v2059_v61 }
 0x390   : > { %v1749_v5 = vpop.permute.xlu1 %1748  ;;  %v1781_v14 = vpop.permute.xlu0 %1780 }
 0x391   : > { %v2028_v12 = vsel %vm2004_vm14, %v1995_v55, %v1749_v5 }
 0x392   : > { %v2061_v25 = vsel %vm2037_vm15, %v2028_v12, %v1781_v14 }
 0x393   : > { %7866 = vmatmul.mubr.msk.bf16.gmra.mrb[20].mxu0 %vm2113_vm0, %v2061_v25 }
 0x394   : > { %v1524_v18 = vpop.permute.xlu1 %1523  ;;  %v1572_v1 = vpop.permute.xlu0 %1571 }
 0x395   : > { %v1829_v40 = vsel %vm1790_vm8, %v10513_v46, %v1524_v18 }
 0x396   : > { %v1865_v9 = vsel %vm1839_vm9, %v1829_v40, %v1572_v1 }
 0x398   : > { %v1526_v50 = vpop.permute.xlu1 %1525  ;;  %v1620_v11 = vpop.permute.xlu0 %1619 }
 0x399   : > { %v1898_v63 = vsel %vm1872_vm10, %v1865_v9, %v1620_v11  ;;  %v1832_v17 = vsel %vm1790_vm8, %v10549_v10, %v1526_v50 }
 0x39c   : > { %v1574_v6 = vpop.permute.xlu1 %1573  ;;  %v1653_v43 = vpop.permute.xlu0 %1652 }
 0x39d   : > { %v1931_v35 = vsel %vm1905_vm11, %v1898_v63, %v1653_v43  ;;  %v1867_v19 = vsel %vm1839_vm9, %v1832_v17, %v1574_v6 }
 0x3a0   : > { %v1622_v48 = vpop.permute.xlu1 %1621  ;;  %v1686_v34 = vpop.permute.xlu0 %1685 }
 0x3a1   : > { %v1964_v42 = vsel %vm1938_vm12, %v1931_v35, %v1686_v34  ;;  %v1900_v51 = vsel %vm1872_vm10, %v1867_v19, %v1622_v48 }
 0x3a4   : > { %v1655_v4 = vpop.permute.xlu1 %1654  ;;  %v1719_v30 = vpop.permute.xlu0 %1718 }
 0x3a5   : > { %v1997_v47 = vsel %vm1971_vm13, %v1964_v42, %v1719_v30  ;;  %v1933_v29 = vsel %vm1905_vm11, %v1900_v51, %v1655_v4 }
 0x3a8   : > { %v1688_v39 = vpop.permute.xlu1 %1687  ;;  %v1751_v31 = vpop.permute.xlu0 %1750 }
 0x3a9   : > { %v2030_v46 = vsel %vm2004_vm14, %v1997_v47, %v1751_v31  ;;  %v1966_v60 = vsel %vm1938_vm12, %v1933_v29, %v1688_v39 }
 0x3ac   : > { %v1721_v57 = vpop.permute.xlu1 %1720  ;;  %v1783_v16 = vpop.permute.xlu0 %1782 }
 0x3ad   : > { %v2063_v45 = vsel %vm2037_vm15, %v2030_v46, %v1783_v16  ;;  %v1999_v10 = vsel %vm1971_vm13, %v1966_v60, %v1721_v57 }
 0x3ae   : > { %7869 = vmatprep.mubr.msk.bf16.mxu0 %vm2113_vm0, %v2063_v45 }
 0x3b0   : > { %v1753_v21 = vpop.permute.xlu1 %1752  ;;  %v1785_v27 = vpop.permute.xlu0 %1784 }
 0x3b1   : > { %v2032_v13 = vsel %vm2004_vm14, %v1999_v10, %v1753_v21 }
 0x3b2   : > { %v2065_v3 = vsel %vm2037_vm15, %v2032_v13, %v1785_v27 }
 0x3b3   : > { %7870 = vmatmul.mubr.msk.bf16.gmra.mrb[24].mxu0 %vm2113_vm0, %v2065_v3 }
 0x3b4   : > { %v1528_v0 = vpop.permute.xlu1 %1527  ;;  %v1576_v22 = vpop.permute.xlu0 %1575 }
 0x3b5   : > { %v1835_v20 = vsel %vm1790_vm8, %v10606_v41, %v1528_v0 }
 0x3b6   : > { %v1869_v59 = vsel %vm1839_vm9, %v1835_v20, %v1576_v22 }
 0x3b8   : > { %v1530_v24 = vpop.permute.xlu1 %1529  ;;  %v1624_v37 = vpop.permute.xlu0 %1623 }
 0x3b9   : > { %v1902_v62 = vsel %vm1872_vm10, %v1869_v59, %v1624_v37  ;;  %v1838_v2 = vsel %vm1790_vm8, %v10634_v7, %v1530_v24  ;;  %v10781_v7 = vld [vmem:[#allocation11] ss:$0 sm:$0xff] }
 0x3bc   : > { %v1578_v36 = vpop.permute.xlu1 %1577  ;;  %v1657_v56 = vpop.permute.xlu0 %1656 }
 0x3bd   : > { %v1935_v32 = vsel %vm1905_vm11, %v1902_v62, %v1657_v56  ;;  %v1871_v61 = vsel %vm1839_vm9, %v1838_v2, %v1578_v36 }
 0x3c0   : > { %v1626_v8 = vpop.permute.xlu1 %1625  ;;  %v1690_v38 = vpop.permute.xlu0 %1689 }
 0x3c1   : > { %v1968_v54 = vsel %vm1938_vm12, %v1935_v32, %v1690_v38  ;;  %v1904_v15 = vsel %vm1872_vm10, %v1871_v61, %v1626_v8  ;;  %vm4343_vm10 = vcmask 27648  }
 0x3c4   : > { %v1659_v53 = vpop.permute.xlu1 %1658  ;;  %v1723_v58 = vpop.permute.xlu0 %1722 }
 0x3c5   : > { %v2001_v26 = vsel %vm1971_vm13, %v1968_v54, %v1723_v58  ;;  %v1937_v55 = vsel %vm1905_vm11, %v1904_v15, %v1659_v53 }
 0x3c8   : > { %v1692_v52 = vpop.permute.xlu1 %1691  ;;  %v1755_v23 = vpop.permute.xlu0 %1754 }
 0x3c9   : > { %v2034_v28 = vsel %vm2004_vm14, %v2001_v26, %v1755_v23  ;;  %v1970_v5 = vsel %vm1938_vm12, %v1937_v55, %v1692_v52 }
 0x3cc   : > { %v1725_v33 = vpop.permute.xlu1 %1724  ;;  %v1787_v44 = vpop.permute.xlu0 %1786 }
 0x3cd   : > { %v2067_v41 = vsel %vm2037_vm15, %v2034_v28, %v1787_v44  ;;  %v2003_v14 = vsel %vm1971_vm13, %v1970_v5, %v1725_v33 }
 0x3ce   : > { %7873 = vmatprep.mubr.msk.bf16.mxu0 %vm2113_vm0, %v2067_v41 }
 0x3d0   : > { %v1757_v49 = vpop.permute.xlu1 %1756 }
 0x3d1   : > { %v2036_v12 = vsel %vm2004_vm14, %v2003_v14, %v1757_v49 }
 0x3d4   : > { %v1789_v25 = vpop.permute.xlu1 %1788 }
 0x3d5   : > { %v2069_v18 = vsel %vm2037_vm15, %v2036_v12, %v1789_v25 }
 0x3d6   : > { %7874 = vmatmul.mubr.msk.bf16.gmra.mrb[28].mxu0 %vm2113_vm0, %v2069_v18 }
 0x3ef   : > { %v7847_v1 = vpop.f32.mrb[0].mxu0 }
 0x3f0   : > { %v2184_v50 = vpop.f32.mrb[1].mxu0  ;;  %v10787_v48 = vadd.f32 %v7847_v1, %v10781_v7 }
 0x3f1   : > { %v10784_v11 = vadd.f32 %v10781_v7, %v2184_v50  ;;  %v7848_v6 = vpop.f32.mrb[2].mxu0 }
 0x3f2   : > { %v2187_v43 = vpop.f32.mrb[3].mxu0  ;;  %14493 = vst [vmem:[#allocation41_spill] sm:$0xff] %v10787_v48  ;;  %v10797_v30 = vadd.f32 %v7848_v6, %v10781_v7  ;;  %v2319_v9 = vsel %vm1207_vm3, %v10787_v48, 0.0 }
 0x3f3   : > { %14492 = vst [vmem:[#allocation40_spill] sm:$0xff] %v10784_v11  ;;  %v10790_v34 = vadd.f32 %v10781_v7, %v2187_v43  ;;  %v2313_v40 = vsel %vm1207_vm3, %v10784_v11, 0.0 }
 0x3f4   : > { %2314 = vadd.xlane.f32.xlu0 %v2313_v40  ;;  %14495 = vst [vmem:[#allocation43_spill] sm:$0xff] %v10797_v30  ;;  %v2322_v63 = vsel %vm1207_vm3, %v10797_v30, 0.0 }
 0x3f5   : > { %14494 = vst [vmem:[#allocation42_spill] sm:$0xff] %v10790_v34  ;;  %v2316_v4 = vsel %vm1207_vm3, %v10790_v34, 0.0 }
 0x3f6   : > { %2317 = vadd.xlane.f32.xlu1 %v2316_v4 }
 0x3f8   : > { %2320 = vadd.xlane.f32.xlu0 %v2319_v9 }
 0x3fc   : > { %2323 = vadd.xlane.f32.xlu0 %v2322_v63 }
 0x3ff   : > { %v7851_v39 = vpop.f32.mrb[4].mxu0 }
 0x400   : > { %v2200_v31 = vpop.f32.mrb[5].mxu0  ;;  %v10807_v47 = vadd.f32 %v7851_v39, %v10781_v7 }
 0x401   : > { %v10804_v35 = vadd.f32 %v10781_v7, %v2200_v31  ;;  %v7852_v42 = vpop.f32.mrb[6].mxu0 }
 0x402   : > { %v2203_v17 = vpop.f32.mrb[7].mxu0  ;;  %14497 = vst [vmem:[#allocation45_spill] sm:$0xff] %v10807_v47  ;;  %v10815_v57 = vadd.f32 %v7852_v42, %v10781_v7  ;;  %v2331_v51 = vsel %vm1207_vm3, %v10807_v47, 0.0 }
 0x403   : > { %14496 = vst [vmem:[#allocation44_spill] sm:$0xff] %v10804_v35  ;;  %v10810_v19 = vadd.f32 %v10781_v7, %v2203_v17  ;;  %v2325_v46 = vsel %vm1207_vm3, %v10804_v35, 0.0 }
 0x404   : > { %2326 = vadd.xlane.f32.xlu1 %v2325_v46  ;;  %14499 = vst [vmem:[#allocation47_spill] sm:$0xff] %v10815_v57  ;;  %v2334_v45 = vsel %vm1207_vm3, %v10815_v57, 0.0 }
 0x405   : > { %14498 = vst [vmem:[#allocation46_spill] sm:$0xff] %v10810_v19  ;;  %v2328_v16 = vsel %vm1207_vm3, %v10810_v19, 0.0 }
 0x406   : > { %2329 = vadd.xlane.f32.xlu0 %v2328_v16 }
 0x408   : > { %2332 = vadd.xlane.f32.xlu1 %v2331_v51 }
 0x40a   : > { %2335 = vadd.xlane.f32.xlu0 %v2334_v45 }
 0x40f   : > { %v7855_v29 = vpop.f32.mrb[8].mxu0 }
 0x410   : > { %v2216_v60 = vpop.f32.mrb[9].mxu0  ;;  %v10827_v13 = vadd.f32 %v7855_v29, %v10781_v7 }
 0x411   : > { %v10824_v10 = vadd.f32 %v10781_v7, %v2216_v60  ;;  %v7856_v21 = vpop.f32.mrb[10].mxu0 }
 0x412   : > { %v2219_v27 = vpop.f32.mrb[11].mxu0  ;;  %14501 = vst [vmem:[#allocation49_spill] sm:$0xff] %v10827_v13  ;;  %v10835_v22 = vadd.f32 %v7856_v21, %v10781_v7  ;;  %v2343_v37 = vsel %vm1207_vm3, %v10827_v13, 0.0 }
 0x413   : > { %14500 = vst [vmem:[#allocation48_spill] sm:$0xff] %v10824_v10  ;;  %v10830_v3 = vadd.f32 %v10781_v7, %v2219_v27  ;;  %v2337_v0 = vsel %vm1207_vm3, %v10824_v10, 0.0 }
 0x414   : > { %2338 = vadd.xlane.f32.xlu1 %v2337_v0  ;;  %14503 = vst [vmem:[#allocation51_spill] sm:$0xff] %v10835_v22  ;;  %v2346_v36 = vsel %vm1207_vm3, %v10835_v22, 0.0 }
 0x415   : > { %14502 = vst [vmem:[#allocation50_spill] sm:$0xff] %v10830_v3  ;;  %v2340_v24 = vsel %vm1207_vm3, %v10830_v3, 0.0 }
 0x416   : > { %2341 = vadd.xlane.f32.xlu0 %v2340_v24 }
 0x418   : > { %2344 = vadd.xlane.f32.xlu1 %v2343_v37 }
 0x41a   : > { %2347 = vadd.xlane.f32.xlu0 %v2346_v36 }
 0x426   : > { %v7859_v56 = vpop.f32.mrb[12].mxu0 }
 0x427   : > { %v2232_v8 = vpop.f32.mrb[13].mxu0  ;;  %v10847_v58 = vadd.f32 %v7859_v56, %v10781_v7 }
 0x428   : > { %v10844_v38 = vadd.f32 %v10781_v7, %v2232_v8  ;;  %v7860_v20 = vpop.f32.mrb[14].mxu0 }
 0x429   : > { %v2235_v53 = vpop.f32.mrb[15].mxu0  ;;  %14505 = vst [vmem:[#allocation53_spill] sm:$0xff] %v10847_v58  ;;  %v10855_v52 = vadd.f32 %v7860_v20, %v10781_v7  ;;  %v2355_v32 = vsel %vm1207_vm3, %v10847_v58, 0.0 }
 0x42a   : > { %14504 = vst [vmem:[#allocation52_spill] sm:$0xff] %v10844_v38  ;;  %v10850_v59 = vadd.f32 %v10781_v7, %v2235_v53  ;;  %v2349_v62 = vsel %vm1207_vm3, %v10844_v38, 0.0 }
 0x42b   : > { %2350 = vadd.xlane.f32.xlu1 %v2349_v62  ;;  %14507 = vst [vmem:[#allocation55_spill] sm:$0xff] %v10855_v52  ;;  %v2358_v54 = vsel %vm1207_vm3, %v10855_v52, 0.0 }
 0x42c   : > { %14506 = vst [vmem:[#allocation54_spill] sm:$0xff] %v10850_v59  ;;  %v2352_v23 = vsel %vm1207_vm3, %v10850_v59, 0.0 }
 0x42d   : > { %2353 = vadd.xlane.f32.xlu0 %v2352_v23 }
 0x42f   : > { %2356 = vadd.xlane.f32.xlu1 %v2355_v32 }
 0x431   : > { %2359 = vadd.xlane.f32.xlu0 %v2358_v54 }
 0x446   : > { %v7863_v26 = vpop.f32.mrb[16].mxu0 }
 0x447   : > { %v2248_v28 = vpop.f32.mrb[17].mxu0  ;;  %v10867_v2 = vadd.f32 %v7863_v26, %v10781_v7 }
 0x448   : > { %v10864_v33 = vadd.f32 %v10781_v7, %v2248_v28  ;;  %v7864_v44 = vpop.f32.mrb[18].mxu0 }
 0x449   : > { %v2251_v41 = vpop.f32.mrb[19].mxu0  ;;  %14509 = vst [vmem:[#allocation57_spill] sm:$0xff] %v10867_v2  ;;  %v10875_v49 = vadd.f32 %v7864_v44, %v10781_v7  ;;  %v2367_v5 = vsel %vm1207_vm3, %v10867_v2, 0.0 }
 0x44a   : > { %14508 = vst [vmem:[#allocation56_spill] sm:$0xff] %v10864_v33  ;;  %v10870_v61 = vadd.f32 %v10781_v7, %v2251_v41  ;;  %v2361_v15 = vsel %vm1207_vm3, %v10864_v33, 0.0 }
 0x44b   : > { %2362 = vadd.xlane.f32.xlu1 %v2361_v15  ;;  %14511 = vst [vmem:[#allocation59_spill] sm:$0xff] %v10875_v49  ;;  %v2370_v14 = vsel %vm1207_vm3, %v10875_v49, 0.0 }
 0x44c   : > { %14510 = vst [vmem:[#allocation58_spill] sm:$0xff] %v10870_v61  ;;  %v2364_v55 = vsel %vm1207_vm3, %v10870_v61, 0.0 }
 0x44d   : > { %2365 = vadd.xlane.f32.xlu0 %v2364_v55 }
 0x44f   : > { %2368 = vadd.xlane.f32.xlu1 %v2367_v5 }
 0x451   : > { %2371 = vadd.xlane.f32.xlu0 %v2370_v14 }
 0x466   : > { %v7867_v12 = vpop.f32.mrb[20].mxu0 }
 0x467   : > { %v2264_v25 = vpop.f32.mrb[21].mxu0  ;;  %v10887_v6 = vadd.f32 %v7867_v12, %v10781_v7 }
 0x468   : > { %v10884_v18 = vadd.f32 %v10781_v7, %v2264_v25  ;;  %v7868_v1 = vpop.f32.mrb[22].mxu0 }
 0x469   : > { %v2267_v50 = vpop.f32.mrb[23].mxu0  ;;  %14513 = vst [vmem:[#allocation61_spill] sm:$0xff] %v10887_v6  ;;  %v10895_v4 = vadd.f32 %v7868_v1, %v10781_v7  ;;  %v2379_v63 = vsel %vm1207_vm3, %v10887_v6, 0.0 }
 0x46a   : > { %14512 = vst [vmem:[#allocation60_spill] sm:$0xff] %v10884_v18  ;;  %v10890_v43 = vadd.f32 %v10781_v7, %v2267_v50  ;;  %v2373_v40 = vsel %vm1207_vm3, %v10884_v18, 0.0 }
 0x46b   : > { %2374 = vadd.xlane.f32.xlu1 %v2373_v40  ;;  %14515 = vst [vmem:[#allocation63_spill] sm:$0xff] %v10895_v4  ;;  %v2382_v39 = vsel %vm1207_vm3, %v10895_v4, 0.0 }
 0x46c   : > { %14514 = vst [vmem:[#allocation62_spill] sm:$0xff] %v10890_v43  ;;  %v2376_v9 = vsel %vm1207_vm3, %v10890_v43, 0.0 }
 0x46d   : > { %2377 = vadd.xlane.f32.xlu0 %v2376_v9 }
 0x46f   : > { %2380 = vadd.xlane.f32.xlu1 %v2379_v63 }
 0x471   : > { %2383 = vadd.xlane.f32.xlu0 %v2382_v39 }
 0x481   : > { %v2315_v24 = vpop.xlane.xlu0 %2314 }
 0x482   : > { %v2410_v8 = vmul.f32 0.25, %v2315_v24 }
 0x483   : > { %v2318_v36 = vpop.xlane.xlu1 %2317 }
 0x484   : > { %v2411_v32 = vmul.f32 0.25, %v2318_v36  ;;  %v10927_v28 = vsub.f32 %v10784_v11, %v2410_v8 }
 0x485   : > { %v2321_v37 = vpop.xlane.xlu0 %2320 }
 0x486   : > { %v7871_v31 = vpop.f32.mrb[24].mxu0  ;;  %v2412_v41 = vmul.f32 0.25, %v2321_v37  ;;  %v10938_v12 = vsub.f32 %v10790_v34, %v2411_v32 }
 0x487   : > { %v2280_v42 = vpop.f32.mrb[25].mxu0  ;;  %v10907_v51 = vadd.f32 %v7871_v31, %v10781_v7  ;;  %v2474_v31 = vmul.f32 %v10927_v28, %v10927_v28 }
 0x488   : > { %v10904_v17 = vadd.f32 %v10781_v7, %v2280_v42  ;;  %v7872_v46 = vpop.f32.mrb[26].mxu0  ;;  %v10946_v9 = vsub.f32 %v10787_v48, %v2412_v41 }
 0x489   : > { %v2283_v16 = vpop.f32.mrb[27].mxu0  ;;  %14517 = vst [vmem:[#allocation65_spill] sm:$0xff] %v10907_v51  ;;  %v10915_v60 = vadd.f32 %v7872_v46, %v10781_v7  ;;  %v2391_v27 = vsel %vm1207_vm3, %v10907_v51, 0.0  ;;  %v2324_v56 = vpop.xlane.xlu0 %2323  ;;  %v2506_v24 = vsel %vm1207_vm3, %v2474_v31, 0.0 }
 0x48a   : > { %14516 = vst [vmem:[#allocation64_spill] sm:$0xff] %v10904_v17  ;;  %v10910_v45 = vadd.f32 %v10781_v7, %v2283_v16  ;;  %v2385_v29 = vsel %vm1207_vm3, %v10904_v17, 0.0  ;;  %v2413_v25 = vmul.f32 0.25, %v2324_v56  ;;  %v2476_v37 = vmul.f32 %v10946_v9, %v10946_v9 }
 0x48b   : > { %2386 = vadd.xlane.f32.xlu1 %v2385_v29  ;;  %14519 = vst [vmem:[#allocation67_spill] sm:$0xff] %v10915_v60  ;;  %v2394_v0 = vsel %vm1207_vm3, %v10915_v60, 0.0  ;;  %v2475_v29 = vmul.f32 %v10938_v12, %v10938_v12 }
 0x48c   : > { %14518 = vst [vmem:[#allocation66_spill] sm:$0xff] %v10910_v45  ;;  %v2388_v21 = vsel %vm1207_vm3, %v10910_v45, 0.0  ;;  %v2512_v32 = vsel %vm1207_vm3, %v2476_v37, 0.0 }
 0x48d   : > { %2389 = vadd.xlane.f32.xlu0 %v2388_v21  ;;  %v2509_v8 = vsel %vm1207_vm3, %v2475_v29, 0.0 }
 0x48f   : > { %2392 = vadd.xlane.f32.xlu1 %v2391_v27 }
 0x491   : > { %2395 = vadd.xlane.f32.xlu0 %v2394_v0  ;;  %v2327_v20 = vpop.xlane.xlu1 %2326 }
 0x492   : > { %v2414_v63 = vmul.f32 0.25, %v2327_v20 }
 0x493   : > { %v2330_v62 = vpop.xlane.xlu0 %2329 }
 0x494   : > { %v2415_v46 = vmul.f32 0.25, %v2330_v62  ;;  %v10960_v27 = vsub.f32 %v10804_v35, %v2414_v63 }
 0x495   : > { %v2333_v14 = vpop.xlane.xlu1 %2332 }
 0x496   : > { %v2416_v0 = vmul.f32 0.25, %v2333_v14  ;;  %v10966_v36 = vsub.f32 %v10810_v19, %v2415_v46 }
 0x497   : > { %v2336_v40 = vpop.xlane.xlu0 %2335 }
 0x498   : > { %v2417_v56 = vmul.f32 0.25, %v2336_v40  ;;  %v10972_v62 = vsub.f32 %v10807_v47, %v2416_v0 }
 0x49a   : > { %v10978_v41 = vsub.f32 %v10815_v57, %v2417_v56  ;;  %v2480_v31 = vmul.f32 %v10972_v62, %v10972_v62 }
 0x49c   : > { %v2524_v37 = vsel %vm1207_vm3, %v2480_v31, 0.0 }
 0x4a1   : > { %v2339_v42 = vpop.xlane.xlu1 %2338 }
 0x4a3   : > { %v2342_v21 = vpop.xlane.xlu0 %2341 }
 0x4a9   : > { %v7875_v53 = vpop.f32.mrb[28].mxu0 }
 0x4aa   : > { %v2296_v23 = vpop.f32.mrb[29].mxu0  ;;  %v10930_v15 = vadd.f32 %v7875_v53, %v10781_v7  ;;  %v2345_v53 = vpop.xlane.xlu1 %2344 }
 0x4ab   : > { %v10924_v54 = vadd.f32 %v10781_v7, %v2296_v23  ;;  %v7876_v26 = vpop.f32.mrb[30].mxu0  ;;  %v2418_v23 = vmul.f32 0.25, %v2339_v42  ;;  %v2420_v63 = vmul.f32 0.25, %v2345_v53 }
 0x4ac   : > { %v2299_v44 = vpop.f32.mrb[31].mxu0  ;;  %14521 = vst [vmem:[#allocation69_spill] sm:$0xff] %v10930_v15  ;;  %v10941_v1 = vadd.f32 %v7876_v26, %v10781_v7  ;;  %v2403_v39 = vsel %vm1207_vm3, %v10930_v15, 0.0  ;;  %v2478_v26 = vmul.f32 %v10960_v27, %v10960_v27 }
 0x4ad   : > { %14520 = vst [vmem:[#allocation68_spill] sm:$0xff] %v10924_v54  ;;  %v10933_v55 = vadd.f32 %v10781_v7, %v2299_v44  ;;  %v2397_v5 = vsel %vm1207_vm3, %v10924_v54, 0.0  ;;  %v10953_v7 = vsub.f32 %v10797_v30, %v2413_v25  ;;  %v2348_v44 = vpop.xlane.xlu0 %2347  ;;  %v2479_v25 = vmul.f32 %v10966_v36, %v10966_v36 }
 0x4ae   : > { %2398 = vadd.xlane.f32.xlu1 %v2397_v5  ;;  %14523 = vst [vmem:[#allocation71_spill] sm:$0xff] %v10941_v1  ;;  %v2406_v16 = vsel %vm1207_vm3, %v10941_v1, 0.0  ;;  %v2419_v5 = vmul.f32 0.25, %v2342_v21  ;;  %v10984_v40 = vsub.f32 %v10824_v10, %v2418_v23  ;;  %v2481_v21 = vmul.f32 %v10978_v41, %v10978_v41 }
 0x4af   : > { %14522 = vst [vmem:[#allocation70_spill] sm:$0xff] %v10933_v55  ;;  %v2400_v50 = vsel %vm1207_vm3, %v10933_v55, 0.0  ;;  %v2477_v20 = vmul.f32 %v10953_v7, %v10953_v7  ;;  %v2521_v29 = vsel %vm1207_vm3, %v2479_v25, 0.0  ;;  %v10996_v0 = vsub.f32 %v10827_v13, %v2420_v63 }
 0x4b0   : > { %2401 = vadd.xlane.f32.xlu0 %v2400_v50  ;;  %v10990_v46 = vsub.f32 %v10830_v3, %v2419_v5  ;;  %v2482_v56 = vmul.f32 %v10984_v40, %v10984_v40  ;;  %v2527_v23 = vsel %vm1207_vm3, %v2481_v21, 0.0 }
 0x4b1   : > { %v2515_v14 = vsel %vm1207_vm3, %v2477_v20, 0.0  ;;  %v2484_v25 = vmul.f32 %v10996_v0, %v10996_v0 }
 0x4b2   : > { %2404 = vadd.xlane.f32.xlu1 %v2403_v39  ;;  %v2518_v39 = vsel %vm1207_vm3, %v2478_v26, 0.0 }
 0x4b4   : > { %2407 = vadd.xlane.f32.xlu0 %v2406_v16  ;;  %v2421_v16 = vmul.f32 0.25, %v2348_v44 }
 0x4b6   : > { %2507 = vadd.xlane.f32.xlu1 %v2506_v24  ;;  %v11002_v20 = vsub.f32 %v10835_v22, %v2421_v16  ;;  %v2536_v16 = vsel %vm1207_vm3, %v2484_v25, 0.0 }
 0x4b8   : > { %2510 = vadd.xlane.f32.xlu0 %v2509_v8  ;;  %v2351_v50 = vpop.xlane.xlu1 %2350  ;;  %v2485_v31 = vmul.f32 %v11002_v20, %v11002_v20 }
 0x4b9   : > { %v2422_v24 = vmul.f32 0.25, %v2351_v50 }
 0x4ba   : > { %2513 = vadd.xlane.f32.xlu1 %v2512_v32  ;;  %v2354_v42 = vpop.xlane.xlu0 %2353  ;;  %v2483_v32 = vmul.f32 %v10990_v46, %v10990_v46 }
 0x4bb   : > { %v2423_v53 = vmul.f32 0.25, %v2354_v42  ;;  %v11008_v44 = vsub.f32 %v10844_v38, %v2422_v24  ;;  %v2539_v24 = vsel %vm1207_vm3, %v2485_v31, 0.0 }
 0x4bc   : > { %2516 = vadd.xlane.f32.xlu0 %v2515_v14  ;;  %v2357_v8 = vpop.xlane.xlu1 %2356  ;;  %v2530_v14 = vsel %vm1207_vm3, %v2482_v56, 0.0 }
 0x4bd   : > { %v2424_v5 = vmul.f32 0.25, %v2357_v8  ;;  %v11014_v50 = vsub.f32 %v10850_v59, %v2423_v53 }
 0x4be   : > { %2519 = vadd.xlane.f32.xlu1 %v2518_v39  ;;  %v2360_v26 = vpop.xlane.xlu0 %2359  ;;  %v2533_v39 = vsel %vm1207_vm3, %v2483_v32, 0.0 }
 0x4bf   : > { %v2425_v63 = vmul.f32 0.25, %v2360_v26  ;;  %v11020_v42 = vsub.f32 %v10847_v58, %v2424_v5 }
 0x4c0   : > { %2522 = vadd.xlane.f32.xlu0 %v2521_v29  ;;  %v2486_v29 = vmul.f32 %v11008_v44, %v11008_v44 }
 0x4c1   : > { %v11026_v21 = vsub.f32 %v10855_v52, %v2425_v63  ;;  %v2488_v8 = vmul.f32 %v11020_v42, %v11020_v42 }
 0x4c2   : > { %2525 = vadd.xlane.f32.xlu1 %v2524_v37  ;;  %v2487_v37 = vmul.f32 %v11014_v50, %v11014_v50  ;;  %v2542_v56 = vsel %vm1207_vm3, %v2486_v29, 0.0 }
 0x4c3   : > { %v2548_v32 = vsel %vm1207_vm3, %v2488_v8, 0.0 }
 0x4c4   : > { %2528 = vadd.xlane.f32.xlu0 %v2527_v23  ;;  %v2545_v53 = vsel %vm1207_vm3, %v2487_v37, 0.0  ;;  %v2489_v23 = vmul.f32 %v11026_v21, %v11026_v21 }
 0x4c6   : > { %2531 = vadd.xlane.f32.xlu1 %v2530_v14  ;;  %v2551_v26 = vsel %vm1207_vm3, %v2489_v23, 0.0 }
 0x4c8   : > { %2534 = vadd.xlane.f32.xlu0 %v2533_v39 }
 0x4ca   : > { %2537 = vadd.xlane.f32.xlu1 %v2536_v16 }
 0x4cc   : > { %2540 = vadd.xlane.f32.xlu0 %v2539_v24 }
 0x4ce   : > { %2543 = vadd.xlane.f32.xlu1 %v2542_v56 }
 0x4d0   : > { %2546 = vadd.xlane.f32.xlu0 %v2545_v53 }
 0x4d2   : > { %2549 = vadd.xlane.f32.xlu1 %v2548_v32  ;;  %v2822_v32 = vld [vmem:[#allocation15] sm:$0x3] }
 0x4d3   : > { %8048 = vmatprep.subr.msk.bf16.mxu1 %vm2871_vm1, %v2822_v32 }
 0x4d4   : > { %2552 = vadd.xlane.f32.xlu0 %v2551_v26 }
 0x4d8   : > { %v2363_v5 = vpop.xlane.xlu1 %2362 }
 0x4d9   : > { %v2426_v14 = vmul.f32 0.25, %v2363_v5 }
 0x4da   : > { %v2366_v25 = vpop.xlane.xlu0 %2365 }
 0x4db   : > { %v11040_v63 = vsub.f32 %v10864_v33, %v2426_v14  ;;  %v2427_v39 = vmul.f32 0.25, %v2366_v25  ;;  %v2873_v25 = vsel %vm2871_vm1, %v2822_v32, 0 }
 0x4dc   : > { %v2369_v31 = vpop.xlane.xlu1 %2368  ;;  %7878 = vmatpush3.bf16.msra.mxu1 %v2873_v25 }
 0x4dd   : > { %v11043_v16 = vsub.f32 %v10870_v61, %v2427_v39  ;;  %v2428_v29 = vmul.f32 0.25, %v2369_v31  ;;  %v2490_v24 = vmul.f32 %v11040_v63, %v11040_v63 }
 0x4de   : > { %v2372_v37 = vpop.xlane.xlu0 %2371 }
 0x4df   : > { %v11048_v56 = vsub.f32 %v10867_v2, %v2428_v29  ;;  %v2429_v8 = vmul.f32 0.25, %v2372_v37  ;;  %v2554_v53 = vsel %vm1207_vm3, %v2490_v24, 0.0  ;;  %v2491_v23 = vmul.f32 %v11043_v16, %v11043_v16 }
 0x4e0   : > { %2555 = vadd.xlane.f32.xlu1 %v2554_v53 }
 0x4e1   : > { %v11054_v26 = vsub.f32 %v10875_v49, %v2429_v8  ;;  %v2557_v5 = vsel %vm1207_vm3, %v2491_v23, 0.0  ;;  %v2492_v14 = vmul.f32 %v11048_v56, %v11048_v56 }
 0x4e2   : > { %2558 = vadd.xlane.f32.xlu0 %v2557_v5 }
 0x4e3   : > { %v2560_v39 = vsel %vm1207_vm3, %v2492_v14, 0.0  ;;  %v2493_v31 = vmul.f32 %v11054_v26, %v11054_v26 }
 0x4e4   : > { %2561 = vadd.xlane.f32.xlu1 %v2560_v39 }
 0x4e5   : > { %v2563_v29 = vsel %vm1207_vm3, %v2493_v31, 0.0 }
 0x4e6   : > { %2564 = vadd.xlane.f32.xlu0 %v2563_v29 }
 0x4f8   : > { %v2375_v24 = vpop.xlane.xlu1 %2374 }
 0x4f9   : > { %v2430_v37 = vmul.f32 0.25, %v2375_v24 }
 0x4fa   : > { %v2378_v8 = vpop.xlane.xlu0 %2377 }
 0x4fb   : > { %v11066_v53 = vsub.f32 %v10884_v18, %v2430_v37  ;;  %v2431_v23 = vmul.f32 0.25, %v2378_v8 }
 0x4fc   : > { %v2381_v49 = vpop.xlane.xlu1 %2380 }
 0x4fd   : > { %v11069_v32 = vsub.f32 %v10890_v43, %v2431_v23  ;;  %v2432_v5 = vmul.f32 0.25, %v2381_v49  ;;  %v2494_v14 = vmul.f32 %v11066_v53, %v11066_v53 }
 0x4fe   : > { %v2384_v25 = vpop.xlane.xlu0 %2383 }
 0x4ff   : > { %v11074_v39 = vsub.f32 %v10887_v6, %v2432_v5  ;;  %v2433_v31 = vmul.f32 0.25, %v2384_v25  ;;  %v2566_v29 = vsel %vm1207_vm3, %v2494_v14, 0.0  ;;  %v2495_v24 = vmul.f32 %v11069_v32, %v11069_v32 }
 0x500   : > { %2567 = vadd.xlane.f32.xlu1 %v2566_v29 }
 0x501   : > { %v11080_v37 = vsub.f32 %v10895_v4, %v2433_v31  ;;  %v2569_v8 = vsel %vm1207_vm3, %v2495_v24, 0.0  ;;  %v2496_v49 = vmul.f32 %v11074_v39, %v11074_v39 }
 0x502   : > { %2570 = vadd.xlane.f32.xlu0 %v2569_v8 }
 0x503   : > { %v2572_v23 = vsel %vm1207_vm3, %v2496_v49, 0.0  ;;  %v2497_v5 = vmul.f32 %v11080_v37, %v11080_v37 }
 0x504   : > { %2573 = vadd.xlane.f32.xlu1 %v2572_v23 }
 0x505   : > { %v2575_v14 = vsel %vm1207_vm3, %v2497_v5, 0.0 }
 0x506   : > { %2576 = vadd.xlane.f32.xlu0 %v2575_v14 }
 0x518   : > { %v2387_v25 = vpop.xlane.xlu1 %2386 }
 0x519   : > { %v2434_v29 = vmul.f32 0.25, %v2387_v25 }
 0x51a   : > { %v2390_v43 = vpop.xlane.xlu0 %2389 }
 0x51b   : > { %v11090_v31 = vsub.f32 %v10904_v17, %v2434_v29  ;;  %v2435_v24 = vmul.f32 0.25, %v2390_v43 }
 0x51c   : > { %v2393_v4 = vpop.xlane.xlu1 %2392 }
 0x51d   : > { %v11093_v6 = vsub.f32 %v10910_v45, %v2435_v24  ;;  %v2436_v8 = vmul.f32 0.25, %v2393_v4  ;;  %v2498_v49 = vmul.f32 %v11090_v31, %v11090_v31 }
 0x51e   : > { %v2396_v18 = vpop.xlane.xlu0 %2395 }
 0x51f   : > { %v11098_v23 = vsub.f32 %v10907_v51, %v2436_v8  ;;  %v2437_v5 = vmul.f32 0.25, %v2396_v18  ;;  %v2578_v14 = vsel %vm1207_vm3, %v2498_v49, 0.0  ;;  %v2499_v25 = vmul.f32 %v11093_v6, %v11093_v6 }
 0x520   : > { %2579 = vadd.xlane.f32.xlu1 %v2578_v14 }
 0x521   : > { %v11104_v43 = vsub.f32 %v10915_v60, %v2437_v5  ;;  %v2581_v29 = vsel %vm1207_vm3, %v2499_v25, 0.0  ;;  %v2500_v4 = vmul.f32 %v11098_v23, %v11098_v23 }
 0x522   : > { %2582 = vadd.xlane.f32.xlu0 %v2581_v29 }
 0x523   : > { %v2584_v24 = vsel %vm1207_vm3, %v2500_v4, 0.0  ;;  %v2501_v18 = vmul.f32 %v11104_v43, %v11104_v43 }
 0x524   : > { %2585 = vadd.xlane.f32.xlu1 %v2584_v24 }
 0x525   : > { %v2587_v8 = vsel %vm1207_vm3, %v2501_v18, 0.0 }
 0x526   : > { %2588 = vadd.xlane.f32.xlu0 %v2587_v8 }
 0x53b   : > { %v2399_v49 = vpop.xlane.xlu1 %2398 }
 0x53c   : > { %v2438_v14 = vmul.f32 0.25, %v2399_v49 }
 0x53d   : > { %v2402_v45 = vpop.xlane.xlu0 %2401 }
 0x53e   : > { %v11114_v5 = vsub.f32 %v10924_v54, %v2438_v14  ;;  %v2439_v25 = vmul.f32 0.25, %v2402_v45 }
 0x53f   : > { %v2405_v60 = vpop.xlane.xlu1 %2404 }
 0x540   : > { %v11117_v51 = vsub.f32 %v10933_v55, %v2439_v25  ;;  %v2440_v29 = vmul.f32 0.25, %v2405_v60  ;;  %v2502_v4 = vmul.f32 %v11114_v5, %v11114_v5 }
 0x541   : > { %v2408_v17 = vpop.xlane.xlu0 %2407 }
 0x542   : > { %v11122_v24 = vsub.f32 %v10930_v15, %v2440_v29  ;;  %v2441_v18 = vmul.f32 0.25, %v2408_v17  ;;  %v2590_v8 = vsel %vm1207_vm3, %v2502_v4, 0.0  ;;  %v2503_v49 = vmul.f32 %v11117_v51, %v11117_v51 }
 0x543   : > { %v2508_v14 = vpop.xlane.xlu1 %2507  ;;  %2591 = vadd.xlane.f32.xlu1 %v2590_v8 }
 0x544   : > { %v11128_v45 = vsub.f32 %v10941_v1, %v2441_v18  ;;  %v2602_v25 = vmul.f32 0.25, %v2508_v14  ;;  %v2593_v60 = vsel %vm1207_vm3, %v2503_v49, 0.0  ;;  %v2504_v55 = vmul.f32 %v11122_v24, %v11122_v24 }
 0x545   : > { %2594 = vadd.xlane.f32.xlu0 %v2593_v60  ;;  %v2511_v29 = vpop.xlane.xlu0 %2510 }
 0x546   : > { %v2634_v15 = vadd.f32 1e-05, %v2602_v25  ;;  %v2603_v17 = vmul.f32 0.25, %v2511_v29  ;;  %v2596_v4 = vsel %vm1207_vm3, %v2504_v55, 0.0  ;;  %v2505_v54 = vmul.f32 %v11128_v45, %v11128_v45 }
 0x547   : > { %2597 = vadd.xlane.f32.xlu1 %v2596_v4  ;;  %v2514_v8 = vpop.xlane.xlu1 %2513 }
 0x548   : > { %8469 = vrsqrt.f32 %v2634_v15  ;;  %v2635_v18 = vadd.f32 1e-05, %v2603_v17  ;;  %v2604_v1 = vmul.f32 0.25, %v2514_v8  ;;  %v2599_v14 = vsel %vm1207_vm3, %v2505_v54, 0.0 }
 0x549   : > { %2600 = vadd.xlane.f32.xlu0 %v2599_v14  ;;  %v2517_v49 = vpop.xlane.xlu0 %2516 }
 0x54a   : > { %8471 = vrsqrt.f32 %v2635_v18  ;;  %v2636_v61 = vadd.f32 1e-05, %v2604_v1  ;;  %v2605_v60 = vmul.f32 0.25, %v2517_v49  ;;  %v11137_v18 = vld [vmem:[#allocation12] ss:$0 sm:$0xff] }
 0x54b   : > { %v2520_v2 = vpop.xlane.xlu1 %2519 }
 0x54c   : > { %8473 = vrsqrt.f32 %v2636_v61  ;;  %v2637_v25 = vadd.f32 1e-05, %v2605_v60  ;;  %v2606_v29 = vmul.f32 0.25, %v2520_v2 }
 0x54d   : > { %v2523_v55 = vpop.xlane.xlu0 %2522 }
 0x54e   : > { %8475 = vrsqrt.f32 %v2637_v25  ;;  %v2638_v33 = vadd.f32 1e-05, %v2606_v29  ;;  %v2607_v52 = vmul.f32 0.25, %v2523_v55 }
 0x54f   : > { %v2526_v4 = vpop.xlane.xlu1 %2525 }
 0x550   : > { %8477 = vrsqrt.f32 %v2638_v33  ;;  %v2639_v15 = vadd.f32 1e-05, %v2607_v52  ;;  %v2608_v17 = vmul.f32 0.25, %v2526_v4 }
 0x551   : > { %v2529_v8 = vpop.xlane.xlu0 %2528 }
 0x552   : > { %v8470_v59 = vpop.eup %8469  ;;  %8479 = vrsqrt.f32 %v2639_v15  ;;  %v2640_v54 = vadd.f32 1e-05, %v2608_v17  ;;  %v2609_v14 = vmul.f32 0.25, %v2529_v8  ;;  %v11142_v15 = vld [vmem:[#allocation14] ss:$0 sm:$0xff] }
 0x553   : > { %v2532_v1 = vpop.xlane.xlu1 %2531  ;;  %v2698_v61 = vmul.f32 %v8470_v59, %v10927_v28 }
 0x554   : > { %v8472_v49 = vpop.eup %8471  ;;  %8481 = vrsqrt.f32 %v2640_v54  ;;  %v2641_v2 = vadd.f32 1e-05, %v2609_v14  ;;  %v2610_v60 = vmul.f32 0.25, %v2532_v1 }
 0x555   : > { %v2535_v25 = vpop.xlane.xlu0 %2534  ;;  %v2699_v29 = vmul.f32 %v8472_v49, %v10938_v12  ;;  %v2736_v52 = vmul.f32 %v11137_v18, %v2698_v61 }
 0x556   : > { %v8474_v33 = vpop.eup %8473  ;;  %8483 = vrsqrt.f32 %v2641_v2  ;;  %v2642_v55 = vadd.f32 1e-05, %v2610_v60  ;;  %v2611_v4 = vmul.f32 0.25, %v2535_v25 }
 0x557   : > { %v2538_v17 = vpop.xlane.xlu1 %2537  ;;  %v2737_v8 = vmul.f32 %v11137_v18, %v2699_v29  ;;  %v2700_v59 = vmul.f32 %v8474_v33, %v10946_v9  ;;  %v2774_v12 = vadd.f32 %v11142_v15, %v2736_v52 }
 0x558   : > { %v8476_v28 = vpop.eup %8475  ;;  %8485 = vrsqrt.f32 %v2642_v55  ;;  %v2643_v54 = vadd.f32 1e-05, %v2611_v4  ;;  %v2612_v14 = vmul.f32 0.25, %v2538_v17 }
 0x559   : > { %v2541_v1 = vpop.xlane.xlu0 %2540  ;;  %v2775_v61 = vadd.f32 %v11142_v15, %v2737_v8  ;;  %v2701_v49 = vmul.f32 %v8476_v28, %v10953_v7  ;;  %v2738_v2 = vmul.f32 %v11137_v18, %v2700_v59 }
 0x55a   : > { %v8478_v60 = vpop.eup %8477  ;;  %8487 = vrsqrt.f32 %v2643_v54  ;;  %v2644_v25 = vadd.f32 1e-05, %v2612_v14  ;;  %v2613_v58 = vmul.f32 0.25, %v2541_v1 }
 0x55b   : > { %v2544_v29 = vpop.xlane.xlu1 %2543  ;;  %v2806_v38 = vpack.c.bf16 %v2775_v61, %v2774_v12  ;;  %v2739_v9 = vmul.f32 %v11137_v18, %v2701_v49  ;;  %v2702_v33 = vmul.f32 %v8478_v60, %v10960_v27  ;;  %v2776_v7 = vadd.f32 %v11142_v15, %v2738_v2 }
 0x55c   : > { %v8480_v55 = vpop.eup %8479  ;;  %8489 = vrsqrt.f32 %v2644_v25  ;;  %v2645_v4 = vadd.f32 1e-05, %v2613_v58  ;;  %v2614_v52 = vmul.f32 0.25, %v2544_v29 }
 0x55d   : > { %7879 = vmatprep.mubr.msk.bf16.mxu1 %vm1207_vm3, %v2806_v38  ;;  %v2547_v17 = vpop.xlane.xlu0 %2546  ;;  %v2777_v8 = vadd.f32 %v11142_v15, %v2739_v9  ;;  %v2703_v59 = vmul.f32 %v8480_v55, %v10966_v36  ;;  %v2740_v28 = vmul.f32 %v11137_v18, %v2702_v33 }
 0x55e   : > { %v8482_v54 = vpop.eup %8481  ;;  %8491 = vrsqrt.f32 %v2645_v4  ;;  %v2646_v14 = vadd.f32 1e-05, %v2614_v52  ;;  %v2615_v1 = vmul.f32 0.25, %v2547_v17 }
 0x55f   : > { %v2550_v27 = vpop.xlane.xlu1 %2549  ;;  %v2807_v12 = vpack.c.bf16 %v2777_v8, %v2776_v7  ;;  %v2741_v58 = vmul.f32 %v11137_v18, %v2703_v59  ;;  %v2704_v61 = vmul.f32 %v8482_v54, %v10972_v62  ;;  %v2778_v36 = vadd.f32 %v11142_v15, %v2740_v28 }
 0x560   : > { %v8484_v38 = vpop.eup %8483  ;;  %8493 = vrsqrt.f32 %v2646_v14  ;;  %v2647_v49 = vadd.f32 1e-05, %v2615_v1  ;;  %v2616_v2 = vmul.f32 0.25, %v2550_v27 }
 0x561   : > { %7880 = vmatmul.mubr.msk.bf16.vlgmr.msra.gmra.mrb[0].mxu1 %vm1207_vm3, %v2807_v12  ;;  %v2553_v60 = vpop.xlane.xlu0 %2552  ;;  %v2779_v25 = vadd.f32 %v11142_v15, %v2741_v58  ;;  %v2705_v29 = vmul.f32 %v8484_v38, %v10978_v41  ;;  %v2742_v9 = vmul.f32 %v11137_v18, %v2704_v61 }
 0x562   : > { %v8486_v33 = vpop.eup %8485  ;;  %8495 = vrsqrt.f32 %v2647_v49  ;;  %v2648_v55 = vadd.f32 1e-05, %v2616_v2  ;;  %v2617_v4 = vmul.f32 0.25, %v2553_v60 }
 0x563   : > { %v2808_v62 = vpack.c.bf16 %v2779_v25, %v2778_v36  ;;  %v2743_v52 = vmul.f32 %v11137_v18, %v2705_v29  ;;  %v2706_v17 = vmul.f32 %v8486_v33, %v10984_v40  ;;  %v2780_v59 = vadd.f32 %v11142_v15, %v2742_v9 }
 0x564   : > { %v8488_v7 = vpop.eup %8487  ;;  %8497 = vrsqrt.f32 %v2648_v55  ;;  %v2649_v8 = vadd.f32 1e-05, %v2617_v4 }
 0x565   : > { %7883 = vmatprep.mubr.msk.bf16.mxu1 %vm1207_vm3, %v2808_v62  ;;  %v2781_v41 = vadd.f32 %v11142_v15, %v2743_v52  ;;  %v2707_v28 = vmul.f32 %v8488_v7, %v10990_v46  ;;  %v2744_v54 = vmul.f32 %v11137_v18, %v2706_v17 }
 0x566   : > { %v8490_v14 = vpop.eup %8489  ;;  %8499 = vrsqrt.f32 %v2649_v8 }
 0x567   : > { %v2809_v1 = vpack.c.bf16 %v2781_v41, %v2780_v59  ;;  %v2745_v27 = vmul.f32 %v11137_v18, %v2707_v28  ;;  %v2708_v40 = vmul.f32 %v8490_v14, %v10996_v0  ;;  %v2782_v58 = vadd.f32 %v11142_v15, %v2744_v54 }
 0x568   : > { %v8492_v12 = vpop.eup %8491 }
 0x569   : > { %7884 = vmatmul.mubr.msk.bf16.gmra.mrb[4].mxu1 %vm1207_vm3, %v2809_v1  ;;  %v2783_v61 = vadd.f32 %v11142_v15, %v2745_v27  ;;  %v2709_v38 = vmul.f32 %v8492_v12, %v11002_v20  ;;  %v2746_v46 = vmul.f32 %v11137_v18, %v2708_v40 }
 0x56a   : > { %v8494_v49 = vpop.eup %8493 }
 0x56b   : > { %v2810_v2 = vpack.c.bf16 %v2783_v61, %v2782_v58  ;;  %v2747_v60 = vmul.f32 %v11137_v18, %v2709_v38  ;;  %v2710_v36 = vmul.f32 %v8494_v49, %v11008_v44  ;;  %v2784_v0 = vadd.f32 %v11142_v15, %v2746_v46 }
 0x56c   : > { %v8496_v25 = vpop.eup %8495 }
 0x56d   : > { %v2556_v29 = vpop.xlane.xlu1 %2555  ;;  %7887 = vmatprep.mubr.msk.bf16.mxu1 %vm1207_vm3, %v2810_v2  ;;  %v2785_v9 = vadd.f32 %v11142_v15, %v2747_v60  ;;  %v2711_v33 = vmul.f32 %v8496_v25, %v11014_v50  ;;  %v2748_v20 = vmul.f32 %v11137_v18, %v2710_v36 }
 0x56e   : > { %v8498_v55 = vpop.eup %8497  ;;  %v2618_v4 = vmul.f32 0.25, %v2556_v29 }
 0x56f   : > { %v2559_v62 = vpop.xlane.xlu0 %2558  ;;  %v2811_v52 = vpack.c.bf16 %v2785_v9, %v2784_v0  ;;  %v2749_v17 = vmul.f32 %v11137_v18, %v2711_v33  ;;  %v2712_v44 = vmul.f32 %v8498_v55, %v11020_v42  ;;  %v2786_v28 = vadd.f32 %v11142_v15, %v2748_v20 }
 0x570   : > { %v8500_v7 = vpop.eup %8499  ;;  %v2650_v8 = vadd.f32 1e-05, %v2618_v4  ;;  %v2619_v59 = vmul.f32 0.25, %v2559_v62 }
 0x571   : > { %v2562_v41 = vpop.xlane.xlu1 %2561  ;;  %7888 = vmatmul.mubr.msk.bf16.gmra.mrb[8].mxu1 %vm1207_vm3, %v2811_v52  ;;  %v2787_v50 = vadd.f32 %v11142_v15, %v2749_v17  ;;  %v2713_v54 = vmul.f32 %v8500_v7, %v11026_v21  ;;  %v2750_v14 = vmul.f32 %v11137_v18, %v2712_v44 }
 0x572   : > { %8501 = vrsqrt.f32 %v2650_v8  ;;  %v2651_v1 = vadd.f32 1e-05, %v2619_v59  ;;  %v2620_v27 = vmul.f32 0.25, %v2562_v41 }
 0x573   : > { %v2565_v40 = vpop.xlane.xlu0 %2564  ;;  %v2812_v12 = vpack.c.bf16 %v2787_v50, %v2786_v28  ;;  %v2751_v42 = vmul.f32 %v11137_v18, %v2713_v54  ;;  %v2788_v38 = vadd.f32 %v11142_v15, %v2750_v14 }
 0x574   : > { %8503 = vrsqrt.f32 %v2651_v1  ;;  %v2652_v58 = vadd.f32 1e-05, %v2620_v27  ;;  %v2621_v61 = vmul.f32 0.25, %v2565_v40 }
 0x575   : > { %7891 = vmatprep.mubr.msk.bf16.mxu1 %vm1207_vm3, %v2812_v12  ;;  %v2789_v46 = vadd.f32 %v11142_v15, %v2751_v42 }
 0x576   : > { %8505 = vrsqrt.f32 %v2652_v58  ;;  %v2653_v21 = vadd.f32 1e-05, %v2621_v61 }
 0x577   : > { %v2813_v49 = vpack.c.bf16 %v2789_v46, %v2788_v38 }
 0x578   : > { %8507 = vrsqrt.f32 %v2653_v21 }
 0x579   : > { %7892 = vmatmul.mubr.msk.bf16.gmra.mrb[12].mxu1 %vm1207_vm3, %v2813_v49 }
 0x57c   : > { %v8502_v2 = vpop.eup %8501 }
 0x57d   : > { %v2714_v60 = vmul.f32 %v8502_v2, %v11040_v63 }
 0x57e   : > { %v8504_v36 = vpop.eup %8503 }
 0x57f   : > { %v2715_v25 = vmul.f32 %v8504_v36, %v11043_v16  ;;  %v2752_v29 = vmul.f32 %v11137_v18, %v2714_v60 }
 0x580   : > { %v8506_v0 = vpop.eup %8505 }
 0x581   : > { %v2753_v9 = vmul.f32 %v11137_v18, %v2715_v25  ;;  %v2716_v33 = vmul.f32 %v8506_v0, %v11048_v56  ;;  %v2790_v55 = vadd.f32 %v11142_v15, %v2752_v29 }
 0x582   : > { %v8508_v20 = vpop.eup %8507 }
 0x583   : > { %v2791_v4 = vadd.f32 %v11142_v15, %v2753_v9  ;;  %v2717_v62 = vmul.f32 %v8508_v20, %v11054_v26  ;;  %v2754_v52 = vmul.f32 %v11137_v18, %v2716_v33 }
 0x585   : > { %v2814_v63 = vpack.c.bf16 %v2791_v4, %v2790_v55  ;;  %v2755_v17 = vmul.f32 %v11137_v18, %v2717_v62  ;;  %v2792_v16 = vadd.f32 %v11142_v15, %v2754_v52 }
 0x587   : > { %7895 = vmatprep.mubr.msk.bf16.mxu1 %vm1207_vm3, %v2814_v63  ;;  %v2793_v44 = vadd.f32 %v11142_v15, %v2755_v17 }
 0x589   : > { %v2815_v7 = vpack.c.bf16 %v2793_v44, %v2792_v16 }
 0x58b   : > { %7896 = vmatmul.mubr.msk.bf16.gmra.mrb[16].mxu1 %vm1207_vm3, %v2815_v7 }
 0x58d   : > { %v2568_v56 = vpop.xlane.xlu1 %2567 }
 0x58e   : > { %v2622_v8 = vmul.f32 0.25, %v2568_v56 }
 0x58f   : > { %v2571_v59 = vpop.xlane.xlu0 %2570 }
 0x590   : > { %v2654_v41 = vadd.f32 1e-05, %v2622_v8  ;;  %v2623_v28 = vmul.f32 0.25, %v2571_v59 }
 0x591   : > { %v2574_v26 = vpop.xlane.xlu1 %2573 }
 0x592   : > { %8509 = vrsqrt.f32 %v2654_v41  ;;  %v2655_v50 = vadd.f32 1e-05, %v2623_v28  ;;  %v2624_v54 = vmul.f32 0.25, %v2574_v26 }
 0x593   : > { %v2577_v14 = vpop.xlane.xlu0 %2576 }
 0x594   : > { %8511 = vrsqrt.f32 %v2655_v50  ;;  %v2656_v1 = vadd.f32 1e-05, %v2624_v54  ;;  %v2625_v27 = vmul.f32 0.25, %v2577_v14 }
 0x596   : > { %8513 = vrsqrt.f32 %v2656_v1  ;;  %v2657_v40 = vadd.f32 1e-05, %v2625_v27 }
 0x598   : > { %8515 = vrsqrt.f32 %v2657_v40 }
 0x59c   : > { %v8510_v12 = vpop.eup %8509 }
 0x59d   : > { %v2718_v42 = vmul.f32 %v8510_v12, %v11066_v53 }
 0x59e   : > { %v8512_v58 = vpop.eup %8511 }
 0x59f   : > { %v2719_v61 = vmul.f32 %v8512_v58, %v11069_v32  ;;  %v2756_v38 = vmul.f32 %v11137_v18, %v2718_v42 }
 0x5a0   : > { %v8514_v46 = vpop.eup %8513 }
 0x5a1   : > { %v2757_v21 = vmul.f32 %v11137_v18, %v2719_v61  ;;  %v2720_v49 = vmul.f32 %v8514_v46, %v11074_v39  ;;  %v2794_v60 = vadd.f32 %v11142_v15, %v2756_v38 }
 0x5a2   : > { %v8516_v2 = vpop.eup %8515 }
 0x5a3   : > { %v2795_v36 = vadd.f32 %v11142_v15, %v2757_v21  ;;  %v2721_v25 = vmul.f32 %v8516_v2, %v11080_v37  ;;  %v2758_v29 = vmul.f32 %v11137_v18, %v2720_v49 }
 0x5a5   : > { %v2816_v53 = vpack.c.bf16 %v2795_v36, %v2794_v60  ;;  %v2759_v0 = vmul.f32 %v11137_v18, %v2721_v25  ;;  %v2796_v32 = vadd.f32 %v11142_v15, %v2758_v29 }
 0x5a7   : > { %7899 = vmatprep.mubr.msk.bf16.mxu1 %vm1207_vm3, %v2816_v53  ;;  %v2797_v9 = vadd.f32 %v11142_v15, %v2759_v0 }
 0x5a9   : > { %v2817_v33 = vpack.c.bf16 %v2797_v9, %v2796_v32 }
 0x5ab   : > { %7900 = vmatmul.mubr.msk.bf16.gmra.mrb[20].mxu1 %vm1207_vm3, %v2817_v33 }
 0x5ad   : > { %v2580_v39 = vpop.xlane.xlu1 %2579 }
 0x5ae   : > { %v2626_v20 = vmul.f32 0.25, %v2580_v39 }
 0x5af   : > { %v2583_v55 = vpop.xlane.xlu0 %2582 }
 0x5b0   : > { %v2658_v4 = vadd.f32 1e-05, %v2626_v20  ;;  %v2627_v62 = vmul.f32 0.25, %v2583_v55 }
 0x5b1   : > { %v2586_v37 = vpop.xlane.xlu1 %2585 }
 0x5b2   : > { %8517 = vrsqrt.f32 %v2658_v4  ;;  %v2659_v52 = vadd.f32 1e-05, %v2627_v62  ;;  %v2628_v63 = vmul.f32 0.25, %v2586_v37 }
 0x5b3   : > { %v2589_v17 = vpop.xlane.xlu0 %2588 }
 0x5b4   : > { %8519 = vrsqrt.f32 %v2659_v52  ;;  %v2660_v16 = vadd.f32 1e-05, %v2628_v63  ;;  %v2629_v44 = vmul.f32 0.25, %v2589_v17 }
 0x5b6   : > { %8521 = vrsqrt.f32 %v2660_v16  ;;  %v2661_v7 = vadd.f32 1e-05, %v2629_v44 }
 0x5b8   : > { %8523 = vrsqrt.f32 %v2661_v7 }
 0x5bc   : > { %v8518_v56 = vpop.eup %8517 }
 0x5bd   : > { %v2722_v8 = vmul.f32 %v8518_v56, %v11090_v31 }
 0x5be   : > { %v8520_v59 = vpop.eup %8519 }
 0x5bf   : > { %v2723_v41 = vmul.f32 %v8520_v59, %v11093_v6  ;;  %v2760_v28 = vmul.f32 %v11137_v18, %v2722_v8  ;;  %v11255_v8 = vld [vmem:[#allocation17] ss:$0 sm:$0xff] }
 0x5c0   : > { %v8522_v26 = vpop.eup %8521 }
 0x5c1   : > { %v2761_v50 = vmul.f32 %v11137_v18, %v2723_v41  ;;  %v2724_v54 = vmul.f32 %v8522_v26, %v11098_v23  ;;  %v2798_v1 = vadd.f32 %v11142_v15, %v2760_v28  ;;  %v11268_v28 = vld [vmem:[#allocation17 + $0x2] ss:$0 sm:$0xff] }
 0x5c2   : > { %v8524_v14 = vpop.eup %8523 }
 0x5c3   : > { %v2799_v27 = vadd.f32 %v11142_v15, %v2761_v50  ;;  %v2725_v40 = vmul.f32 %v8524_v14, %v11104_v43  ;;  %v2762_v12 = vmul.f32 %v11137_v18, %v2724_v54 }
 0x5c5   : > { %v2818_v31 = vpack.c.bf16 %v2799_v27, %v2798_v1  ;;  %v2763_v42 = vmul.f32 %v11137_v18, %v2725_v40  ;;  %v2800_v6 = vadd.f32 %v11142_v15, %v2762_v12  ;;  %v11278_v40 = vld [vmem:[#allocation17 + $0x3] ss:$0 sm:$0xff] }
 0x5c7   : > { %7903 = vmatprep.mubr.msk.bf16.mxu1 %vm1207_vm3, %v2818_v31  ;;  %v2801_v58 = vadd.f32 %v11142_v15, %v2763_v42 }
 0x5c9   : > { %v2819_v61 = vpack.c.bf16 %v2801_v58, %v2800_v6 }
 0x5cb   : > { %7904 = vmatmul.mubr.msk.bf16.gmra.mrb[24].mxu1 %vm1207_vm3, %v2819_v61 }
 0x5d0   : > { %v2592_v23 = vpop.xlane.xlu1 %2591 }
 0x5d1   : > { %v2630_v38 = vmul.f32 0.25, %v2592_v23 }
 0x5d2   : > { %v2595_v46 = vpop.xlane.xlu0 %2594 }
 0x5d3   : > { %v2662_v21 = vadd.f32 1e-05, %v2630_v38  ;;  %v2631_v49 = vmul.f32 0.25, %v2595_v46 }
 0x5d4   : > { %v2598_v43 = vpop.xlane.xlu1 %2597 }
 0x5d5   : > { %8525 = vrsqrt.f32 %v2662_v21  ;;  %v2663_v2 = vadd.f32 1e-05, %v2631_v49  ;;  %v2632_v60 = vmul.f32 0.25, %v2598_v43 }
 0x5d6   : > { %v2601_v36 = vpop.xlane.xlu0 %2600 }
 0x5d7   : > { %8527 = vrsqrt.f32 %v2663_v2  ;;  %v2664_v25 = vadd.f32 1e-05, %v2632_v60  ;;  %v2633_v29 = vmul.f32 0.25, %v2601_v36  ;;  %v11291_v60 = vld [vmem:[#allocation17 + $0x4] ss:$0 sm:$0xff] }
 0x5d9   : > { %8529 = vrsqrt.f32 %v2664_v25  ;;  %v2665_v53 = vadd.f32 1e-05, %v2633_v29 }
 0x5db   : > { %8531 = vrsqrt.f32 %v2665_v53 }
 0x5df   : > { %v8526_v0 = vpop.eup %8525 }
 0x5e0   : > { %v2726_v32 = vmul.f32 %v8526_v0, %v11114_v5 }
 0x5e1   : > { %v8528_v9 = vpop.eup %8527 }
 0x5e2   : > { %v2727_v33 = vmul.f32 %v8528_v9, %v11117_v51  ;;  %v2764_v39 = vmul.f32 %v11137_v18, %v2726_v32  ;;  %v11303_v9 = vld [vmem:[#allocation17 + $0x7] ss:$0 sm:$0xff] }
 0x5e3   : > { %v8530_v20 = vpop.eup %8529 }
 0x5e4   : > { %v2765_v55 = vmul.f32 %v11137_v18, %v2727_v33  ;;  %v2728_v4 = vmul.f32 %v8530_v20, %v11122_v24  ;;  %v2802_v37 = vadd.f32 %v11142_v15, %v2764_v39  ;;  %v9246_v24 = vmov 0.0  }
 0x5e5   : > { %v8532_v62 = vpop.eup %8531  ;;  %v11253_v56 = vrot.slane %v9246_v24, 7 }
 0x5e6   : > { %v2803_v52 = vadd.f32 %v11142_v15, %v2765_v55  ;;  %v2729_v63 = vmul.f32 %v8532_v62, %v11128_v45  ;;  %v2766_v17 = vmul.f32 %v11137_v18, %v2728_v4  ;;  %v11257_v45 = vld [vmem:[#allocation17 + $0x1] ss:$0 sm:$0xff] }
 0x5e7   : > { %14524 = vst [vmem:[#allocation72_spill] sm:$0xff] %v11253_v56  ;;  %v11261_v59 = vsel %vm1384_vm4, 0.0, %v11253_v56  ;;  %v3242_v41 = vmul.f32 0.0, %v11257_v45  ;;  %v3171_v14 = vmul.f32 %v11255_v8, %v11253_v56 }
 0x5e8   : > { %v2820_v5 = vpack.c.bf16 %v2803_v52, %v2802_v37  ;;  %v2767_v16 = vmul.f32 %v11137_v18, %v2729_v63  ;;  %v2804_v51 = vadd.f32 %v11142_v15, %v2766_v17  ;;  %14525 = vst [vmem:[#allocation73_spill] sm:$0xff] %v11261_v59  ;;  %v3170_v18 = vmul.f32 %v11255_v8, %v11261_v59 }
 0x5e9   : > { %v3274_v38 = vadd.f32 %v3242_v41, %v3171_v14 }
 0x5ea   : > { %7907 = vmatprep.mubr.msk.bf16.mxu1 %vm1207_vm3, %v2820_v5  ;;  %v2805_v44 = vadd.f32 %v11142_v15, %v2767_v16  ;;  %v11266_v15 = vrot.slane %v9246_v24, 1  ;;  %v3273_v50 = vadd.f32 %v3242_v41, %v3170_v18 }
 0x5ec   : > { %v2821_v7 = vpack.c.bf16 %v2805_v44, %v2804_v51  ;;  %14526 = vst [vmem:[#allocation74_spill] sm:$0xff] %v11266_v15  ;;  %v3409_v54 = vmul.f32 %v11268_v28, %v11266_v15  ;;  %v11276_v27 = vsel %vm3305_vm2, %v11266_v15, 0.0 }
 0x5ed   : > { %14527 = vst [vmem:[#allocation75_spill] sm:$0xff] %v11276_v27  ;;  %v3410_v46 = vmul.f32 %v11268_v28, %v11276_v27 }
 0x5ee   : > { %7908 = vmatmul.mubr.msk.bf16.gmra.mrb[28].mxu1 %vm1207_vm3, %v2821_v7  ;;  %v3441_v23 = vadd.f32 %v3409_v54, %v3273_v50  ;;  %v11322_v54 = vld [vmem:[#allocation17 + $0x5] ss:$0 sm:$0xff] }
 0x5ef   : > { %v3442_v55 = vadd.f32 %v3410_v46, %v3274_v38 }
 0x634   : > { %v7881_v26 = vpop.f32.mrb[0].mxu1 }
 0x635   : > { %v2909_v1 = vpop.f32.mrb[1].mxu1  ;;  %v3073_v42 = vrot.slane %v7881_v26, 7  ;;  %v3311_v21 = vrot.slane %v7881_v26, 1  ;;  %v3245_v62 = vmul.f32 %v7881_v26, %v11257_v45  ;;  %v3563_v18 = vmul.f32 %v7881_v26, %v11291_v60 }
 0x636   : > { %v3070_v12 = vrot.slane %v2909_v1, 7  ;;  %v11280_v31 = vpop.f32.mrb[2].mxu1  ;;  %v3243_v37 = vmul.f32 %v11257_v45, %v2909_v1  ;;  %v3308_v52 = vrot.slane %v2909_v1, 1  ;;  %v3561_v63 = vmul.f32 %v11291_v60, %v2909_v1 }
 0x637   : > { %v3074_v6 = vrot.slane %v11280_v31, 7  ;;  %v2912_v58 = vpop.f32.mrb[3].mxu1  ;;  %v3312_v2 = vrot.slane %v11280_v31, 1  ;;  %v3246_v25 = vmul.f32 %v11280_v31, %v11257_v45  ;;  %v3149_v29 = vsel %vm1384_vm4, 0.0, %v3073_v42 }
 0x638   : > { %v3148_v61 = vsel %vm1384_vm4, 0.0, %v3070_v12  ;;  %v3174_v5 = vmul.f32 %v11255_v8, %v3149_v29  ;;  %v3071_v51 = vrot.slane %v2912_v58, 7  ;;  %v3309_v44 = vrot.slane %v2912_v58, 1 }
 0x639   : > { %v3489_v49 = vmul.f32 %v11278_v40, %v3148_v61  ;;  %v11288_v43 = vsel %vm1384_vm4, %v3073_v42, %v3074_v6  ;;  %v3172_v53 = vmul.f32 %v11255_v8, %v3148_v61  ;;  %v3313_v0 = vsel %vm3305_vm2, %v3311_v21, %v3312_v2 }
 0x63a   : > { %v3175_v36 = vmul.f32 %v11255_v8, %v11288_v43  ;;  %v11301_v32 = vsel %vm3305_vm2, %v3312_v2, 0.0  ;;  %v3491_v24 = vmul.f32 %v11278_v40, %v3149_v29  ;;  %v3783_v41 = vmul.f32 %v7881_v26, %v11303_v9 }
 0x63b   : > { %v3521_v33 = vadd.f32 %v3489_v49, %v3441_v23  ;;  %v3414_v20 = vmul.f32 %v11268_v28, %v11301_v32  ;;  %v3275_v50 = vadd.f32 %v3243_v37, %v3172_v53  ;;  %v3072_v42 = vsel %vm1384_vm4, %v3070_v12, %v3071_v51  ;;  %v11329_v23 = vld [vmem:[#allocation17 + $0x6] ss:$0 sm:$0xff] }
 0x63c   : > { %v3278_v39 = vadd.f32 %v3246_v25, %v3175_v36  ;;  %v11307_v4 = vpop.f32.mrb[4].mxu1  ;;  %v3310_v6 = vsel %vm3305_vm2, %v3308_v52, %v3309_v44  ;;  %v3386_v61 = vsel %vm3305_vm2, %v3309_v44, 0.0  ;;  %v3173_v38 = vmul.f32 %v11255_v8, %v3072_v42  ;;  %v11338_v25 = vld [vmem:[#allocation17 + $0x8] ss:$0 sm:$0xff] }
 0x63d   : > { %v11312_v17 = vpop.f32.mrb[5].mxu1  ;;  %v3593_v1 = vadd.f32 %v3561_v63, %v3521_v33  ;;  %v3244_v46 = vmul.f32 %v11257_v45, %v2912_v58  ;;  %v3411_v26 = vmul.f32 %v11268_v28, %v3310_v6  ;;  %v3490_v21 = vmul.f32 %v11278_v40, %v3072_v42 }
 0x63e   : > { %v11315_v16 = vadd.f32 %v3414_v20, %v3278_v39  ;;  %v11317_v7 = vpop.f32.mrb[6].mxu1  ;;  %v3277_v49 = vadd.f32 %v3245_v62, %v3174_v5  ;;  %v3413_v2 = vmul.f32 %v11268_v28, %v3313_v0  ;;  %v3562_v36 = vmul.f32 %v11291_v60, %v2912_v58 }
 0x63f   : > { %v11324_v14 = vpop.f32.mrb[7].mxu1  ;;  %v3639_v12 = vmul.f32 %v11322_v54, %v3310_v6  ;;  %v3276_v53 = vadd.f32 %v3244_v46, %v3173_v38  ;;  %v3412_v33 = vmul.f32 %v11268_v28, %v3386_v61  ;;  %v3443_v39 = vadd.f32 %v3411_v26, %v3275_v50 }
 0x640   : > { %v3522_v20 = vadd.f32 %v3490_v21, %v3442_v55  ;;  %v3711_v37 = vmul.f32 %v11329_v23, %v3149_v29  ;;  %v3564_v52 = vmul.f32 %v11280_v31, %v11291_v60  ;;  %v3492_v62 = vmul.f32 %v11278_v40, %v11288_v43 }
 0x641   : > { %v3671_v63 = vadd.f32 %v3639_v12, %v3593_v1  ;;  %v3444_v58 = vadd.f32 %v3412_v33, %v3276_v53  ;;  %v3523_v51 = vadd.f32 %v3491_v24, %v3443_v39  ;;  %v3640_v42 = vmul.f32 %v11322_v54, %v3386_v61 }
 0x642   : > { %v3594_v44 = vadd.f32 %v3562_v36, %v3522_v20  ;;  %v3641_v55 = vmul.f32 %v11322_v54, %v3313_v0  ;;  %v3854_v29 = vmul.f32 %v11338_v25, %v3313_v0  ;;  %v14294_v38 = vrot.slane %v11312_v17, 7 }
 0x643   : > { %v3743_v50 = vadd.f32 %v3711_v37, %v3671_v63  ;;  %v3524_v26 = vadd.f32 %v3492_v62, %v3444_v58  ;;  %v3712_v21 = vmul.f32 %v11329_v23, %v11288_v43  ;;  %v3445_v24 = vadd.f32 %v3413_v2, %v3277_v49 }
 0x644   : > { %v11346_v5 = vpop.f32.mrb[8].mxu1  ;;  %v3672_v1 = vadd.f32 %v3640_v42, %v3594_v44  ;;  %v3079_v12 = vrot.slane %v11307_v4, 7  ;;  %v3150_v0 = vsel %vm1384_vm4, 0.0, %v14294_v38  ;;  %v3595_v53 = vadd.f32 %v3563_v18, %v3523_v51 }
 0x645   : > { %v11349_v6 = vpop.f32.mrb[9].mxu1  ;;  %v3814_v61 = vadd.f32 %v3783_v41, %v3743_v50  ;;  %v3784_v33 = vmul.f32 %v11280_v31, %v11303_v9  ;;  %v3596_v39 = vadd.f32 %v3564_v52, %v3524_v26  ;;  %v3493_v37 = vmul.f32 %v11278_v40, %v3150_v0 }
 0x646   : > { %v11354_v46 = vpop.f32.mrb[10].mxu1  ;;  %v3744_v20 = vadd.f32 %v3712_v21, %v3672_v1  ;;  %v3855_v43 = vmul.f32 %v11338_v25, %v11301_v32  ;;  %v3673_v41 = vadd.f32 %v3641_v55, %v3595_v53  ;;  %v3713_v2 = vmul.f32 %v11329_v23, %v3150_v0 }
 0x647   : > { %v11358_v36 = vpop.f32.mrb[11].mxu1  ;;  %v11369_v49 = vadd.f32 %v3854_v29, %v3814_v61  ;;  %v3525_v63 = vadd.f32 %v3493_v37, %v3445_v24  ;;  %v3565_v18 = vmul.f32 %v11291_v60, %v11312_v17  ;;  %v3080_v58 = vrot.slane %v11317_v7, 7 }
 0x648   : > { %v3815_v62 = vadd.f32 %v3784_v33, %v3744_v20  ;;  %v3151_v31 = vsel %vm1384_vm4, 0.0, %v3079_v12  ;;  %v3745_v52 = vadd.f32 %v3713_v2, %v3673_v41  ;;  %v3785_v51 = vmul.f32 %v11303_v9, %v11312_v17 }
 0x649   : > { %14528 = vst [vmem:[#allocation76_spill] sm:$0xff] %v11369_v49  ;;  %v3318_v44 = vrot.slane %v11317_v7, 1  ;;  %v3317_v29 = vrot.slane %v11307_v4, 1  ;;  %v3597_v50 = vadd.f32 %v3565_v18, %v3525_v63  ;;  %v3081_v26 = vsel %vm1384_vm4, %v3079_v12, %v3080_v58 }
 0x64a   : > { %v11381_v55 = vadd.f32 %v3855_v43, %v3815_v62  ;;  %v3816_v21 = vadd.f32 %v3785_v51, %v3745_v52  ;;  %v3179_v24 = vmul.f32 %v11255_v8, %v3081_v26  ;;  %v3250_v61 = vmul.f32 %v11317_v7, %v11257_v45 }
 0x64b   : > { %v3178_v33 = vmul.f32 %v11255_v8, %v3151_v31  ;;  %v11394_v20 = vsel %vm3305_vm2, %v3317_v29, %v3318_v44  ;;  %v11397_v37 = vsel %vm3305_vm2, %v3318_v44, 0.0  ;;  %v3919_v12 = vmul.f32 %v11369_v49, %v11369_v49 }
 0x64c   : > { %v11379_v42 = vpop.f32.mrb[12].mxu1  ;;  %14529 = vst [vmem:[#allocation77_spill] sm:$0xff] %v11381_v55  ;;  %v3176_v41 = vmul.f32 %v11255_v8, %v3150_v0  ;;  %v3282_v2 = vadd.f32 %v3250_v61, %v3179_v24  ;;  %v3418_v62 = vmul.f32 %v11268_v28, %v11397_v37  ;;  %v3642_v63 = vmul.f32 %v11322_v54, %v11301_v32 }
 0x64d   : > { %v11385_v1 = vpop.f32.mrb[13].mxu1  ;;  %v3249_v18 = vmul.f32 %v11307_v4, %v11257_v45  ;;  %v11411_v58 = vmul.f32 %v11278_v40, %v3151_v31  ;;  %v3715_v52 = vmul.f32 %v11329_v23, %v3151_v31  ;;  %v3247_v51 = vmul.f32 %v11257_v45, %v11312_v17 }
 0x64e   : > { %v11390_v53 = vpop.f32.mrb[14].mxu1  ;;  %v11416_v44 = vadd.f32 %v3418_v62, %v3282_v2  ;;  %v3787_v29 = vmul.f32 %v11307_v4, %v11303_v9  ;;  %v3314_v24 = vrot.slane %v11312_v17, 1  ;;  %v3077_v32 = vrot.slane %v11324_v14, 7 }
 0x64f   : > { %v11399_v43 = vpop.f32.mrb[15].mxu1  ;;  %v3281_v0 = vadd.f32 %v3249_v18, %v3178_v33  ;;  %v3951_v61 = vsel %vm1207_vm3, %v3919_v12, 0.0  ;;  %v3279_v38 = vadd.f32 %v3247_v51, %v3176_v41  ;;  %v3315_v22 = vrot.slane %v11324_v14, 1 }
 0x650   : > { %v3674_v31 = vadd.f32 %v3642_v63, %v3596_v39  ;;  %v3920_v3 = vmul.f32 %v11381_v55, %v11381_v55  ;;  %v3496_v2 = vmul.f32 %v11278_v40, %v3081_v26  ;;  %v14530_v33 = vrot.slane %v11312_v17, 7 }
 0x651   : > { %v3248_v18 = vmul.f32 %v11257_v45, %v11324_v14  ;;  %v3316_v10 = vsel %vm3305_vm2, %v3314_v24, %v3315_v22  ;;  %v3388_v41 = vsel %vm3305_vm2, %v3315_v22, 0.0  ;;  %v3566_v17 = vmul.f32 %v11291_v60, %v11324_v14 }
 0x652   : > { %v3078_v62 = vsel %vm1384_vm4, %v14530_v33, %v3077_v32  ;;  %v3415_v63 = vmul.f32 %v11268_v28, %v3316_v10  ;;  %v3416_v51 = vmul.f32 %v11268_v28, %v3388_v41  ;;  %v3643_v32 = vmul.f32 %v11322_v54, %v3316_v10 }
 0x653   : > { %v3177_v13 = vmul.f32 %v11255_v8, %v3078_v62  ;;  %v3494_v39 = vmul.f32 %v11278_v40, %v3078_v62  ;;  %v3714_v19 = vmul.f32 %v11329_v23, %v3078_v62  ;;  %v3856_v24 = vmul.f32 %v11338_v25, %v3316_v10 }
 0x654   : > { %v3447_v47 = vadd.f32 %v3415_v63, %v3279_v38  ;;  %v3644_v22 = vmul.f32 %v11322_v54, %v3388_v41  ;;  %v3675_v35 = vadd.f32 %v3643_v32, %v3597_v50  ;;  %v3786_v30 = vmul.f32 %v11303_v9, %v11324_v14 }
 0x655   : > { %v3280_v33 = vadd.f32 %v3248_v18, %v3177_v13  ;;  %v3526_v57 = vadd.f32 %v3494_v39, %v11315_v16  ;;  %v3746_v11 = vadd.f32 %v3714_v19, %v3674_v31  ;;  %v11447_v55 = vadd.f32 %v3856_v24, %v3816_v21 }
 0x656   : > { %v3952_v13 = vsel %vm1207_vm3, %v3920_v3, 0.0  ;;  %v3716_v16 = vmul.f32 %v11329_v23, %v3081_v26  ;;  %v3747_v18 = vadd.f32 %v3715_v52, %v3675_v35  ;;  %v3085_v62 = vrot.slane %v11346_v5, 7 }
 0x657   : > { %v3448_v34 = vadd.f32 %v3416_v51, %v3280_v33  ;;  %v3598_v48 = vadd.f32 %v3566_v17, %v3526_v57  ;;  %14531 = vst [vmem:[#allocation78_spill] sm:$0xff] %v11447_v55  ;;  %v3817_v39 = vadd.f32 %v3786_v30, %v3746_v11  ;;  %v3857_v50 = vmul.f32 %v11338_v25, %v3388_v41 }
 0x658   : > { %v4065_v14 = vsel %vm4063_vm5, %v3920_v3, 0.0  ;;  %v3417_v19 = vmul.f32 %v11268_v28, %v11394_v20  ;;  %v3858_v57 = vmul.f32 %v11338_v25, %v11394_v20  ;;  %v3818_v21 = vadd.f32 %v3787_v29, %v3747_v18 }
 0x659   : > { %v11452_v10 = vadd.f32 %v3496_v2, %v3448_v34  ;;  %v3676_v38 = vadd.f32 %v3644_v22, %v3598_v48  ;;  %v3788_v35 = vmul.f32 %v11317_v7, %v11303_v9  ;;  %v11462_v52 = vadd.f32 %v3857_v50, %v3817_v39 }
 0x65a   : > { %v3921_v11 = vmul.f32 %v11447_v55, %v11447_v55  ;;  %v3953_v34 = vadd.f32 %v3952_v13, %v3951_v61  ;;  %v4064_v30 = vsel %vm4063_vm5, %v3919_v12, 0.0  ;;  %v11469_v3 = vadd.f32 %v3858_v57, %v3818_v21 }
 0x65b   : > { %v3748_v26 = vadd.f32 %v3716_v16, %v3676_v38  ;;  %14532 = vst [vmem:[#allocation79_spill] sm:$0xff] %v11462_v52  ;;  %v3082_v31 = vrot.slane %v11349_v6, 7  ;;  %v4066_v29 = vadd.f32 %v4065_v14, %v4064_v30  ;;  %v3859_v41 = vmul.f32 %v11338_v25, %v11397_v37 }
 0x65c   : > { %14533 = vst [vmem:[#allocation80_spill] sm:$0xff] %v11469_v3  ;;  %v11477_v51 = vsel %vm1384_vm4, 0.0, %v3085_v62  ;;  %v3922_v61 = vmul.f32 %v11462_v52, %v11462_v52  ;;  %v3449_v32 = vadd.f32 %v3417_v19, %v3281_v0  ;;  %v3527_v33 = vadd.f32 %v11411_v58, %v3447_v47 }
 0x65d   : > { %v3819_v63 = vadd.f32 %v3788_v35, %v3748_v26  ;;  %v3152_v12 = vsel %vm1384_vm4, 0.0, %v3082_v31  ;;  %v3567_v22 = vmul.f32 %v11307_v4, %v11291_v60  ;;  %v3954_v16 = vsel %vm1207_vm3, %v3921_v11, 0.0 }
 0x65e   : > { %v11466_v48 = vpop.f32.mrb[16].mxu1  ;;  %v4067_v18 = vsel %vm4063_vm5, %v3921_v11, 0.0  ;;  %v3568_v38 = vmul.f32 %v11317_v7, %v11291_v60  ;;  %v3645_v39 = vmul.f32 %v11322_v54, %v11394_v20  ;;  %v3646_v47 = vmul.f32 %v11322_v54, %v11397_v37 }
 0x65f   : > { %v11472_v2 = vpop.f32.mrb[17].mxu1  ;;  %v11489_v13 = vadd.f32 %v3859_v41, %v3819_v63  ;;  %v3323_v58 = vrot.slane %v11346_v5, 1  ;;  %v11502_v4 = vmul.f32 %v11255_v8, %v11477_v51  ;;  %v11506_v0 = vmul.f32 %v11329_v23, %v11477_v51 }
 0x660   : > { %v11479_v17 = vpop.f32.mrb[18].mxu1  ;;  %v11510_v50 = vmul.f32 %v11346_v5, %v11303_v9  ;;  %v3497_v7 = vmul.f32 %v11278_v40, %v3152_v12  ;;  %v3955_v20 = vadd.f32 %v3954_v16, %v3953_v34  ;;  %v3956_v14 = vsel %vm1207_vm3, %v3922_v61, 0.0 }
 0x661   : > { %v11485_v24 = vpop.f32.mrb[19].mxu1  ;;  %14534 = vst [vmem:[#allocation81_spill] sm:$0xff] %v11489_v13  ;;  %v4068_v37 = vadd.f32 %v4067_v18, %v4066_v29  ;;  %v3599_v19 = vadd.f32 %v3567_v22, %v3527_v33  ;;  %v3180_v57 = vmul.f32 %v11255_v8, %v3152_v12  ;;  %v3569_v35 = vmul.f32 %v11291_v60, %v11349_v6 }
 0x662   : > { %v3529_v21 = vadd.f32 %v3497_v7, %v3449_v32  ;;  %v3086_v26 = vrot.slane %v11354_v46, 7  ;;  %v3717_v30 = vmul.f32 %v11329_v23, %v3152_v12  ;;  %v3789_v41 = vmul.f32 %v11303_v9, %v11349_v6 }
 0x663   : > { %v3677_v11 = vadd.f32 %v3645_v39, %v3599_v19  ;;  %v3324_v34 = vrot.slane %v11354_v46, 1  ;;  %v3254_v33 = vmul.f32 %v11354_v46, %v11257_v45  ;;  %v3083_v32 = vrot.slane %v11358_v36, 7 }
 0x664   : > { %v3601_v63 = vadd.f32 %v3569_v35, %v3529_v21  ;;  %v3087_v29 = vsel %vm1384_vm4, %v3085_v62, %v3086_v26  ;;  %v3923_v39 = vmul.f32 %v11469_v3, %v11469_v3  ;;  %v4069_v7 = vsel %vm4063_vm5, %v3922_v61, 0.0 }
 0x665   : > { %v3749_v22 = vadd.f32 %v3717_v30, %v3677_v11  ;;  %v3183_v16 = vmul.f32 %v11255_v8, %v3087_v29  ;;  %v11528_v18 = vsel %vm3305_vm2, %v3323_v58, %v3324_v34  ;;  %v11531_v12 = vsel %vm3305_vm2, %v3324_v34, 0.0 }
 0x666   : > { %v3251_v62 = vmul.f32 %v11257_v45, %v11349_v6  ;;  %v3320_v19 = vrot.slane %v11349_v6, 1  ;;  %v3957_v21 = vadd.f32 %v3956_v14, %v3955_v20  ;;  %v3422_v58 = vmul.f32 %v11268_v28, %v11531_v12 }
 0x667   : > { %v3820_v35 = vadd.f32 %v3789_v41, %v3749_v22  ;;  %v3286_v26 = vadd.f32 %v3254_v33, %v3183_v16  ;;  %v3084_v30 = vsel %vm1384_vm4, %v3082_v31, %v3083_v32  ;;  %v3252_v34 = vmul.f32 %v11257_v45, %v11358_v36 }
 0x668   : > { %v3283_v11 = vadd.f32 %v3251_v62, %v3180_v57  ;;  %v3321_v3 = vrot.slane %v11358_v36, 1  ;;  %v3500_v52 = vmul.f32 %v11278_v40, %v3087_v29  ;;  %v3181_v6 = vmul.f32 %v11255_v8, %v3084_v30 }
 0x669   : > { %v11545_v61 = vadd.f32 %v3422_v58, %v3286_v26  ;;  %v3498_v20 = vmul.f32 %v11278_v40, %v3084_v30  ;;  %v3570_v31 = vmul.f32 %v11291_v60, %v11358_v36  ;;  %v3600_v57 = vadd.f32 %v3568_v38, %v11452_v10 }
 0x66a   : > { %v3322_v14 = vsel %vm3305_vm2, %v3320_v19, %v3321_v3  ;;  %v3390_v41 = vsel %vm3305_vm2, %v3321_v3, 0.0  ;;  %v3284_v33 = vadd.f32 %v3252_v34, %v3181_v6  ;;  %v3718_v19 = vmul.f32 %v11329_v23, %v3084_v30 }
 0x66b   : > { %v3419_v32 = vmul.f32 %v11268_v28, %v3322_v14  ;;  %v3420_v22 = vmul.f32 %v11268_v28, %v3390_v41  ;;  %v3530_v16 = vadd.f32 %v3498_v20, %v11416_v44  ;;  %v3647_v62 = vmul.f32 %v11322_v54, %v3322_v14 }
 0x66c   : > { %v3648_v26 = vmul.f32 %v11322_v54, %v3390_v41  ;;  %v3678_v58 = vadd.f32 %v3646_v47, %v3600_v57  ;;  %v3860_v27 = vmul.f32 %v11338_v25, %v3322_v14  ;;  %v3958_v10 = vsel %vm1207_vm3, %v3923_v39, 0.0 }
 0x66d   : > { %v3451_v3 = vadd.f32 %v3419_v32, %v3283_v11  ;;  %v3452_v55 = vadd.f32 %v3420_v22, %v3284_v33  ;;  %v3602_v49 = vadd.f32 %v3570_v31, %v3530_v16  ;;  %v3679_v38 = vadd.f32 %v3647_v62, %v3601_v63 }
 0x66e   : > { %v3750_v34 = vadd.f32 %v3718_v19, %v3678_v58  ;;  %v3790_v6 = vmul.f32 %v11303_v9, %v11358_v36  ;;  %v3720_v44 = vmul.f32 %v11329_v23, %v3087_v29  ;;  %v11568_v47 = vadd.f32 %v3860_v27, %v3820_v35 }
 0x66f   : > { %v11566_v20 = vadd.f32 %v3500_v52, %v3452_v55  ;;  %v3680_v15 = vadd.f32 %v3648_v26, %v3602_v49  ;;  %v3924_v11 = vmul.f32 %v11489_v13, %v11489_v13  ;;  %v3751_v30 = vadd.f32 %v11506_v0, %v3679_v38 }
 0x670   : > { %14535 = vst [vmem:[#allocation82_spill] sm:$0xff] %v11568_v47  ;;  %v3821_v14 = vadd.f32 %v3790_v6, %v3750_v34  ;;  %v3861_v31 = vmul.f32 %v11338_v25, %v3390_v41  ;;  %v4070_v63 = vadd.f32 %v4069_v7, %v4068_v37  ;;  %v3253_v57 = vmul.f32 %v11346_v5, %v11257_v45 }
 0x671   : > { %v3792_v36 = vmul.f32 %v11354_v46, %v11303_v9  ;;  %v3752_v55 = vadd.f32 %v3720_v44, %v3680_v15  ;;  %v4071_v49 = vsel %vm4063_vm5, %v3923_v39, 0.0  ;;  %v3862_v27 = vmul.f32 %v11338_v25, %v11528_v18 }
 0x672   : > { %v3822_v52 = vadd.f32 %v11510_v50, %v3751_v30  ;;  %v11582_v29 = vadd.f32 %v3861_v31, %v3821_v14  ;;  %v3959_v0 = vadd.f32 %v3958_v10, %v3957_v21  ;;  %v3863_v37 = vmul.f32 %v11338_v25, %v11531_v12 }
 0x673   : > { %v3823_v7 = vadd.f32 %v3792_v36, %v3752_v55  ;;  %v3285_v35 = vadd.f32 %v3253_v57, %v11502_v4  ;;  %v3925_v15 = vmul.f32 %v11568_v47, %v11568_v47  ;;  %v3960_v39 = vsel %vm1207_vm3, %v3924_v11, 0.0 }
 0x674   : > { %14536 = vst [vmem:[#allocation83_spill] sm:$0xff] %v11582_v29  ;;  %v11587_v41 = vadd.f32 %v3862_v27, %v3822_v52  ;;  %v4072_v33 = vadd.f32 %v4071_v49, %v4070_v63  ;;  %v3421_v50 = vmul.f32 %v11268_v28, %v11528_v18  ;;  %v3091_v21 = vrot.slane %v11379_v42, 7 }
 0x675   : > { %v11594_v32 = vadd.f32 %v3863_v37, %v3823_v7  ;;  %v4073_v22 = vsel %vm4063_vm5, %v3924_v11, 0.0  ;;  %v3499_v4 = vmul.f32 %v11278_v40, %v11477_v51  ;;  %v3571_v16 = vmul.f32 %v11346_v5, %v11291_v60 }
 0x676   : > { %14537 = vst [vmem:[#allocation84_spill] sm:$0xff] %v11587_v41  ;;  %v3961_v62 = vadd.f32 %v3960_v39, %v3959_v0  ;;  %v3572_v26 = vmul.f32 %v11354_v46, %v11291_v60  ;;  %v3649_v58 = vmul.f32 %v11322_v54, %v11528_v18  ;;  %v3962_v19 = vsel %vm1207_vm3, %v3925_v15, 0.0 }
 0x677   : > { %14538 = vst [vmem:[#allocation85_spill] sm:$0xff] %v11594_v32  ;;  %v3088_v10 = vrot.slane %v11385_v1, 7  ;;  %v3650_v38 = vmul.f32 %v11322_v54, %v11531_v12  ;;  %v4074_v34 = vadd.f32 %v4073_v22, %v4072_v33  ;;  %v11611_v51 = vsel %vm1384_vm4, 0.0, %v3091_v21 }
 0x678   : > { %v3453_v6 = vadd.f32 %v3421_v50, %v3285_v35  ;;  %v4075_v5 = vsel %vm4063_vm5, %v3925_v15, 0.0  ;;  %v3329_v44 = vrot.slane %v11379_v42, 1  ;;  %v3531_v11 = vadd.f32 %v3499_v4, %v3451_v3 }
 0x679   : > { %v3154_v46 = vsel %vm1384_vm4, 0.0, %v3088_v10  ;;  %v11620_v30 = vmul.f32 %v11582_v29, %v11582_v29  ;;  %v11622_v14 = vadd.f32 %v3962_v19, %v3961_v62  ;;  %v3092_v31 = vrot.slane %v11390_v53, 7 }
 0x67a   : > { %v3501_v12 = vmul.f32 %v11278_v40, %v3154_v46  ;;  %v3184_v57 = vmul.f32 %v11255_v8, %v3154_v46  ;;  %v3573_v36 = vmul.f32 %v11291_v60, %v11385_v1  ;;  %v3603_v3 = vadd.f32 %v3571_v16, %v3531_v11 }
 0x67b   : > { %v3330_v55 = vrot.slane %v11390_v53, 1  ;;  %v3721_v52 = vmul.f32 %v11329_v23, %v3154_v46  ;;  %v3093_v0 = vsel %vm1384_vm4, %v3091_v21, %v3092_v31  ;;  %v3258_v37 = vmul.f32 %v11390_v53, %v11257_v45 }
 0x67c   : > { %v3533_v27 = vadd.f32 %v3501_v12, %v3453_v6  ;;  %v3681_v35 = vadd.f32 %v3649_v58, %v3603_v3  ;;  %v3187_v15 = vmul.f32 %v11255_v8, %v3093_v0  ;;  %v11649_v50 = vmul.f32 %v11587_v41, %v11587_v41 }
 0x67d   : > { %v11642_v39 = vsel %vm3305_vm2, %v3329_v44, %v3330_v55  ;;  %v11645_v33 = vsel %vm3305_vm2, %v3330_v55, 0.0  ;;  %v4076_v22 = vadd.f32 %v4075_v5, %v4074_v34  ;;  %v3255_v21 = vmul.f32 %v11257_v45, %v11385_v1 }
 0x67e   : > { %v11616_v18 = vpop.f32.mrb[20].mxu1  ;;  %v3605_v4 = vadd.f32 %v3573_v36, %v3533_v27  ;;  %v3753_v16 = vadd.f32 %v3721_v52, %v3681_v35  ;;  %v3793_v62 = vmul.f32 %v11303_v9, %v11385_v1  ;;  %v3290_v58 = vadd.f32 %v3258_v37, %v3187_v15 }
 0x67f   : > { %v11626_v63 = vpop.f32.mrb[21].mxu1  ;;  %v3426_v19 = vmul.f32 %v11268_v28, %v11645_v33  ;;  %v3964_v6 = vsel %vm1207_vm3, %v11620_v30, 0.0  ;;  %v3723_v44 = vmul.f32 %v11329_v23, %v11611_v51  ;;  %v3326_v34 = vrot.slane %v11385_v1, 1 }
 0x680   : > { %v11632_v49 = vpop.f32.mrb[22].mxu1  ;;  %v3089_v5 = vrot.slane %v11399_v43, 7  ;;  %v3287_v46 = vadd.f32 %v3255_v21, %v3184_v57  ;;  %v3824_v11 = vadd.f32 %v3793_v62, %v3753_v16  ;;  %v3327_v31 = vrot.slane %v11399_v43, 1 }
 0x681   : > { %v11638_v7 = vpop.f32.mrb[23].mxu1  ;;  %v11663_v12 = vadd.f32 %v3426_v19, %v3290_v58  ;;  %v3504_v36 = vmul.f32 %v11278_v40, %v3093_v0  ;;  %v3256_v55 = vmul.f32 %v11257_v45, %v11399_v43  ;;  %v3604_v27 = vadd.f32 %v3572_v26, %v11566_v20 }
 0x682   : > { %v3090_v3 = vsel %vm1384_vm4, %v3088_v10, %v3089_v5  ;;  %v3328_v1 = vsel %vm3305_vm2, %v3326_v34, %v3327_v31  ;;  %v3392_v57 = vsel %vm3305_vm2, %v3327_v31, 0.0  ;;  %v3574_v10 = vmul.f32 %v11291_v60, %v11399_v43 }
 0x683   : > { %v3185_v52 = vmul.f32 %v11255_v8, %v3090_v3  ;;  %v3502_v37 = vmul.f32 %v11278_v40, %v3090_v3  ;;  %v3423_v35 = vmul.f32 %v11268_v28, %v3328_v1  ;;  %v3424_v15 = vmul.f32 %v11268_v28, %v3392_v57 }
 0x684   : > { %v3651_v21 = vmul.f32 %v11322_v54, %v3328_v1  ;;  %v3682_v26 = vadd.f32 %v3650_v38, %v3604_v27  ;;  %v3722_v62 = vmul.f32 %v11329_v23, %v3090_v3  ;;  %v3794_v34 = vmul.f32 %v11303_v9, %v11399_v43 }
 0x685   : > { %v3288_v16 = vadd.f32 %v3256_v55, %v3185_v52  ;;  %v3534_v20 = vadd.f32 %v3502_v37, %v11545_v61  ;;  %v3455_v58 = vadd.f32 %v3423_v35, %v3287_v46  ;;  %v3864_v5 = vmul.f32 %v11338_v25, %v3328_v1 }
 0x686   : > { %v3683_v19 = vadd.f32 %v3651_v21, %v3605_v4  ;;  %v3652_v29 = vmul.f32 %v11322_v54, %v3392_v57  ;;  %v3754_v47 = vadd.f32 %v3722_v62, %v3682_v26  ;;  %v3795_v55 = vmul.f32 %v11379_v42, %v11303_v9 }
 0x687   : > { %v3456_v31 = vadd.f32 %v3424_v15, %v3288_v16  ;;  %v3606_v41 = vadd.f32 %v3574_v10, %v3534_v20  ;;  %v3724_v61 = vmul.f32 %v11329_v23, %v3093_v0  ;;  %v11689_v27 = vadd.f32 %v3864_v5, %v3824_v11 }
 0x688   : > { %v3755_v38 = vadd.f32 %v3723_v44, %v3683_v19  ;;  %v3825_v3 = vadd.f32 %v3794_v34, %v3754_v47  ;;  %v3865_v43 = vmul.f32 %v11338_v25, %v3392_v57  ;;  %v4077_v52 = vsel %vm4063_vm5, %v11620_v30, 0.0 }
 0x689   : > { %14539 = vst [vmem:[#allocation86_spill] sm:$0xff] %v11689_v27  ;;  %v11691_v46 = vadd.f32 %v3504_v36, %v3456_v31  ;;  %v3684_v4 = vadd.f32 %v3652_v29, %v3606_v41  ;;  %v3186_v1 = vmul.f32 %v11255_v8, %v11611_v51  ;;  %v3866_v37 = vmul.f32 %v11338_v25, %v11642_v39 }
 0x68a   : > { %v3826_v35 = vadd.f32 %v3795_v55, %v3755_v38  ;;  %v3965_v0 = vadd.f32 %v3964_v6, %v11622_v14  ;;  %v3796_v44 = vmul.f32 %v11390_v53, %v11303_v9  ;;  %v11703_v29 = vadd.f32 %v3865_v43, %v3825_v3 }
 0x68b   : > { %v3756_v11 = vadd.f32 %v3724_v61, %v3684_v4  ;;  %v3928_v47 = vmul.f32 %v11594_v32, %v11594_v32  ;;  %v3966_v41 = vsel %vm1207_vm3, %v11649_v50, 0.0  ;;  %v3257_v30 = vmul.f32 %v11379_v42, %v11257_v45 }
 0x68c   : > { %14540 = vst [vmem:[#allocation87_spill] sm:$0xff] %v11703_v29  ;;  %v11711_v36 = vadd.f32 %v3866_v37, %v3826_v35  ;;  %v4078_v57 = vadd.f32 %v4077_v52, %v4076_v22  ;;  %v3867_v14 = vmul.f32 %v11338_v25, %v11645_v33  ;;  %v4079_v15 = vsel %vm4063_vm5, %v11649_v50, 0.0 }
 0x68d   : > { %v3827_v6 = vadd.f32 %v3796_v44, %v3756_v11  ;;  %v3289_v10 = vadd.f32 %v3257_v30, %v3186_v1  ;;  %v3425_v21 = vmul.f32 %v11268_v28, %v11642_v39  ;;  %v3967_v16 = vadd.f32 %v3966_v41, %v3965_v0 }
 0x68e   : > { %14541 = vst [vmem:[#allocation88_spill] sm:$0xff] %v11711_v36  ;;  %v3968_v26 = vsel %vm1207_vm3, %v3928_v47, 0.0  ;;  %v3097_v62 = vrot.slane %v11466_v48, 7  ;;  %v11723_v19 = vadd.f32 %v4079_v15, %v4078_v57  ;;  %v3503_v22 = vmul.f32 %v11278_v40, %v11611_v51 }
 0x68f   : > { %v11719_v20 = vadd.f32 %v3867_v14, %v3827_v6  ;;  %v3575_v34 = vmul.f32 %v11379_v42, %v11291_v60  ;;  %v3094_v50 = vrot.slane %v11472_v2, 7  ;;  %v3576_v5 = vmul.f32 %v11390_v53, %v11291_v60 }
 0x690   : > { %v3653_v31 = vmul.f32 %v11322_v54, %v11642_v39  ;;  %v3654_v55 = vmul.f32 %v11322_v54, %v11645_v33  ;;  %v3457_v61 = vadd.f32 %v3425_v21, %v3289_v10  ;;  %v11738_v38 = vmul.f32 %v11689_v27, %v11689_v27 }
 0x691   : > { %14542 = vst [vmem:[#allocation89_spill] sm:$0xff] %v11719_v20  ;;  %v11740_v51 = vadd.f32 %v3968_v26, %v3967_v16  ;;  %v3156_v42 = vsel %vm1384_vm4, 0.0, %v3094_v50  ;;  %v3535_v4 = vadd.f32 %v3503_v22, %v3455_v58  ;;  %v11744_v3 = vsel %vm1384_vm4, 0.0, %v3097_v62 }
 0x692   : > { %v3335_v53 = vrot.slane %v11466_v48, 1  ;;  %v3505_v39 = vmul.f32 %v11278_v40, %v3156_v42  ;;  %v3098_v43 = vrot.slane %v11479_v17, 7  ;;  %v3577_v33 = vmul.f32 %v11291_v60, %v11472_v2 }
 0x693   : > { %v3607_v52 = vadd.f32 %v3575_v34, %v3535_v4  ;;  %v3725_v1 = vmul.f32 %v11329_v23, %v3156_v42  ;;  %v3336_v37 = vrot.slane %v11479_v17, 1  ;;  %v3188_v35 = vmul.f32 %v11255_v8, %v3156_v42 }
 0x694   : > { %v3537_v58 = vadd.f32 %v3505_v39, %v3457_v61  ;;  %v3099_v0 = vsel %vm1384_vm4, %v3097_v62, %v3098_v43  ;;  %v3262_v44 = vmul.f32 %v11479_v17, %v11257_v45  ;;  %v3970_v14 = vsel %vm1207_vm3, %v11738_v38, 0.0 }
 0x695   : > { %v3685_v11 = vadd.f32 %v3653_v31, %v3607_v52  ;;  %v3191_v41 = vmul.f32 %v11255_v8, %v3099_v0  ;;  %v11759_v30 = vsel %vm3305_vm2, %v3335_v53, %v3336_v37  ;;  %v11762_v57 = vsel %vm3305_vm2, %v3336_v37, 0.0 }
 0x696   : > { %v4081_v6 = vsel %vm4063_vm5, %v3928_v47, 0.0  ;;  %v3259_v15 = vmul.f32 %v11257_v45, %v11472_v2  ;;  %v3609_v10 = vadd.f32 %v3577_v33, %v3537_v58  ;;  %v3797_v16 = vmul.f32 %v11303_v9, %v11472_v2 }
 0x697   : > { %v3757_v21 = vadd.f32 %v3725_v1, %v3685_v11  ;;  %v3294_v26 = vadd.f32 %v3262_v44, %v3191_v41  ;;  %v3430_v62 = vmul.f32 %v11268_v28, %v11762_v57  ;;  %v3930_v34 = vmul.f32 %v11703_v29, %v11703_v29 }
 0x698   : > { %v3727_v47 = vmul.f32 %v11329_v23, %v11744_v3  ;;  %v3332_v31 = vrot.slane %v11472_v2, 1  ;;  %v3095_v61 = vrot.slane %v11485_v24, 7  ;;  %v3291_v4 = vadd.f32 %v3259_v15, %v3188_v35 }
 0x699   : > { %v3828_v53 = vadd.f32 %v3797_v16, %v3757_v21  ;;  %v11783_v39 = vadd.f32 %v3430_v62, %v3294_v26  ;;  %v3333_v43 = vrot.slane %v11485_v24, 1  ;;  %v3508_v52 = vmul.f32 %v11278_v40, %v3099_v0 }
 0x69a   : > { %v3096_v1 = vsel %vm1384_vm4, %v3094_v50, %v3095_v61  ;;  %v3260_v37 = vmul.f32 %v11257_v45, %v11485_v24  ;;  %v3608_v2 = vadd.f32 %v3576_v5, %v11691_v46  ;;  %v3578_v50 = vmul.f32 %v11291_v60, %v11485_v24 }
 0x69b   : > { %v3189_v35 = vmul.f32 %v11255_v8, %v3096_v1  ;;  %v3334_v44 = vsel %vm3305_vm2, %v3332_v31, %v3333_v43  ;;  %v3394_v11 = vsel %vm3305_vm2, %v3333_v43, 0.0  ;;  %v3506_v41 = vmul.f32 %v11278_v40, %v3096_v1 }
 0x69c   : > { %v3427_v15 = vmul.f32 %v11268_v28, %v3334_v44  ;;  %v3428_v21 = vmul.f32 %v11268_v28, %v3394_v11  ;;  %v3655_v16 = vmul.f32 %v11322_v54, %v3334_v44  ;;  %v3686_v26 = vadd.f32 %v3654_v55, %v3608_v2 }
 0x69d   : > { %v3292_v46 = vadd.f32 %v3260_v37, %v3189_v35  ;;  %v3538_v5 = vadd.f32 %v3506_v41, %v11663_v12  ;;  %v3726_v62 = vmul.f32 %v11329_v23, %v3096_v1  ;;  %v3798_v43 = vmul.f32 %v11303_v9, %v11485_v24 }
 0x69e   : > { %v11773_v22 = vpop.f32.mrb[24].mxu1  ;;  %v3459_v31 = vadd.f32 %v3427_v15, %v3291_v4  ;;  %v3687_v61 = vadd.f32 %v3655_v16, %v3609_v10  ;;  %v3868_v29 = vmul.f32 %v11338_v25, %v3334_v44  ;;  %v3656_v13 = vmul.f32 %v11322_v54, %v3394_v11 }
 0x69f   : > { %v11781_v42 = vpop.f32.mrb[25].mxu1  ;;  %v3460_v27 = vadd.f32 %v3428_v21, %v3292_v46  ;;  %v3610_v32 = vadd.f32 %v3578_v50, %v3538_v5  ;;  %v3758_v56 = vadd.f32 %v3726_v62, %v3686_v26  ;;  %v3190_v37 = vmul.f32 %v11255_v8, %v11744_v3 }
 0x6a0   : > { %v11786_v33 = vpop.f32.mrb[26].mxu1  ;;  %v3728_v12 = vmul.f32 %v11329_v23, %v3099_v0  ;;  %v11813_v55 = vadd.f32 %v3727_v47, %v3687_v61  ;;  %v11815_v1 = vadd.f32 %v3868_v29, %v3828_v53  ;;  %v3869_v2 = vmul.f32 %v11338_v25, %v3394_v11 }
 0x6a1   : > { %v11793_v58 = vpop.f32.mrb[27].mxu1  ;;  %v11817_v10 = vadd.f32 %v3508_v52, %v3460_v27  ;;  %v3688_v4 = vadd.f32 %v3656_v13, %v3610_v32  ;;  %v3829_v24 = vadd.f32 %v3798_v43, %v3758_v56  ;;  %v3261_v35 = vmul.f32 %v11466_v48, %v11257_v45  ;;  %v11868_v43 = vld [vmem:[#allocation17 + $0x1] ss:$0 sm:$0xff] }
 0x6a2   : > { %14543 = vst [vmem:[#allocation90_spill] sm:$0xff] %v11815_v1  ;;  %v3800_v44 = vmul.f32 %v11479_v17, %v11303_v9  ;;  %v3971_v0 = vadd.f32 %v3970_v14, %v11740_v51  ;;  %v4082_v29 = vadd.f32 %v4081_v6, %v11723_v19  ;;  %v4083_v27 = vsel %vm4063_vm5, %v11738_v38, 0.0 }
 0x6a3   : > { %v3760_v41 = vadd.f32 %v3728_v12, %v3688_v4  ;;  %v11824_v8 = vadd.f32 %v3869_v2, %v3829_v24  ;;  %v3100_v56 = vrot.slane %v11626_v63, 7  ;;  %v3972_v13 = vsel %vm1207_vm3, %v3930_v34, 0.0  ;;  %v11873_v2 = vld [vmem:[#allocation17] ss:$0 sm:$0xff] }
 0x6a4   : > { %v3293_v32 = vadd.f32 %v3261_v35, %v3190_v37  ;;  %v3429_v45 = vmul.f32 %v11268_v28, %v11759_v30  ;;  %v3103_v53 = vrot.slane %v11616_v18, 7  ;;  %v3507_v19 = vmul.f32 %v11278_v40, %v11744_v3 }
 0x6a5   : > { %14544 = vst [vmem:[#allocation91_spill] sm:$0xff] %v11824_v8  ;;  %v11834_v47 = vadd.f32 %v3800_v44, %v3760_v41  ;;  %v3158_v52 = vsel %vm1384_vm4, 0.0, %v3100_v56  ;;  %v3579_v38 = vmul.f32 %v11466_v48, %v11291_v60  ;;  %v11844_v51 = vmul.f32 %v11711_v36, %v11711_v36 }
 0x6a6   : > { %v11846_v14 = vadd.f32 %v3972_v13, %v3971_v0  ;;  %v11848_v6 = vadd.f32 %v4083_v27, %v4082_v29  ;;  %v11851_v28 = vsel %vm4063_vm5, %v3930_v34, 0.0  ;;  %v3657_v11 = vmul.f32 %v11322_v54, %v11759_v30 }
 0x6a7   : > { %v3461_v15 = vadd.f32 %v3429_v45, %v3293_v32  ;;  %v3509_v3 = vmul.f32 %v11278_v40, %v3158_v52  ;;  %v3539_v21 = vadd.f32 %v3507_v19, %v3459_v31  ;;  %v11857_v50 = vsel %vm1384_vm4, 0.0, %v3103_v53  ;;  %v11889_v32 = vld [vmem:[#allocation17 + $0x2] ss:$0 sm:$0xff] }
 0x6a8   : > { %v3341_v16 = vrot.slane %v11616_v18, 1  ;;  %v3581_v46 = vmul.f32 %v11291_v60, %v11626_v63  ;;  %v3104_v5 = vrot.slane %v11632_v49, 7  ;;  %v3729_v62 = vmul.f32 %v11329_v23, %v3158_v52 }
 0x6a9   : > { %v3541_v26 = vadd.f32 %v3509_v3, %v3461_v15  ;;  %v3611_v34 = vadd.f32 %v3579_v38, %v3539_v21  ;;  %v3342_v61 = vrot.slane %v11632_v49, 1  ;;  %v3580_v40 = vmul.f32 %v11479_v17, %v11291_v60 }
 0x6aa   : > { %v3105_v31 = vsel %vm1384_vm4, %v3103_v53, %v3104_v5  ;;  %v3266_v37 = vmul.f32 %v11868_v43, %v11632_v49  ;;  %v3101_v12 = vrot.slane %v11638_v7, 7  ;;  %v3658_v60 = vmul.f32 %v11322_v54, %v11762_v57 }
 0x6ab   : > { %v3613_v4 = vadd.f32 %v3581_v46, %v3541_v26  ;;  %v3689_v24 = vadd.f32 %v3657_v11, %v3611_v34  ;;  %v3195_v35 = vmul.f32 %v11873_v2, %v3105_v31  ;;  %v11877_v44 = vsel %vm3305_vm2, %v3341_v16, %v3342_v61  ;;  %v11905_v46 = vld [vmem:[#allocation17 + $0x3] ss:$0 sm:$0xff]  ;;  %v11910_v34 = vld [vmem:[#allocation17 + $0x4] ss:$0 sm:$0xff] }
 0x6ac   : > { %v3194_v17 = vmul.f32 %v11873_v2, %v11857_v50  ;;  %v3192_v41 = vmul.f32 %v11873_v2, %v3158_v52  ;;  %v11885_v0 = vsel %vm3305_vm2, %v3342_v61, 0.0  ;;  %v3801_v27 = vmul.f32 %v11303_v9, %v11626_v63 }
 0x6ad   : > { %v3761_v29 = vadd.f32 %v3729_v62, %v3689_v24  ;;  %v3298_v13 = vadd.f32 %v3266_v37, %v3195_v35  ;;  %v3434_v45 = vmul.f32 %v11889_v32, %v11885_v0  ;;  %v3731_v53 = vmul.f32 %v11329_v23, %v11857_v50 }
 0x6ae   : > { %v3263_v19 = vmul.f32 %v11868_v43, %v11626_v63  ;;  %v3338_v52 = vrot.slane %v11626_v63, 1  ;;  %v3102_v38 = vsel %vm1384_vm4, %v3100_v56, %v3101_v12  ;;  %v3264_v3 = vmul.f32 %v11868_v43, %v11638_v7 }
 0x6af   : > { %v3832_v11 = vadd.f32 %v3801_v27, %v3761_v29  ;;  %v11899_v15 = vadd.f32 %v3434_v45, %v3298_v13  ;;  %v3193_v9 = vmul.f32 %v11873_v2, %v3102_v38  ;;  %v3339_v16 = vrot.slane %v11638_v7, 1  ;;  %v11921_v29 = vld [vmem:[#allocation17 + $0x7] ss:$0 sm:$0xff] }
 0x6b0   : > { %v3295_v21 = vadd.f32 %v3263_v19, %v3192_v41  ;;  %v3510_v5 = vmul.f32 %v11905_v46, %v3102_v38  ;;  %v3612_v26 = vadd.f32 %v3580_v40, %v11817_v10  ;;  %v3512_v63 = vmul.f32 %v11905_v46, %v3105_v31 }
 0x6b1   : > { %v3296_v56 = vadd.f32 %v3264_v3, %v3193_v9  ;;  %v3582_v62 = vmul.f32 %v11910_v34, %v11638_v7  ;;  %v3730_v61 = vmul.f32 %v11329_v23, %v3102_v38  ;;  %v3340_v37 = vsel %vm3305_vm2, %v3338_v52, %v3339_v16 }
 0x6b2   : > { %v3396_v12 = vsel %vm3305_vm2, %v3339_v16, 0.0  ;;  %v3542_v24 = vadd.f32 %v3510_v5, %v11783_v39  ;;  %v3690_v35 = vadd.f32 %v3658_v60, %v3612_v26  ;;  %v3431_v41 = vmul.f32 %v11889_v32, %v3340_v37 }
 0x6b3   : > { %v3432_v10 = vmul.f32 %v11889_v32, %v3396_v12  ;;  %v3659_v40 = vmul.f32 %v11322_v54, %v3340_v37  ;;  %v3802_v27 = vmul.f32 %v11921_v29, %v11638_v7  ;;  %v3660_v45 = vmul.f32 %v11322_v54, %v3396_v12 }
 0x6b4   : > { %v3614_v13 = vadd.f32 %v3582_v62, %v3542_v24  ;;  %v3762_v19 = vadd.f32 %v3730_v61, %v3690_v35  ;;  %v3872_v52 = vmul.f32 %v11338_v25, %v3340_v37  ;;  %v3732_v39 = vmul.f32 %v11329_v23, %v3105_v31  ;;  %v11953_v35 = vld [vmem:[#allocation17 + $0x8] ss:$0 sm:$0xff] }
 0x6b5   : > { %v3463_v60 = vadd.f32 %v3431_v41, %v3295_v21  ;;  %v3464_v38 = vadd.f32 %v3432_v10, %v3296_v56  ;;  %v3691_v9 = vadd.f32 %v3659_v40, %v3613_v4  ;;  %v3873_v5 = vmul.f32 %v11338_v25, %v3396_v12 }
 0x6b6   : > { %v3692_v3 = vadd.f32 %v3660_v45, %v3614_v13  ;;  %v3833_v16 = vadd.f32 %v3802_v27, %v3762_v19  ;;  %v11929_v26 = vadd.f32 %v3872_v52, %v3832_v11  ;;  %v3265_v7 = vmul.f32 %v11868_v43, %v11616_v18 }
 0x6b7   : > { %v3803_v54 = vmul.f32 %v11921_v29, %v11616_v18  ;;  %v11935_v62 = vadd.f32 %v3512_v63, %v3464_v38  ;;  %v3763_v61 = vadd.f32 %v3731_v53, %v3691_v9  ;;  %v3974_v23 = vsel %vm1207_vm3, %v11844_v51, 0.0 }
 0x6b8   : > { %v3804_v31 = vmul.f32 %v11921_v29, %v11632_v49  ;;  %v3764_v4 = vadd.f32 %v3732_v39, %v3692_v3  ;;  %v11941_v21 = vadd.f32 %v3873_v5, %v3833_v16  ;;  %v3297_v56 = vadd.f32 %v3265_v7, %v3194_v17 }
 0x6b9   : > { %v3433_v37 = vmul.f32 %v11889_v32, %v11877_v44  ;;  %v3874_v63 = vmul.f32 %v11338_v25, %v11877_v44  ;;  %v3834_v12 = vadd.f32 %v3803_v54, %v3763_v61  ;;  %v4086_v24 = vadd.f32 %v11851_v28, %v11848_v6  ;;  %v12003_v54 = vld [vmem:[#allocation17 + $0x6] ss:$0 sm:$0xff] }
 0x6ba   : > { %v3875_v41 = vmul.f32 %v11953_v35, %v11885_v0  ;;  %v3835_v10 = vadd.f32 %v3804_v31, %v3764_v4  ;;  %v3109_v17 = vrot.slane %v11773_v22, 7  ;;  %v4087_v27 = vsel %vm4063_vm5, %v11844_v51, 0.0 }
 0x6bb   : > { %v3511_v25 = vmul.f32 %v11905_v46, %v11857_v50  ;;  %v11964_v13 = vadd.f32 %v3874_v63, %v3834_v12  ;;  %v3106_v6 = vrot.slane %v11781_v42, 7  ;;  %v11971_v45 = vmul.f32 %v11719_v20, %v11719_v20 }
 0x6bc   : > { %v11974_v19 = vadd.f32 %v3974_v23, %v11846_v14  ;;  %v11978_v52 = vmul.f32 %v11921_v29, %v11466_v48  ;;  %v11980_v51 = vadd.f32 %v3875_v41, %v3835_v10  ;;  %v3583_v50 = vmul.f32 %v11910_v34, %v11616_v18  ;;  %v11999_v18 = vld [vmem:[#allocation17 + $0x5] ss:$0 sm:$0xff] }
 0x6bd   : > { %v3160_v39 = vsel %vm1384_vm4, 0.0, %v3106_v6  ;;  %v3465_v38 = vadd.f32 %v3433_v37, %v3297_v56  ;;  %v3543_v9 = vadd.f32 %v3511_v25, %v3463_v60  ;;  %v11985_v3 = vadd.f32 %v4087_v27, %v4086_v24 }
 0x6be   : > { %14545 = vst [vmem:[#allocation92_spill] sm:$0xff] %v11980_v51  ;;  %v11989_v16 = vmul.f32 %v11953_v35, %v11759_v30  ;;  %v11992_v14 = vsel %vm1384_vm4, 0.0, %v3109_v17  ;;  %v3513_v48 = vmul.f32 %v11905_v46, %v3160_v39  ;;  %v11997_v5 = vmul.f32 %v11953_v35, %v11762_v57 }
 0x6bf   : > { %v3661_v60 = vmul.f32 %v11999_v18, %v11877_v44  ;;  %v3615_v7 = vadd.f32 %v3583_v50, %v3543_v9  ;;  %v3733_v30 = vmul.f32 %v12003_v54, %v3160_v39  ;;  %v12008_v61 = vsel %vm4063_vm5, %v11971_v45, 0.0 }
 0x6c0   : > { %v3584_v23 = vmul.f32 %v11910_v34, %v11632_v49  ;;  %v3545_v31 = vadd.f32 %v3513_v48, %v3465_v38  ;;  %v3585_v57 = vmul.f32 %v11910_v34, %v11781_v42  ;;  %v3198_v4 = vmul.f32 %v11873_v2, %v11992_v14 }
 0x6c1   : > { %v11943_v11 = vpop.f32.mrb[28].mxu1  ;;  %v3269_v44 = vmul.f32 %v11868_v43, %v11773_v22  ;;  %v3693_v56 = vadd.f32 %v3661_v60, %v3615_v7  ;;  %v3110_v37 = vrot.slane %v11786_v33, 7  ;;  %v3347_v63 = vrot.slane %v11773_v22, 1 }
 0x6c2   : > { %v11949_v53 = vpop.f32.mrb[29].mxu1  ;;  %v3196_v12 = vmul.f32 %v11873_v2, %v3160_v39  ;;  %v3617_v24 = vadd.f32 %v3585_v57, %v3545_v31  ;;  %v3348_v49 = vrot.slane %v11786_v33, 1  ;;  %v3805_v10 = vmul.f32 %v11921_v29, %v11781_v42 }
 0x6c3   : > { %v11958_v40 = vpop.f32.mrb[30].mxu1  ;;  %v3765_v41 = vadd.f32 %v3733_v30, %v3693_v56  ;;  %v3111_v27 = vsel %vm1384_vm4, %v3109_v17, %v3110_v37  ;;  %v3107_v25 = vrot.slane %v11793_v58, 7  ;;  %v3270_v38 = vmul.f32 %v11868_v43, %v11786_v33 }
 0x6c4   : > { %v11967_v28 = vpop.f32.mrb[31].mxu1  ;;  %v3199_v50 = vmul.f32 %v11873_v2, %v3111_v27  ;;  %v12030_v9 = vsel %vm3305_vm2, %v3347_v63, %v3348_v49  ;;  %v12033_v39 = vsel %vm3305_vm2, %v3348_v49, 0.0  ;;  %v3662_v48 = vmul.f32 %v11999_v18, %v11885_v0 }
 0x6c5   : > { %v3301_v60 = vadd.f32 %v3269_v44, %v3198_v4  ;;  %v3267_v17 = vmul.f32 %v11868_v43, %v11781_v42  ;;  %v3836_v7 = vadd.f32 %v3805_v10, %v3765_v41  ;;  %v3735_v30 = vmul.f32 %v12003_v54, %v11992_v14 }
 0x6c6   : > { %v3344_v31 = vrot.slane %v11781_v42, 1  ;;  %v3302_v57 = vadd.f32 %v3270_v38, %v3199_v50  ;;  %v3438_v56 = vmul.f32 %v11889_v32, %v12033_v39  ;;  %v3108_v63 = vsel %vm1384_vm4, %v3106_v6, %v3107_v25 }
 0x6c7   : > { %v3299_v37 = vadd.f32 %v3267_v17, %v3196_v12  ;;  %v3268_v0 = vmul.f32 %v11868_v43, %v11793_v58  ;;  %v3345_v4 = vrot.slane %v11793_v58, 1  ;;  %v3197_v49 = vmul.f32 %v11873_v2, %v3108_v63 }
 0x6c8   : > { %v12048_v44 = vadd.f32 %v3438_v56, %v3302_v57  ;;  %v3514_v41 = vmul.f32 %v11905_v46, %v3108_v63  ;;  %v3616_v42 = vadd.f32 %v3584_v23, %v11935_v62  ;;  %v3586_v6 = vmul.f32 %v11910_v34, %v11793_v58 }
 0x6c9   : > { %v3346_v10 = vsel %vm3305_vm2, %v3344_v31, %v3345_v4  ;;  %v3398_v50 = vsel %vm3305_vm2, %v3345_v4, 0.0  ;;  %v3734_v12 = vmul.f32 %v12003_v54, %v3108_v63  ;;  %v3300_v25 = vadd.f32 %v3268_v0, %v3197_v49 }
 0x6ca   : > { %v3435_v38 = vmul.f32 %v11889_v32, %v3346_v10  ;;  %v3436_v17 = vmul.f32 %v11889_v32, %v3398_v50  ;;  %v3546_v57 = vadd.f32 %v3514_v41, %v11899_v15  ;;  %v3516_v56 = vmul.f32 %v11905_v46, %v3111_v27 }
 0x6cb   : > { %v3663_v62 = vmul.f32 %v11999_v18, %v3346_v10  ;;  %v3694_v23 = vadd.f32 %v3662_v48, %v3616_v42  ;;  %v3876_v31 = vmul.f32 %v11953_v35, %v3346_v10  ;;  %v3664_v59 = vmul.f32 %v11999_v18, %v3398_v50 }
 0x6cc   : > { %v3467_v4 = vadd.f32 %v3435_v38, %v3299_v37  ;;  %v3468_v20 = vadd.f32 %v3436_v17, %v3300_v25  ;;  %v3618_v36 = vadd.f32 %v3586_v6, %v3546_v57  ;;  %v3806_v49 = vmul.f32 %v11921_v29, %v11793_v58 }
 0x6cd   : > { %v3695_v63 = vadd.f32 %v3663_v62, %v3617_v24  ;;  %v3766_v0 = vadd.f32 %v3734_v12, %v3694_v23  ;;  %v12067_v51 = vadd.f32 %v3876_v31, %v3836_v7  ;;  %v3807_v15 = vmul.f32 %v11921_v29, %v11773_v22 }
 0x6ce   : > { %v3736_v41 = vmul.f32 %v12003_v54, %v3111_v27  ;;  %v12072_v48 = vadd.f32 %v3516_v56, %v3468_v20  ;;  %v3696_v42 = vadd.f32 %v3664_v59, %v3618_v36  ;;  %v3437_v37 = vmul.f32 %v11889_v32, %v12030_v9 }
 0x6cf   : > { %v3767_v10 = vadd.f32 %v3735_v30, %v3695_v63  ;;  %v3837_v6 = vadd.f32 %v3806_v49, %v3766_v0  ;;  %v3877_v24 = vmul.f32 %v11953_v35, %v3398_v50  ;;  %v12079_v58 = vmul.f32 %v11815_v1, %v11815_v1 }
 0x6d0   : > { %v3515_v7 = vmul.f32 %v11905_v46, %v11992_v14  ;;  %v3808_v27 = vmul.f32 %v11921_v29, %v11786_v33  ;;  %v3768_v20 = vadd.f32 %v3736_v41, %v3696_v42  ;;  %v3878_v59 = vmul.f32 %v11953_v35, %v12030_v9 }
 0x6d1   : > { %v3838_v36 = vadd.f32 %v3807_v15, %v3767_v10  ;;  %v12087_v12 = vadd.f32 %v3877_v24, %v3837_v6  ;;  %v3475_v30 = vrot.slane %v11943_v11, 7  ;;  %v12092_v50 = vsel %vm1207_vm3, %v11971_v45, 0.0 }
 0x6d2   : > { %v3879_v25 = vmul.f32 %v11953_v35, %v12033_v39  ;;  %v3839_v14 = vadd.f32 %v3808_v27, %v3768_v20  ;;  %v3112_v38 = vrot.slane %v11949_v53, 7  ;;  %v12099_v17 = vadd.f32 %v12008_v61, %v11985_v3 }
 0x6d3   : > { %v12101_v57 = vadd.f32 %v3878_v59, %v3838_v36  ;;  %v3469_v56 = vadd.f32 %v3437_v37, %v3301_v60  ;;  %v3547_v62 = vadd.f32 %v3515_v7, %v3467_v4  ;;  %v12105_v23 = vsel %vm4063_vm5, %v12079_v58, 0.0 }
 0x6d4   : > { %v3587_v45 = vmul.f32 %v11910_v34, %v11773_v22  ;;  %v12109_v31 = vadd.f32 %v3879_v25, %v3839_v14  ;;  %v3162_v63 = vsel %vm1384_vm4, 0.0, %v3112_v38  ;;  %v12114_v0 = vmul.f32 %v11824_v8, %v11824_v8 }
 0x6d5   : > { %v3588_v3 = vmul.f32 %v11910_v34, %v11786_v33  ;;  %v3665_v61 = vmul.f32 %v11999_v18, %v12030_v9  ;;  %v3480_v60 = vsel %vm1384_vm4, 0.0, %v3475_v30  ;;  %v3666_v4 = vmul.f32 %v11999_v18, %v12033_v39 }
 0x6d6   : > { %v3517_v22 = vmul.f32 %v11905_v46, %v3162_v63  ;;  %v3619_v49 = vadd.f32 %v3587_v45, %v3547_v62  ;;  %v3737_v15 = vmul.f32 %v12003_v54, %v3162_v63  ;;  %v3591_v41 = vmul.f32 %v11910_v34, %v11943_v11 }
 0x6d7   : > { %v3625_v42 = vrot.slane %v11943_v11, 1  ;;  %v3200_v33 = vmul.f32 %v11873_v2, %v3162_v63  ;;  %v3476_v37 = vrot.slane %v11958_v40, 7  ;;  %v3519_v9 = vmul.f32 %v11905_v46, %v3480_v60 }
 0x6d8   : > { %v3549_v10 = vadd.f32 %v3517_v22, %v3469_v56  ;;  %v3589_v39 = vmul.f32 %v11910_v34, %v11949_v53  ;;  %v3697_v6 = vadd.f32 %v3665_v61, %v3619_v49  ;;  %v3739_v24 = vmul.f32 %v12003_v54, %v3480_v60 }
 0x6d9   : > { %v3271_v7 = vmul.f32 %v11868_v43, %v11949_v53  ;;  %v3477_v27 = vsel %vm1384_vm4, %v3475_v30, %v3476_v37  ;;  %v3626_v20 = vrot.slane %v11958_v40, 1  ;;  %v3811_v59 = vmul.f32 %v11921_v29, %v11943_v11 }
 0x6da   : > { %v3621_v36 = vadd.f32 %v3589_v39, %v3549_v10  ;;  %v3769_v25 = vadd.f32 %v3737_v15, %v3697_v6  ;;  %v3809_v14 = vmul.f32 %v11921_v29, %v11949_v53  ;;  %v3350_v62 = vrot.slane %v11949_v53, 1 }
 0x6db   : > { %v3303_v56 = vadd.f32 %v3271_v7, %v3200_v33  ;;  %v3627_v45 = vsel %vm3305_vm2, %v3625_v42, %v3626_v20  ;;  %v3113_v63 = vrot.slane %v11967_v28, 7  ;;  %v3520_v30 = vmul.f32 %v11905_v46, %v3477_v27 }
 0x6dc   : > { %v3840_v61 = vadd.f32 %v3809_v14, %v3769_v25  ;;  %v3592_v60 = vmul.f32 %v11910_v34, %v11958_v40  ;;  %v3812_v11 = vmul.f32 %v11921_v29, %v11958_v40  ;;  %v3630_v22 = vsel %vm3305_vm2, %v3626_v20, 0.0 }
 0x6dd   : > { %v3740_v49 = vmul.f32 %v12003_v54, %v3477_v27  ;;  %v3114_v15 = vsel %vm1384_vm4, %v3112_v38, %v3113_v63  ;;  %v3351_v53 = vrot.slane %v11967_v28, 1  ;;  %v3272_v33 = vmul.f32 %v11868_v43, %v11967_v28 }
 0x6de   : > { %v3201_v42 = vmul.f32 %v11873_v2, %v3114_v15  ;;  %v3518_v37 = vmul.f32 %v11905_v46, %v3114_v15  ;;  %v3620_v10 = vadd.f32 %v3588_v3, %v12072_v48  ;;  %v3590_v6 = vmul.f32 %v11910_v34, %v11967_v28 }
 0x6df   : > { %v3352_v39 = vsel %vm3305_vm2, %v3350_v62, %v3351_v53  ;;  %v3400_v40 = vsel %vm3305_vm2, %v3351_v53, 0.0  ;;  %v3738_v38 = vmul.f32 %v12003_v54, %v3114_v15  ;;  %v3669_v46 = vmul.f32 %v11999_v18, %v3627_v45 }
 0x6e0   : > { %v3304_v7 = vadd.f32 %v3272_v33, %v3201_v42  ;;  %v3439_v27 = vmul.f32 %v11889_v32, %v3352_v39  ;;  %v3440_v2 = vmul.f32 %v11889_v32, %v3400_v40  ;;  %v3550_v43 = vadd.f32 %v3518_v37, %v12048_v44 }
 0x6e1   : > { %v3667_v48 = vmul.f32 %v11999_v18, %v3352_v39  ;;  %v3668_v3 = vmul.f32 %v11999_v18, %v3400_v40  ;;  %v3698_v20 = vadd.f32 %v3666_v4, %v3620_v10  ;;  %v3880_v34 = vmul.f32 %v11953_v35, %v3352_v39 }
 0x6e2   : > { %v3471_v25 = vadd.f32 %v3439_v27, %v3303_v56  ;;  %v3472_v14 = vadd.f32 %v3440_v2, %v3304_v7  ;;  %v3622_v62 = vadd.f32 %v3590_v6, %v3550_v43  ;;  %v3810_v53 = vmul.f32 %v11921_v29, %v11967_v28  ;;  %v14546_v2 = vld [vmem:[#allocation92_spill] sm:$0xff] }
 0x6e3   : > { %v3699_v63 = vadd.f32 %v3667_v48, %v3621_v36  ;;  %v3770_v15 = vadd.f32 %v3738_v38, %v3698_v20  ;;  %v3881_v32 = vmul.f32 %v11953_v35, %v3400_v40  ;;  %v12174_v37 = vadd.f32 %v3880_v34, %v3840_v61  ;;  %v14547_v20 = vld [vmem:[#allocation73_spill] sm:$0xff] }
 0x6e4   : > { %v3551_v44 = vadd.f32 %v3519_v9, %v3471_v25  ;;  %v3552_v42 = vadd.f32 %v3520_v30, %v3472_v14  ;;  %v3700_v33 = vadd.f32 %v3668_v3, %v3622_v62  ;;  %v3830_v4 = vadd.f32 %v11978_v52, %v11813_v55 }
 0x6e5   : > { %v3771_v8 = vadd.f32 %v3739_v24, %v3699_v63  ;;  %v3841_v1 = vadd.f32 %v3810_v53, %v3770_v15  ;;  %v12180_v56 = vadd.f32 %v11997_v5, %v11834_v47  ;;  %v3670_v36 = vmul.f32 %v11999_v18, %v3630_v22 }
 0x6e6   : > { %v3623_v10 = vadd.f32 %v3591_v41, %v3551_v44  ;;  %v3624_v28 = vadd.f32 %v3592_v60, %v3552_v42  ;;  %v3772_v39 = vadd.f32 %v3740_v49, %v3700_v33  ;;  %v3882_v9 = vmul.f32 %v11953_v35, %v3627_v45 }
 0x6e7   : > { %v3842_v30 = vadd.f32 %v3811_v59, %v3771_v8  ;;  %v12184_v40 = vadd.f32 %v3881_v32, %v3841_v1  ;;  %v12187_v24 = vadd.f32 %v11989_v16, %v3830_v4  ;;  %v3883_v61 = vmul.f32 %v11953_v35, %v3630_v22  ;;  %v14548_v32 = vld [vmem:[#allocation72_spill] sm:$0xff] }
 0x6e8   : > { %v3701_v55 = vadd.f32 %v3669_v46, %v3623_v10  ;;  %v3702_v52 = vadd.f32 %v3670_v36, %v3624_v28  ;;  %v3843_v6 = vadd.f32 %v3812_v11, %v3772_v39  ;;  %v3978_v47 = vsel %vm1207_vm3, %v12079_v58, 0.0 }
 0x6e9   : > { %v4092_v5 = vadd.f32 %v12105_v23, %v12099_v17  ;;  %v12194_v18 = vadd.f32 %v3882_v9, %v3842_v30  ;;  %v3935_v1 = vmul.f32 %v12187_v24, %v12187_v24  ;;  %v3977_v8 = vadd.f32 %v12092_v50, %v11974_v19 }
 0x6ea   : > { %v4093_v16 = vsel %vm4063_vm5, %v12114_v0, 0.0  ;;  %v12202_v41 = vadd.f32 %v3883_v61, %v3843_v6  ;;  %v3936_v59 = vmul.f32 %v12180_v56, %v12180_v56  ;;  %v3937_v17 = vmul.f32 %v11929_v26, %v11929_v26 }
 0x6eb   : > { %v3979_v58 = vadd.f32 %v3978_v47, %v3977_v8  ;;  %v3980_v23 = vsel %vm1207_vm3, %v12114_v0, 0.0  ;;  %v4094_v45 = vadd.f32 %v4093_v16, %v4092_v5  ;;  %v4095_v60 = vsel %vm4063_vm5, %v3935_v1, 0.0  ;;  %v14549_v16 = vld [vmem:[#allocation74_spill] sm:$0xff] }
 0x6ec   : > { %v3938_v19 = vmul.f32 %v11941_v21, %v11941_v21  ;;  %v3982_v50 = vsel %vm1207_vm3, %v3935_v1, 0.0  ;;  %v4097_v22 = vsel %vm4063_vm5, %v3936_v59, 0.0  ;;  %v3939_v38 = vmul.f32 %v11964_v13, %v11964_v13 }
 0x6ed   : > { %v4096_v11 = vadd.f32 %v4095_v60, %v4094_v45  ;;  %v3981_v49 = vadd.f32 %v3980_v23, %v3979_v58  ;;  %v4099_v7 = vsel %vm4063_vm5, %v3937_v17, 0.0  ;;  %v3940_v0 = vmul.f32 %v14546_v2, %v14546_v2  ;;  %v14550_v58 = vld [vmem:[#allocation75_spill] sm:$0xff] }
 0x6ee   : > { %v4101_v43 = vsel %vm4063_vm5, %v3938_v19, 0.0  ;;  %v3984_v48 = vsel %vm1207_vm3, %v3936_v59, 0.0  ;;  %v3741_v25 = vmul.f32 %v12003_v54, %v14547_v20  ;;  %v4103_v14 = vsel %vm4063_vm5, %v3939_v38, 0.0 }
 0x6ef   : > { %v4098_v27 = vadd.f32 %v4097_v22, %v4096_v11  ;;  %v3983_v46 = vadd.f32 %v3982_v50, %v3981_v49  ;;  %v3941_v62 = vmul.f32 %v12067_v51, %v12067_v51  ;;  %v3986_v34 = vsel %vm1207_vm3, %v3937_v17, 0.0 }
 0x6f0   : > { %v4105_v15 = vsel %vm4063_vm5, %v3940_v0, 0.0  ;;  %v3942_v53 = vmul.f32 %v12087_v12, %v12087_v12  ;;  %v3742_v44 = vmul.f32 %v12003_v54, %v14548_v32  ;;  %v3943_v33 = vmul.f32 %v12101_v57, %v12101_v57 }
 0x6f1   : > { %v4100_v3 = vadd.f32 %v4099_v7, %v4098_v27  ;;  %v3985_v42 = vadd.f32 %v3984_v48, %v3983_v46  ;;  %v4107_v36 = vsel %vm4063_vm5, %v3941_v62, 0.0  ;;  %v3773_v10 = vadd.f32 %v3741_v25, %v3701_v55 }
 0x6f2   : > { %v3813_v28 = vmul.f32 0.0, %v11921_v29  ;;  %v3988_v9 = vsel %vm1207_vm3, %v3938_v19, 0.0  ;;  %v3944_v61 = vmul.f32 %v12109_v31, %v12109_v31  ;;  %v4109_v6 = vsel %vm4063_vm5, %v3942_v53, 0.0 }
 0x6f3   : > { %v4102_v63 = vadd.f32 %v4101_v43, %v4100_v3  ;;  %v3987_v39 = vadd.f32 %v3986_v34, %v3985_v42  ;;  %v3774_v54 = vadd.f32 %v3742_v44, %v3702_v52  ;;  %v3990_v47 = vsel %vm1207_vm3, %v3939_v38, 0.0 }
 0x6f4   : > { %v4111_v5 = vsel %vm4063_vm5, %v3943_v33, 0.0  ;;  %v3844_v8 = vadd.f32 %v3813_v28, %v3773_v10  ;;  %v3884_v55 = vmul.f32 %v11953_v35, %v14549_v16  ;;  %v3945_v29 = vmul.f32 %v12174_v37, %v12174_v37 }
 0x6f5   : > { %v4104_v4 = vadd.f32 %v4103_v14, %v4102_v63  ;;  %v3989_v59 = vadd.f32 %v3988_v9, %v3987_v39  ;;  %v3885_v17 = vmul.f32 %v11953_v35, %v14550_v58  ;;  %v4113_v45 = vsel %vm4063_vm5, %v3944_v61, 0.0 }
 0x6f6   : > { %v3845_v52 = vadd.f32 %v3813_v28, %v3774_v54  ;;  %v3946_v60 = vmul.f32 %v12184_v40, %v12184_v40  ;;  %v3992_v50 = vsel %vm1207_vm3, %v3940_v0, 0.0  ;;  %v12253_v22 = vadd.f32 %v3884_v55, %v3844_v8 }
 0x6f7   : > { %v4106_v30 = vadd.f32 %v4105_v15, %v4104_v4  ;;  %v3991_v19 = vadd.f32 %v3990_v47, %v3989_v59  ;;  %v3947_v49 = vmul.f32 %v12194_v18, %v12194_v18  ;;  %v4115_v38 = vsel %vm4063_vm5, %v3945_v29, 0.0 }
 0x6f8   : > { %v3994_v35 = vsel %vm1207_vm3, %v3941_v62, 0.0  ;;  %v12259_v27 = vadd.f32 %v3885_v17, %v3845_v52  ;;  %v3948_v43 = vmul.f32 %v12202_v41, %v12202_v41  ;;  %v4117_v46 = vsel %vm4063_vm5, %v3946_v60, 0.0 }
 0x6f9   : > { %v4108_v1 = vadd.f32 %v4107_v36, %v4106_v30  ;;  %v3993_v48 = vadd.f32 %v3992_v50, %v3991_v19  ;;  %v3949_v3 = vmul.f32 %v12253_v22, %v12253_v22  ;;  %v4119_v25 = vsel %vm4063_vm5, %v3947_v49, 0.0 }
 0x6fa   : > { %v3996_v34 = vsel %vm1207_vm3, %v3942_v53, 0.0  ;;  %v3950_v62 = vmul.f32 %v12259_v27, %v12259_v27  ;;  %v4121_v15 = vsel %vm4063_vm5, %v3948_v43, 0.0  ;;  %v3998_v44 = vsel %vm1207_vm3, %v3943_v33, 0.0 }
 0x6fb   : > { %v4110_v23 = vadd.f32 %v4109_v6, %v4108_v1  ;;  %v3995_v14 = vadd.f32 %v3994_v35, %v3993_v48  ;;  %v4123_v4 = vsel %vm4063_vm5, %v3949_v3, 0.0  ;;  %v4000_v9 = vsel %vm1207_vm3, %v3944_v61, 0.0 }
 0x6fc   : > { %v4125_v28 = vsel %vm4063_vm5, %v3950_v62, 0.0  ;;  %v4002_v53 = vsel %vm1207_vm3, %v3945_v29, 0.0  ;;  %v4004_v1 = vsel %vm1207_vm3, %v3946_v60, 0.0  ;;  %v4006_v8 = vsel %vm1207_vm3, %v3947_v49, 0.0 }
 0x6fd   : > { %v4112_v11 = vadd.f32 %v4111_v5, %v4110_v23  ;;  %v3997_v36 = vadd.f32 %v3996_v34, %v3995_v14  ;;  %v4010_v29 = vsel %vm1207_vm3, %v3949_v3, 0.0 }
 0x6ff   : > { %v4114_v7 = vadd.f32 %v4113_v45, %v4112_v11  ;;  %v3999_v39 = vadd.f32 %v3998_v44, %v3997_v36  ;;  %v4008_v45 = vsel %vm1207_vm3, %v3948_v43, 0.0  ;;  %v4012_v11 = vsel %vm1207_vm3, %v3950_v62, 0.0 }
 0x701   : > { %v4116_v0 = vadd.f32 %v4115_v38, %v4114_v7  ;;  %v4001_v54 = vadd.f32 %v4000_v9, %v3999_v39 }
 0x703   : > { %v4118_v63 = vadd.f32 %v4117_v46, %v4116_v0  ;;  %v4003_v5 = vadd.f32 %v4002_v53, %v4001_v54 }
 0x705   : > { %v4120_v42 = vadd.f32 %v4119_v25, %v4118_v63  ;;  %v4005_v59 = vadd.f32 %v4004_v1, %v4003_v5 }
 0x707   : > { %v4122_v10 = vadd.f32 %v4121_v15, %v4120_v42  ;;  %v4007_v23 = vadd.f32 %v4006_v8, %v4005_v59  ;;  %v14551_v15 = vld [vmem:[#allocation76_spill] sm:$0xff]  ;;  %v14552_v42 = vld [vmem:[#allocation77_spill] sm:$0xff] }
 0x708   : > { %v14555_v59 = vld [vmem:[#allocation80_spill] sm:$0xff] }
 0x709   : > { %v4124_v30 = vadd.f32 %v4123_v4, %v4122_v10  ;;  %v4009_v19 = vadd.f32 %v4008_v45, %v4007_v23  ;;  %v14556_v23 = vld [vmem:[#allocation81_spill] sm:$0xff] }
 0x70b   : > { %v4126_v6 = vadd.f32 %v4125_v28, %v4124_v30  ;;  %v4011_v50 = vadd.f32 %v4010_v29, %v4009_v19 }
 0x70d   : > { %v4127_v47 = vrot.slane %v4126_v6, 4  ;;  %v4013_v38 = vadd.f32 %v4012_v11, %v4011_v50  ;;  %v14557_v11 = vld [vmem:[#allocation82_spill] sm:$0xff] }
 0x70f   : > { %v4128_v33 = vadd.f32 %v4127_v47, %v4126_v6  ;;  %v4014_v7 = vrot.slane %v4013_v38, 4  ;;  %v14553_v6 = vld [vmem:[#allocation78_spill] sm:$0xff]  ;;  %v14554_v47 = vld [vmem:[#allocation79_spill] sm:$0xff] }
 0x711   : > { %v4129_v55 = vrot.slane %v4128_v33, 2  ;;  %v4015_v43 = vadd.f32 %v4014_v7, %v4013_v38 }
 0x713   : > { %v4130_v17 = vadd.f32 %v4129_v55, %v4128_v33  ;;  %v4016_v25 = vrot.slane %v4015_v43, 2 }
 0x715   : > { %v4131_v52 = vrot.slane %v4130_v17, 1  ;;  %v4017_v14 = vadd.f32 %v4016_v25, %v4015_v43  ;;  %v14560_v43 = vld [vmem:[#allocation85_spill] sm:$0xff] }
 0x717   : > { %v4132_v61 = vadd.f32 %v4131_v52, %v4130_v17  ;;  %v4018_v3 = vrot.slane %v4017_v14, 1 }
 0x719   : > { %8533 = vrsqrt.f32 %v4132_v61  ;;  %vm4135_vm6 = vcmp.eq.f32.partialorder %v4132_v61, inf  ;;  %v4138_v49 = vand.u32 2147483648, %v4132_v61  ;;  %vm4137_vm7 = vcmp.eq.f32.partialorder %v4132_v61, 0.0 }
 0x71a   : > { %v4019_v53 = vadd.f32 %v4018_v3, %v4017_v14 }
 0x71c   : > { %vm4022_vm8 = vcmp.eq.f32.partialorder %v4019_v53, inf  ;;  %vm4024_vm9 = vcmp.eq.f32.partialorder %v4019_v53, 0.0 }
 0x723   : > { %v8534_v60 = vpop.eup %8533 }
 0x724   : > { %v4134_v35 = vmul.f32 %v8534_v60, %v4132_v61 }
 0x726   : > { %v4136_v46 = vsel %vm4135_vm6, %v4132_v61, %v4134_v35  ;;  %v14558_v35 = vld [vmem:[#allocation83_spill] sm:$0xff] }
 0x727   : > { %v4139_v48 = vsel %vm4137_vm7, %v4138_v49, %v4136_v46 }
 0x728   : > { %v4140_v0 = vmax.f32 %v4139_v48, 1e-12  ;;  %v14559_v48 = vld [vmem:[#allocation84_spill] sm:$0xff] }
 0x72a   : > { %8535 = vrcp.f32 %v4140_v0 }
 0x72b   : > { %8537 = vrsqrt.f32 %v4019_v53 }
 0x734   : > { %v12281_v34 = vpop.eup %8535 }
 0x735   : > { %v4159_v63 = vmul.f32 %v12281_v34, %v12187_v24  ;;  %v4160_v62 = vmul.f32 %v12281_v34, %v12180_v56  ;;  %v4143_v44 = vmul.f32 %v12281_v34, %v14551_v15  ;;  %v4144_v4 = vmul.f32 %v12281_v34, %v14552_v42  ;;  %v8538_v14 = vpop.eup %8537 }
 0x736   : > { %v4161_v36 = vmul.f32 %v12281_v34, %v11929_v26  ;;  %v4162_v10 = vmul.f32 %v12281_v34, %v11941_v21  ;;  %v4163_v9 = vmul.f32 %v12281_v34, %v11964_v13  ;;  %v4164_v30 = vmul.f32 %v12281_v34, %v14546_v2 }
 0x737   : > { %v4199_v28 = vpack.c.bf16 %v4160_v62, %v4159_v63  ;;  %v4191_v39 = vpack.c.bf16 %v4144_v4, %v4143_v44  ;;  %v4145_v54 = vmul.f32 %v12281_v34, %v14553_v6  ;;  %v4146_v5 = vmul.f32 %v12281_v34, %v14554_v47 }
 0x738   : > { %v4200_v1 = vpack.c.bf16 %v4162_v10, %v4161_v36  ;;  %v4201_v33 = vpack.c.bf16 %v4164_v30, %v4163_v9  ;;  %v4165_v8 = vmul.f32 %v12281_v34, %v12067_v51  ;;  %v4166_v55 = vmul.f32 %v12281_v34, %v12087_v12  ;;  %v14561_v10 = vld [vmem:[#allocation86_spill] sm:$0xff]  ;;  %v14562_v9 = vld [vmem:[#allocation87_spill] sm:$0xff] }
 0x739   : > { %4271 = vrot.lane.b32.xlu1 %v4199_v28, %s9247_s17  ;;  %4255 = vrot.lane.b32.xlu0 %v4191_v39, %s9247_s17  ;;  %v4147_v17 = vmul.f32 %v12281_v34, %v14555_v59  ;;  %v4148_v45 = vmul.f32 %v12281_v34, %v14556_v23  ;;  %v4192_v52 = vpack.c.bf16 %v4146_v5, %v4145_v54 }
 0x73a   : > { %v4202_v61 = vpack.c.bf16 %v4166_v55, %v4165_v8  ;;  %v4167_v19 = vmul.f32 %v12281_v34, %v12101_v57  ;;  %v4168_v29 = vmul.f32 %v12281_v34, %v12109_v31  ;;  %v4149_v38 = vmul.f32 %v12281_v34, %v14557_v11 }
 0x73b   : > { %v4193_v50 = vpack.c.bf16 %v4148_v45, %v4147_v17  ;;  %v4150_v7 = vmul.f32 %v12281_v34, %v14558_v35  ;;  %v4169_v49 = vmul.f32 %v12281_v34, %v12174_v37  ;;  %v4170_v46 = vmul.f32 %v12281_v34, %v12184_v40  ;;  %v14563_v17 = vld [vmem:[#allocation88_spill] sm:$0xff] }
 0x73c   : > { %v4203_v60 = vpack.c.bf16 %v4168_v29, %v4167_v19  ;;  %v4151_v0 = vmul.f32 %v12281_v34, %v14559_v48  ;;  %v4152_v25 = vmul.f32 %v12281_v34, %v14560_v43  ;;  %v4171_v62 = vmul.f32 %v12281_v34, %v12194_v18 }
 0x73d   : > { %4273 = vrot.lane.b32.xlu1 %v4200_v1, %s9247_s17  ;;  %4275 = vrot.lane.b32.xlu0 %v4201_v33, %s9247_s17  ;;  %v4194_v3 = vpack.c.bf16 %v4150_v7, %v4149_v38  ;;  %v4204_v63 = vpack.c.bf16 %v4170_v46, %v4169_v49  ;;  %v4172_v44 = vmul.f32 %v12281_v34, %v12202_v41  ;;  %v4025_v33 = vand.u32 2147483648, %v4019_v53 }
 0x73e   : > { %v4021_v4 = vmul.f32 %v8538_v14, %v4019_v53  ;;  %v4195_v36 = vpack.c.bf16 %v4152_v25, %v4151_v0  ;;  %v4153_v28 = vmul.f32 %v12281_v34, %v14561_v10  ;;  %v4154_v30 = vmul.f32 %v12281_v34, %v14562_v9 }
 0x73f   : > { %v4205_v39 = vpack.c.bf16 %v4172_v44, %v4171_v62  ;;  %v4173_v54 = vmul.f32 %v12281_v34, %v12253_v22  ;;  %v4174_v5 = vmul.f32 %v12281_v34, %v12259_v27  ;;  %v4155_v45 = vmul.f32 %v12281_v34, %v14563_v17 }
 0x740   : > { %v4023_v1 = vsel %vm4022_vm8, %v4019_v53, %v4021_v4  ;;  %v4196_v8 = vpack.c.bf16 %v4154_v30, %v4153_v28  ;;  %v4028_v0 = vstv %s3918_s19 }
 0x741   : > { %4257 = vrot.lane.b32.xlu1 %v4192_v52, %s9247_s17  ;;  %4277 = vrot.lane.b32.xlu0 %v4202_v61, %s9247_s17  ;;  %v4206_v55 = vpack.c.bf16 %v4174_v5, %v4173_v54  ;;  %v14564_v52 = vld [vmem:[#allocation89_spill] sm:$0xff]  ;;  %v4026_v19 = vsel %vm4024_vm9, %v4025_v33, %v4023_v1 }
 0x742   : > { %v4156_v61 = vmul.f32 %v12281_v34, %v14564_v52  ;;  %v4027_v49 = vmax.f32 %v4026_v19, 1e-12 }
 0x744   : > { %v4197_v29 = vpack.c.bf16 %v4156_v61, %v4155_v45  ;;  %8539 = vrcp.f32 %v4027_v49 }
 0x745   : > { %4259 = vrot.lane.b32.xlu1 %v4193_v50, %s9247_s17  ;;  %4279 = vrot.lane.b32.xlu0 %v4203_v60, %s9247_s17  ;;  %v14565_v50 = vld [vmem:[#allocation90_spill] sm:$0xff]  ;;  %v14566_v60 = vld [vmem:[#allocation91_spill] sm:$0xff] }
 0x746   : > { %v4157_v38 = vmul.f32 %v12281_v34, %v14565_v50  ;;  %v4158_v7 = vmul.f32 %v12281_v34, %v14566_v60 }
 0x748   : > { %v4198_v46 = vpack.c.bf16 %v4158_v7, %v4157_v38 }
 0x749   : > { %4261 = vrot.lane.b32.xlu1 %v4194_v3, %s9247_s17  ;;  %4281 = vrot.lane.b32.xlu0 %v4204_v63, %s9247_s17 }
 0x74d   : > { %4263 = vrot.lane.b32.xlu1 %v4195_v36, %s9247_s17  ;;  %4283 = vrot.lane.b32.xlu0 %v4205_v39, %s9247_s17 }
 0x74e   : > { %v8540_v53 = vpop.eup %8539 }
 0x74f   : > { %v4030_v25 = vmul.f32 %v8540_v53, %v4028_v0 }
 0x751   : > { %4265 = vrot.lane.b32.xlu1 %v4196_v8, %s9247_s17  ;;  %4285 = vrot.lane.b32.xlu0 %v4206_v55, %s9247_s17  ;;  %v4047_v14 = vmul.f32 %v4030_v25, %v12187_v24  ;;  %v4048_v3 = vmul.f32 %v4030_v25, %v12180_v56  ;;  %v4049_v62 = vmul.f32 %v4030_v25, %v11929_v26 }
 0x752   : > { %v4050_v34 = vmul.f32 %v4030_v25, %v11941_v21  ;;  %v4051_v4 = vmul.f32 %v4030_v25, %v11964_v13  ;;  %v4052_v36 = vmul.f32 %v4030_v25, %v14546_v2  ;;  %v4053_v39 = vmul.f32 %v4030_v25, %v12067_v51 }
 0x753   : > { %v4183_v63 = vpack.c.bf16 %v4048_v3, %v4047_v14  ;;  %v4054_v30 = vmul.f32 %v4030_v25, %v12087_v12  ;;  %v4031_v54 = vmul.f32 %v4030_v25, %v14551_v15  ;;  %v4032_v5 = vmul.f32 %v4030_v25, %v14552_v42 }
 0x754   : > { %v4184_v44 = vpack.c.bf16 %v4050_v34, %v4049_v62  ;;  %v4185_v28 = vpack.c.bf16 %v4052_v36, %v4051_v4  ;;  %v4055_v33 = vmul.f32 %v4030_v25, %v12101_v57  ;;  %v4056_v8 = vmul.f32 %v4030_v25, %v12109_v31 }
 0x755   : > { %4267 = vrot.lane.b32.xlu1 %v4197_v29, %s9247_s17  ;;  %v4186_v1 = vpack.c.bf16 %v4054_v30, %v4053_v39  ;;  %v4175_v55 = vpack.c.bf16 %v4032_v5, %v4031_v54  ;;  %v4033_v45 = vmul.f32 %v4030_v25, %v14553_v6  ;;  %v4034_v61 = vmul.f32 %v4030_v25, %v14554_v47 }
 0x756   : > { %v4187_v19 = vpack.c.bf16 %v4056_v8, %v4055_v33  ;;  %v4057_v29 = vmul.f32 %v4030_v25, %v12174_v37  ;;  %v4058_v38 = vmul.f32 %v4030_v25, %v12184_v40  ;;  %v4035_v49 = vmul.f32 %v4030_v25, %v14555_v59 }
 0x757   : > { %v4176_v7 = vpack.c.bf16 %v4034_v61, %v4033_v45  ;;  %v4059_v0 = vmul.f32 %v4030_v25, %v12194_v18  ;;  %v4060_v14 = vmul.f32 %v4030_v25, %v12202_v41  ;;  %v4038_v62 = vmul.f32 %v4030_v25, %v14558_v35 }
 0x758   : > { %v4188_v53 = vpack.c.bf16 %v4058_v38, %v4057_v29  ;;  %v4062_v4 = vmul.f32 %v4030_v25, %v12259_v27  ;;  %v4040_v39 = vmul.f32 %v4030_v25, %v14560_v43  ;;  %v4041_v5 = vmul.f32 %v4030_v25, %v14561_v10 }
 0x759   : > { %4269 = vrot.lane.b32.xlu1 %v4198_v46, %s9247_s17  ;;  %v4036_v46 = vmul.f32 %v4030_v25, %v14556_v23  ;;  %v4189_v34 = vpack.c.bf16 %v4060_v14, %v4059_v0  ;;  %v4043_v8 = vmul.f32 %v4030_v25, %v14563_v17  ;;  %v4045_v61 = vmul.f32 %v4030_v25, %v14565_v50  ;;  %s9121_s17 = scalar_lea.vmem %s9120_s11, 256 }
 0x75a   : > { %p9123_p3 = scmp.lt.s32.totalorder %s9121_s17, %s9115_s2 }
 0x75b   : > { %v4177_v3 = vpack.c.bf16 %v4036_v46, %v4035_v49 }
 0x75c   : > { %p9124_p7 = por %p9123_p3, %p9122_p1 }
 0x75e   : > { %p9125_p2 = pnand %p9124_p7, %p9118_p13 }
 0x76f   : > { %4223 = vxpose.xlu0.c.b16.start [1/8] (narrow) %v4183_v63, 16  ;;  %v4037_v63 = vmul.f32 %v4030_v25, %v14557_v11 }
 0x771   : > { %v4178_v36 = vpack.c.bf16 %v4038_v62, %v4037_v63 }
 0x773   : > { %4224 = vxpose.xlu0.c.b16.cont [2/8] (narrow) %v4184_v44, 16  ;;  %v4061_v44 = vmul.f32 %v4030_v25, %v12253_v22 }
 0x775   : > { %v4190_v30 = vpack.c.bf16 %v4062_v4, %v4061_v44 }
 0x777   : > { %4225 = vxpose.xlu0.c.b16.cont [3/8] (narrow) %v4185_v28, 16  ;;  %v4039_v28 = vmul.f32 %v4030_v25, %v14559_v48 }
 0x779   : > { %v4179_v54 = vpack.c.bf16 %v4040_v39, %v4039_v28 }
 0x77b   : > { %4226 = vxpose.xlu0.c.b16.cont [4/8] (narrow) %v4186_v1, 16  ;;  %v4042_v1 = vmul.f32 %v4030_v25, %v14562_v9 }
 0x77c   : > { %4207 = vxpose.xlu1.c.b16.start [1/8] (narrow) %v4175_v55, 16  ;;  %v4044_v55 = vmul.f32 %v4030_v25, %v14564_v52 }
 0x77d   : > { %v4180_v33 = vpack.c.bf16 %v4042_v1, %v4041_v5 }
 0x77e   : > { %v4181_v45 = vpack.c.bf16 %v4044_v55, %v4043_v8 }
 0x77f   : > { %4227 = vxpose.xlu0.c.b16.cont [5/8] (narrow) %v4187_v19, 16  ;;  %v4046_v19 = vmul.f32 %v4030_v25, %v14566_v60 }
 0x780   : > { %4208 = vxpose.xlu1.c.b16.cont [2/8] (narrow) %v4176_v7, 16 }
 0x781   : > { %v4182_v29 = vpack.c.bf16 %v4046_v19, %v4045_v61  ;;  %v4357_v61 = vpack.c.bf16 %v14556_v23, %v14555_v59  ;;  %v4359_v19 = vpack.c.bf16 %v14560_v43, %v14559_v48  ;;  %v4367_v59 = vpack.c.bf16 %v12109_v31, %v12101_v57 }
 0x782   : > { %v4369_v23 = vpack.c.bf16 %v12202_v41, %v12194_v18  ;;  %v4356_v57 = vpack.c.bf16 %v14554_v47, %v14553_v6  ;;  %v4358_v31 = vpack.c.bf16 %v14558_v35, %v14557_v11  ;;  %v4360_v18 = vpack.c.bf16 %v14562_v9, %v14561_v10  ;;  %v4648_v10 = vld [vmem:[#allocation18] sm:$0x3] }
 0x783   : > { %4228 = vxpose.xlu0.c.b16.cont [6/8] (narrow) %v4188_v53, 16  ;;  %v4362_v41 = vpack.c.bf16 %v14566_v60, %v14565_v50  ;;  %v4364_v6 = vpack.c.bf16 %v11941_v21, %v11929_v26  ;;  %v4366_v47 = vpack.c.bf16 %v12087_v12, %v12067_v51  ;;  %v4368_v11 = vpack.c.bf16 %v12184_v40, %v12174_v37 }
 0x784   : > { %4209 = vxpose.xlu1.c.b16.cont [3/8] (narrow) %v4177_v3, 16  ;;  %v4370_v35 = vpack.c.bf16 %v12259_v27, %v12253_v22  ;;  %8050 = vmatprep.subr.msk.bf16.mxu0 %vm2871_vm1, %v4648_v10  ;;  %v4698_v26 = vsel %vm2871_vm1, %v4648_v10, 0 }
 0x785   : > { %7946 = vmatpush3.bf16.msra.mxu0 %v4698_v26 }
 0x787   : > { %4229 = vxpose.xlu0.c.b16.cont [7/8] (narrow) %v4189_v34, 16 }
 0x788   : > { %4210 = vxpose.xlu1.c.b16.cont [4/8] (narrow) %v4178_v36, 16 }
 0x78b   : > { %4230 = vxpose.xlu0.c.b16.end [8/8] (narrow) %v4190_v30, 16 }
 0x78c   : > { %4211 = vxpose.xlu1.c.b16.cont [5/8] (narrow) %v4179_v54, 16 }
 0x790   : > { %4212 = vxpose.xlu1.c.b16.cont [6/8] (narrow) %v4180_v33, 16 }
 0x794   : > { %4213 = vxpose.xlu1.c.b16.cont [7/8] (narrow) %v4181_v45, 16  ;;  %v4355_v45 = vpack.c.bf16 %v14552_v42, %v14551_v15  ;;  %v4363_v15 = vpack.c.bf16 %v12180_v56, %v12187_v24  ;;  %v4365_v42 = vpack.c.bf16 %v14546_v2, %v11964_v13 }
 0x798   : > { %4214 = vxpose.xlu1.c.b16.end [8/8] (narrow) %v4182_v29, 16  ;;  %v4361_v29 = vpack.c.bf16 %v14564_v52, %v14563_v17 }
 0x7ab   : > { %v4272_v38 = vpop.permute.xlu1 %4271  ;;  %v4256_v7 = vpop.permute.xlu0 %4255 }
 0x7ac   : > { %7745 = vmatprep.subr.bf16.mxu1 %v4272_v38 }
 0x7ad   : > { %7746 = vmatpush3.bf16.msra.mxu1 %v4256_v7 }
 0x7af   : > { %v4274_v49 = vpop.permute.xlu1 %4273  ;;  %v4276_v46 = vpop.permute.xlu0 %4275 }
 0x7b0   : > { %7747 = vmatprep.subr.bf16.mxu1 %v4274_v49 }
 0x7b3   : > { %v4258_v53 = vpop.permute.xlu1 %4257  ;;  %v4278_v0 = vpop.permute.xlu0 %4277 }
 0x7b4   : > { %7748 = vmatpush3.bf16.msra.mxu1 %v4258_v53 }
 0x7b5   : > { %7749 = vmatprep.subr.bf16.mxu1 %v4276_v46 }
 0x7b7   : > { %v4260_v14 = vpop.permute.xlu1 %4259  ;;  %v4280_v3 = vpop.permute.xlu0 %4279 }
 0x7b8   : > { %7750 = vmatpush3.bf16.msra.mxu1 %v4260_v14 }
 0x7b9   : > { %7751 = vmatprep.subr.bf16.mxu1 %v4278_v0 }
 0x7bb   : > { %v4262_v63 = vpop.permute.xlu1 %4261  ;;  %v4282_v25 = vpop.permute.xlu0 %4281 }
 0x7bc   : > { %7752 = vmatpush3.bf16.msra.mxu1 %v4262_v63 }
 0x7bd   : > { %7753 = vmatprep.subr.bf16.mxu1 %v4280_v3 }
 0x7bf   : > { %v4264_v62 = vpop.permute.xlu1 %4263  ;;  %v4284_v34 = vpop.permute.xlu0 %4283 }
 0x7c0   : > { %7754 = vmatpush3.bf16.msra.mxu1 %v4264_v62 }
 0x7c1   : > { %7755 = vmatprep.subr.bf16.mxu1 %v4282_v25 }
 0x7c3   : > { %v4266_v44 = vpop.permute.xlu1 %4265  ;;  %v4286_v36 = vpop.permute.xlu0 %4285 }
 0x7c4   : > { %7756 = vmatpush3.bf16.msra.mxu1 %v4266_v44 }
 0x7c5   : > { %7757 = vmatprep.subr.bf16.mxu1 %v4284_v34 }
 0x7c7   : > { %v4268_v4 = vpop.permute.xlu1 %4267 }
 0x7c8   : > { %7758 = vmatpush3.bf16.msra.mxu1 %v4268_v4 }
 0x7c9   : > { %7759 = vmatprep.subr.bf16.mxu1 %v4286_v36 }
 0x7cb   : > { %v4270_v28 = vpop.permute.xlu1 %4269 }
 0x7cc   : > { %7760 = vmatpush3.bf16.msra.mxu1 %v4270_v28 }
 0x7d5   : > { %v4231_v39 = vpop.trf.xlu0 }
 0x7d6   : > { %4335 = vmatprep.mubr.bf16.mxu1 %v4231_v39 }
 0x7e2   : > { %v4215_v30 = vpop.trf.xlu1 }
 0x7e3   : > { %4336 = vmatmul.mubr.bf16.vlgmr.msra.gmra.mrb[32].mxu1 %v4215_v30 }
 0x8b6   : > { %v7761_v54 = vpop.f32.mrb[32].mxu1 }
 0x8b7   : > { %v7762_v5 = vpop.f32.mrb[33].mxu1 }
 0x8b8   : > { %v7763_v1 = vadd.f32 %v7762_v5, %v7761_v54  ;;  %v7764_v33 = vpop.f32.mrb[34].mxu1 }
 0x8b9   : > { %v7765_v8 = vpop.f32.mrb[35].mxu1 }
 0x8ba   : > { %v4344_v55 = vsel %vm4343_vm10, %v7763_v1, -inf }
 0x8bb   : > { %4345 = vmax.xlane.f32.xlu0 %v4344_v55 }
 0x8d1   : > { %4388 = vrot.lane.b32.xlu0 %v4355_v45, %s9248_s30 }
 0x8d5   : > { %4392 = vrot.lane.b32.xlu0 %v4357_v61, %s9248_s30 }
 0x8d9   : > { %4396 = vrot.lane.b32.xlu0 %v4359_v19, %s9248_s30 }
 0x8dd   : > { %4400 = vrot.lane.b32.xlu0 %v4361_v29, %s9248_s30 }
 0x8e1   : > { %4404 = vrot.lane.b32.xlu0 %v4363_v15, %s9248_s30 }
 0x8e5   : > { %4408 = vrot.lane.b32.xlu0 %v4365_v42, %s9248_s30 }
 0x8e9   : > { %4412 = vrot.lane.b32.xlu0 %v4367_v59, %s9248_s30 }
 0x8ed   : > { %4416 = vrot.lane.b32.xlu0 %v4369_v23, %s9248_s30 }
 0x948   : > { %v4346_v48 = vpop.xlane.xlu0 %4345 }
 0x949   : > { %v4347_v43 = vsub.f32 %v7763_v1, %v4346_v48 }
 0x94b   : > { %v4348_v56 = vmul.f32 1.442695, %v4347_v43 }
 0x94c   : > { %v4389_v24 = vpop.permute.xlu0 %4388 }
 0x94d   : > { %8541 = vpow2.f32 %v4348_v56  ;;  %7913 = vmatprep.mubr.msk.bf16.mxu1 %vm1207_vm3, %v4389_v24 }
 0x950   : > { %v4393_v22 = vpop.permute.xlu0 %4392 }
 0x954   : > { %v4397_v17 = vpop.permute.xlu0 %4396 }
 0x957   : > { %v8542_v13 = vpop.eup %8541 }
 0x958   : > { %v4350_v2 = vsel %vm4343_vm10, %v8542_v13, 0.0  ;;  %v4401_v50 = vpop.permute.xlu0 %4400 }
 0x959   : > { %4351 = vadd.xlane.f32.xlu1 %v4350_v2 }
 0x95c   : > { %v4405_v38 = vpop.permute.xlu0 %4404 }
 0x960   : > { %v4409_v49 = vpop.permute.xlu0 %4408 }
 0x964   : > { %v4413_v53 = vpop.permute.xlu0 %4412 }
 0x968   : > { %v4417_v14 = vpop.permute.xlu0 %4416 }
 0x96a   : > { %4390 = vrot.lane.b32.xlu1 %v4356_v57, %s9248_s30 }
 0x96e   : > { %4394 = vrot.lane.b32.xlu1 %v4358_v31, %s9248_s30 }
 0x972   : > { %4398 = vrot.lane.b32.xlu1 %v4360_v18, %s9248_s30 }
 0x976   : > { %4402 = vrot.lane.b32.xlu1 %v4362_v41, %s9248_s30 }
 0x97a   : > { %4406 = vrot.lane.b32.xlu1 %v4364_v6, %s9248_s30 }
 0x97e   : > { %4410 = vrot.lane.b32.xlu1 %v4366_v47, %s9248_s30 }
 0x982   : > { %4414 = vrot.lane.b32.xlu1 %v4368_v11, %s9248_s30 }
 0x986   : > { %4418 = vrot.lane.b32.xlu1 %v4370_v35, %s9248_s30 }
 0x9e6   : > { %v4352_v21 = vpop.xlane.xlu1 %4351 }
 0x9e7   : > { %8543 = vrcp.f32 %v4352_v21 }
 0x9ea   : > { %v4391_v40 = vpop.permute.xlu1 %4390 }
 0x9ee   : > { %v4395_v27 = vpop.permute.xlu1 %4394 }
 0x9f1   : > { %v8544_v51 = vpop.eup %8543 }
 0x9f2   : > { %v4354_v12 = vmul.f32 %v8544_v51, %v8542_v13  ;;  %v4399_v52 = vpop.permute.xlu1 %4398 }
 0x9f4   : > { %v4371_v9 = vpack.c.bf16 %v4354_v12, %v4354_v12 }
 0x9f6   : > { %8049 = vmatprep.subr.msk.bf16.mxu1 %vm1207_vm3, %v4371_v9  ;;  %v4469_v37 = vsel %vm1207_vm3, %v4371_v9, 0  ;;  %v4403_v60 = vpop.permute.xlu1 %4402 }
 0x9f7   : > { %7912 = vmatpush3.bf16.xpose.msra.mxu1 %v4469_v37 }
 0x9fa   : > { %v4407_v7 = vpop.permute.xlu1 %4406 }
 0x9fe   : > { %7914 = vmatmul.mubr.msk.bf16.vlgmr.msra.gmra.mrb[36].mxu1 %vm1207_vm3, %v4391_v40  ;;  %v4411_v46 = vpop.permute.xlu1 %4410 }
 0x9ff   : > { %7917 = vmatprep.mubr.msk.bf16.mxu1 %vm1207_vm3, %v4393_v22 }
 0xa02   : > { %v4415_v0 = vpop.permute.xlu1 %4414 }
 0xa06   : > { %7918 = vmatmul.mubr.msk.bf16.gmra.mrb[40].mxu1 %vm1207_vm3, %v4395_v27  ;;  %v4419_v3 = vpop.permute.xlu1 %4418 }
 0xa07   : > { %7921 = vmatprep.mubr.msk.bf16.mxu1 %vm1207_vm3, %v4397_v17 }
 0xa0e   : > { %7922 = vmatmul.mubr.msk.bf16.gmra.mrb[44].mxu1 %vm1207_vm3, %v4399_v52 }
 0xa0f   : > { %7925 = vmatprep.mubr.msk.bf16.mxu1 %vm1207_vm3, %v4401_v50  ;;  %v14567_v50 = vld [vmem:[#allocation40_spill] sm:$0xff] }
 0xa16   : > { %7926 = vmatmul.mubr.msk.bf16.gmra.mrb[48].mxu1 %vm1207_vm3, %v4403_v60 }
 0xa17   : > { %7929 = vmatprep.mubr.msk.bf16.mxu1 %vm1207_vm3, %v4405_v38 }
 0xa1e   : > { %7930 = vmatmul.mubr.msk.bf16.gmra.mrb[52].mxu1 %vm1207_vm3, %v4407_v7 }
 0xa1f   : > { %7933 = vmatprep.mubr.msk.bf16.mxu1 %vm1207_vm3, %v4409_v49  ;;  %v14569_v49 = vld [vmem:[#allocation41_spill] sm:$0xff] }
 0xa26   : > { %7934 = vmatmul.mubr.msk.bf16.gmra.mrb[56].mxu1 %vm1207_vm3, %v4411_v46 }
 0xa27   : > { %7937 = vmatprep.mubr.msk.bf16.mxu1 %vm1207_vm3, %v4413_v53  ;;  %v14571_v53 = vld [vmem:[#allocation42_spill] sm:$0xff] }
 0xa2e   : > { %7938 = vmatmul.mubr.msk.bf16.gmra.mrb[60].mxu1 %vm1207_vm3, %v4415_v0 }
 0xa2f   : > { %7941 = vmatprep.mubr.msk.bf16.mxu1 %vm1207_vm3, %v4417_v14 }
 0xa36   : > { %7942 = vmatmul.mubr.msk.bf16.gmra.mrb[64].mxu1 %vm1207_vm3, %v4419_v3 }
 0xad1   : > { %v7915_v63 = vpop.f32.mrb[36].mxu1 }
 0xad2   : > { %v4505_v25 = vpop.f32.mrb[37].mxu1 }
 0xad3   : > { %v7916_v62 = vpop.f32.mrb[38].mxu1 }
 0xad4   : > { %v4633_v34 = vpack.c.bf16 %v7916_v62, %v7915_v63  ;;  %v4508_v44 = vpop.f32.mrb[39].mxu1  ;;  %v14573_v63 = vld [vmem:[#allocation43_spill] sm:$0xff] }
 0xad5   : > { %v4632_v4 = vpack.c.bf16 %v4508_v44, %v4505_v25 }
 0xad7   : > { %7947 = vmatprep.mubr.msk.bf16.mxu0 %vm1207_vm3, %v4632_v4  ;;  %v14575_v4 = vld [vmem:[#allocation44_spill] sm:$0xff] }
 0xad8   : > { %7948 = vmatmul.mubr.msk.bf16.vlgmr.msra.gmra.mrb[32].mxu0 %vm1207_vm3, %v4633_v34 }
 0xad9   : > { %v7919_v36 = vpop.f32.mrb[40].mxu1 }
 0xada   : > { %v4521_v28 = vpop.f32.mrb[41].mxu1 }
 0xadb   : > { %v7920_v39 = vpop.f32.mrb[42].mxu1 }
 0xadc   : > { %v4635_v30 = vpack.c.bf16 %v7920_v39, %v7919_v36  ;;  %v4524_v54 = vpop.f32.mrb[43].mxu1 }
 0xadd   : > { %v4634_v5 = vpack.c.bf16 %v4524_v54, %v4521_v28 }
 0xadf   : > { %7951 = vmatprep.mubr.msk.bf16.mxu0 %vm1207_vm3, %v4634_v5  ;;  %v14579_v5 = vld [vmem:[#allocation46_spill] sm:$0xff] }
 0xae0   : > { %7952 = vmatmul.mubr.msk.bf16.gmra.mrb[36].mxu0 %vm1207_vm3, %v4635_v30  ;;  %v14577_v30 = vld [vmem:[#allocation45_spill] sm:$0xff] }
 0xae1   : > { %v7923_v1 = vpop.f32.mrb[44].mxu1 }
 0xae2   : > { %v4537_v33 = vpop.f32.mrb[45].mxu1 }
 0xae3   : > { %v7924_v8 = vpop.f32.mrb[46].mxu1 }
 0xae4   : > { %v4637_v55 = vpack.c.bf16 %v7924_v8, %v7923_v1  ;;  %v4540_v45 = vpop.f32.mrb[47].mxu1 }
 0xae5   : > { %v4636_v61 = vpack.c.bf16 %v4540_v45, %v4537_v33 }
 0xae7   : > { %7955 = vmatprep.mubr.msk.bf16.mxu0 %vm1207_vm3, %v4636_v61 }
 0xae8   : > { %7956 = vmatmul.mubr.msk.bf16.gmra.mrb[40].mxu0 %vm1207_vm3, %v4637_v55  ;;  %v14581_v55 = vld [vmem:[#allocation47_spill] sm:$0xff] }
 0xae9   : > { %v7927_v19 = vpop.f32.mrb[48].mxu1 }
 0xaea   : > { %v4553_v29 = vpop.f32.mrb[49].mxu1 }
 0xaeb   : > { %v7928_v15 = vpop.f32.mrb[50].mxu1 }
 0xaec   : > { %v4639_v42 = vpack.c.bf16 %v7928_v15, %v7927_v19  ;;  %v4556_v59 = vpop.f32.mrb[51].mxu1 }
 0xaed   : > { %v4638_v23 = vpack.c.bf16 %v4556_v59, %v4553_v29 }
 0xaef   : > { %7959 = vmatprep.mubr.msk.bf16.mxu0 %vm1207_vm3, %v4638_v23 }
 0xaf0   : > { %7960 = vmatmul.mubr.msk.bf16.gmra.mrb[44].mxu0 %vm1207_vm3, %v4639_v42  ;;  %v14583_v42 = vld [vmem:[#allocation48_spill] sm:$0xff] }
 0xaf1   : > { %v7931_v48 = vpop.f32.mrb[52].mxu1 }
 0xaf2   : > { %v4569_v43 = vpop.f32.mrb[53].mxu1 }
 0xaf3   : > { %v7932_v56 = vpop.f32.mrb[54].mxu1 }
 0xaf4   : > { %v4641_v24 = vpack.c.bf16 %v7932_v56, %v7931_v48  ;;  %v4572_v13 = vpop.f32.mrb[55].mxu1 }
 0xaf5   : > { %v4640_v2 = vpack.c.bf16 %v4572_v13, %v4569_v43  ;;  %v14585_v43 = vld [vmem:[#allocation49_spill] sm:$0xff] }
 0xaf7   : > { %7963 = vmatprep.mubr.msk.bf16.mxu0 %vm1207_vm3, %v4640_v2 }
 0xaf8   : > { %7964 = vmatmul.mubr.msk.bf16.gmra.mrb[48].mxu0 %vm1207_vm3, %v4641_v24  ;;  %v14587_v24 = vld [vmem:[#allocation50_spill] sm:$0xff] }
 0xaf9   : > { %v7935_v57 = vpop.f32.mrb[56].mxu1 }
 0xafa   : > { %v4585_v31 = vpop.f32.mrb[57].mxu1 }
 0xafb   : > { %v7936_v18 = vpop.f32.mrb[58].mxu1 }
 0xafc   : > { %v4643_v41 = vpack.c.bf16 %v7936_v18, %v7935_v57  ;;  %v4588_v6 = vpop.f32.mrb[59].mxu1 }
 0xafd   : > { %v4642_v47 = vpack.c.bf16 %v4588_v6, %v4585_v31  ;;  %v14589_v31 = vld [vmem:[#allocation51_spill] sm:$0xff] }
 0xaff   : > { %7967 = vmatprep.mubr.msk.bf16.mxu0 %vm1207_vm3, %v4642_v47 }
 0xb00   : > { %7968 = vmatmul.mubr.msk.bf16.gmra.mrb[52].mxu0 %vm1207_vm3, %v4643_v41 }
 0xb01   : > { %v7939_v11 = vpop.f32.mrb[60].mxu1 }
 0xb02   : > { %v4601_v35 = vpop.f32.mrb[61].mxu1 }
 0xb03   : > { %v7940_v10 = vpop.f32.mrb[62].mxu1 }
 0xb04   : > { %v4645_v26 = vpack.c.bf16 %v7940_v10, %v7939_v11  ;;  %v4604_v21 = vpop.f32.mrb[63].mxu1 }
 0xb05   : > { %v4644_v51 = vpack.c.bf16 %v4604_v21, %v4601_v35  ;;  %v14591_v35 = vld [vmem:[#allocation52_spill] sm:$0xff] }
 0xb07   : > { %7971 = vmatprep.mubr.msk.bf16.mxu0 %vm1207_vm3, %v4644_v51  ;;  %v14593_v51 = vld [vmem:[#allocation53_spill] sm:$0xff] }
 0xb08   : > { %7972 = vmatmul.mubr.msk.bf16.gmra.mrb[56].mxu0 %vm1207_vm3, %v4645_v26 }
 0xb09   : > { %v7943_v12 = vpop.f32.mrb[64].mxu1 }
 0xb0a   : > { %v4617_v9 = vpop.f32.mrb[65].mxu1 }
 0xb0b   : > { %v7944_v37 = vpop.f32.mrb[66].mxu1 }
 0xb0c   : > { %v4647_v40 = vpack.c.bf16 %v7944_v37, %v7943_v12  ;;  %v4620_v22 = vpop.f32.mrb[67].mxu1 }
 0xb0d   : > { %v4646_v27 = vpack.c.bf16 %v4620_v22, %v4617_v9  ;;  %v14595_v9 = vld [vmem:[#allocation54_spill] sm:$0xff] }
 0xb0f   : > { %7975 = vmatprep.mubr.msk.bf16.mxu0 %vm1207_vm3, %v4646_v27  ;;  %v14597_v27 = vld [vmem:[#allocation55_spill] sm:$0xff] }
 0xb10   : > { %7976 = vmatmul.mubr.msk.bf16.gmra.mrb[60].mxu0 %vm1207_vm3, %v4647_v40 }
 0xbab   : > { %v7949_v17 = vpop.f32.mrb[32].mxu0 }
 0xbac   : > { %v4734_v52 = vpop.f32.mrb[33].mxu0  ;;  %v12485_v46 = vadd.f32 %v7949_v17, %v14569_v49  ;;  %v14599_v49 = vld [vmem:[#allocation56_spill] sm:$0xff] }
 0xbad   : > { %v12482_v60 = vadd.f32 %v4734_v52, %v14567_v50  ;;  %v7950_v38 = vpop.f32.mrb[34].mxu0 }
 0xbae   : > { %v4737_v7 = vpop.f32.mrb[35].mxu0  ;;  %14570 = vst [vmem:[#allocation76_spill] sm:$0xff] %v12485_v46  ;;  %v12495_v25 = vadd.f32 %v7950_v38, %v14573_v63  ;;  %v4901_v34 = vsel %vm1207_vm3, %v12485_v46, 0.0  ;;  %v14601_v63 = vld [vmem:[#allocation57_spill] sm:$0xff] }
 0xbaf   : > { %14568 = vst [vmem:[#allocation92_spill] sm:$0xff] %v12482_v60  ;;  %v12488_v0 = vadd.f32 %v4737_v7, %v14571_v53  ;;  %v4895_v14 = vsel %vm1207_vm3, %v12482_v60, 0.0 }
 0xbb0   : > { %4896 = vadd.xlane.f32.xlu0 %v4895_v14  ;;  %14574 = vst [vmem:[#allocation78_spill] sm:$0xff] %v12495_v25  ;;  %v4904_v33 = vsel %vm1207_vm3, %v12495_v25, 0.0 }
 0xbb1   : > { %14572 = vst [vmem:[#allocation77_spill] sm:$0xff] %v12488_v0  ;;  %v4898_v3 = vsel %vm1207_vm3, %v12488_v0, 0.0 }
 0xbb2   : > { %4899 = vadd.xlane.f32.xlu1 %v4898_v3 }
 0xbb3   : > { %v7953_v62 = vpop.f32.mrb[36].mxu0 }
 0xbb4   : > { %4902 = vadd.xlane.f32.xlu0 %v4901_v34  ;;  %v4750_v44 = vpop.f32.mrb[37].mxu0  ;;  %v12503_v54 = vadd.f32 %v7953_v62, %v14577_v30  ;;  %v14603_v34 = vld [vmem:[#allocation58_spill] sm:$0xff] }
 0xbb5   : > { %v12500_v36 = vadd.f32 %v4750_v44, %v14575_v4  ;;  %v7954_v28 = vpop.f32.mrb[38].mxu0 }
 0xbb6   : > { %v4753_v39 = vpop.f32.mrb[39].mxu0  ;;  %14578 = vst [vmem:[#allocation80_spill] sm:$0xff] %v12503_v54  ;;  %v12513_v45 = vadd.f32 %v7954_v28, %v14581_v55  ;;  %v4913_v19 = vsel %vm1207_vm3, %v12503_v54, 0.0 }
 0xbb7   : > { %14576 = vst [vmem:[#allocation79_spill] sm:$0xff] %v12500_v36  ;;  %v12506_v1 = vadd.f32 %v4753_v39, %v14579_v5  ;;  %v4907_v8 = vsel %vm1207_vm3, %v12500_v36, 0.0  ;;  %v14605_v39 = vld [vmem:[#allocation59_spill] sm:$0xff] }
 0xbb8   : > { %4905 = vadd.xlane.f32.xlu0 %v4904_v33  ;;  %4908 = vadd.xlane.f32.xlu1 %v4907_v8  ;;  %14582 = vst [vmem:[#allocation82_spill] sm:$0xff] %v12513_v45  ;;  %v4916_v2 = vsel %vm1207_vm3, %v12513_v45, 0.0 }
 0xbb9   : > { %14580 = vst [vmem:[#allocation81_spill] sm:$0xff] %v12506_v1  ;;  %v4910_v29 = vsel %vm1207_vm3, %v12506_v1, 0.0 }
 0xbbb   : > { %v7957_v61 = vpop.f32.mrb[40].mxu0 }
 0xbbc   : > { %4914 = vadd.xlane.f32.xlu1 %v4913_v19  ;;  %4911 = vadd.xlane.f32.xlu0 %v4910_v29  ;;  %v4766_v15 = vpop.f32.mrb[41].mxu0  ;;  %v12523_v56 = vadd.f32 %v7957_v61, %v14585_v43  ;;  %v14607_v61 = vld [vmem:[#allocation60_spill] sm:$0xff] }
 0xbbd   : > { %v12520_v59 = vadd.f32 %v4766_v15, %v14583_v42  ;;  %v7958_v23 = vpop.f32.mrb[42].mxu0  ;;  %v14609_v42 = vld [vmem:[#allocation61_spill] sm:$0xff] }
 0xbbe   : > { %v4769_v48 = vpop.f32.mrb[43].mxu0  ;;  %14586 = vst [vmem:[#allocation84_spill] sm:$0xff] %v12523_v56  ;;  %v12533_v18 = vadd.f32 %v7958_v23, %v14589_v31  ;;  %v4925_v6 = vsel %vm1207_vm3, %v12523_v56, 0.0 }
 0xbbf   : > { %14584 = vst [vmem:[#allocation83_spill] sm:$0xff] %v12520_v59  ;;  %v12526_v13 = vadd.f32 %v4769_v48, %v14587_v24  ;;  %v4919_v57 = vsel %vm1207_vm3, %v12520_v59, 0.0  ;;  %v14611_v48 = vld [vmem:[#allocation62_spill] sm:$0xff] }
 0xbc0   : > { %4917 = vadd.xlane.f32.xlu0 %v4916_v2  ;;  %4920 = vadd.xlane.f32.xlu1 %v4919_v57  ;;  %14590 = vst [vmem:[#allocation86_spill] sm:$0xff] %v12533_v18  ;;  %v4928_v40 = vsel %vm1207_vm3, %v12533_v18, 0.0  ;;  %v14613_v57 = vld [vmem:[#allocation63_spill] sm:$0xff] }
 0xbc1   : > { %14588 = vst [vmem:[#allocation85_spill] sm:$0xff] %v12526_v13  ;;  %v4922_v47 = vsel %vm1207_vm3, %v12526_v13, 0.0 }
 0xbc3   : > { %v7961_v41 = vpop.f32.mrb[44].mxu0 }
 0xbc4   : > { %4926 = vadd.xlane.f32.xlu1 %v4925_v6  ;;  %4923 = vadd.xlane.f32.xlu0 %v4922_v47  ;;  %v4782_v11 = vpop.f32.mrb[45].mxu0  ;;  %v12543_v12 = vadd.f32 %v7961_v41, %v14593_v51 }
 0xbc5   : > { %v12540_v10 = vadd.f32 %v4782_v11, %v14591_v35  ;;  %v7962_v26 = vpop.f32.mrb[46].mxu0  ;;  %v14615_v35 = vld [vmem:[#allocation64_spill] sm:$0xff] }
 0xbc6   : > { %v4785_v21 = vpop.f32.mrb[47].mxu0  ;;  %14594 = vst [vmem:[#allocation88_spill] sm:$0xff] %v12543_v12  ;;  %v12553_v17 = vadd.f32 %v7962_v26, %v14597_v27  ;;  %v4937_v50 = vsel %vm1207_vm3, %v12543_v12, 0.0 }
 0xbc7   : > { %14592 = vst [vmem:[#allocation87_spill] sm:$0xff] %v12540_v10  ;;  %v12546_v37 = vadd.f32 %v4785_v21, %v14595_v9  ;;  %v4931_v22 = vsel %vm1207_vm3, %v12540_v10, 0.0  ;;  %v14617_v9 = vld [vmem:[#allocation65_spill] sm:$0xff] }
 0xbc8   : > { %4929 = vadd.xlane.f32.xlu0 %v4928_v40  ;;  %4932 = vadd.xlane.f32.xlu1 %v4931_v22  ;;  %14598 = vst [vmem:[#allocation90_spill] sm:$0xff] %v12553_v17  ;;  %v4940_v4 = vsel %vm1207_vm3, %v12553_v17, 0.0  ;;  %v14619_v22 = vld [vmem:[#allocation66_spill] sm:$0xff] }
 0xbc9   : > { %14596 = vst [vmem:[#allocation89_spill] sm:$0xff] %v12546_v37  ;;  %v4934_v38 = vsel %vm1207_vm3, %v12546_v37, 0.0 }
 0xbcb   : > { %v7965_v52 = vpop.f32.mrb[48].mxu0 }
 0xbcc   : > { %4938 = vadd.xlane.f32.xlu1 %v4937_v50  ;;  %4935 = vadd.xlane.f32.xlu0 %v4934_v38  ;;  %v4798_v7 = vpop.f32.mrb[49].mxu0  ;;  %v12563_v62 = vadd.f32 %v7965_v52, %v14601_v63  ;;  %v14621_v38 = vld [vmem:[#allocation67_spill] sm:$0xff] }
 0xbcd   : > { %v12560_v53 = vadd.f32 %v4798_v7, %v14599_v49  ;;  %v7966_v14 = vpop.f32.mrb[50].mxu0 }
 0xbce   : > { %v4801_v3 = vpop.f32.mrb[51].mxu0  ;;  %14602 = vst [vmem:[#allocation40_spill] sm:$0xff] %v12563_v62  ;;  %v12573_v30 = vadd.f32 %v7966_v14, %v14605_v39  ;;  %v4949_v33 = vsel %vm1207_vm3, %v12563_v62, 0.0 }
 0xbcf   : > { %14600 = vst [vmem:[#allocation91_spill] sm:$0xff] %v12560_v53  ;;  %v12566_v44 = vadd.f32 %v4801_v3, %v14603_v34  ;;  %v4943_v28 = vsel %vm1207_vm3, %v12560_v53, 0.0  ;;  %v14623_v34 = vld [vmem:[#allocation68_spill] sm:$0xff] }
 0xbd0   : > { %4941 = vadd.xlane.f32.xlu0 %v4940_v4  ;;  %4944 = vadd.xlane.f32.xlu1 %v4943_v28  ;;  %14606 = vst [vmem:[#allocation42_spill] sm:$0xff] %v12573_v30  ;;  %v4952_v24 = vsel %vm1207_vm3, %v12573_v30, 0.0 }
 0xbd1   : > { %14604 = vst [vmem:[#allocation41_spill] sm:$0xff] %v12566_v44  ;;  %v4946_v8 = vsel %vm1207_vm3, %v12566_v44, 0.0 }
 0xbd3   : > { %v7969_v5 = vpop.f32.mrb[52].mxu0 }
 0xbd4   : > { %4950 = vadd.xlane.f32.xlu1 %v4949_v33  ;;  %4947 = vadd.xlane.f32.xlu0 %v4946_v8  ;;  %v4814_v55 = vpop.f32.mrb[53].mxu0  ;;  %v12583_v23 = vadd.f32 %v7969_v5, %v14609_v42  ;;  %v14625_v5 = vld [vmem:[#allocation69_spill] sm:$0xff]  ;;  %v14627_v8 = vld [vmem:[#allocation70_spill] sm:$0xff] }
 0xbd5   : > { %v12580_v19 = vadd.f32 %v4814_v55, %v14607_v61  ;;  %v7970_v29 = vpop.f32.mrb[54].mxu0 }
 0xbd6   : > { %v4817_v15 = vpop.f32.mrb[55].mxu0  ;;  %14610 = vst [vmem:[#allocation44_spill] sm:$0xff] %v12583_v23  ;;  %v12593_v31 = vadd.f32 %v7970_v29, %v14613_v57  ;;  %v4961_v6 = vsel %vm1207_vm3, %v12583_v23, 0.0  ;;  %v5403_v57 = vld [vmem:[#allocation23] sm:$0x3] }
 0xbd7   : > { %14608 = vst [vmem:[#allocation43_spill] sm:$0xff] %v12580_v19  ;;  %v12586_v43 = vadd.f32 %v4817_v15, %v14611_v48  ;;  %v4955_v2 = vsel %vm1207_vm3, %v12580_v19, 0.0  ;;  %v14629_v15 = vld [vmem:[#allocation71_spill] sm:$0xff]  ;;  %8051 = vmatprep.subr.msk.bf16.mxu1 %vm2871_vm1, %v5403_v57 }
 0xbd8   : > { %4953 = vadd.xlane.f32.xlu0 %v4952_v24  ;;  %4956 = vadd.xlane.f32.xlu1 %v4955_v2  ;;  %14614 = vst [vmem:[#allocation46_spill] sm:$0xff] %v12593_v31  ;;  %v4964_v52 = vsel %vm1207_vm3, %v12593_v31, 0.0 }
 0xbd9   : > { %14612 = vst [vmem:[#allocation45_spill] sm:$0xff] %v12586_v43  ;;  %v4958_v47 = vsel %vm1207_vm3, %v12586_v43, 0.0 }
 0xbdb   : > { %v7973_v41 = vpop.f32.mrb[56].mxu0 }
 0xbdc   : > { %4962 = vadd.xlane.f32.xlu1 %v4961_v6  ;;  %4959 = vadd.xlane.f32.xlu0 %v4958_v47  ;;  %v4830_v11 = vpop.f32.mrb[57].mxu0  ;;  %v12603_v40 = vadd.f32 %v7973_v41, %v14617_v9  ;;  %v5453_v41 = vsel %vm2871_vm1, %v5403_v57, 0 }
 0xbdd   : > { %v12600_v26 = vadd.f32 %v4830_v11, %v14615_v35  ;;  %v7974_v21 = vpop.f32.mrb[58].mxu0  ;;  %7980 = vmatpush3.bf16.msra.mxu1 %v5453_v41 }
 0xbde   : > { %v4833_v51 = vpop.f32.mrb[59].mxu0  ;;  %14618 = vst [vmem:[#allocation48_spill] sm:$0xff] %v12603_v40  ;;  %v12613_v7 = vadd.f32 %v7974_v21, %v14621_v38  ;;  %v4973_v14 = vsel %vm1207_vm3, %v12603_v40, 0.0 }
 0xbdf   : > { %14616 = vst [vmem:[#allocation47_spill] sm:$0xff] %v12600_v26  ;;  %v12606_v27 = vadd.f32 %v4833_v51, %v14619_v22  ;;  %v4967_v50 = vsel %vm1207_vm3, %v12600_v26, 0.0 }
 0xbe0   : > { %4965 = vadd.xlane.f32.xlu0 %v4964_v52  ;;  %4968 = vadd.xlane.f32.xlu1 %v4967_v50  ;;  %14622 = vst [vmem:[#allocation50_spill] sm:$0xff] %v12613_v7  ;;  %v4976_v61 = vsel %vm1207_vm3, %v12613_v7, 0.0 }
 0xbe1   : > { %14620 = vst [vmem:[#allocation49_spill] sm:$0xff] %v12606_v27  ;;  %v4970_v3 = vsel %vm1207_vm3, %v12606_v27, 0.0 }
 0xbe3   : > { %v7977_v49 = vpop.f32.mrb[60].mxu0 }
 0xbe4   : > { %4974 = vadd.xlane.f32.xlu1 %v4973_v14  ;;  %4971 = vadd.xlane.f32.xlu0 %v4970_v3  ;;  %v4846_v63 = vpop.f32.mrb[61].mxu0  ;;  %v12623_v33 = vadd.f32 %v7977_v49, %v14625_v5 }
 0xbe5   : > { %v12620_v4 = vadd.f32 %v4846_v63, %v14623_v34  ;;  %v7978_v28 = vpop.f32.mrb[62].mxu0 }
 0xbe6   : > { %v4849_v39 = vpop.f32.mrb[63].mxu0  ;;  %14626 = vst [vmem:[#allocation52_spill] sm:$0xff] %v12623_v33  ;;  %v12633_v42 = vadd.f32 %v7978_v28, %v14629_v15  ;;  %v4985_v48 = vsel %vm1207_vm3, %v12623_v33, 0.0 }
 0xbe7   : > { %14624 = vst [vmem:[#allocation51_spill] sm:$0xff] %v12620_v4  ;;  %v12626_v55 = vadd.f32 %v4849_v39, %v14627_v8  ;;  %v4979_v29 = vsel %vm1207_vm3, %v12620_v4, 0.0 }
 0xbe8   : > { %4977 = vadd.xlane.f32.xlu0 %v4976_v61  ;;  %4980 = vadd.xlane.f32.xlu1 %v4979_v29  ;;  %14630 = vst [vmem:[#allocation54_spill] sm:$0xff] %v12633_v42  ;;  %v4988_v2 = vsel %vm1207_vm3, %v12633_v42, 0.0 }
 0xbe9   : > { %14628 = vst [vmem:[#allocation53_spill] sm:$0xff] %v12626_v55  ;;  %v4982_v24 = vsel %vm1207_vm3, %v12626_v55, 0.0 }
 0xbec   : > { %4986 = vadd.xlane.f32.xlu1 %v4985_v48  ;;  %4983 = vadd.xlane.f32.xlu0 %v4982_v24 }
 0xbf0   : > { %4989 = vadd.xlane.f32.xlu0 %v4988_v2 }
 0xc3d   : > { %v4897_v6 = vpop.xlane.xlu0 %4896 }
 0xc3e   : > { %v4991_v47 = vmul.f32 0.25, %v4897_v6 }
 0xc3f   : > { %v4900_v11 = vpop.xlane.xlu1 %4899 }
 0xc40   : > { %v12644_v35 = vsub.f32 %v12482_v60, %v4991_v47  ;;  %v4992_v21 = vmul.f32 0.25, %v4900_v11 }
 0xc41   : > { %v4903_v51 = vpop.xlane.xlu0 %4902 }
 0xc42   : > { %v12647_v9 = vsub.f32 %v12488_v0, %v4992_v21  ;;  %v4993_v22 = vmul.f32 0.25, %v4903_v51  ;;  %v5055_v52 = vmul.f32 %v12644_v35, %v12644_v35 }
 0xc44   : > { %v12652_v50 = vsub.f32 %v12485_v46, %v4993_v22  ;;  %v5087_v38 = vsel %vm1207_vm3, %v5055_v52, 0.0  ;;  %v5056_v49 = vmul.f32 %v12647_v9, %v12647_v9 }
 0xc45   : > { %v4909_v14 = vpop.xlane.xlu1 %4908  ;;  %5088 = vadd.xlane.f32.xlu1 %v5087_v38  ;;  %v4906_v3 = vpop.xlane.xlu0 %4905 }
 0xc46   : > { %v4995_v63 = vmul.f32 0.25, %v4909_v14  ;;  %v4994_v34 = vmul.f32 0.25, %v4906_v3  ;;  %v5090_v28 = vsel %vm1207_vm3, %v5056_v49, 0.0  ;;  %v5057_v39 = vmul.f32 %v12652_v50, %v12652_v50 }
 0xc47   : > { %5091 = vadd.xlane.f32.xlu0 %v5090_v28 }
 0xc48   : > { %v12661_v5 = vsub.f32 %v12500_v36, %v4995_v63  ;;  %v12664_v8 = vsub.f32 %v12495_v25, %v4994_v34  ;;  %v5093_v61 = vsel %vm1207_vm3, %v5057_v39, 0.0 }
 0xc49   : > { %v4915_v29 = vpop.xlane.xlu1 %4914  ;;  %5094 = vadd.xlane.f32.xlu1 %v5093_v61  ;;  %v4912_v15 = vpop.xlane.xlu0 %4911 }
 0xc4a   : > { %v4997_v48 = vmul.f32 0.25, %v4915_v29  ;;  %v4996_v24 = vmul.f32 0.25, %v4912_v15  ;;  %v5059_v2 = vmul.f32 %v12661_v5, %v12661_v5  ;;  %v5058_v57 = vmul.f32 %v12664_v8, %v12664_v8 }
 0xc4c   : > { %v12672_v41 = vsub.f32 %v12503_v54, %v4997_v48  ;;  %v12675_v6 = vsub.f32 %v12506_v1, %v4996_v24  ;;  %v5099_v47 = vsel %vm1207_vm3, %v5059_v2, 0.0  ;;  %v5096_v11 = vsel %vm1207_vm3, %v5058_v57, 0.0 }
 0xc4d   : > { %v4921_v21 = vpop.xlane.xlu1 %4920  ;;  %5100 = vadd.xlane.f32.xlu1 %v5099_v47  ;;  %5097 = vadd.xlane.f32.xlu0 %v5096_v11  ;;  %v4918_v51 = vpop.xlane.xlu0 %4917 }
 0xc4e   : > { %v4999_v22 = vmul.f32 0.25, %v4921_v21  ;;  %v4998_v52 = vmul.f32 0.25, %v4918_v51  ;;  %v5061_v38 = vmul.f32 %v12672_v41, %v12672_v41  ;;  %v5060_v49 = vmul.f32 %v12675_v6, %v12675_v6 }
 0xc50   : > { %v12684_v14 = vsub.f32 %v12520_v59, %v4999_v22  ;;  %v12687_v3 = vsub.f32 %v12513_v45, %v4998_v52  ;;  %v5105_v63 = vsel %vm1207_vm3, %v5061_v38, 0.0  ;;  %v5102_v34 = vsel %vm1207_vm3, %v5060_v49, 0.0 }
 0xc51   : > { %v4927_v28 = vpop.xlane.xlu1 %4926  ;;  %5106 = vadd.xlane.f32.xlu1 %v5105_v63  ;;  %5103 = vadd.xlane.f32.xlu0 %v5102_v34  ;;  %v4924_v39 = vpop.xlane.xlu0 %4923 }
 0xc52   : > { %v5001_v61 = vmul.f32 0.25, %v4927_v28  ;;  %v5000_v29 = vmul.f32 0.25, %v4924_v39  ;;  %v5063_v15 = vmul.f32 %v12684_v14, %v12684_v14  ;;  %v5062_v48 = vmul.f32 %v12687_v3, %v12687_v3 }
 0xc54   : > { %v12696_v24 = vsub.f32 %v12523_v56, %v5001_v61  ;;  %v12699_v2 = vsub.f32 %v12526_v13, %v5000_v29  ;;  %v5111_v57 = vsel %vm1207_vm3, %v5063_v15, 0.0  ;;  %v5108_v47 = vsel %vm1207_vm3, %v5062_v48, 0.0 }
 0xc55   : > { %v4933_v11 = vpop.xlane.xlu1 %4932  ;;  %5112 = vadd.xlane.f32.xlu1 %v5111_v57  ;;  %5109 = vadd.xlane.f32.xlu0 %v5108_v47  ;;  %v4930_v21 = vpop.xlane.xlu0 %4929 }
 0xc56   : > { %v5003_v51 = vmul.f32 0.25, %v4933_v11  ;;  %v5002_v22 = vmul.f32 0.25, %v4930_v21  ;;  %v5065_v52 = vmul.f32 %v12696_v24, %v12696_v24  ;;  %v5064_v38 = vmul.f32 %v12699_v2, %v12699_v2 }
 0xc58   : > { %v12708_v49 = vsub.f32 %v12540_v10, %v5003_v51  ;;  %v12711_v63 = vsub.f32 %v12533_v18, %v5002_v22  ;;  %v5117_v34 = vsel %vm1207_vm3, %v5065_v52, 0.0  ;;  %v5114_v28 = vsel %vm1207_vm3, %v5064_v38, 0.0 }
 0xc59   : > { %v4939_v39 = vpop.xlane.xlu1 %4938  ;;  %5118 = vadd.xlane.f32.xlu1 %v5117_v34  ;;  %5115 = vadd.xlane.f32.xlu0 %v5114_v28  ;;  %v4936_v61 = vpop.xlane.xlu0 %4935 }
 0xc5a   : > { %v5005_v29 = vmul.f32 0.25, %v4939_v39  ;;  %v5004_v15 = vmul.f32 0.25, %v4936_v61  ;;  %v5067_v48 = vmul.f32 %v12708_v49, %v12708_v49  ;;  %v5066_v57 = vmul.f32 %v12711_v63, %v12711_v63 }
 0xc5c   : > { %v12720_v47 = vsub.f32 %v12543_v12, %v5005_v29  ;;  %v12723_v11 = vsub.f32 %v12546_v37, %v5004_v15  ;;  %v5123_v21 = vsel %vm1207_vm3, %v5067_v48, 0.0  ;;  %v5120_v51 = vsel %vm1207_vm3, %v5066_v57, 0.0 }
 0xc5d   : > { %v4945_v22 = vpop.xlane.xlu1 %4944  ;;  %5124 = vadd.xlane.f32.xlu1 %v5123_v21  ;;  %5121 = vadd.xlane.f32.xlu0 %v5120_v51  ;;  %v4942_v52 = vpop.xlane.xlu0 %4941 }
 0xc5e   : > { %v5007_v38 = vmul.f32 0.25, %v4945_v22  ;;  %v5006_v34 = vmul.f32 0.25, %v4942_v52  ;;  %v5069_v28 = vmul.f32 %v12720_v47, %v12720_v47  ;;  %v5068_v39 = vmul.f32 %v12723_v11, %v12723_v11 }
 0xc60   : > { %v12732_v61 = vsub.f32 %v12560_v53, %v5007_v38  ;;  %v12735_v29 = vsub.f32 %v12553_v17, %v5006_v34  ;;  %v5129_v15 = vsel %vm1207_vm3, %v5069_v28, 0.0  ;;  %v5126_v48 = vsel %vm1207_vm3, %v5068_v39, 0.0 }
 0xc61   : > { %v4951_v57 = vpop.xlane.xlu1 %4950  ;;  %5130 = vadd.xlane.f32.xlu1 %v5129_v15  ;;  %5127 = vadd.xlane.f32.xlu0 %v5126_v48  ;;  %v4948_v21 = vpop.xlane.xlu0 %4947 }
 0xc62   : > { %v5009_v51 = vmul.f32 0.25, %v4951_v57  ;;  %v5008_v22 = vmul.f32 0.25, %v4948_v21  ;;  %v5071_v52 = vmul.f32 %v12732_v61, %v12732_v61  ;;  %v5070_v38 = vmul.f32 %v12735_v29, %v12735_v29 }
 0xc64   : > { %v12744_v53 = vsub.f32 %v12563_v62, %v5009_v51  ;;  %v12747_v34 = vsub.f32 %v12566_v44, %v5008_v22  ;;  %v5135_v28 = vsel %vm1207_vm3, %v5071_v52, 0.0  ;;  %v5132_v39 = vsel %vm1207_vm3, %v5070_v38, 0.0 }
 0xc65   : > { %v4957_v15 = vpop.xlane.xlu1 %4956  ;;  %5136 = vadd.xlane.f32.xlu1 %v5135_v28  ;;  %5133 = vadd.xlane.f32.xlu0 %v5132_v39  ;;  %v4954_v48 = vpop.xlane.xlu0 %4953 }
 0xc66   : > { %v5011_v57 = vmul.f32 0.25, %v4957_v15  ;;  %v5010_v21 = vmul.f32 0.25, %v4954_v48  ;;  %v5073_v17 = vmul.f32 %v12744_v53, %v12744_v53  ;;  %v5072_v51 = vmul.f32 %v12747_v34, %v12747_v34 }
 0xc68   : > { %v12756_v62 = vsub.f32 %v12580_v19, %v5011_v57  ;;  %v12759_v22 = vsub.f32 %v12573_v30, %v5010_v21  ;;  %v5141_v52 = vsel %vm1207_vm3, %v5073_v17, 0.0  ;;  %v5138_v38 = vsel %vm1207_vm3, %v5072_v51, 0.0 }
 0xc69   : > { %v4963_v28 = vpop.xlane.xlu1 %4962  ;;  %5142 = vadd.xlane.f32.xlu1 %v5141_v52  ;;  %5139 = vadd.xlane.f32.xlu0 %v5138_v38  ;;  %v4960_v39 = vpop.xlane.xlu0 %4959 }
 0xc6a   : > { %v5013_v15 = vmul.f32 0.25, %v4963_v28  ;;  %v5012_v48 = vmul.f32 0.25, %v4960_v39  ;;  %v5075_v44 = vmul.f32 %v12756_v62, %v12756_v62  ;;  %v5074_v57 = vmul.f32 %v12759_v22, %v12759_v22 }
 0xc6c   : > { %v12768_v19 = vsub.f32 %v12583_v23, %v5013_v15  ;;  %v12771_v21 = vsub.f32 %v12586_v43, %v5012_v48  ;;  %v5147_v17 = vsel %vm1207_vm3, %v5075_v44, 0.0  ;;  %v5144_v51 = vsel %vm1207_vm3, %v5074_v57, 0.0 }
 0xc6d   : > { %v4969_v52 = vpop.xlane.xlu1 %4968  ;;  %5148 = vadd.xlane.f32.xlu1 %v5147_v17  ;;  %5145 = vadd.xlane.f32.xlu0 %v5144_v51  ;;  %v4966_v38 = vpop.xlane.xlu0 %4965 }
 0xc6e   : > { %v5015_v28 = vmul.f32 0.25, %v4969_v52  ;;  %v5014_v39 = vmul.f32 0.25, %v4966_v38  ;;  %v5077_v30 = vmul.f32 %v12768_v19, %v12768_v19  ;;  %v5076_v15 = vmul.f32 %v12771_v21, %v12771_v21 }
 0xc70   : > { %v12780_v23 = vsub.f32 %v12600_v26, %v5015_v28  ;;  %v12783_v48 = vsub.f32 %v12593_v31, %v5014_v39  ;;  %v5153_v44 = vsel %vm1207_vm3, %v5077_v30, 0.0  ;;  %v5150_v57 = vsel %vm1207_vm3, %v5076_v15, 0.0 }
 0xc71   : > { %v4975_v17 = vpop.xlane.xlu1 %4974  ;;  %5154 = vadd.xlane.f32.xlu1 %v5153_v44  ;;  %5151 = vadd.xlane.f32.xlu0 %v5150_v57  ;;  %v4972_v51 = vpop.xlane.xlu0 %4971 }
 0xc72   : > { %v5017_v52 = vmul.f32 0.25, %v4975_v17  ;;  %v5016_v38 = vmul.f32 0.25, %v4972_v51  ;;  %v5079_v43 = vmul.f32 %v12780_v23, %v12780_v23  ;;  %v5078_v28 = vmul.f32 %v12783_v48, %v12783_v48 }
 0xc74   : > { %v12792_v26 = vsub.f32 %v12603_v40, %v5017_v52  ;;  %v12795_v39 = vsub.f32 %v12606_v27, %v5016_v38  ;;  %v5159_v30 = vsel %vm1207_vm3, %v5079_v43, 0.0  ;;  %v5156_v15 = vsel %vm1207_vm3, %v5078_v28, 0.0 }
 0xc75   : > { %v4981_v44 = vpop.xlane.xlu1 %4980  ;;  %5160 = vadd.xlane.f32.xlu1 %v5159_v30  ;;  %5157 = vadd.xlane.f32.xlu0 %v5156_v15  ;;  %v4978_v57 = vpop.xlane.xlu0 %4977 }
 0xc76   : > { %v5019_v17 = vmul.f32 0.25, %v4981_v44  ;;  %v5018_v51 = vmul.f32 0.25, %v4978_v57  ;;  %v5081_v31 = vmul.f32 %v12792_v26, %v12792_v26  ;;  %v5080_v52 = vmul.f32 %v12795_v39, %v12795_v39 }
 0xc78   : > { %v12804_v40 = vsub.f32 %v12620_v4, %v5019_v17  ;;  %v12807_v38 = vsub.f32 %v12613_v7, %v5018_v51  ;;  %v5165_v43 = vsel %vm1207_vm3, %v5081_v31, 0.0  ;;  %v5162_v28 = vsel %vm1207_vm3, %v5080_v52, 0.0 }
 0xc79   : > { %v4987_v30 = vpop.xlane.xlu1 %4986  ;;  %5166 = vadd.xlane.f32.xlu1 %v5165_v43  ;;  %5163 = vadd.xlane.f32.xlu0 %v5162_v28  ;;  %v4984_v15 = vpop.xlane.xlu0 %4983 }
 0xc7a   : > { %v5021_v44 = vmul.f32 0.25, %v4987_v30  ;;  %v5020_v57 = vmul.f32 0.25, %v4984_v15  ;;  %v5083_v27 = vmul.f32 %v12804_v40, %v12804_v40  ;;  %v5082_v17 = vmul.f32 %v12807_v38, %v12807_v38 }
 0xc7c   : > { %v12816_v4 = vsub.f32 %v12623_v33, %v5021_v44  ;;  %v12819_v51 = vsub.f32 %v12626_v55, %v5020_v57  ;;  %v5171_v31 = vsel %vm1207_vm3, %v5083_v27, 0.0  ;;  %v5168_v52 = vsel %vm1207_vm3, %v5082_v17, 0.0 }
 0xc7d   : > { %5172 = vadd.xlane.f32.xlu1 %v5171_v31  ;;  %5169 = vadd.xlane.f32.xlu0 %v5168_v52  ;;  %v4990_v43 = vpop.xlane.xlu0 %4989 }
 0xc7e   : > { %v5022_v28 = vmul.f32 0.25, %v4990_v43  ;;  %v5085_v30 = vmul.f32 %v12816_v4, %v12816_v4  ;;  %v5084_v15 = vmul.f32 %v12819_v51, %v12819_v51 }
 0xc80   : > { %v12828_v44 = vsub.f32 %v12633_v42, %v5022_v28  ;;  %v5177_v57 = vsel %vm1207_vm3, %v5085_v30, 0.0  ;;  %v5174_v33 = vsel %vm1207_vm3, %v5084_v15, 0.0 }
 0xc81   : > { %5178 = vadd.xlane.f32.xlu1 %v5177_v57  ;;  %5175 = vadd.xlane.f32.xlu0 %v5174_v33 }
 0xc82   : > { %v5086_v27 = vmul.f32 %v12828_v44, %v12828_v44 }
 0xc84   : > { %v5180_v17 = vsel %vm1207_vm3, %v5086_v27, 0.0 }
 0xc85   : > { %5181 = vadd.xlane.f32.xlu0 %v5180_v17 }
 0xcd2   : > { %v5089_v31 = vpop.xlane.xlu1 %5088 }
 0xcd3   : > { %v5183_v52 = vmul.f32 0.25, %v5089_v31 }
 0xcd4   : > { %v5092_v43 = vpop.xlane.xlu0 %5091 }
 0xcd5   : > { %v5215_v55 = vadd.f32 1e-05, %v5183_v52  ;;  %v5184_v7 = vmul.f32 0.25, %v5092_v43  ;;  %v12835_v43 = vld [vmem:[#allocation20] ss:$0 sm:$0xff] }
 0xcd6   : > { %v5095_v12 = vpop.xlane.xlu1 %5094 }
 0xcd7   : > { %8545 = vrsqrt.f32 %v5215_v55  ;;  %v5216_v28 = vadd.f32 1e-05, %v5184_v7  ;;  %v5185_v42 = vmul.f32 0.25, %v5095_v12 }
 0xcd9   : > { %8547 = vrsqrt.f32 %v5216_v28  ;;  %v5217_v30 = vadd.f32 1e-05, %v5185_v42 }
 0xcda   : > { %v5101_v15 = vpop.xlane.xlu1 %5100  ;;  %v5098_v57 = vpop.xlane.xlu0 %5097 }
 0xcdb   : > { %8549 = vrsqrt.f32 %v5217_v30  ;;  %v5187_v33 = vmul.f32 0.25, %v5101_v15  ;;  %v5186_v37 = vmul.f32 0.25, %v5098_v57 }
 0xcdd   : > { %v5219_v10 = vadd.f32 1e-05, %v5187_v33  ;;  %v5218_v18 = vadd.f32 1e-05, %v5186_v37 }
 0xcde   : > { %v5107_v27 = vpop.xlane.xlu1 %5106  ;;  %v5104_v17 = vpop.xlane.xlu0 %5103 }
 0xcdf   : > { %8551 = vrsqrt.f32 %v5219_v10  ;;  %v5189_v31 = vmul.f32 0.25, %v5107_v27  ;;  %v5188_v56 = vmul.f32 0.25, %v5104_v17 }
 0xce0   : > { %8553 = vrsqrt.f32 %v5218_v18  ;;  %v12840_v18 = vld [vmem:[#allocation21] ss:$0 sm:$0xff] }
 0xce1   : > { %v8546_v52 = vpop.eup %8545  ;;  %v5221_v7 = vadd.f32 1e-05, %v5189_v31  ;;  %v5220_v12 = vadd.f32 1e-05, %v5188_v56 }
 0xce2   : > { %v5279_v55 = vmul.f32 %v8546_v52, %v12644_v35  ;;  %v5113_v42 = vpop.xlane.xlu1 %5112  ;;  %v5110_v28 = vpop.xlane.xlu0 %5109 }
 0xce3   : > { %v8548_v30 = vpop.eup %8547  ;;  %8555 = vrsqrt.f32 %v5221_v7  ;;  %v5191_v15 = vmul.f32 0.25, %v5113_v42  ;;  %v5190_v57 = vmul.f32 0.25, %v5110_v28 }
 0xce4   : > { %v5280_v37 = vmul.f32 %v8548_v30, %v12647_v9  ;;  %8557 = vrsqrt.f32 %v5220_v12  ;;  %v5317_v10 = vmul.f32 %v12835_v43, %v5279_v55 }
 0xce5   : > { %v8550_v33 = vpop.eup %8549  ;;  %v5223_v27 = vadd.f32 1e-05, %v5191_v15  ;;  %v5222_v17 = vadd.f32 1e-05, %v5190_v57 }
 0xce6   : > { %v5281_v56 = vmul.f32 %v8550_v33, %v12652_v50  ;;  %v5119_v31 = vpop.xlane.xlu1 %5118  ;;  %v5116_v35 = vpop.xlane.xlu0 %5115  ;;  %v5318_v52 = vmul.f32 %v12835_v43, %v5280_v37  ;;  %v5355_v9 = vadd.f32 %v12840_v18, %v5317_v10 }
 0xce7   : > { %8559 = vrsqrt.f32 %v5223_v27  ;;  %v5193_v7 = vmul.f32 0.25, %v5119_v31  ;;  %v5192_v42 = vmul.f32 0.25, %v5116_v35 }
 0xce8   : > { %8561 = vrsqrt.f32 %v5222_v17  ;;  %v5356_v12 = vadd.f32 %v12840_v18, %v5318_v52  ;;  %v5319_v15 = vmul.f32 %v12835_v43, %v5281_v56 }
 0xce9   : > { %v8552_v55 = vpop.eup %8551  ;;  %v5225_v28 = vadd.f32 1e-05, %v5193_v7  ;;  %v5224_v30 = vadd.f32 1e-05, %v5192_v42 }
 0xcea   : > { %v8554_v13 = vpop.eup %8553  ;;  %v5125_v57 = vpop.xlane.xlu1 %5124  ;;  %v5387_v33 = vpack.c.bf16 %v5356_v12, %v5355_v9  ;;  %v5283_v17 = vmul.f32 %v8552_v55, %v12661_v5  ;;  %v5357_v56 = vadd.f32 %v12840_v18, %v5319_v15 }
 0xceb   : > { %v5122_v50 = vpop.xlane.xlu0 %5121  ;;  %v5282_v59 = vmul.f32 %v8554_v13, %v12664_v8  ;;  %8563 = vrsqrt.f32 %v5225_v28  ;;  %v5195_v37 = vmul.f32 0.25, %v5125_v57 }
 0xcec   : > { %v5194_v27 = vmul.f32 0.25, %v5122_v50  ;;  %8565 = vrsqrt.f32 %v5224_v30  ;;  %7981 = vmatprep.mubr.msk.bf16.mxu1 %vm1207_vm3, %v5387_v33  ;;  %v5321_v28 = vmul.f32 %v12835_v43, %v5283_v17 }
 0xced   : > { %v8556_v10 = vpop.eup %8555  ;;  %v5320_v31 = vmul.f32 %v12835_v43, %v5282_v59  ;;  %v5227_v35 = vadd.f32 1e-05, %v5195_v37 }
 0xcee   : > { %v5226_v52 = vadd.f32 1e-05, %v5194_v27  ;;  %v8558_v7 = vpop.eup %8557  ;;  %v5131_v42 = vpop.xlane.xlu1 %5130  ;;  %v5285_v5 = vmul.f32 %v8556_v10, %v12672_v41  ;;  %v5359_v17 = vadd.f32 %v12840_v18, %v5321_v28 }
 0xcef   : > { %v5128_v9 = vpop.xlane.xlu0 %5127  ;;  %v5358_v13 = vadd.f32 %v12840_v18, %v5320_v31  ;;  %v5284_v8 = vmul.f32 %v8558_v7, %v12675_v6  ;;  %8567 = vrsqrt.f32 %v5227_v35  ;;  %v5197_v12 = vmul.f32 0.25, %v5131_v42 }
 0xcf0   : > { %8569 = vrsqrt.f32 %v5226_v52  ;;  %v5196_v55 = vmul.f32 0.25, %v5128_v9  ;;  %v5323_v52 = vmul.f32 %v12835_v43, %v5285_v5 }
 0xcf1   : > { %v8560_v59 = vpop.eup %8559  ;;  %v5229_v30 = vadd.f32 1e-05, %v5197_v12  ;;  %v5388_v57 = vpack.c.bf16 %v5358_v13, %v5357_v56  ;;  %v5322_v50 = vmul.f32 %v12835_v43, %v5284_v8 }
 0xcf2   : > { %v8562_v15 = vpop.eup %8561  ;;  %v5287_v33 = vmul.f32 %v8560_v59, %v12684_v14  ;;  %v5228_v37 = vadd.f32 1e-05, %v5196_v55  ;;  %v5137_v27 = vpop.xlane.xlu1 %5136  ;;  %v5361_v5 = vadd.f32 %v12840_v18, %v5323_v52 }
 0xcf3   : > { %v5134_v31 = vpop.xlane.xlu0 %5133  ;;  %v5286_v6 = vmul.f32 %v8562_v15, %v12687_v3  ;;  %8571 = vrsqrt.f32 %v5229_v30  ;;  %v5199_v35 = vmul.f32 0.25, %v5137_v27  ;;  %7982 = vmatmul.mubr.msk.bf16.vlgmr.msra.gmra.mrb[68].mxu1 %vm1207_vm3, %v5388_v57  ;;  %v5360_v10 = vadd.f32 %v12840_v18, %v5322_v50 }
 0xcf4   : > { %v5198_v41 = vmul.f32 0.25, %v5134_v31  ;;  %8573 = vrsqrt.f32 %v5228_v37  ;;  %v5325_v12 = vmul.f32 %v12835_v43, %v5287_v33 }
 0xcf5   : > { %v8564_v7 = vpop.eup %8563  ;;  %v5231_v56 = vadd.f32 1e-05, %v5199_v35  ;;  %v5324_v42 = vmul.f32 %v12835_v43, %v5286_v6  ;;  %v5389_v3 = vpack.c.bf16 %v5360_v10, %v5359_v17 }
 0xcf6   : > { %v5230_v14 = vadd.f32 1e-05, %v5198_v41  ;;  %v8566_v9 = vpop.eup %8565  ;;  %v5143_v13 = vpop.xlane.xlu1 %5142  ;;  %v5289_v30 = vmul.f32 %v8564_v7, %v12696_v24  ;;  %v5363_v35 = vadd.f32 %v12840_v18, %v5325_v12 }
 0xcf7   : > { %v5140_v8 = vpop.xlane.xlu0 %5139  ;;  %v5288_v55 = vmul.f32 %v8566_v9, %v12699_v2  ;;  %8575 = vrsqrt.f32 %v5231_v56  ;;  %v5201_v59 = vmul.f32 0.25, %v5143_v13  ;;  %7985 = vmatprep.mubr.msk.bf16.mxu1 %vm1207_vm3, %v5389_v3  ;;  %v5362_v57 = vadd.f32 %v12840_v18, %v5324_v42 }
 0xcf8   : > { %v5200_v28 = vmul.f32 0.25, %v5140_v8  ;;  %8577 = vrsqrt.f32 %v5230_v14  ;;  %v5327_v7 = vmul.f32 %v12835_v43, %v5289_v30 }
 0xcf9   : > { %v8568_v50 = vpop.eup %8567  ;;  %v5233_v15 = vadd.f32 1e-05, %v5201_v59  ;;  %v5326_v27 = vmul.f32 %v12835_v43, %v5288_v55  ;;  %v5390_v2 = vpack.c.bf16 %v5362_v57, %v5361_v5 }
 0xcfa   : > { %v5232_v37 = vadd.f32 1e-05, %v5200_v28  ;;  %v8570_v33 = vpop.eup %8569  ;;  %v5149_v31 = vpop.xlane.xlu1 %5148  ;;  %v5291_v10 = vmul.f32 %v8568_v50, %v12708_v49  ;;  %v5365_v28 = vadd.f32 %v12840_v18, %v5327_v7 }
 0xcfb   : > { %v5146_v6 = vpop.xlane.xlu0 %5145  ;;  %v5290_v24 = vmul.f32 %v8570_v33, %v12711_v63  ;;  %8579 = vrsqrt.f32 %v5233_v15  ;;  %v5203_v41 = vmul.f32 0.25, %v5149_v31  ;;  %7986 = vmatmul.mubr.msk.bf16.gmra.mrb[72].mxu1 %vm1207_vm3, %v5390_v2  ;;  %v5364_v52 = vadd.f32 %v12840_v18, %v5326_v27 }
 0xcfc   : > { %v5202_v17 = vmul.f32 0.25, %v5146_v6  ;;  %8581 = vrsqrt.f32 %v5232_v37  ;;  %v5329_v5 = vmul.f32 %v12835_v43, %v5291_v10 }
 0xcfd   : > { %v8572_v56 = vpop.eup %8571  ;;  %v5235_v14 = vadd.f32 1e-05, %v5203_v41  ;;  %v5328_v9 = vmul.f32 %v12835_v43, %v5290_v24  ;;  %v5391_v8 = vpack.c.bf16 %v5364_v52, %v5363_v35 }
 0xcfe   : > { %v5234_v42 = vadd.f32 1e-05, %v5202_v17  ;;  %v8574_v13 = vpop.eup %8573  ;;  %v5293_v63 = vmul.f32 %v8572_v56, %v12720_v47  ;;  %v5155_v3 = vpop.xlane.xlu1 %5154  ;;  %v5367_v41 = vadd.f32 %v12840_v18, %v5329_v5 }
 0xcff   : > { %v5152_v12 = vpop.xlane.xlu0 %5151  ;;  %v5292_v49 = vmul.f32 %v8574_v13, %v12723_v11  ;;  %8583 = vrsqrt.f32 %v5235_v14  ;;  %v5205_v55 = vmul.f32 0.25, %v5155_v3  ;;  %7989 = vmatprep.mubr.msk.bf16.mxu1 %vm1207_vm3, %v5391_v8  ;;  %v5366_v30 = vadd.f32 %v12840_v18, %v5328_v9 }
 0xd00   : > { %v5204_v59 = vmul.f32 0.25, %v5152_v12  ;;  %8585 = vrsqrt.f32 %v5234_v42  ;;  %v5331_v31 = vmul.f32 %v12835_v43, %v5293_v63 }
 0xd01   : > { %v8576_v57 = vpop.eup %8575  ;;  %v5237_v50 = vadd.f32 1e-05, %v5205_v55  ;;  %v5330_v15 = vmul.f32 %v12835_v43, %v5292_v49  ;;  %v5392_v11 = vpack.c.bf16 %v5366_v30, %v5365_v28 }
 0xd02   : > { %v5236_v47 = vadd.f32 1e-05, %v5204_v59  ;;  %v8578_v37 = vpop.eup %8577  ;;  %v5161_v27 = vpop.xlane.xlu1 %5160  ;;  %v5295_v24 = vmul.f32 %v8576_v57, %v12732_v61  ;;  %v5369_v13 = vadd.f32 %v12840_v18, %v5331_v31 }
 0xd03   : > { %v5158_v33 = vpop.xlane.xlu0 %5157  ;;  %v5294_v2 = vmul.f32 %v8578_v37, %v12735_v29  ;;  %8587 = vrsqrt.f32 %v5237_v50  ;;  %v5207_v6 = vmul.f32 0.25, %v5161_v27  ;;  %7990 = vmatmul.mubr.msk.bf16.gmra.mrb[76].mxu1 %vm1207_vm3, %v5392_v11  ;;  %v5368_v17 = vadd.f32 %v12840_v18, %v5330_v15 }
 0xd04   : > { %v5206_v35 = vmul.f32 0.25, %v5158_v33  ;;  %8589 = vrsqrt.f32 %v5236_v47  ;;  %v5333_v49 = vmul.f32 %v12835_v43, %v5295_v24 }
 0xd05   : > { %v8580_v10 = vpop.eup %8579  ;;  %v5239_v52 = vadd.f32 1e-05, %v5207_v6  ;;  %v5332_v56 = vmul.f32 %v12835_v43, %v5294_v2  ;;  %v5393_v29 = vpack.c.bf16 %v5368_v17, %v5367_v41 }
 0xd06   : > { %v5238_v7 = vadd.f32 1e-05, %v5206_v35  ;;  %v8582_v14 = vpop.eup %8581  ;;  %v5167_v42 = vpop.xlane.xlu1 %5166  ;;  %v5297_v8 = vmul.f32 %v8580_v10, %v12744_v53  ;;  %v5371_v27 = vadd.f32 %v12840_v18, %v5333_v49 }
 0xd07   : > { %v5164_v9 = vpop.xlane.xlu0 %5163  ;;  %v5296_v61 = vmul.f32 %v8582_v14, %v12747_v34  ;;  %8591 = vrsqrt.f32 %v5239_v52  ;;  %v5209_v63 = vmul.f32 0.25, %v5167_v42  ;;  %7993 = vmatprep.mubr.msk.bf16.mxu1 %vm1207_vm3, %v5393_v29  ;;  %v5370_v12 = vadd.f32 %v12840_v18, %v5332_v56 }
 0xd08   : > { %v5208_v3 = vmul.f32 0.25, %v5164_v9  ;;  %8593 = vrsqrt.f32 %v5238_v7  ;;  %v5335_v33 = vmul.f32 %v12835_v43, %v5297_v8 }
 0xd09   : > { %v8584_v55 = vpop.eup %8583  ;;  %v5241_v59 = vadd.f32 1e-05, %v5209_v63  ;;  %v5334_v30 = vmul.f32 %v12835_v43, %v5296_v61  ;;  %v5394_v50 = vpack.c.bf16 %v5370_v12, %v5369_v13 }
 0xd0a   : > { %v5240_v28 = vadd.f32 1e-05, %v5208_v3  ;;  %v8586_v5 = vpop.eup %8585  ;;  %v5299_v34 = vmul.f32 %v8584_v55, %v12756_v62  ;;  %v5173_v57 = vpop.xlane.xlu1 %5172  ;;  %v5373_v14 = vadd.f32 %v12840_v18, %v5335_v33 }
 0xd0b   : > { %v5170_v47 = vpop.xlane.xlu0 %5169  ;;  %v5298_v53 = vmul.f32 %v8586_v5, %v12759_v22  ;;  %8595 = vrsqrt.f32 %v5241_v59  ;;  %v5211_v15 = vmul.f32 0.25, %v5173_v57  ;;  %7994 = vmatmul.mubr.msk.bf16.gmra.mrb[80].mxu1 %vm1207_vm3, %v5394_v50  ;;  %v5372_v11 = vadd.f32 %v12840_v18, %v5334_v30 }
 0xd0c   : > { %v5210_v37 = vmul.f32 0.25, %v5170_v47  ;;  %8597 = vrsqrt.f32 %v5240_v28  ;;  %v5337_v10 = vmul.f32 %v12835_v43, %v5299_v34 }
 0xd0d   : > { %v8588_v31 = vpop.eup %8587  ;;  %v5243_v2 = vadd.f32 1e-05, %v5211_v15  ;;  %v5336_v6 = vmul.f32 %v12835_v43, %v5298_v53  ;;  %v5395_v41 = vpack.c.bf16 %v5372_v11, %v5371_v27 }
 0xd0e   : > { %v5242_v62 = vadd.f32 1e-05, %v5210_v37  ;;  %v8590_v35 = vpop.eup %8589  ;;  %v5301_v22 = vmul.f32 %v8588_v31, %v12768_v19  ;;  %v5179_v24 = vpop.xlane.xlu1 %5178  ;;  %v5375_v8 = vadd.f32 %v12840_v18, %v5337_v10 }
 0xd0f   : > { %v5176_v17 = vpop.xlane.xlu0 %5175  ;;  %v5300_v52 = vmul.f32 %v8590_v35, %v12771_v21  ;;  %8599 = vrsqrt.f32 %v5243_v2  ;;  %v5213_v7 = vmul.f32 0.25, %v5179_v24  ;;  %7997 = vmatprep.mubr.msk.bf16.mxu1 %vm1207_vm3, %v5395_v41  ;;  %v5374_v42 = vadd.f32 %v12840_v18, %v5336_v6 }
 0xd10   : > { %v5212_v56 = vmul.f32 0.25, %v5176_v17  ;;  %8601 = vrsqrt.f32 %v5242_v62  ;;  %v5339_v12 = vmul.f32 %v12835_v43, %v5301_v22 }
 0xd11   : > { %v8592_v29 = vpop.eup %8591  ;;  %v5245_v9 = vadd.f32 1e-05, %v5213_v7  ;;  %v5338_v13 = vmul.f32 %v12835_v43, %v5300_v52  ;;  %v5396_v3 = vpack.c.bf16 %v5374_v42, %v5373_v14 }
 0xd12   : > { %v5244_v19 = vadd.f32 1e-05, %v5212_v56  ;;  %v8594_v61 = vpop.eup %8593  ;;  %v5303_v63 = vmul.f32 %v8592_v29, %v12780_v23  ;;  %v5377_v57 = vadd.f32 %v12840_v18, %v5339_v12 }
 0xd13   : > { %v5182_v21 = vpop.xlane.xlu0 %5181  ;;  %v5302_v49 = vmul.f32 %v8594_v61, %v12783_v48  ;;  %8603 = vrsqrt.f32 %v5245_v9  ;;  %v5376_v59 = vadd.f32 %v12840_v18, %v5338_v13  ;;  %7998 = vmatmul.mubr.msk.bf16.gmra.mrb[84].mxu1 %vm1207_vm3, %v5396_v3  ;;  %v12951_v61 = vld [vmem:[#allocation24] ss:$0 sm:$0xff] }
 0xd14   : > { %v5214_v55 = vmul.f32 0.25, %v5182_v21  ;;  %8605 = vrsqrt.f32 %v5244_v19  ;;  %v5341_v50 = vmul.f32 %v12835_v43, %v5303_v63  ;;  %v5743_v63 = vmul.f32 %v12951_v61, %v14547_v20  ;;  %v12958_v21 = vld [vmem:[#allocation24 + $0x2] ss:$0 sm:$0xff] }
 0xd15   : > { %v8596_v28 = vpop.eup %8595  ;;  %v5397_v5 = vpack.c.bf16 %v5376_v59, %v5375_v8  ;;  %v5340_v23 = vmul.f32 %v12835_v43, %v5302_v49  ;;  %v5976_v8 = vmul.f32 %v12958_v21, %v14549_v16  ;;  %v5977_v49 = vmul.f32 %v12958_v21, %v14550_v58  ;;  %v12968_v59 = vld [vmem:[#allocation24 + $0x7] ss:$0 sm:$0xff] }
 0xd16   : > { %v5246_v30 = vadd.f32 1e-05, %v5214_v55  ;;  %v8598_v34 = vpop.eup %8597  ;;  %v5305_v47 = vmul.f32 %v8596_v28, %v12792_v26  ;;  %v5379_v33 = vadd.f32 %v12840_v18, %v5341_v50  ;;  %v12966_v55 = vld [vmem:[#allocation24 + $0x4] ss:$0 sm:$0xff] }
 0xd17   : > { %v5304_v48 = vmul.f32 %v8598_v34, %v12795_v39  ;;  %8001 = vmatprep.mubr.msk.bf16.mxu1 %vm1207_vm3, %v5397_v5  ;;  %v5378_v53 = vadd.f32 %v12840_v18, %v5340_v23 }
 0xd18   : > { %8607 = vrsqrt.f32 %v5246_v30  ;;  %v5343_v39 = vmul.f32 %v12835_v43, %v5305_v47 }
 0xd19   : > { %v8600_v15 = vpop.eup %8599  ;;  %v5398_v37 = vpack.c.bf16 %v5378_v53, %v5377_v57  ;;  %v5342_v27 = vmul.f32 %v12835_v43, %v5304_v48  ;;  %v12971_v57 = vld [vmem:[#allocation24 + $0x3] ss:$0 sm:$0xff] }
 0xd1a   : > { %v8602_v11 = vpop.eup %8601  ;;  %v5307_v31 = vmul.f32 %v8600_v15, %v12804_v40  ;;  %v5381_v40 = vadd.f32 %v12840_v18, %v5343_v39 }
 0xd1b   : > { %v5306_v2 = vmul.f32 %v8602_v11, %v12807_v38  ;;  %v5380_v26 = vadd.f32 %v12840_v18, %v5342_v27  ;;  %8002 = vmatmul.mubr.msk.bf16.gmra.mrb[88].mxu1 %vm1207_vm3, %v5398_v37 }
 0xd1c   : > { %v5345_v17 = vmul.f32 %v12835_v43, %v5307_v31 }
 0xd1d   : > { %v8604_v62 = vpop.eup %8603  ;;  %v5399_v6 = vpack.c.bf16 %v5380_v26, %v5379_v33  ;;  %v5344_v35 = vmul.f32 %v12835_v43, %v5306_v2  ;;  %v12983_v33 = vld [vmem:[#allocation24 + $0x6] ss:$0 sm:$0xff] }
 0xd1e   : > { %v8606_v22 = vpop.eup %8605  ;;  %v5309_v24 = vmul.f32 %v8604_v62, %v12816_v4 }
 0xd1f   : > { %v5308_v41 = vmul.f32 %v8606_v22, %v12819_v51  ;;  %8005 = vmatprep.mubr.msk.bf16.mxu1 %vm1207_vm3, %v5399_v6  ;;  %v5382_v38 = vadd.f32 %v12840_v18, %v5344_v35  ;;  %v5383_v51 = vadd.f32 %v12840_v18, %v5345_v17 }
 0xd20   : > { %v5347_v10 = vmul.f32 %v12835_v43, %v5309_v24 }
 0xd21   : > { %v5400_v7 = vpack.c.bf16 %v5382_v38, %v5381_v40  ;;  %v5346_v56 = vmul.f32 %v12835_v43, %v5308_v41 }
 0xd22   : > { %v8608_v52 = vpop.eup %8607  ;;  %v5385_v4 = vadd.f32 %v12840_v18, %v5347_v10 }
 0xd23   : > { %v5310_v14 = vmul.f32 %v8608_v52, %v12828_v44  ;;  %v5384_v42 = vadd.f32 %v12840_v18, %v5346_v56  ;;  %8006 = vmatmul.mubr.msk.bf16.gmra.mrb[92].mxu1 %vm1207_vm3, %v5400_v7  ;;  %v12953_v44 = vld [vmem:[#allocation24 + $0x1] ss:$0 sm:$0xff]  ;;  %v13000_v56 = vld [vmem:[#allocation24 + $0x5] ss:$0 sm:$0xff] }
 0xd24   : > { %v5815_v3 = vmul.f32 0.0, %v12953_v44 }
 0xd25   : > { %v5348_v29 = vmul.f32 %v12835_v43, %v5310_v14  ;;  %v5401_v9 = vpack.c.bf16 %v5384_v42, %v5383_v51  ;;  %v5744_v43 = vmul.f32 %v12951_v61, %v14548_v32  ;;  %v13002_v14 = vld [vmem:[#allocation24 + $0x8] ss:$0 sm:$0xff] }
 0xd27   : > { %v5386_v19 = vadd.f32 %v12840_v18, %v5348_v29  ;;  %8009 = vmatprep.mubr.msk.bf16.mxu1 %vm1207_vm3, %v5401_v9  ;;  %v5846_v18 = vadd.f32 %v5815_v3, %v5743_v63  ;;  %v5847_v12 = vadd.f32 %v5815_v3, %v5744_v43 }
 0xd29   : > { %v5402_v13 = vpack.c.bf16 %v5386_v19, %v5385_v4  ;;  %v6008_v30 = vadd.f32 %v5976_v8, %v5846_v18  ;;  %v12973_v47 = vadd.f32 %v5977_v49, %v5847_v12 }
 0xd2b   : > { %8010 = vmatmul.mubr.msk.bf16.gmra.mrb[96].mxu1 %vm1207_vm3, %v5402_v13  ;;  %vm7005_vm3 = vcmask 1044480  }
 0xdc6   : > { %v7983_v28 = vpop.f32.mrb[68].mxu1 }
 0xdc7   : > { %v5649_v5 = vrot.slane %v7983_v28, 7  ;;  %v5818_v23 = vmul.f32 %v7983_v28, %v12953_v44  ;;  %v5881_v34 = vrot.slane %v7983_v28, 1  ;;  %v5489_v50 = vpop.f32.mrb[69].mxu1  ;;  %v12976_v48 = vmul.f32 %v7983_v28, %v12966_v55 }
 0xdc8   : > { %v12979_v53 = vmul.f32 %v7983_v28, %v12968_v59  ;;  %v5646_v15 = vrot.slane %v5489_v50, 7  ;;  %v5816_v37 = vmul.f32 %v12953_v44, %v5489_v50  ;;  %v7984_v27 = vpop.f32.mrb[70].mxu1  ;;  %v5878_v31 = vrot.slane %v5489_v50, 1 }
 0xdc9   : > { %v5722_v11 = vsel %vm1384_vm4, 0.0, %v5649_v5  ;;  %v6128_v2 = vmul.f32 %v12966_v55, %v5489_v50  ;;  %v5650_v26 = vrot.slane %v7984_v27, 7  ;;  %v5492_v39 = vpop.f32.mrb[71].mxu1  ;;  %v5819_v22 = vmul.f32 %v7984_v27, %v12953_v44 }
 0xdca   : > { %v5747_v62 = vmul.f32 %v12951_v61, %v5722_v11  ;;  %v6058_v6 = vmul.f32 %v12971_v57, %v5722_v11  ;;  %v5721_v35 = vsel %vm1384_vm4, 0.0, %v5646_v15  ;;  %v5882_v38 = vrot.slane %v7984_v27, 1 }
 0xdcb   : > { %v5745_v24 = vmul.f32 %v12951_v61, %v5721_v35  ;;  %v6056_v41 = vmul.f32 %v12971_v57, %v5721_v35  ;;  %v5651_v40 = vsel %vm1384_vm4, %v5649_v5, %v5650_v26  ;;  %v6278_v10 = vmul.f32 %v12983_v33, %v5722_v11 }
 0xdcc   : > { %v12993_v17 = vadd.f32 %v5818_v23, %v5747_v62  ;;  %v5748_v52 = vmul.f32 %v12951_v61, %v5651_v40  ;;  %v12998_v7 = vmul.f32 %v7984_v27, %v12966_v55  ;;  %v5883_v51 = vsel %vm3305_vm2, %v5881_v34, %v5882_v38 }
 0xdcd   : > { %v6088_v4 = vadd.f32 %v6056_v41, %v6008_v30  ;;  %v5954_v42 = vsel %vm3305_vm2, %v5882_v38, 0.0  ;;  %v13007_v29 = vmul.f32 %v7984_v27, %v12968_v59  ;;  %v5848_v9 = vadd.f32 %v5816_v37, %v5745_v24 }
 0xdce   : > { %v5851_v19 = vadd.f32 %v5819_v22, %v5748_v52  ;;  %v5980_v13 = vmul.f32 %v12958_v21, %v5883_v51  ;;  %v5981_v63 = vmul.f32 %v12958_v21, %v5954_v42  ;;  %v6208_v43 = vmul.f32 %v13000_v56, %v5883_v51  ;;  %v13018_v12 = vpop.f32.mrb[72].mxu1 }
 0xdcf   : > { %v6160_v3 = vadd.f32 %v6128_v2, %v6088_v4  ;;  %v13013_v18 = vmul.f32 %v13000_v56, %v5954_v42  ;;  %v13016_v8 = vmul.f32 %v13002_v14, %v5883_v51  ;;  %v13023_v28 = vmul.f32 %v13002_v14, %v5954_v42  ;;  %v13025_v23 = vpop.f32.mrb[73].mxu1 }
 0xdd0   : > { %v13020_v49 = vadd.f32 %v5981_v63, %v5851_v19  ;;  %v5647_v30 = vrot.slane %v5492_v39, 7  ;;  %v5879_v5 = vrot.slane %v5492_v39, 1  ;;  %v5817_v34 = vmul.f32 %v12953_v44, %v5492_v39  ;;  %v13031_v11 = vpop.f32.mrb[74].mxu1 }
 0xdd1   : > { %v6059_v50 = vmul.f32 %v12971_v57, %v5651_v40  ;;  %v6129_v37 = vmul.f32 %v12966_v55, %v5492_v39  ;;  %v5655_v27 = vrot.slane %v13018_v12, 7  ;;  %v6279_v35 = vmul.f32 %v12983_v33, %v5651_v40  ;;  %v13037_v22 = vpop.f32.mrb[75].mxu1 }
 0xdd2   : > { %v5648_v2 = vsel %vm1384_vm4, %v5646_v15, %v5647_v30  ;;  %v5880_v26 = vsel %vm3305_vm2, %v5878_v31, %v5879_v5  ;;  %v5953_v62 = vsel %vm3305_vm2, %v5879_v5, 0.0  ;;  %v5822_v38 = vmul.f32 %v13018_v12, %v12953_v44 }
 0xdd3   : > { %v5746_v24 = vmul.f32 %v12951_v61, %v5648_v2  ;;  %v5978_v41 = vmul.f32 %v12958_v21, %v5880_v26  ;;  %v6057_v39 = vmul.f32 %v12971_v57, %v5648_v2  ;;  %v5979_v52 = vmul.f32 %v12958_v21, %v5953_v62 }
 0xdd4   : > { %v6206_v15 = vmul.f32 %v13000_v56, %v5880_v26  ;;  %v6207_v31 = vmul.f32 %v13000_v56, %v5953_v62  ;;  %v5724_v4 = vsel %vm1384_vm4, 0.0, %v5655_v27  ;;  %v5887_v30 = vrot.slane %v13018_v12, 1 }
 0xdd5   : > { %v5849_v40 = vadd.f32 %v5817_v34, %v5746_v24  ;;  %v6010_v51 = vadd.f32 %v5978_v41, %v5848_v9  ;;  %v6089_v42 = vadd.f32 %v6057_v39, %v12973_v47  ;;  %v5751_v19 = vmul.f32 %v12951_v61, %v5724_v4 }
 0xdd6   : > { %v6238_v63 = vadd.f32 %v6206_v15, %v6160_v3  ;;  %v13052_v5 = vmul.f32 %v12971_v57, %v5724_v4  ;;  %v13056_v2 = vmul.f32 %v13018_v12, %v12966_v55  ;;  %v13059_v34 = vmul.f32 %v12983_v33, %v5724_v4  ;;  %v13061_v9 = vpop.f32.mrb[76].mxu1 }
 0xdd7   : > { %v6011_v26 = vadd.f32 %v5979_v52, %v5849_v40  ;;  %v6090_v62 = vadd.f32 %v6058_v6, %v6010_v51  ;;  %v6161_v45 = vadd.f32 %v6129_v37, %v6089_v42  ;;  %v13063_v24 = vadd.f32 %v5822_v38, %v5751_v19  ;;  %v13070_v39 = vpop.f32.mrb[77].mxu1 }
 0xdd8   : > { %v6310_v47 = vadd.f32 %v6278_v10, %v6238_v63  ;;  %v13067_v3 = vmul.f32 %v13018_v12, %v12968_v59  ;;  %v5652_v41 = vrot.slane %v13025_v23, 7  ;;  %v5820_v6 = vmul.f32 %v12953_v44, %v13025_v23  ;;  %v13075_v4 = vpop.f32.mrb[78].mxu1 }
 0xdd9   : > { %v6091_v15 = vadd.f32 %v6059_v50, %v6011_v26  ;;  %v6239_v52 = vadd.f32 %v6207_v31, %v6161_v45  ;;  %v6012_v37 = vadd.f32 %v5980_v13, %v12993_v17  ;;  %v5884_v12 = vrot.slane %v13025_v23, 1  ;;  %v13083_v51 = vpop.f32.mrb[79].mxu1 }
 0xdda   : > { %v13078_v10 = vadd.f32 %v12979_v53, %v6310_v47  ;;  %v5723_v38 = vsel %vm1384_vm4, 0.0, %v5652_v41  ;;  %v6162_v40 = vadd.f32 %v12976_v48, %v6090_v62  ;;  %v6132_v13 = vmul.f32 %v12966_v55, %v13025_v23 }
 0xddb   : > { %v6163_v45 = vadd.f32 %v12998_v7, %v6091_v15  ;;  %v6311_v50 = vadd.f32 %v6279_v35, %v6239_v52  ;;  %v5749_v31 = vmul.f32 %v12951_v61, %v5723_v38  ;;  %v6060_v17 = vmul.f32 %v12971_v57, %v5723_v38 }
 0xddc   : > { %v6240_v53 = vadd.f32 %v6208_v43, %v6162_v40  ;;  %v6280_v42 = vmul.f32 %v12983_v33, %v5723_v38  ;;  %v5656_v19 = vrot.slane %v13031_v11, 7  ;;  %v6352_v7 = vmul.f32 %v12968_v59, %v13025_v23 }
 0xddd   : > { %v6382_v63 = vadd.f32 %v13007_v29, %v6311_v50  ;;  %v5852_v48 = vadd.f32 %v5820_v6, %v5749_v31  ;;  %v6092_v26 = vadd.f32 %v6060_v17, %v6012_v37  ;;  %v5823_v47 = vmul.f32 %v13031_v11, %v12953_v44 }
 0xdde   : > { %v6312_v35 = vadd.f32 %v6280_v42, %v6240_v53  ;;  %v5657_v62 = vsel %vm1384_vm4, %v5655_v27, %v5656_v19  ;;  %v5888_v15 = vrot.slane %v13031_v11, 1  ;;  %v13105_v29 = vmul.f32 %v13031_v11, %v12966_v55  ;;  %v13107_v6 = vpop.f32.mrb[80].mxu1 }
 0xddf   : > { %v13100_v43 = vadd.f32 %v13023_v28, %v6382_v63  ;;  %v6164_v52 = vadd.f32 %v6132_v13, %v6092_v26  ;;  %v5752_v38 = vmul.f32 %v12951_v61, %v5657_v62  ;;  %v6063_v40 = vmul.f32 %v12971_v57, %v5657_v62  ;;  %v13112_v50 = vpop.f32.mrb[81].mxu1 }
 0xde0   : > { %v6383_v23 = vadd.f32 %v6352_v7, %v6312_v35  ;;  %v5889_v27 = vsel %vm3305_vm2, %v5887_v30, %v5888_v15  ;;  %v5956_v37 = vsel %vm3305_vm2, %v5888_v15, 0.0  ;;  %v6283_v13 = vmul.f32 %v12983_v33, %v5657_v62  ;;  %v13119_v53 = vpop.f32.mrb[82].mxu1 }
 0xde1   : > { %14631 = vst [vmem:[#allocation55_spill] sm:$0xff] %v13100_v43  ;;  %v5855_v28 = vadd.f32 %v5823_v47, %v5752_v38  ;;  %v5984_v31 = vmul.f32 %v12958_v21, %v5889_v27  ;;  %v5985_v17 = vmul.f32 %v12958_v21, %v5956_v37  ;;  %6807 = vrot.lane.b32.xlu0 %v13100_v43, %s9249_s7  ;;  %v13132_v26 = vpop.f32.mrb[83].mxu1  ;;  %v5653_v62 = vrot.slane %v13037_v22, 7 }
 0xde2   : > { %v13122_v30 = vmul.f32 %v13000_v56, %v5889_v27  ;;  %v13125_v42 = vmul.f32 %v13000_v56, %v5956_v37  ;;  %v6355_v19 = vmul.f32 %v13031_v11, %v12968_v59  ;;  %v13130_v63 = vmul.f32 %v13002_v14, %v5889_v27 }
 0xde3   : > { %v13134_v7 = vadd.f32 %v5985_v17, %v5855_v28  ;;  %v13137_v35 = vmul.f32 %v13002_v14, %v5956_v37  ;;  %v5885_v47 = vrot.slane %v13037_v22, 1  ;;  %v5821_v15 = vmul.f32 %v12953_v44, %v13037_v22 }
 0xde4   : > { %v6133_v11 = vmul.f32 %v12966_v55, %v13037_v22  ;;  %v6241_v38 = vadd.f32 %v13013_v18, %v6163_v45  ;;  %v6353_v27 = vmul.f32 %v12968_v59, %v13037_v22  ;;  %v5654_v28 = vsel %vm1384_vm4, %v5652_v41, %v5653_v62 }
 0xde5   : > { %14632 = vst [vmem:[#allocation56_spill] sm:$0xff] %v13137_v35  ;;  %v5886_v37 = vsel %vm3305_vm2, %v5884_v12, %v5885_v47  ;;  %v5955_v17 = vsel %vm3305_vm2, %v5885_v47, 0.0  ;;  %v5661_v54 = vrot.slane %v13061_v9, 7  ;;  %v5750_v1 = vmul.f32 %v12951_v61, %v5654_v28 }
 0xde6   : > { %v5982_v36 = vmul.f32 %v12958_v21, %v5886_v37  ;;  %v6061_v25 = vmul.f32 %v12971_v57, %v5654_v28  ;;  %v5826_v18 = vmul.f32 %v13061_v9, %v12953_v44  ;;  %v5983_v45 = vmul.f32 %v12958_v21, %v5955_v17  ;;  %v13161_v62 = vpop.f32.mrb[84].mxu1 }
 0xde7   : > { %v6210_v22 = vmul.f32 %v13000_v56, %v5886_v37  ;;  %v6281_v41 = vmul.f32 %v12983_v33, %v5654_v28  ;;  %v6423_v12 = vmul.f32 %v13002_v14, %v5886_v37  ;;  %14633 = vst [vmem:[#allocation57_spill] sm:$0xff] %v13161_v62  ;;  %v5853_v47 = vadd.f32 %v5821_v15, %v5750_v1  ;;  %v13165_v58 = vpop.f32.mrb[85].mxu1 }
 0xde8   : > { %v6014_v46 = vadd.f32 %v5982_v36, %v5852_v48  ;;  %v6093_v0 = vadd.f32 %v6061_v25, %v13020_v49  ;;  %v6211_v60 = vmul.f32 %v13000_v56, %v5955_v17  ;;  %v5726_v20 = vsel %vm1384_vm4, 0.0, %v5661_v54  ;;  %v13170_v35 = vpop.f32.mrb[86].mxu1 }
 0xde9   : > { %v6242_v16 = vadd.f32 %v6210_v22, %v6164_v52  ;;  %v6313_v43 = vadd.f32 %v6281_v41, %v6241_v38  ;;  %v13167_v32 = vadd.f32 %v6423_v12, %v6383_v23  ;;  %v6015_v28 = vadd.f32 %v5983_v45, %v5853_v47  ;;  %v13174_v1 = vpop.f32.mrb[87].mxu1 }
 0xdea   : > { %v6165_v37 = vadd.f32 %v6133_v11, %v6093_v0  ;;  %v6424_v62 = vmul.f32 %v13002_v14, %v5955_v17  ;;  %v5755_v36 = vmul.f32 %v12951_v61, %v5726_v20  ;;  %14635 = vst [vmem:[#allocation59_spill] sm:$0xff] %v13174_v1  ;;  %v5893_v48 = vrot.slane %v13061_v9, 1 }
 0xdeb   : > { %14634 = vst [vmem:[#allocation58_spill] sm:$0xff] %v13167_v32  ;;  %v13177_v25 = vadd.f32 %v13059_v34, %v6242_v16  ;;  %v6384_v49 = vadd.f32 %v6353_v27, %v6313_v43  ;;  %v13181_v52 = vmul.f32 %v12971_v57, %v5726_v20  ;;  %v6095_v23 = vadd.f32 %v6063_v40, %v6015_v28 }
 0xdec   : > { %v6243_v15 = vadd.f32 %v6211_v60, %v6165_v37  ;;  %v13183_v38 = vadd.f32 %v5826_v18, %v5755_v36  ;;  %v13187_v0 = vmul.f32 %v13061_v9, %v12966_v55  ;;  %v13192_v17 = vmul.f32 %v12983_v33, %v5726_v20 }
 0xded   : > { %v13189_v11 = vadd.f32 %v6424_v62, %v6384_v49  ;;  %v13196_v16 = vmul.f32 %v13061_v9, %v12968_v59  ;;  %v5658_v34 = vrot.slane %v13070_v39, 7  ;;  %v5824_v60 = vmul.f32 %v12953_v44, %v13070_v39 }
 0xdee   : > { %v6315_v43 = vadd.f32 %v6283_v13, %v6243_v15  ;;  %v6016_v40 = vadd.f32 %v5984_v31, %v13063_v24  ;;  %v6094_v27 = vadd.f32 %v13052_v5, %v6014_v46  ;;  %v5890_v45 = vrot.slane %v13070_v39, 1  ;;  %v13208_v22 = vpop.f32.mrb[88].mxu1 }
 0xdef   : > { %14636 = vst [vmem:[#allocation60_spill] sm:$0xff] %v13189_v11  ;;  %v5725_v18 = vsel %vm1384_vm4, 0.0, %v5658_v34  ;;  %v6136_v20 = vmul.f32 %v12966_v55, %v13070_v39  ;;  %v5662_v9 = vrot.slane %v13075_v4, 7  ;;  %14637 = vst [vmem:[#allocation61_spill] sm:$0xff] %v13208_v22  ;;  %v13215_v46 = vpop.f32.mrb[89].mxu1  ;;  %v6356_v31 = vmul.f32 %v12968_v59, %v13070_v39 }
 0xdf0   : > { %v13210_v41 = vadd.f32 %v6355_v19, %v6315_v43  ;;  %v5753_v13 = vmul.f32 %v12951_v61, %v5725_v18  ;;  %v6064_v12 = vmul.f32 %v12971_v57, %v5725_v18  ;;  %v6166_v24 = vadd.f32 %v13056_v2, %v6094_v27  ;;  %14638 = vst [vmem:[#allocation62_spill] sm:$0xff] %v13215_v46  ;;  %v13222_v28 = vpop.f32.mrb[90].mxu1 }
 0xdf1   : > { %v6284_v5 = vmul.f32 %v12983_v33, %v5725_v18  ;;  %v5663_v62 = vsel %vm1384_vm4, %v5661_v54, %v5662_v9  ;;  %v5894_v47 = vrot.slane %v13075_v4, 1  ;;  %14639 = vst [vmem:[#allocation63_spill] sm:$0xff] %v13222_v28  ;;  %v5827_v2 = vmul.f32 %v13075_v4, %v12953_v44  ;;  %v13228_v49 = vpop.f32.mrb[91].mxu1 }
 0xdf2   : > { %v6096_v19 = vadd.f32 %v6064_v12, %v6016_v40  ;;  %v6244_v37 = vadd.f32 %v13122_v30, %v6166_v24  ;;  %v5756_v36 = vmul.f32 %v12951_v61, %v5663_v62  ;;  %14640 = vst [vmem:[#allocation64_spill] sm:$0xff] %v13228_v49  ;;  %v5856_v15 = vadd.f32 %v5824_v60, %v5753_v13 }
 0xdf3   : > { %v5895_v43 = vsel %vm3305_vm2, %v5893_v48, %v5894_v47  ;;  %v5958_v39 = vsel %vm3305_vm2, %v5894_v47, 0.0  ;;  %v6067_v54 = vmul.f32 %v12971_v57, %v5663_v62  ;;  %v13235_v30 = vmul.f32 %v13075_v4, %v12966_v55 }
 0xdf4   : > { %v6168_v27 = vadd.f32 %v6136_v20, %v6096_v19  ;;  %v6316_v18 = vadd.f32 %v6284_v5, %v6244_v37  ;;  %v5859_v9 = vadd.f32 %v5827_v2, %v5756_v36  ;;  %v13238_v40 = vmul.f32 %v12958_v21, %v5895_v43 }
 0xdf5   : > { %v5989_v12 = vmul.f32 %v12958_v21, %v5958_v39  ;;  %v13242_v60 = vmul.f32 %v13000_v56, %v5895_v43  ;;  %v13245_v48 = vmul.f32 %v13000_v56, %v5958_v39  ;;  %v6287_v20 = vmul.f32 %v12983_v33, %v5663_v62 }
 0xdf6   : > { %v6387_v13 = vadd.f32 %v6356_v31, %v6316_v18  ;;  %v13250_v24 = vmul.f32 %v13075_v4, %v12968_v59  ;;  %v13253_v5 = vmul.f32 %v13002_v14, %v5895_v43  ;;  %v13258_v19 = vmul.f32 %v13002_v14, %v5958_v39  ;;  %v13265_v36 = vpop.f32.mrb[92].mxu1 }
 0xdf7   : > { %v13255_v47 = vadd.f32 %v5989_v12, %v5859_v9  ;;  %v13262_v37 = vadd.f32 %v13016_v8, %v13078_v10  ;;  %v5659_v31 = vrot.slane %v13083_v51, 7  ;;  %14644 = vst [vmem:[#allocation68_spill] sm:$0xff] %v13265_v36  ;;  %v5825_v4 = vmul.f32 %v12953_v44, %v13083_v51  ;;  %v13273_v39 = vpop.f32.mrb[93].mxu1 }
 0xdf8   : > { %14641 = vst [vmem:[#allocation65_spill] sm:$0xff] %v13253_v5  ;;  %14642 = vst [vmem:[#allocation66_spill] sm:$0xff] %v13258_v19  ;;  %v5891_v62 = vrot.slane %v13083_v51, 1  ;;  %v6137_v2 = vmul.f32 %v12966_v55, %v13083_v51  ;;  %v6167_v43 = vadd.f32 %v13105_v29, %v6095_v23  ;;  %v6357_v10 = vmul.f32 %v12968_v59, %v13083_v51  ;;  %v13283_v12 = vpop.f32.mrb[94].mxu1 }
 0xdf9   : > { %14643 = vst [vmem:[#allocation67_spill] sm:$0xff] %v13262_v37  ;;  %14645 = vst [vmem:[#allocation69_spill] sm:$0xff] %v13273_v39  ;;  %6805 = vrot.lane.b32.xlu1 %v13262_v37, %s9249_s7  ;;  %v5660_v8 = vsel %vm1384_vm4, %v5658_v34, %v5659_v31  ;;  %v5830_v9 = vmul.f32 %v13107_v6, %v12953_v44  ;;  %v13289_v39 = vpop.f32.mrb[95].mxu1  ;;  %v5899_v18 = vrot.slane %v13107_v6, 1 }
 0xdfa   : > { %14646 = vst [vmem:[#allocation70_spill] sm:$0xff] %v13283_v12  ;;  %v5754_v36 = vmul.f32 %v12951_v61, %v5660_v8  ;;  %v5892_v29 = vsel %vm3305_vm2, %v5890_v45, %v5891_v62  ;;  %v5957_v23 = vsel %vm3305_vm2, %v5891_v62, 0.0  ;;  %v6065_v37 = vmul.f32 %v12971_v57, %v5660_v8  ;;  %14647 = vst [vmem:[#allocation71_spill] sm:$0xff] %v13289_v39 }
 0xdfb   : > { %v5986_v34 = vmul.f32 %v12958_v21, %v5892_v29  ;;  %v5987_v51 = vmul.f32 %v12958_v21, %v5957_v23  ;;  %v6214_v31 = vmul.f32 %v13000_v56, %v5892_v29  ;;  %v6245_v28 = vadd.f32 %v13125_v42, %v6167_v43 }
 0xdfc   : > { %v5857_v49 = vadd.f32 %v5825_v4, %v5754_v36  ;;  %v6097_v12 = vadd.f32 %v6065_v37, %v13134_v7  ;;  %v6285_v45 = vmul.f32 %v12983_v33, %v5660_v8  ;;  %v6215_v46 = vmul.f32 %v13000_v56, %v5957_v23 }
 0xdfd   : > { %v6018_v62 = vadd.f32 %v5986_v34, %v5856_v15  ;;  %v6246_v22 = vadd.f32 %v6214_v31, %v6168_v27  ;;  %v6427_v39 = vmul.f32 %v13002_v14, %v5892_v29  ;;  %6809 = vrot.lane.b32.xlu1 %v13167_v32, %s9249_s7  ;;  %v14648_v36 = vrot.slane %v13107_v6, 7 }
 0xdfe   : > { %v6019_v19 = vadd.f32 %v5987_v51, %v5857_v49  ;;  %v6169_v5 = vadd.f32 %v6137_v2, %v6097_v12  ;;  %v6317_v1 = vadd.f32 %v6285_v45, %v6245_v28  ;;  %v6428_v15 = vmul.f32 %v13002_v14, %v5957_v23  ;;  %v13312_v4 = vpop.f32.mrb[96].mxu1 }
 0xdff   : > { %v5728_v7 = vsel %vm1384_vm4, 0.0, %v14648_v36  ;;  %v13306_v42 = vadd.f32 %v13192_v17, %v6246_v22  ;;  %v13309_v37 = vadd.f32 %v6427_v39, %v6387_v13  ;;  %v13317_v2 = vpop.f32.mrb[97].mxu1  ;;  %v13323_v17 = vmul.f32 %v13107_v6, %v12966_v55 }
 0xe00   : > { %v5759_v27 = vmul.f32 %v12951_v61, %v5728_v7  ;;  %v6099_v43 = vadd.f32 %v6067_v54, %v6019_v19  ;;  %v6247_v8 = vadd.f32 %v6215_v46, %v6169_v5  ;;  %v6388_v49 = vadd.f32 %v6357_v10, %v6317_v1  ;;  %14650 = vst [vmem:[#allocation94_spill] sm:$0xff] %v13317_v2  ;;  %v13331_v1 = vpop.f32.mrb[98].mxu1 }
 0xe01   : > { %14649 = vst [vmem:[#allocation93_spill] sm:$0xff] %v13309_v37  ;;  %v13315_v28 = vmul.f32 %v12971_v57, %v5728_v7  ;;  %v13326_v22 = vmul.f32 %v12983_v33, %v5728_v7  ;;  %v5664_v13 = vrot.slane %v13112_v50, 7  ;;  %6811 = vrot.lane.b32.xlu1 %v13189_v11, %s9249_s7  ;;  %14651 = vst [vmem:[#allocation95_spill] sm:$0xff] %v13331_v1  ;;  %v13341_v39 = vpop.f32.mrb[99].mxu1 }
 0xe02   : > { %v13319_v12 = vadd.f32 %v5830_v9, %v5759_v27  ;;  %v6319_v46 = vadd.f32 %v6287_v20, %v6247_v8  ;;  %v13333_v54 = vadd.f32 %v6428_v15, %v6388_v49  ;;  %v13337_v5 = vmul.f32 %v13107_v6, %v12968_v59  ;;  %14653 = vst [vmem:[#allocation97_spill] sm:$0xff] %v13341_v39 }
 0xe03   : > { %v5828_v19 = vmul.f32 %v12953_v44, %v13112_v50  ;;  %v5727_v10 = vsel %vm1384_vm4, 0.0, %v5664_v13  ;;  %v5896_v9 = vrot.slane %v13112_v50, 1  ;;  %v6020_v29 = vadd.f32 %v13238_v40, %v13183_v38 }
 0xe04   : > { %14652 = vst [vmem:[#allocation96_spill] sm:$0xff] %v13333_v54  ;;  %v6098_v20 = vadd.f32 %v13181_v52, %v6018_v62  ;;  %v13349_v23 = vadd.f32 %v13250_v24, %v6319_v46  ;;  %v5757_v34 = vmul.f32 %v12951_v61, %v5727_v10  ;;  %v6068_v51 = vmul.f32 %v12971_v57, %v5727_v10 }
 0xe05   : > { %v6140_v31 = vmul.f32 %v12966_v55, %v13112_v50  ;;  %v6288_v36 = vmul.f32 %v12983_v33, %v5727_v10  ;;  %v6360_v7 = vmul.f32 %v12968_v59, %v13112_v50  ;;  %v5668_v38 = vrot.slane %v13119_v53, 7 }
 0xe06   : > { %v6170_v45 = vadd.f32 %v13187_v0, %v6098_v20  ;;  %v5860_v52 = vadd.f32 %v5828_v19, %v5757_v34  ;;  %v6100_v40 = vadd.f32 %v6068_v51, %v6020_v29  ;;  %v5831_v24 = vmul.f32 %v13119_v53, %v12953_v44 }
 0xe07   : > { %v5900_v62 = vrot.slane %v13119_v53, 1  ;;  %v14654_v27 = vrot.slane %v13107_v6, 7  ;;  %v13369_v8 = vmul.f32 %v13119_v53, %v12966_v55  ;;  %v6385_v50 = vadd.f32 %v13067_v3, %v13177_v25 }
 0xe08   : > { %v6248_v15 = vadd.f32 %v13242_v60, %v6170_v45  ;;  %v6172_v49 = vadd.f32 %v6140_v31, %v6100_v40  ;;  %v13382_v20 = vmul.f32 %v13119_v53, %v12968_v59  ;;  %v5665_v40 = vrot.slane %v13132_v26, 7 }
 0xe09   : > { %v5669_v0 = vsel %vm1384_vm4, %v14654_v27, %v5668_v38  ;;  %v5901_v19 = vsel %vm3305_vm2, %v5899_v18, %v5900_v62  ;;  %v5960_v10 = vsel %vm3305_vm2, %v5900_v62, 0.0  ;;  %v6141_v62 = vmul.f32 %v12966_v55, %v13132_v26 }
 0xe0a   : > { %v5760_v46 = vmul.f32 %v12951_v61, %v5669_v0  ;;  %v6320_v29 = vadd.f32 %v6288_v36, %v6248_v15  ;;  %v13377_v60 = vmul.f32 %v12958_v21, %v5901_v19  ;;  %v5993_v6 = vmul.f32 %v12958_v21, %v5960_v10  ;;  %v14656_v15 = vld [vmem:[#allocation56_spill] sm:$0xff] }
 0xe0b   : > { %v6071_v3 = vmul.f32 %v12971_v57, %v5669_v0  ;;  %v13386_v25 = vmul.f32 %v13000_v56, %v5901_v19  ;;  %v13389_v18 = vmul.f32 %v13000_v56, %v5960_v10  ;;  %v6291_v31 = vmul.f32 %v12983_v33, %v5669_v0 }
 0xe0c   : > { %v5863_v34 = vadd.f32 %v5831_v24, %v5760_v46  ;;  %v6391_v51 = vadd.f32 %v6360_v7, %v6320_v29  ;;  %v13393_v45 = vmul.f32 %v13002_v14, %v5901_v19  ;;  %v13396_v36 = vadd.f32 %v13130_v63, %v6385_v50  ;;  %v14658_v19 = vld [vmem:[#allocation57_spill] sm:$0xff] }
 0xe0d   : > { %v13401_v38 = vmul.f32 %v13002_v14, %v5960_v10  ;;  %v5897_v24 = vrot.slane %v13132_v26, 1  ;;  %v5829_v7 = vmul.f32 %v12953_v44, %v13132_v26  ;;  %v6171_v63 = vadd.f32 %v13235_v30, %v6099_v43 }
 0xe0e   : > { %14655 = vst [vmem:[#allocation98_spill] sm:$0xff] %v13396_v36  ;;  %v13398_v53 = vadd.f32 %v5993_v6, %v5863_v34  ;;  %6813 = vrot.lane.b32.xlu0 %v13396_v36, %s9249_s7  ;;  %v13414_v27 = vadd.f32 %v14656_v15, %v13210_v41  ;;  %v5666_v0 = vsel %vm1384_vm4, %v5664_v13, %v5665_v40  ;;  %v5673_v10 = vrot.slane %v14658_v19, 7 }
 0xe0f   : > { %v5898_v50 = vsel %vm3305_vm2, %v5896_v9, %v5897_v24  ;;  %v5959_v46 = vsel %vm3305_vm2, %v5897_v24, 0.0  ;;  %v5758_v29 = vmul.f32 %v12951_v61, %v5666_v0  ;;  %v6069_v34 = vmul.f32 %v12971_v57, %v5666_v0 }
 0xe10   : > { %14657 = vst [vmem:[#allocation56_spill] sm:$0xff] %v13414_v27  ;;  %v5990_v6 = vmul.f32 %v12958_v21, %v5898_v50  ;;  %v6361_v30 = vmul.f32 %v12968_v59, %v13132_v26  ;;  %6815 = vrot.lane.b32.xlu1 %v13414_v27, %s9249_s7  ;;  %v5991_v41 = vmul.f32 %v12958_v21, %v5959_v46  ;;  %v5730_v32 = vsel %vm1384_vm4, 0.0, %v5673_v10 }
 0xe11   : > { %v6218_v43 = vmul.f32 %v13000_v56, %v5898_v50  ;;  %v6249_v13 = vadd.f32 %v13245_v48, %v6171_v63  ;;  %v6289_v9 = vmul.f32 %v12983_v33, %v5666_v0  ;;  %v5861_v40 = vadd.f32 %v5829_v7, %v5758_v29 }
 0xe12   : > { %v6022_v24 = vadd.f32 %v5990_v6, %v5860_v52  ;;  %v6101_v15 = vadd.f32 %v6069_v34, %v13255_v47  ;;  %v6431_v36 = vmul.f32 %v13002_v14, %v5898_v50  ;;  %6817 = vrot.lane.b32.xlu0 %v13309_v37, %s9249_s7  ;;  %v6219_v26 = vmul.f32 %v13000_v56, %v5959_v46  ;;  %v14664_v37 = vld [vmem:[#allocation66_spill] sm:$0xff] }
 0xe13   : > { %v6250_v27 = vadd.f32 %v6218_v43, %v6172_v49  ;;  %v6321_v11 = vadd.f32 %v6289_v9, %v6249_v13  ;;  %v6023_v39 = vadd.f32 %v5991_v41, %v5861_v40  ;;  %v5763_v7 = vmul.f32 %v12951_v61, %v5730_v32 }
 0xe14   : > { %v6173_v1 = vadd.f32 %v6141_v62, %v6101_v15  ;;  %v13437_v48 = vadd.f32 %v6431_v36, %v6391_v51  ;;  %6819 = vrot.lane.b32.xlu1 %v13333_v54, %s9249_s7  ;;  %v6432_v63 = vmul.f32 %v13002_v14, %v5959_v46  ;;  %v5834_v49 = vmul.f32 %v14658_v19, %v12953_v44 }
 0xe15   : > { %v13443_v47 = vadd.f32 %v13326_v22, %v6250_v27  ;;  %v6392_v52 = vadd.f32 %v6361_v30, %v6321_v11  ;;  %v6103_v0 = vadd.f32 %v6071_v3, %v6023_v39  ;;  %v5905_v62 = vrot.slane %v14658_v19, 1 }
 0xe16   : > { %14659 = vst [vmem:[#allocation57_spill] sm:$0xff] %v13437_v48  ;;  %v6251_v50 = vadd.f32 %v6219_v26, %v6173_v1  ;;  %v13450_v51 = vmul.f32 %v12971_v57, %v5730_v32  ;;  %v13454_v29 = vadd.f32 %v5834_v49, %v5763_v7  ;;  %v13458_v22 = vmul.f32 %v14658_v19, %v12966_v55 }
 0xe17   : > { %v13452_v36 = vadd.f32 %v6432_v63, %v6392_v52  ;;  %v13461_v11 = vmul.f32 %v12983_v33, %v5730_v32  ;;  %v13465_v1 = vmul.f32 %v14658_v19, %v12968_v59  ;;  %v5670_v39 = vrot.slane %v13165_v58, 7 }
 0xe18   : > { %v6323_v27 = vadd.f32 %v6291_v31, %v6251_v50  ;;  %v5832_v3 = vmul.f32 %v12953_v44, %v13165_v58  ;;  %v5902_v46 = vrot.slane %v13165_v58, 1  ;;  %v6024_v6 = vadd.f32 %v13377_v60, %v13319_v12 }
 0xe19   : > { %14660 = vst [vmem:[#allocation99_spill] sm:$0xff] %v13452_v36  ;;  %v6102_v34 = vadd.f32 %v13315_v28, %v6022_v24  ;;  %v6144_v32 = vmul.f32 %v12966_v55, %v13165_v58  ;;  %v5729_v19 = vsel %vm1384_vm4, 0.0, %v5670_v39  ;;  %v6364_v30 = vmul.f32 %v12968_v59, %v13165_v58 }
 0xe1a   : > { %v13477_v31 = vadd.f32 %v13382_v20, %v6323_v27  ;;  %v5674_v41 = vrot.slane %v13170_v35, 7  ;;  %v5761_v43 = vmul.f32 %v12951_v61, %v5729_v19  ;;  %v6072_v13 = vmul.f32 %v12971_v57, %v5729_v19 }
 0xe1b   : > { %v6174_v12 = vadd.f32 %v13323_v17, %v6102_v34  ;;  %v5835_v28 = vmul.f32 %v13170_v35, %v12953_v44  ;;  %v6292_v60 = vmul.f32 %v12983_v33, %v5729_v19  ;;  %v5906_v9 = vrot.slane %v13170_v35, 1  ;;  %v14661_v19 = vld [vmem:[#allocation59_spill] sm:$0xff] }
 0xe1c   : > { %v5675_v20 = vsel %vm1384_vm4, %v5673_v10, %v5674_v41  ;;  %v13493_v58 = vmul.f32 %v13170_v35, %v12966_v55  ;;  %v6104_v40 = vadd.f32 %v6072_v13, %v6024_v6  ;;  %v13499_v17 = vmul.f32 %v13170_v35, %v12968_v59 }
 0xe1d   : > { %v6252_v24 = vadd.f32 %v13386_v25, %v6174_v12  ;;  %v5764_v15 = vmul.f32 %v12951_v61, %v5675_v20  ;;  %v5864_v26 = vadd.f32 %v5832_v3, %v5761_v43  ;;  %v5907_v7 = vsel %vm3305_vm2, %v5905_v62, %v5906_v9 }
 0xe1e   : > { %v5962_v10 = vsel %vm3305_vm2, %v5906_v9, 0.0  ;;  %v6075_v52 = vmul.f32 %v12971_v57, %v5675_v20  ;;  %v6176_v63 = vadd.f32 %v6144_v32, %v6104_v40  ;;  %v6295_v27 = vmul.f32 %v12983_v33, %v5675_v20 }
 0xe1f   : > { %v6324_v49 = vadd.f32 %v6292_v60, %v6252_v24  ;;  %v5867_v50 = vadd.f32 %v5835_v28, %v5764_v15  ;;  %v5996_v25 = vmul.f32 %v12958_v21, %v5907_v7  ;;  %v5997_v6 = vmul.f32 %v12958_v21, %v5962_v10  ;;  %v14662_v60 = vld [vmem:[#allocation65_spill] sm:$0xff] }
 0xe20   : > { %v13508_v34 = vmul.f32 %v13000_v56, %v5907_v7  ;;  %v13511_v35 = vmul.f32 %v13000_v56, %v5962_v10  ;;  %v13514_v3 = vmul.f32 %v13002_v14, %v5907_v7  ;;  %v6389_v32 = vadd.f32 %v13196_v16, %v13306_v42 }
 0xe21   : > { %v6395_v62 = vadd.f32 %v6364_v30, %v6324_v49  ;;  %v5671_v41 = vrot.slane %v14661_v19, 7  ;;  %v13519_v43 = vadd.f32 %v5997_v6, %v5867_v50  ;;  %v13522_v13 = vmul.f32 %v13002_v14, %v5962_v10 }
 0xe22   : > { %v5833_v12 = vmul.f32 %v12953_v44, %v14661_v19  ;;  %v5903_v28 = vrot.slane %v14661_v19, 1  ;;  %v13528_v30 = vadd.f32 %v14662_v60, %v6389_v32  ;;  %v6145_v16 = vmul.f32 %v12966_v55, %v14661_v19 }
 0xe23   : > { %v5672_v20 = vsel %vm1384_vm4, %v5670_v39, %v5671_v41  ;;  %v6175_v42 = vadd.f32 %v13369_v8, %v6103_v0  ;;  %v6365_v8 = vmul.f32 %v12968_v59, %v14661_v19  ;;  %v13552_v2 = vadd.f32 %v14664_v37, %v13349_v23 }
 0xe24   : > { %14663 = vst [vmem:[#allocation59_spill] sm:$0xff] %v13528_v30  ;;  %v5762_v9 = vmul.f32 %v12951_v61, %v5672_v20  ;;  %v5904_v40 = vsel %vm3305_vm2, %v5902_v46, %v5903_v28  ;;  %v5961_v24 = vsel %vm3305_vm2, %v5903_v28, 0.0  ;;  %v6073_v15 = vmul.f32 %v12971_v57, %v5672_v20  ;;  %6821 = vrot.lane.b32.xlu0 %v13528_v30, %s9249_s7 }
 0xe25   : > { %v5994_v7 = vmul.f32 %v12958_v21, %v5904_v40  ;;  %v5995_v39 = vmul.f32 %v12958_v21, %v5961_v24  ;;  %v6222_v10 = vmul.f32 %v13000_v56, %v5904_v40  ;;  %v6253_v46 = vadd.f32 %v13389_v18, %v6175_v42  ;;  %14665 = vst [vmem:[#allocation65_spill] sm:$0xff] %v13552_v2  ;;  %v14668_v42 = vld [vmem:[#allocation62_spill] sm:$0xff] }
 0xe26   : > { %v5865_v0 = vadd.f32 %v5833_v12, %v5762_v9  ;;  %v6105_v49 = vadd.f32 %v6073_v15, %v13398_v53  ;;  %v6293_v50 = vmul.f32 %v12983_v33, %v5672_v20  ;;  %v6223_v32 = vmul.f32 %v13000_v56, %v5961_v24  ;;  %6823 = vrot.lane.b32.xlu1 %v13552_v2, %s9249_s7 }
 0xe27   : > { %v6026_v6 = vadd.f32 %v5994_v7, %v5864_v26  ;;  %v6254_v41 = vadd.f32 %v6222_v10, %v6176_v63  ;;  %v6435_v28 = vmul.f32 %v13002_v14, %v5904_v40  ;;  %v6436_v18 = vmul.f32 %v13002_v14, %v5961_v24  ;;  %v14667_v26 = vld [vmem:[#allocation61_spill] sm:$0xff] }
 0xe28   : > { %v6027_v60 = vadd.f32 %v5995_v39, %v5865_v0  ;;  %v6177_v30 = vadd.f32 %v6145_v16, %v6105_v49  ;;  %v6325_v54 = vadd.f32 %v6293_v50, %v6253_v46  ;;  %6825 = vrot.lane.b32.xlu0 %v13437_v48, %s9249_s7  ;;  %v5679_v63 = vrot.slane %v14667_v26, 7 }
 0xe29   : > { %v13555_v19 = vadd.f32 %v13461_v11, %v6254_v41  ;;  %v13558_v53 = vadd.f32 %v6435_v28, %v6395_v62  ;;  %v5838_v37 = vmul.f32 %v14667_v26, %v12953_v44  ;;  %v5911_v11 = vrot.slane %v14667_v26, 1 }
 0xe2a   : > { %v13563_v12 = vadd.f32 %v6075_v52, %v6027_v60  ;;  %v6255_v20 = vadd.f32 %v6223_v32, %v6177_v30  ;;  %v6396_v16 = vadd.f32 %v6365_v8, %v6325_v54  ;;  %v5732_v23 = vsel %vm1384_vm4, 0.0, %v5679_v63  ;;  %6827 = vrot.lane.b32.xlu1 %v13452_v36, %s9249_s7  ;;  %v14670_v60 = vld [vmem:[#allocation63_spill] sm:$0xff] }
 0xe2b   : > { %14666 = vst [vmem:[#allocation66_spill] sm:$0xff] %v13558_v53  ;;  %v13573_v62 = vmul.f32 %v14667_v26, %v12966_v55  ;;  %v5676_v9 = vrot.slane %v14668_v42, 7  ;;  %v5767_v54 = vmul.f32 %v12951_v61, %v5732_v23  ;;  %v13581_v30 = vmul.f32 %v14667_v26, %v12968_v59 }
 0xe2c   : > { %v6327_v52 = vadd.f32 %v6295_v27, %v6255_v20  ;;  %v13576_v40 = vadd.f32 %v6436_v18, %v6396_v16  ;;  %v13584_v24 = vmul.f32 %v12971_v57, %v5732_v23  ;;  %v13587_v15 = vmul.f32 %v12983_v33, %v5732_v23 }
 0xe2d   : > { %v5731_v7 = vsel %vm1384_vm4, 0.0, %v5676_v9  ;;  %v5836_v39 = vmul.f32 %v12953_v44, %v14668_v42  ;;  %v5908_v8 = vrot.slane %v14668_v42, 1  ;;  %v6028_v0 = vadd.f32 %v5996_v25, %v13454_v29 }
 0xe2e   : > { %14669 = vst [vmem:[#allocation61_spill] sm:$0xff] %v13576_v40  ;;  %v13593_v27 = vadd.f32 %v13499_v17, %v6327_v52  ;;  %v5765_v10 = vmul.f32 %v12951_v61, %v5731_v7  ;;  %v13600_v49 = vadd.f32 %v5838_v37, %v5767_v54  ;;  %v6076_v46 = vmul.f32 %v12971_v57, %v5731_v7  ;;  %v14671_v37 = vld [vmem:[#allocation64_spill] sm:$0xff] }
 0xe2f   : > { %v6106_v50 = vadd.f32 %v13450_v51, %v6026_v6  ;;  %v6148_v32 = vmul.f32 %v12966_v55, %v14668_v42  ;;  %v6296_v41 = vmul.f32 %v12983_v33, %v5731_v7  ;;  %v6368_v28 = vmul.f32 %v12968_v59, %v14668_v42 }
 0xe30   : > { %v5868_v17 = vadd.f32 %v5836_v39, %v5765_v10  ;;  %v5680_v29 = vrot.slane %v14670_v60, 7  ;;  %v6108_v25 = vadd.f32 %v6076_v46, %v6028_v0  ;;  %v5839_v26 = vmul.f32 %v14670_v60, %v12953_v44 }
 0xe31   : > { %v6178_v18 = vadd.f32 %v13458_v22, %v6106_v50  ;;  %v5912_v20 = vrot.slane %v14670_v60, 1  ;;  %v13617_v6 = vmul.f32 %v14670_v60, %v12966_v55  ;;  %v6393_v16 = vadd.f32 %v13337_v5, %v13443_v47 }
 0xe32   : > { %v5681_v51 = vsel %vm1384_vm4, %v5679_v63, %v5680_v29  ;;  %v5677_v23 = vrot.slane %v14671_v37, 7  ;;  %v6180_v42 = vadd.f32 %v6148_v32, %v6108_v25  ;;  %v13632_v10 = vmul.f32 %v14670_v60, %v12968_v59 }
 0xe33   : > { %v6256_v52 = vadd.f32 %v13508_v34, %v6178_v18  ;;  %v5768_v22 = vmul.f32 %v12951_v61, %v5681_v51  ;;  %v5913_v54 = vsel %vm3305_vm2, %v5911_v11, %v5912_v20  ;;  %v5964_v7 = vsel %vm3305_vm2, %v5912_v20, 0.0 }
 0xe34   : > { %v13627_v63 = vmul.f32 %v12958_v21, %v5913_v54  ;;  %v6079_v39 = vmul.f32 %v12971_v57, %v5681_v51  ;;  %v6001_v0 = vmul.f32 %v12958_v21, %v5964_v7  ;;  %v13636_v34 = vmul.f32 %v13000_v56, %v5913_v54 }
 0xe35   : > { %v6328_v5 = vadd.f32 %v6296_v41, %v6256_v52  ;;  %v5871_v47 = vadd.f32 %v5839_v26, %v5768_v22  ;;  %v13639_v11 = vmul.f32 %v13000_v56, %v5964_v7  ;;  %v6299_v46 = vmul.f32 %v12983_v33, %v5681_v51 }
 0xe36   : > { %v13643_v50 = vmul.f32 %v13002_v14, %v5913_v54  ;;  %v13646_v32 = vadd.f32 %v13393_v45, %v6393_v16  ;;  %v13651_v41 = vmul.f32 %v13002_v14, %v5964_v7  ;;  %v5678_v21 = vsel %vm1384_vm4, %v5676_v9, %v5677_v23  ;;  %v14674_v7 = vld [vmem:[#allocation68_spill] sm:$0xff] }
 0xe37   : > { %v6399_v59 = vadd.f32 %v6368_v28, %v6328_v5  ;;  %v13648_v60 = vadd.f32 %v6001_v0, %v5871_v47  ;;  %v5766_v29 = vmul.f32 %v12951_v61, %v5678_v21  ;;  %v5837_v25 = vmul.f32 %v12953_v44, %v14671_v37 }
 0xe38   : > { %14672 = vst [vmem:[#allocation62_spill] sm:$0xff] %v13646_v32  ;;  %6829 = vrot.lane.b32.xlu0 %v13646_v32, %s9249_s7  ;;  %v5909_v18 = vrot.slane %v14671_v37, 1  ;;  %v6077_v45 = vmul.f32 %v12971_v57, %v5678_v21  ;;  %v6149_v28 = vmul.f32 %v12966_v55, %v14671_v37  ;;  %v6179_v26 = vadd.f32 %v13493_v58, %v13563_v12  ;;  %v13673_v57 = vld [vmem:[#allocation24 + $0x2] ss:$0 sm:$0xff] }
 0xe39   : > { %v6297_v9 = vmul.f32 %v12983_v33, %v5678_v21  ;;  %v13668_v20 = vadd.f32 %v13401_v38, %v13477_v31  ;;  %v5869_v61 = vadd.f32 %v5837_v25, %v5766_v29  ;;  %v13678_v33 = vld [vmem:[#allocation24 + $0x7] ss:$0 sm:$0xff]  ;;  %v5685_v5 = vrot.slane %v14674_v7, 7  ;;  %v13699_v25 = vld [vmem:[#allocation24 + $0x1] ss:$0 sm:$0xff] }
 0xe3a   : > { %v5910_v51 = vsel %vm3305_vm2, %v5908_v8, %v5909_v18  ;;  %v5963_v44 = vsel %vm3305_vm2, %v5909_v18, 0.0  ;;  %v6109_v16 = vadd.f32 %v6077_v45, %v13519_v43  ;;  %v6369_v38 = vmul.f32 %v13678_v33, %v14671_v37 }
 0xe3b   : > { %14673 = vst [vmem:[#allocation63_spill] sm:$0xff] %v13668_v20  ;;  %v5998_v55 = vmul.f32 %v13673_v57, %v5910_v51  ;;  %v5999_v23 = vmul.f32 %v13673_v57, %v5963_v44  ;;  %v6226_v58 = vmul.f32 %v13000_v56, %v5910_v51  ;;  %6831 = vrot.lane.b32.xlu1 %v13668_v20, %s9249_s7 }
 0xe3c   : > { %v6181_v31 = vadd.f32 %v6149_v28, %v6109_v16  ;;  %v6227_v12 = vmul.f32 %v13000_v56, %v5963_v44  ;;  %v6257_v43 = vadd.f32 %v13511_v35, %v6179_v26  ;;  %v6439_v8 = vmul.f32 %v13002_v14, %v5910_v51  ;;  %6833 = vrot.lane.b32.xlu0 %v13558_v53, %s9249_s7  ;;  %v13714_v28 = vld [vmem:[#allocation24 + $0x4] ss:$0 sm:$0xff] }
 0xe3d   : > { %v6030_v52 = vadd.f32 %v5998_v55, %v5868_v17  ;;  %v6031_v22 = vadd.f32 %v5999_v23, %v5869_v61  ;;  %v6258_v54 = vadd.f32 %v6226_v58, %v6180_v42  ;;  %v6440_v0 = vmul.f32 %v13002_v14, %v5963_v44  ;;  %v13705_v14 = vld [vmem:[#allocation24] ss:$0 sm:$0xff]  ;;  %v14675_v61 = vld [vmem:[#allocation69_spill] sm:$0xff] }
 0xe3e   : > { %v6259_v47 = vadd.f32 %v6227_v12, %v6181_v31  ;;  %v6329_v37 = vadd.f32 %v6297_v9, %v6257_v43  ;;  %v13691_v21 = vadd.f32 %v6439_v8, %v6399_v59  ;;  %v5734_v35 = vsel %vm1384_vm4, 0.0, %v5685_v5  ;;  %v13720_v9 = vld [vmem:[#allocation24 + $0x6] ss:$0 sm:$0xff] }
 0xe3f   : > { %v13693_v29 = vadd.f32 %v6079_v39, %v6031_v22  ;;  %v13696_v56 = vadd.f32 %v13587_v15, %v6258_v54  ;;  %v5842_v17 = vmul.f32 %v13699_v25, %v14674_v7  ;;  %6835 = vrot.lane.b32.xlu1 %v13576_v40, %s9249_s7  ;;  %v5771_v39 = vmul.f32 %v13705_v14, %v5734_v35  ;;  %v13709_v15 = vld [vmem:[#allocation24 + $0x3] ss:$0 sm:$0xff] }
 0xe40   : > { %v6331_v42 = vadd.f32 %v6299_v46, %v6259_v47  ;;  %v6400_v18 = vadd.f32 %v6369_v38, %v6329_v37  ;;  %v5917_v59 = vrot.slane %v14674_v7, 1  ;;  %v13712_v45 = vmul.f32 %v13709_v15, %v5734_v35  ;;  %v14676_v37 = vld [vmem:[#allocation70_spill] sm:$0xff] }
 0xe41   : > { %v13718_v26 = vmul.f32 %v13714_v28, %v14674_v7  ;;  %v13723_v46 = vmul.f32 %v13720_v9, %v5734_v35  ;;  %v5682_v51 = vrot.slane %v14675_v61, 7  ;;  %v13731_v55 = vadd.f32 %v5842_v17, %v5771_v39 }
 0xe42   : > { %v13727_v44 = vadd.f32 %v13632_v10, %v6331_v42  ;;  %v13729_v16 = vadd.f32 %v6440_v0, %v6400_v18  ;;  %v13735_v23 = vmul.f32 %v13678_v33, %v14674_v7  ;;  %v5840_v38 = vmul.f32 %v13699_v25, %v14675_v61 }
 0xe43   : > { %v5733_v58 = vsel %vm1384_vm4, 0.0, %v5682_v51  ;;  %v6032_v31 = vadd.f32 %v13627_v63, %v13600_v49  ;;  %v6110_v12 = vadd.f32 %v13584_v24, %v6030_v52  ;;  %v5914_v43 = vrot.slane %v14675_v61, 1 }
 0xe44   : > { %v5769_v10 = vmul.f32 %v13705_v14, %v5733_v58  ;;  %v6080_v8 = vmul.f32 %v13709_v15, %v5733_v58  ;;  %v6152_v22 = vmul.f32 %v13714_v28, %v14675_v61  ;;  %v6300_v7 = vmul.f32 %v13720_v9, %v5733_v58 }
 0xe45   : > { %v6182_v54 = vadd.f32 %v13573_v62, %v6110_v12  ;;  %v6372_v47 = vmul.f32 %v13678_v33, %v14675_v61  ;;  %v5686_v49 = vrot.slane %v14676_v37, 7  ;;  %v5843_v52 = vmul.f32 %v13699_v25, %v14676_v37 }
 0xe46   : > { %v5872_v63 = vadd.f32 %v5840_v38, %v5769_v10  ;;  %v6112_v24 = vadd.f32 %v6080_v8, %v6032_v31  ;;  %v5918_v0 = vrot.slane %v14676_v37, 1  ;;  %v13760_v62 = vmul.f32 %v13714_v28, %v14676_v37 }
 0xe47   : > { %v6260_v35 = vadd.f32 %v13636_v34, %v6182_v54  ;;  %v5687_v17 = vsel %vm1384_vm4, %v5685_v5, %v5686_v49  ;;  %v6397_v42 = vadd.f32 %v13465_v1, %v13555_v19  ;;  %v13773_v5 = vmul.f32 %v13678_v33, %v14676_v37  ;;  %v13778_v19 = vld [vmem:[#allocation24 + $0x5] ss:$0 sm:$0xff]  ;;  %v13787_v54 = vld [vmem:[#allocation24 + $0x8] ss:$0 sm:$0xff] }
 0xe48   : > { %v6184_v18 = vadd.f32 %v6152_v22, %v6112_v24  ;;  %v5772_v39 = vmul.f32 %v13705_v14, %v5687_v17  ;;  %v5919_v61 = vsel %vm3305_vm2, %v5917_v59, %v5918_v0  ;;  %v5966_v58 = vsel %vm3305_vm2, %v5918_v0, 0.0  ;;  %v14678_v24 = vld [vmem:[#allocation71_spill] sm:$0xff] }
 0xe49   : > { %v6332_v38 = vadd.f32 %v6300_v7, %v6260_v35  ;;  %v6004_v31 = vmul.f32 %v13673_v57, %v5919_v61  ;;  %v13769_v34 = vmul.f32 %v13673_v57, %v5966_v58  ;;  %v6083_v1 = vmul.f32 %v13709_v15, %v5687_v17 }
 0xe4a   : > { %v13775_v12 = vadd.f32 %v5843_v52, %v5772_v39  ;;  %v13781_v59 = vmul.f32 %v13778_v19, %v5919_v61  ;;  %v13784_v10 = vmul.f32 %v13778_v19, %v5966_v58  ;;  %v6303_v22 = vmul.f32 %v13720_v9, %v5687_v17 }
 0xe4b   : > { %v6403_v8 = vadd.f32 %v6372_v47, %v6332_v38  ;;  %v13790_v7 = vmul.f32 %v13787_v54, %v5919_v61  ;;  %v13793_v37 = vadd.f32 %v13514_v3, %v6397_v42  ;;  %v13796_v49 = vmul.f32 %v13787_v54, %v5966_v58 }
 0xe4c   : > { %v5683_v52 = vrot.slane %v14678_v24, 7  ;;  %v5841_v0 = vmul.f32 %v13699_v25, %v14678_v24  ;;  %v5915_v47 = vrot.slane %v14678_v24, 1  ;;  %v6153_v35 = vmul.f32 %v13714_v28, %v14678_v24 }
 0xe4d   : > { %14677 = vst [vmem:[#allocation64_spill] sm:$0xff] %v13793_v37  ;;  %6837 = vrot.lane.b32.xlu0 %v13793_v37, %s9249_s7  ;;  %v6183_v3 = vadd.f32 %v13617_v6, %v13693_v29  ;;  %v6373_v17 = vmul.f32 %v13678_v33, %v14678_v24  ;;  %v13812_v42 = vadd.f32 %v13522_v13, %v13593_v27  ;;  %v6042_v38 = vrot.slane %v13312_v4, 7 }
 0xe4e   : > { %v5684_v39 = vsel %vm1384_vm4, %v5682_v51, %v5683_v52  ;;  %v5916_v61 = vsel %vm3305_vm2, %v5914_v43, %v5915_v47  ;;  %v5965_v58 = vsel %vm3305_vm2, %v5915_v47, 0.0  ;;  %v13825_v13 = vmul.f32 %v13714_v28, %v13312_v4 }
 0xe4f   : > { %14679 = vst [vmem:[#allocation68_spill] sm:$0xff] %v13812_v42  ;;  %v5770_v37 = vmul.f32 %v13705_v14, %v5684_v39  ;;  %v6002_v40 = vmul.f32 %v13673_v57, %v5916_v61  ;;  %v6081_v6 = vmul.f32 %v13709_v15, %v5684_v39  ;;  %6839 = vrot.lane.b32.xlu1 %v13812_v42, %s9249_s7  ;;  %v6047_v36 = vsel %vm1384_vm4, 0.0, %v6042_v38 }
 0xe50   : > { %v6003_v27 = vmul.f32 %v13673_v57, %v5965_v58  ;;  %v6230_v29 = vmul.f32 %v13778_v19, %v5916_v61  ;;  %v6261_v51 = vadd.f32 %v13639_v11, %v6183_v3  ;;  %v6301_v43 = vmul.f32 %v13720_v9, %v5684_v39  ;;  %v14680_v39 = vld [vmem:[#allocation94_spill] sm:$0xff] }
 0xe51   : > { %v5873_v24 = vadd.f32 %v5841_v0, %v5770_v37  ;;  %v6034_v52 = vadd.f32 %v6002_v40, %v5872_v63  ;;  %v6113_v47 = vadd.f32 %v6081_v6, %v13648_v60  ;;  %v6443_v53 = vmul.f32 %v13787_v54, %v5916_v61  ;;  %6841 = vrot.lane.b32.xlu0 %v13691_v21, %s9249_s7 }
 0xe52   : > { %v6231_v42 = vmul.f32 %v13778_v19, %v5965_v58  ;;  %v6262_v20 = vadd.f32 %v6230_v29, %v6184_v18  ;;  %v6333_v32 = vadd.f32 %v6301_v43, %v6261_v51  ;;  %v6444_v11 = vmul.f32 %v13787_v54, %v5965_v58 }
 0xe53   : > { %v6035_v48 = vadd.f32 %v6003_v27, %v5873_v24  ;;  %v6185_v2 = vadd.f32 %v6153_v35, %v6113_v47  ;;  %v13838_v3 = vadd.f32 %v6443_v53, %v6403_v8  ;;  %6843 = vrot.lane.b32.xlu1 %v13729_v16, %s9249_s7  ;;  %v13846_v63 = vmul.f32 %v13709_v15, %v6047_v36 }
 0xe54   : > { %v13843_v40 = vadd.f32 %v13723_v46, %v6262_v20  ;;  %v6404_v60 = vadd.f32 %v6373_v17, %v6333_v32  ;;  %v6192_v18 = vrot.slane %v13312_v4, 1  ;;  %v13850_v35 = vmul.f32 %v13720_v9, %v6047_v36 }
 0xe55   : > { %v6115_v37 = vadd.f32 %v6083_v1, %v6035_v48  ;;  %v6263_v0 = vadd.f32 %v6231_v42, %v6185_v2  ;;  %v5688_v53 = vrot.slane %v14680_v39, 7  ;;  %v13857_v61 = vmul.f32 %v13678_v33, %v13312_v4 }
 0xe56   : > { %v13853_v8 = vadd.f32 %v6444_v11, %v6404_v60  ;;  %v5844_v32 = vmul.f32 %v13699_v25, %v14680_v39  ;;  %v6036_v20 = vadd.f32 %v6004_v31, %v13731_v55  ;;  %v5920_v2 = vrot.slane %v14680_v39, 1 }
 0xe57   : > { %v6335_v46 = vadd.f32 %v6303_v22, %v6263_v0  ;;  %v5735_v48 = vsel %vm1384_vm4, 0.0, %v5688_v53  ;;  %v6114_v36 = vadd.f32 %v13712_v45, %v6034_v52  ;;  %v6156_v4 = vmul.f32 %v13714_v28, %v14680_v39  ;;  %v14681_v22 = vld [vmem:[#allocation95_spill] sm:$0xff] }
 0xe58   : > { %v5773_v1 = vmul.f32 %v13705_v14, %v5735_v48  ;;  %v6084_v17 = vmul.f32 %v13709_v15, %v5735_v48  ;;  %v6304_v42 = vmul.f32 %v13720_v9, %v5735_v48  ;;  %v6376_v31 = vmul.f32 %v13678_v33, %v14680_v39 }
 0xe59   : > { %v6406_v58 = vadd.f32 %v13773_v5, %v6335_v46  ;;  %v6186_v55 = vadd.f32 %v13718_v26, %v6114_v36  ;;  %v6043_v6 = vrot.slane %v14681_v22, 7  ;;  %v6159_v29 = vmul.f32 %v13714_v28, %v14681_v22  ;;  %v14682_v26 = vld [vmem:[#allocation97_spill] sm:$0xff] }
 0xe5a   : > { %v5876_v27 = vadd.f32 %v5844_v32, %v5773_v1  ;;  %v6116_v45 = vadd.f32 %v6084_v17, %v6036_v20  ;;  %v6193_v51 = vrot.slane %v14681_v22, 1  ;;  %v6401_v5 = vadd.f32 %v13581_v30, %v13696_v56 }
 0xe5b   : > { %v6264_v43 = vadd.f32 %v13781_v59, %v6186_v55  ;;  %v6044_v24 = vsel %vm1384_vm4, %v6042_v38, %v6043_v6  ;;  %v5689_v52 = vrot.slane %v14682_v26, 7  ;;  %v6379_v0 = vmul.f32 %v13678_v33, %v14681_v22 }
 0xe5c   : > { %v6188_v47 = vadd.f32 %v6156_v4, %v6116_v45  ;;  %v6194_v11 = vsel %vm3305_vm2, %v6192_v18, %v6193_v51  ;;  %v6197_v60 = vsel %vm3305_vm2, %v6193_v51, 0.0  ;;  %v6087_v32 = vmul.f32 %v13709_v15, %v6044_v24 }
 0xe5d   : > { %v6336_v39 = vadd.f32 %v6304_v42, %v6264_v43  ;;  %v6236_v59 = vmul.f32 %v13778_v19, %v6194_v11  ;;  %v6237_v38 = vmul.f32 %v13778_v19, %v6197_v60  ;;  %v6307_v20 = vmul.f32 %v13720_v9, %v6044_v24 }
 0xe5e   : > { %v6449_v30 = vmul.f32 %v13787_v54, %v6194_v11  ;;  %v13893_v56 = vadd.f32 %v13643_v50, %v6401_v5  ;;  %v5690_v18 = vsel %vm1384_vm4, %v5688_v53, %v5689_v52  ;;  %v5845_v36 = vmul.f32 %v13699_v25, %v14682_v26 }
 0xe5f   : > { %v6407_v46 = vadd.f32 %v6376_v31, %v6336_v39  ;;  %v5774_v48 = vmul.f32 %v13705_v14, %v5690_v18  ;;  %v5921_v1 = vrot.slane %v14682_v26, 1  ;;  %v6450_v17 = vmul.f32 %v13787_v54, %v6197_v60 }
 0xe60   : > { %6845 = vrot.lane.b32.xlu0 %v13893_v56, %s9249_s7  ;;  %v6037_v4 = vadd.f32 %v13769_v34, %v13775_v12  ;;  %v6085_v50 = vmul.f32 %v13709_v15, %v5690_v18  ;;  %v6187_v53 = vadd.f32 %v13760_v62, %v6115_v37  ;;  %v6157_v25 = vmul.f32 %v13714_v28, %v14682_v26 }
 0xe61   : > { %v5877_v42 = vadd.f32 %v5845_v36, %v5774_v48  ;;  %v5922_v14 = vsel %vm3305_vm2, %v5920_v2, %v5921_v1  ;;  %v5967_v55 = vsel %vm3305_vm2, %v5921_v1, 0.0  ;;  %v6305_v62 = vmul.f32 %v13720_v9, %v5690_v18  ;;  %v14687_v1 = vld [vmem:[#allocation74_spill] sm:$0xff] }
 0xe62   : > { %v6006_v31 = vmul.f32 %v13673_v57, %v5922_v14  ;;  %v6007_v22 = vmul.f32 %v13673_v57, %v5967_v55  ;;  %v6117_v6 = vadd.f32 %v6085_v50, %v6037_v4  ;;  %v6234_v45 = vmul.f32 %v13778_v19, %v5922_v14  ;;  %v14688_v50 = vld [vmem:[#allocation58_spill] sm:$0xff] }
 0xe63   : > { %v6235_v34 = vmul.f32 %v13778_v19, %v5967_v55  ;;  %v6265_v15 = vadd.f32 %v13784_v10, %v6187_v53  ;;  %v6377_v12 = vmul.f32 %v13678_v33, %v14682_v26  ;;  %v6447_v43 = vmul.f32 %v13787_v54, %v5922_v14 }
 0xe64   : > { %v6038_v37 = vadd.f32 %v6006_v31, %v5876_v27  ;;  %v6039_v2 = vadd.f32 %v6007_v22, %v5877_v42  ;;  %v6189_v51 = vadd.f32 %v6157_v25, %v6117_v6  ;;  %v6266_v28 = vadd.f32 %v6234_v45, %v6188_v47  ;;  %6849 = vrot.lane.b32.xlu0 %v13838_v3, %s9249_s7  ;;  %v14689_v42 = vld [vmem:[#allocation60_spill] sm:$0xff]  ;;  %v14690_v45 = vld [vmem:[#allocation98_spill] sm:$0xff] }
 0xe65   : > { %v6337_v57 = vadd.f32 %v6305_v62, %v6265_v15  ;;  %v6448_v24 = vmul.f32 %v13787_v54, %v5967_v55  ;;  %v13925_v19 = vadd.f32 %v13651_v41, %v13727_v44  ;;  %v13929_v47 = vadd.f32 %v6447_v43, %v6407_v46  ;;  %v14683_v46 = vld [vmem:[#allocation73_spill] sm:$0xff]  ;;  %v14691_v62 = vld [vmem:[#allocation75_spill] sm:$0xff] }
 0xe66   : > { %v6118_v10 = vadd.f32 %v13846_v63, %v6038_v37  ;;  %v6119_v5 = vadd.f32 %v6087_v32, %v6039_v2  ;;  %v6267_v26 = vadd.f32 %v6235_v34, %v6189_v51  ;;  %v6338_v27 = vadd.f32 %v13850_v35, %v6266_v28  ;;  %v8340_v32 = vld [vmem:[#allocation26] sm:$0x1f]   ;;  %v14692_v2 = vld [vmem:[#allocation56_spill] sm:$0xff] }
 0xe67   : > { %v6408_v52 = vadd.f32 %v6377_v12, %v6337_v57  ;;  %6847 = vrot.lane.b32.xlu1 %v13925_v19, %s9249_s7  ;;  %v6405_v11 = vadd.f32 %v13735_v23, %v13843_v40  ;;  %v13936_v60 = vadd.f32 %v13796_v49, %v6406_v58  ;;  %v6308_v48 = vmul.f32 %v13720_v9, %v14683_v46 }
 0xe68   : > { %v6190_v41 = vadd.f32 %v13825_v13, %v6118_v10  ;;  %v6191_v44 = vadd.f32 %v6159_v29, %v6119_v5  ;;  %v6339_v63 = vadd.f32 %v6307_v20, %v6267_v26  ;;  %v6409_v39 = vadd.f32 %v13857_v61, %v6338_v27  ;;  %v14684_v13 = vld [vmem:[#allocation72_spill] sm:$0xff]  ;;  %8052 = vmatprep.subr.msk.bf16.mxu0 %vm7005_vm3, %v8340_v32 }
 0xe69   : > { %v13940_v35 = vadd.f32 %v6448_v24, %v6408_v52  ;;  %v13943_v18 = vadd.f32 %v13790_v7, %v6405_v11  ;;  %v6380_v23 = vmul.f32 0.0, %v13678_v33  ;;  %v6309_v7 = vmul.f32 %v13720_v9, %v14684_v13  ;;  %v14693_v24 = vld [vmem:[#allocation93_spill] sm:$0xff] }
 0xe6a   : > { %v6268_v40 = vadd.f32 %v6236_v59, %v6190_v41  ;;  %v6269_v49 = vadd.f32 %v6237_v38, %v6191_v44  ;;  %v6410_v58 = vadd.f32 %v6379_v0, %v6339_v63  ;;  %v13948_v36 = vadd.f32 %v6449_v30, %v6409_v39  ;;  %v14685_v59 = vld [vmem:[#allocation67_spill] sm:$0xff] }
 0xe6b   : > { %6853 = vrot.lane.b32.xlu0 %v13943_v18, %s9249_s7  ;;  %6851 = vrot.lane.b32.xlu1 %v13853_v8, %s9249_s7  ;;  %v7007_v33 = vsel %vm7005_vm3, %v8340_v32, 0  ;;  %v6517_v0 = vmul.f32 0.044715, %v14685_v59  ;;  %v14686_v38 = vld [vmem:[#allocation55_spill] sm:$0xff]  ;;  %v6451_v4 = vmul.f32 %v13787_v54, %v14687_v1  ;;  %v6519_v53 = vmul.f32 0.044715, %v14688_v50 }
 0xe6c   : > { %v13956_v61 = vadd.f32 %v6450_v17, %v6410_v58  ;;  %v6340_v29 = vadd.f32 %v6308_v48, %v6268_v40  ;;  %8014 = vmatpush3.bf16.msra.mxu0 %v7007_v33  ;;  %v6518_v20 = vmul.f32 0.044715, %v14686_v38  ;;  %v6520_v14 = vmul.f32 0.044715, %v14689_v42  ;;  %v14694_v48 = vld [vmem:[#allocation96_spill] sm:$0xff] }
 0xe6d   : > { %v6549_v9 = vmul.f32 %v6517_v0, %v14685_v59  ;;  %v6341_v55 = vadd.f32 %v6309_v7, %v6269_v49  ;;  %v6551_v25 = vmul.f32 %v6519_v53, %v14688_v50  ;;  %v6521_v34 = vmul.f32 0.044715, %v14690_v45  ;;  %v14695_v0 = vld [vmem:[#allocation59_spill] sm:$0xff] }
 0xe6e   : > { %v6411_v30 = vadd.f32 %v6380_v23, %v6340_v29  ;;  %v6550_v17 = vmul.f32 %v6518_v20, %v14686_v38  ;;  %v6552_v6 = vmul.f32 %v6520_v14, %v14689_v42  ;;  %v6452_v12 = vmul.f32 %v13787_v54, %v14691_v62  ;;  %v13989_v54 = vpop.permute.xlu1 %6805  ;;  %v14696_v14 = vld [vmem:[#allocation65_spill] sm:$0xff]  ;;  %v14698_v62 = vld [vmem:[#allocation99_spill] sm:$0xff] }
 0xe6f   : > { %6855 = vrot.lane.b32.xlu1 %v13936_v60, %s9249_s7  ;;  %6857 = vrot.lane.b32.xlu0 %v13929_v47, %s9249_s7  ;;  %v6581_v31 = vmul.f32 %v6549_v9, %v14685_v59  ;;  %v6583_v37 = vmul.f32 %v6551_v25, %v14688_v50  ;;  %v6522_v51 = vmul.f32 0.044715, %v14692_v2  ;;  %v6523_v10 = vmul.f32 0.044715, %v14693_v24 }
 0xe70   : > { %v6582_v22 = vmul.f32 %v6550_v17, %v14686_v38  ;;  %v13975_v15 = vadd.f32 %v6451_v4, %v6411_v30  ;;  %v6584_v43 = vmul.f32 %v6552_v6, %v14689_v42  ;;  %v6412_v5 = vadd.f32 %v6380_v23, %v6341_v55 }
 0xe71   : > { %v6613_v28 = vadd.f32 %v6581_v31, %v14685_v59  ;;  %v6615_v26 = vadd.f32 %v6583_v37, %v14688_v50  ;;  %v6553_v27 = vmul.f32 %v6521_v34, %v14690_v45  ;;  %v6554_v52 = vmul.f32 %v6522_v51, %v14692_v2  ;;  %v14697_v31 = vld [vmem:[#allocation57_spill] sm:$0xff] }
 0xe72   : > { %v6614_v57 = vadd.f32 %v6582_v22, %v14686_v38  ;;  %v6616_v44 = vadd.f32 %v6584_v43, %v14689_v42  ;;  %v6555_v63 = vmul.f32 %v6523_v10, %v14693_v24  ;;  %v6524_v23 = vmul.f32 0.044715, %v14694_v48  ;;  %v14011_v30 = vpop.permute.xlu1 %6809 }
 0xe73   : > { %6861 = vrot.lane.b32.xlu0 %v13948_v36, %s9249_s7  ;;  %6859 = vrot.lane.b32.xlu1 %v13940_v35, %s9249_s7  ;;  %v6645_v11 = vmul.f32 0.7978846, %v6613_v28  ;;  %v6647_v39 = vmul.f32 0.7978846, %v6615_v26  ;;  %v6585_v32 = vmul.f32 %v6553_v27, %v14690_v45  ;;  %v6586_v46 = vmul.f32 %v6554_v52, %v14692_v2 }
 0xe74   : > { %v6646_v41 = vmul.f32 0.7978846, %v6614_v57  ;;  %v6648_v40 = vmul.f32 0.7978846, %v6616_v44  ;;  %v6587_v49 = vmul.f32 %v6555_v63, %v14693_v24  ;;  %v6556_v7 = vmul.f32 %v6524_v23, %v14694_v48  ;;  %v14699_v23 = vld [vmem:[#allocation62_spill] sm:$0xff] }
 0xe75   : > { %8609 = vtanh.f32 %v6645_v11  ;;  %v6617_v58 = vadd.f32 %v6585_v32, %v14690_v45  ;;  %v6618_v13 = vadd.f32 %v6586_v46, %v14692_v2  ;;  %v14007_v29 = vadd.f32 %v6452_v12, %v6412_v5 }
 0xe76   : > { %8611 = vtanh.f32 %v6646_v41  ;;  %v6619_v33 = vadd.f32 %v6587_v49, %v14693_v24  ;;  %v6525_v20 = vmul.f32 0.044715, %v14695_v0  ;;  %v6588_v53 = vmul.f32 %v6556_v7, %v14694_v48  ;;  %v6812_v10 = vpop.permute.xlu1 %6811 }
 0xe77   : > { %6865 = vrot.lane.b32.xlu0 %v13975_v15, %s9249_s7  ;;  %6863 = vrot.lane.b32.xlu1 %v13956_v61, %s9249_s7  ;;  %8613 = vtanh.f32 %v6647_v39  ;;  %v6649_v1 = vmul.f32 0.7978846, %v6617_v58  ;;  %v6650_v4 = vmul.f32 0.7978846, %v6618_v13  ;;  %v6526_v55 = vmul.f32 0.044715, %v14696_v14  ;;  %v6808_v39 = vpop.permute.xlu0 %6807 }
 0xe78   : > { %8615 = vtanh.f32 %v6648_v40  ;;  %v6651_v9 = vmul.f32 0.7978846, %v6619_v33  ;;  %v6557_v17 = vmul.f32 %v6525_v20, %v14695_v0  ;;  %v6620_v25 = vadd.f32 %v6588_v53, %v14694_v48 }
 0xe79   : > { %8617 = vtanh.f32 %v6649_v1  ;;  %v6527_v22 = vmul.f32 0.044715, %v14697_v31  ;;  %v6558_v34 = vmul.f32 %v6526_v55, %v14696_v14  ;;  %v6528_v12 = vmul.f32 0.044715, %v14698_v62 }
 0xe7a   : > { %8619 = vtanh.f32 %v6650_v4  ;;  %v6589_v6 = vmul.f32 %v6557_v17, %v14695_v0  ;;  %v6652_v37 = vmul.f32 0.7978846, %v6620_v25  ;;  %v6485_v27 = vmul.f32 0.5, %v14685_v59  ;;  %v14700_v59 = vld [vmem:[#allocation63_spill] sm:$0xff] }
 0xe7b   : > { %6867 = vrot.lane.b32.xlu1 %v14007_v29, %s9249_s7  ;;  %8621 = vtanh.f32 %v6651_v9  ;;  %v6559_v51 = vmul.f32 %v6527_v22, %v14697_v31  ;;  %v6590_v57 = vmul.f32 %v6558_v34, %v14696_v14  ;;  %v6560_v43 = vmul.f32 %v6528_v12, %v14698_v62 }
 0xe7c   : > { %v6621_v28 = vadd.f32 %v6589_v6, %v14695_v0  ;;  %8623 = vtanh.f32 %v6652_v37  ;;  %v6486_v52 = vmul.f32 0.5, %v14686_v38  ;;  %v6487_v11 = vmul.f32 0.5, %v14688_v50 }
 0xe7d   : > { %v6591_v5 = vmul.f32 %v6559_v51, %v14697_v31  ;;  %v6622_v41 = vadd.f32 %v6590_v57, %v14696_v14  ;;  %v6592_v46 = vmul.f32 %v6560_v43, %v14698_v62  ;;  %v6529_v40 = vmul.f32 0.044715, %v14699_v23 }
 0xe7e   : > { %v6653_v32 = vmul.f32 0.7978846, %v6621_v28  ;;  %vm6956_vm4 = vcmask 80896   ;;  %v6488_v13 = vmul.f32 0.5, %v14689_v42  ;;  %v6530_v7 = vmul.f32 0.044715, %v14700_v59 }
 0xe7f   : > { %v8610_v26 = vpop.eup %8609  ;;  %v6654_v20 = vmul.f32 0.7978846, %v6622_v41  ;;  %v6623_v1 = vadd.f32 %v6591_v5, %v14697_v31  ;;  %v6489_v9 = vmul.f32 0.5, %v14690_v45  ;;  %v6490_v17 = vmul.f32 0.5, %v14692_v2 }
 0xe80   : > { %v8612_v44 = vpop.eup %8611  ;;  %v6709_v63 = vadd.f32 1.0, %v8610_v26  ;;  %v6814_v22 = vpop.permute.xlu0 %6813  ;;  %8625 = vtanh.f32 %v6653_v32  ;;  %v6624_v42 = vadd.f32 %v6592_v46, %v14698_v62  ;;  %v6561_v34 = vmul.f32 %v6529_v40, %v14699_v23  ;;  %v14701_v46 = vld [vmem:[#allocation66_spill] sm:$0xff] }
 0xe81   : > { %v8614_v49 = vpop.eup %8613  ;;  %v6710_v58 = vadd.f32 1.0, %v8612_v44  ;;  %8627 = vtanh.f32 %v6654_v20  ;;  %v6655_v45 = vmul.f32 0.7978846, %v6623_v1  ;;  %v6562_v2 = vmul.f32 %v6530_v7, %v14700_v59  ;;  %v14702_v20 = vld [vmem:[#allocation61_spill] sm:$0xff] }
 0xe82   : > { %v8616_v38 = vpop.eup %8615  ;;  %v6741_v33 = vmul.f32 %v6709_v63, %v6485_v27  ;;  %v6711_v50 = vadd.f32 1.0, %v8614_v49  ;;  %v6816_v6 = vpop.permute.xlu1 %6815  ;;  %v6656_v32 = vmul.f32 0.7978846, %v6624_v42  ;;  %v6491_v40 = vmul.f32 0.5, %v14693_v24 }
 0xe83   : > { %v6742_v4 = vmul.f32 %v6710_v58, %v6486_v52  ;;  %v6712_v53 = vadd.f32 1.0, %v8616_v38  ;;  %v8618_v55 = vpop.eup %8617  ;;  %v6492_v49 = vmul.f32 0.5, %v14694_v48  ;;  %8629 = vtanh.f32 %v6655_v45 }
 0xe84   : > { %v6901_v25 = vmul.f32 %v13989_v54, %v6741_v33  ;;  %v8620_v12 = vpop.eup %8619  ;;  %v6743_v51 = vmul.f32 %v6711_v50, %v6487_v11  ;;  %v6713_v57 = vadd.f32 1.0, %v8618_v55  ;;  %v6818_v38 = vpop.permute.xlu0 %6817  ;;  %v6532_v1 = vmul.f32 0.044715, %v14702_v20 }
 0xe85   : > { %v6902_v37 = vmul.f32 %v6808_v39, %v6742_v4  ;;  %v6744_v28 = vmul.f32 %v6712_v53, %v6488_v13  ;;  %v8622_v43 = vpop.eup %8621  ;;  %v6714_v5 = vadd.f32 1.0, %v8620_v12  ;;  %v6531_v39 = vmul.f32 0.044715, %v14701_v46 }
 0xe86   : > { %v6903_v54 = vmul.f32 %v14011_v30, %v6743_v51  ;;  %v6715_v52 = vadd.f32 1.0, %v8622_v43  ;;  %v8624_v41 = vpop.eup %8623  ;;  %v6745_v44 = vmul.f32 %v6713_v57, %v6489_v9  ;;  %v6820_v30 = vpop.permute.xlu1 %6819  ;;  %8631 = vtanh.f32 %v6656_v32  ;;  %v14704_v32 = vld [vmem:[#allocation68_spill] sm:$0xff] }
 0xe87   : > { %v6933_v26 = vpack.c.bf16 %v6902_v37, %v6901_v25  ;;  %v6904_v27 = vmul.f32 %v6812_v10, %v6744_v28  ;;  %v6746_v63 = vmul.f32 %v6714_v5, %v6490_v17  ;;  %v6716_v58 = vadd.f32 1.0, %v8624_v41 }
 0xe88   : > { %v6905_v13 = vmul.f32 %v6814_v22, %v6745_v44  ;;  %v6593_v10 = vmul.f32 %v6561_v34, %v14699_v23  ;;  %v6747_v33 = vmul.f32 %v6715_v52, %v6491_v40  ;;  %v6594_v24 = vmul.f32 %v6562_v2, %v14700_v59  ;;  %v14703_v52 = vld [vmem:[#allocation64_spill] sm:$0xff] }
 0xe89   : > { %8015 = vmatprep.mubr.msk.bf16.mxu0 %vm6956_vm4, %v6933_v26  ;;  %v6934_v11 = vpack.c.bf16 %v6904_v27, %v6903_v54  ;;  %v6906_v7 = vmul.f32 %v6816_v6, %v6746_v63  ;;  %v6748_v50 = vmul.f32 %v6716_v58, %v6492_v49  ;;  %v6563_v48 = vmul.f32 %v6531_v39, %v14701_v46 }
 0xe8a   : > { %v6907_v53 = vmul.f32 %v6818_v38, %v6747_v33  ;;  %v6564_v17 = vmul.f32 %v6532_v1, %v14702_v20  ;;  %v8626_v55 = vpop.eup %8625  ;;  %v6625_v22 = vadd.f32 %v6593_v10, %v14699_v23  ;;  %v6626_v42 = vadd.f32 %v6594_v24, %v14700_v59 }
 0xe8b   : > { %8016 = vmatmul.mubr.msk.bf16.vlgmr.msra.gmra.mrb[64].mxu0 %vm6956_vm4, %v6934_v11  ;;  %v6935_v4 = vpack.c.bf16 %v6906_v7, %v6905_v13  ;;  %v6908_v9 = vmul.f32 %v6820_v30, %v6748_v50  ;;  %v8628_v6 = vpop.eup %8627  ;;  %v6595_v34 = vmul.f32 %v6563_v48, %v14701_v46  ;;  %v6717_v43 = vadd.f32 1.0, %v8626_v55 }
 0xe8c   : > { %v6596_v12 = vmul.f32 %v6564_v17, %v14702_v20  ;;  %v6657_v37 = vmul.f32 0.7978846, %v6625_v22  ;;  %v6658_v51 = vmul.f32 0.7978846, %v6626_v42  ;;  %v6718_v5 = vadd.f32 1.0, %v8628_v6 }
 0xe8d   : > { %8019 = vmatprep.mubr.msk.bf16.mxu0 %vm6956_vm4, %v6935_v4  ;;  %v6936_v25 = vpack.c.bf16 %v6908_v9, %v6907_v53  ;;  %v6627_v28 = vadd.f32 %v6595_v34, %v14701_v46  ;;  %v8630_v57 = vpop.eup %8629  ;;  %v6493_v54 = vmul.f32 0.5, %v14695_v0  ;;  %v6494_v27 = vmul.f32 0.5, %v14696_v14 }
 0xe8e   : > { %v6628_v45 = vadd.f32 %v6596_v12, %v14702_v20  ;;  %8633 = vtanh.f32 %v6657_v37  ;;  %v6533_v41 = vmul.f32 0.044715, %v14703_v52  ;;  %v6719_v44 = vadd.f32 1.0, %v8630_v57 }
 0xe8f   : > { %8635 = vtanh.f32 %v6658_v51  ;;  %v6659_v63 = vmul.f32 0.7978846, %v6627_v28  ;;  %v6534_v39 = vmul.f32 0.044715, %v14704_v32  ;;  %v6749_v11 = vmul.f32 %v6717_v43, %v6493_v54 }
 0xe90   : > { %v8632_v2 = vpop.eup %8631  ;;  %v6750_v40 = vmul.f32 %v6718_v5, %v6494_v27  ;;  %v6660_v58 = vmul.f32 0.7978846, %v6628_v45  ;;  %v6495_v7 = vmul.f32 0.5, %v14697_v31  ;;  %v6496_v0 = vmul.f32 0.5, %v14698_v62 }
 0xe91   : > { %v6720_v49 = vadd.f32 1.0, %v8632_v2  ;;  %v6565_v14 = vmul.f32 %v6533_v41, %v14703_v52  ;;  %8637 = vtanh.f32 %v6659_v63  ;;  %v6566_v50 = vmul.f32 %v6534_v39, %v14704_v32 }
 0xe92   : > { %v6751_v10 = vmul.f32 %v6719_v44, %v6495_v7  ;;  %v6535_v1 = vmul.f32 0.044715, %v13691_v21  ;;  %8639 = vtanh.f32 %v6660_v58  ;;  %v6536_v48 = vmul.f32 0.044715, %v13729_v16 }
 0xe93   : > { %8020 = vmatmul.mubr.msk.bf16.gmra.mrb[68].mxu0 %vm6956_vm4, %v6936_v25  ;;  %v6752_v24 = vmul.f32 %v6720_v49, %v6496_v0  ;;  %v6597_v62 = vmul.f32 %v6565_v14, %v14703_v52  ;;  %v6598_v22 = vmul.f32 %v6566_v50, %v14704_v32  ;;  %v6497_v45 = vmul.f32 0.5, %v14699_v23 }
 0xe94   : > { %v6567_v17 = vmul.f32 %v6535_v1, %v13691_v21  ;;  %v6568_v6 = vmul.f32 %v6536_v48, %v13729_v16  ;;  %v6499_v58 = vmul.f32 0.5, %v14701_v46  ;;  %v6537_v0 = vmul.f32 0.044715, %v13893_v56 }
 0xe95   : > { %v6629_v34 = vadd.f32 %v6597_v62, %v14703_v52  ;;  %v6630_v37 = vadd.f32 %v6598_v22, %v14704_v32  ;;  %v6538_v1 = vmul.f32 0.044715, %v13925_v19 }
 0xe96   : > { %v6822_v26 = vpop.permute.xlu0 %6821  ;;  %v6599_v12 = vmul.f32 %v6567_v17, %v13691_v21  ;;  %v6600_v51 = vmul.f32 %v6568_v6, %v13729_v16  ;;  %v6569_v46 = vmul.f32 %v6537_v0, %v13893_v56  ;;  %v6541_v6 = vmul.f32 0.044715, %v13943_v18 }
 0xe97   : > { %v6909_v38 = vmul.f32 %v6822_v26, %v6749_v11  ;;  %v6498_v26 = vmul.f32 0.5, %v14700_v59  ;;  %v6661_v54 = vmul.f32 0.7978846, %v6629_v34  ;;  %v6662_v41 = vmul.f32 0.7978846, %v6630_v37 }
 0xe98   : > { %v6824_v13 = vpop.permute.xlu1 %6823  ;;  %v8634_v55 = vpop.eup %8633  ;;  %v6631_v27 = vadd.f32 %v6599_v12, %v13691_v21  ;;  %v6632_v44 = vadd.f32 %v6600_v51, %v13729_v16  ;;  %v6542_v12 = vmul.f32 0.044715, %v13936_v60  ;;  %v6545_v0 = vmul.f32 0.044715, %v13948_v36 }
 0xe99   : > { %v6910_v30 = vmul.f32 %v6824_v13, %v6750_v40  ;;  %v8636_v42 = vpop.eup %8635  ;;  %v6721_v57 = vadd.f32 1.0, %v8634_v55  ;;  %v6500_v13 = vmul.f32 0.5, %v14702_v20  ;;  %8641 = vtanh.f32 %v6661_v54 }
 0xe9a   : > { %v6826_v33 = vpop.permute.xlu0 %6825  ;;  %v6722_v43 = vadd.f32 1.0, %v8636_v42  ;;  %8643 = vtanh.f32 %v6662_v41  ;;  %v6539_v20 = vmul.f32 0.044715, %v13838_v3  ;;  %v6502_v54 = vmul.f32 0.5, %v14704_v32 }
 0xe9b   : > { %v6937_v4 = vpack.c.bf16 %v6910_v30, %v6909_v38  ;;  %v6911_v31 = vmul.f32 %v6826_v33, %v6751_v10  ;;  %v8638_v28 = vpop.eup %8637  ;;  %v6753_v63 = vmul.f32 %v6721_v57, %v6497_v45  ;;  %v6663_v38 = vmul.f32 0.7978846, %v6631_v27 }
 0xe9c   : > { %v6828_v53 = vpop.permute.xlu1 %6827  ;;  %v8640_v5 = vpop.eup %8639  ;;  %v6754_v39 = vmul.f32 %v6722_v43, %v6498_v26  ;;  %v6723_v11 = vadd.f32 1.0, %v8638_v28  ;;  %v6664_v30 = vmul.f32 0.7978846, %v6632_v44  ;;  %v6571_v62 = vmul.f32 %v6539_v20, %v13838_v3 }
 0xe9d   : > { %v6912_v9 = vmul.f32 %v6828_v53, %v6752_v24  ;;  %8023 = vmatprep.mubr.msk.bf16.mxu0 %vm6956_vm4, %v6937_v4  ;;  %v6724_v40 = vadd.f32 1.0, %v8640_v5  ;;  %8645 = vtanh.f32 %v6663_v38  ;;  %v6570_v53 = vmul.f32 %v6538_v1, %v13925_v19 }
 0xe9e   : > { %v6755_v10 = vmul.f32 %v6723_v11, %v6499_v58  ;;  %8647 = vtanh.f32 %v6664_v30  ;;  %v6603_v34 = vmul.f32 %v6571_v62, %v13838_v3  ;;  %v6573_v45 = vmul.f32 %v6541_v6, %v13943_v18 }
 0xe9f   : > { %v6938_v25 = vpack.c.bf16 %v6912_v9, %v6911_v31  ;;  %v6756_v33 = vmul.f32 %v6724_v40, %v6500_v13  ;;  %v6540_v31 = vmul.f32 0.044715, %v13853_v8  ;;  %v6601_v9 = vmul.f32 %v6569_v46, %v13893_v56 }
 0xea0   : > { %v6501_v26 = vmul.f32 0.5, %v14703_v52  ;;  %v6503_v27 = vmul.f32 0.5, %v13691_v21  ;;  %v6544_v11 = vmul.f32 0.044715, %v13940_v35  ;;  %v6605_v32 = vmul.f32 %v6573_v45, %v13943_v18 }
 0xea1   : > { %8024 = vmatmul.mubr.msk.bf16.gmra.mrb[72].mxu0 %vm6956_vm4, %v6938_v25  ;;  %v6602_v25 = vmul.f32 %v6570_v53, %v13925_v19  ;;  %v6572_v22 = vmul.f32 %v6540_v31, %v13853_v8  ;;  %v6633_v42 = vadd.f32 %v6601_v9, %v13893_v56  ;;  %v6504_v30 = vmul.f32 0.5, %v13729_v16 }
 0xea2   : > { %v6637_v53 = vadd.f32 %v6605_v32, %v13943_v18  ;;  %v6577_v62 = vmul.f32 %v6545_v0, %v13948_v36  ;;  %v6548_v6 = vmul.f32 0.044715, %v14007_v29  ;;  %v6505_v32 = vmul.f32 0.5, %v13893_v56 }
 0xea3   : > { %v8642_v17 = vpop.eup %8641  ;;  %v6634_v43 = vadd.f32 %v6602_v25, %v13925_v19  ;;  %v6604_v5 = vmul.f32 %v6572_v22, %v13853_v8  ;;  %v6665_v44 = vmul.f32 0.7978846, %v6633_v42  ;;  %v6508_v56 = vmul.f32 0.5, %v13853_v8 }
 0xea4   : > { %v8644_v55 = vpop.eup %8643  ;;  %v6725_v51 = vadd.f32 1.0, %v8642_v17  ;;  %v6547_v17 = vmul.f32 0.044715, %v13975_v15 }
 0xea5   : > { %v6726_v28 = vadd.f32 1.0, %v8644_v55  ;;  %v6636_v52 = vadd.f32 %v6604_v5, %v13853_v8  ;;  %8649 = vtanh.f32 %v6665_v44  ;;  %v6580_v5 = vmul.f32 %v6548_v6, %v14007_v29 }
 0xea6   : > { %v6757_v40 = vmul.f32 %v6725_v51, %v6501_v26  ;;  %v6579_v51 = vmul.f32 %v6547_v17, %v13975_v15 }
 0xea7   : > { %v8646_v37 = vpop.eup %8645 }
 0xea8   : > { %v8648_v57 = vpop.eup %8647  ;;  %v6727_v58 = vadd.f32 1.0, %v8646_v37  ;;  %v6609_v37 = vmul.f32 %v6577_v62, %v13948_v36 }
 0xea9   : > { %v6728_v13 = vadd.f32 1.0, %v8648_v57 }
 0xeaa   : > { %v6830_v2 = vpop.permute.xlu0 %6829  ;;  %v6641_v26 = vadd.f32 %v6609_v37, %v13948_v36 }
 0xeab   : > { %v6913_v7 = vmul.f32 %v6830_v2, %v6753_v63  ;;  %v6543_v2 = vmul.f32 0.044715, %v13929_v47  ;;  %v6635_v63 = vadd.f32 %v6603_v34, %v13838_v3  ;;  %v6669_v34 = vmul.f32 0.7978846, %v6637_v53 }
 0xead   : > { %v6832_v49 = vpop.permute.xlu1 %6831  ;;  %v6575_v21 = vmul.f32 %v6543_v2, %v13929_v47  ;;  %v6667_v46 = vmul.f32 0.7978846, %v6635_v63  ;;  %v6612_v63 = vmul.f32 %v6580_v5, %v14007_v29 }
 0xeae   : > { %v6914_v23 = vmul.f32 %v6832_v49, %v6754_v39  ;;  %v6834_v59 = vpop.permute.xlu0 %6833  ;;  %v6574_v39 = vmul.f32 %v6542_v12, %v13936_v60  ;;  %v6758_v49 = vmul.f32 %v6726_v28, %v6502_v54  ;;  %v6611_v54 = vmul.f32 %v6579_v51, %v13975_v15 }
 0xeaf   : > { %v6915_v4 = vmul.f32 %v6834_v59, %v6755_v10  ;;  %v6607_v16 = vmul.f32 %v6575_v21, %v13929_v47  ;;  %v8650_v45 = vpop.eup %8649  ;;  %v6506_v21 = vmul.f32 0.5, %v13925_v19 }
 0xeb0   : > { %v6939_v14 = vpack.c.bf16 %v6914_v23, %v6913_v7  ;;  %v6666_v23 = vmul.f32 0.7978846, %v6634_v43  ;;  %v6606_v10 = vmul.f32 %v6574_v39, %v13936_v60 }
 0xeb1   : > { %v6836_v50 = vpop.permute.xlu1 %6835  ;;  %v6639_v12 = vadd.f32 %v6607_v16, %v13929_v47 }
 0xeb2   : > { %v6916_v24 = vmul.f32 %v6836_v50, %v6756_v33  ;;  %8027 = vmatprep.mubr.msk.bf16.mxu0 %vm6956_vm4, %v6939_v14  ;;  %v6576_v33 = vmul.f32 %v6544_v11, %v13940_v35  ;;  %v6546_v50 = vmul.f32 0.044715, %v13956_v61  ;;  %8651 = vtanh.f32 %v6666_v23 }
 0xeb3   : > { %v6638_v55 = vadd.f32 %v6606_v10, %v13936_v60  ;;  %8653 = vtanh.f32 %v6667_v46  ;;  %v6671_v2 = vmul.f32 0.7978846, %v6639_v12  ;;  %v6729_v23 = vadd.f32 1.0, %v8650_v45 }
 0xeb4   : > { %v6940_v48 = vpack.c.bf16 %v6916_v24, %v6915_v4  ;;  %v6759_v4 = vmul.f32 %v6727_v58, %v6503_v27  ;;  %v6760_v24 = vmul.f32 %v6728_v13, %v6504_v30  ;;  %v6608_v25 = vmul.f32 %v6576_v33, %v13940_v35 }
 0xeb5   : > { %v6578_v22 = vmul.f32 %v6546_v50, %v13956_v61  ;;  %v6670_v28 = vmul.f32 0.7978846, %v6638_v55  ;;  %v6509_v55 = vmul.f32 0.5, %v13943_v18  ;;  %v6511_v18 = vmul.f32 0.5, %v13929_v47 }
 0xeb6   : > { %8028 = vmatmul.mubr.msk.bf16.gmra.mrb[76].mxu0 %vm6956_vm4, %v6940_v48  ;;  %v6668_v48 = vmul.f32 0.7978846, %v6636_v52  ;;  %v6640_v57 = vadd.f32 %v6608_v25, %v13940_v35  ;;  %v6514_v47 = vmul.f32 0.5, %v13956_v61 }
 0xeb7   : > { %v6610_v43 = vmul.f32 %v6578_v22, %v13956_v61 }
 0xeb8   : > { %8655 = vtanh.f32 %v6668_v48 }
 0xeb9   : > { %8657 = vtanh.f32 %v6669_v34  ;;  %v6642_v44 = vadd.f32 %v6610_v43, %v13956_v61 }
 0xeba   : > { %8659 = vtanh.f32 %v6670_v28 }
 0xebb   : > { %8661 = vtanh.f32 %v6671_v2  ;;  %v6674_v13 = vmul.f32 0.7978846, %v6642_v44  ;;  %v6512_v2 = vmul.f32 0.5, %v13940_v35 }
 0xebc   : > { %v8652_v27 = vpop.eup %8651 }
 0xebd   : > { %v8654_v39 = vpop.eup %8653  ;;  %v6730_v52 = vadd.f32 1.0, %v8652_v27 }
 0xebe   : > { %v6731_v33 = vadd.f32 1.0, %v8654_v39 }
 0xebf   : > { %v6838_v41 = vpop.permute.xlu0 %6837  ;;  %v6762_v10 = vmul.f32 %v6730_v52, %v6506_v21 }
 0xec0   : > { %v6917_v38 = vmul.f32 %v6838_v41, %v6757_v40  ;;  %v6672_v41 = vmul.f32 0.7978846, %v6640_v57  ;;  %v6673_v40 = vmul.f32 0.7978846, %v6641_v26 }
 0xec1   : > { %v6840_v7 = vpop.permute.xlu1 %6839 }
 0xec2   : > { %v6918_v59 = vmul.f32 %v6840_v7, %v6758_v49  ;;  %v6643_v49 = vadd.f32 %v6611_v54, %v13975_v15  ;;  %v8656_v58 = vpop.eup %8655  ;;  %8663 = vtanh.f32 %v6672_v41  ;;  %v6644_v7 = vadd.f32 %v6612_v63, %v14007_v29 }
 0xec3   : > { %v6842_v14 = vpop.permute.xlu0 %6841  ;;  %8665 = vtanh.f32 %v6673_v40  ;;  %v8658_v0 = vpop.eup %8657  ;;  %v6732_v50 = vadd.f32 1.0, %v8656_v58 }
 0xec4   : > { %v6941_v1 = vpack.c.bf16 %v6918_v59, %v6917_v38  ;;  %v6919_v31 = vmul.f32 %v6842_v14, %v6759_v4  ;;  %v6675_v38 = vmul.f32 0.7978846, %v6643_v49  ;;  %8667 = vtanh.f32 %v6674_v13 }
 0xec5   : > { %v6844_v20 = vpop.permute.xlu1 %6843  ;;  %v6676_v30 = vmul.f32 0.7978846, %v6644_v7  ;;  %v6761_v14 = vmul.f32 %v6729_v23, %v6505_v32  ;;  %v6733_v19 = vadd.f32 1.0, %v8658_v0 }
 0xec6   : > { %v6920_v9 = vmul.f32 %v6844_v20, %v6760_v24  ;;  %8031 = vmatprep.mubr.msk.bf16.mxu0 %vm6956_vm4, %v6941_v1  ;;  %v8660_v1 = vpop.eup %8659  ;;  %v6507_v24 = vmul.f32 0.5, %v13838_v3  ;;  %8669 = vtanh.f32 %v6675_v38  ;;  %v6510_v3 = vmul.f32 0.5, %v13936_v60 }
 0xec7   : > { %8671 = vtanh.f32 %v6676_v30  ;;  %v8662_v48 = vpop.eup %8661  ;;  %v6765_v8 = vmul.f32 %v6733_v19, %v6509_v55 }
 0xec8   : > { %v6942_v42 = vpack.c.bf16 %v6920_v9, %v6919_v31  ;;  %v6763_v16 = vmul.f32 %v6731_v33, %v6507_v24  ;;  %v6764_v31 = vmul.f32 %v6732_v50, %v6508_v56  ;;  %v6734_v9 = vadd.f32 1.0, %v8660_v1 }
 0xec9   : > { %v6735_v37 = vadd.f32 1.0, %v8662_v48 }
 0xeca   : > { %8032 = vmatmul.mubr.msk.bf16.gmra.mrb[80].mxu0 %vm6956_vm4, %v6942_v42  ;;  %v6766_v12 = vmul.f32 %v6734_v9, %v6510_v3 }
 0xecb   : > { %v6767_v27 = vmul.f32 %v6735_v37, %v6511_v18 }
 0xecc   : > { %v8664_v62 = vpop.eup %8663 }
 0xecd   : > { %v8666_v42 = vpop.eup %8665  ;;  %v6736_v51 = vadd.f32 1.0, %v8664_v62 }
 0xece   : > { %v8668_v28 = vpop.eup %8667  ;;  %v6737_v26 = vadd.f32 1.0, %v8666_v42 }
 0xecf   : > { %v6768_v41 = vmul.f32 %v6736_v51, %v6512_v2  ;;  %v6738_v44 = vadd.f32 1.0, %v8668_v28  ;;  %v14712_v28 = vld [vmem:[#allocation82_spill] sm:$0xff] }
 0xed0   : > { %v8670_v54 = vpop.eup %8669 }
 0xed1   : > { %v8672_v63 = vpop.eup %8671  ;;  %v6770_v35 = vmul.f32 %v6738_v44, %v6514_v47  ;;  %v6739_v23 = vadd.f32 1.0, %v8670_v54  ;;  %v14716_v44 = vld [vmem:[#allocation86_spill] sm:$0xff] }
 0xed2   : > { %v6846_v11 = vpop.permute.xlu0 %6845  ;;  %v6740_v52 = vadd.f32 1.0, %v8672_v63 }
 0xed3   : > { %v6921_v46 = vmul.f32 %v6846_v11, %v6761_v14  ;;  %v6513_v11 = vmul.f32 0.5, %v13948_v36  ;;  %v6516_v36 = vmul.f32 0.5, %v14007_v29  ;;  %v14706_v29 = vld [vmem:[#allocation77_spill] sm:$0xff] }
 0xed5   : > { %v6769_v13 = vmul.f32 %v6737_v26, %v6513_v11  ;;  %v14715_v26 = vld [vmem:[#allocation84_spill] sm:$0xff] }
 0xed6   : > { %v6850_v59 = vpop.permute.xlu0 %6849 }
 0xed7   : > { %v6923_v22 = vmul.f32 %v6850_v59, %v6763_v16  ;;  %v6515_v59 = vmul.f32 0.5, %v13975_v15  ;;  %v14707_v16 = vld [vmem:[#allocation76_spill] sm:$0xff] }
 0xed9   : > { %v6848_v4 = vpop.permute.xlu1 %6847  ;;  %v6771_v14 = vmul.f32 %v6739_v23, %v6515_v59  ;;  %v14722_v59 = vld [vmem:[#allocation41_spill] sm:$0xff] }
 0xeda   : > { %v6922_v20 = vmul.f32 %v6848_v4, %v6762_v10  ;;  %v6772_v10 = vmul.f32 %v6740_v52, %v6516_v36  ;;  %v14721_v52 = vld [vmem:[#allocation91_spill] sm:$0xff] }
 0xedc   : > { %v6943_v53 = vpack.c.bf16 %v6922_v20, %v6921_v46  ;;  %v14705_v46 = vld [vmem:[#allocation92_spill] sm:$0xff] }
 0xedd   : > { %v6852_v17 = vpop.permute.xlu1 %6851  ;;  %v6854_v25 = vpop.permute.xlu0 %6853 }
 0xede   : > { %v6924_v6 = vmul.f32 %v6852_v17, %v6764_v31  ;;  %8035 = vmatprep.mubr.msk.bf16.mxu0 %vm6956_vm4, %v6943_v53  ;;  %v6925_v5 = vmul.f32 %v6854_v25, %v6765_v8  ;;  %v14708_v17 = vld [vmem:[#allocation78_spill] sm:$0xff]  ;;  %v14709_v25 = vld [vmem:[#allocation79_spill] sm:$0xff] }
 0xee0   : > { %v6944_v34 = vpack.c.bf16 %v6924_v6, %v6923_v22  ;;  %v14710_v6 = vld [vmem:[#allocation81_spill] sm:$0xff] }
 0xee1   : > { %v6856_v57 = vpop.permute.xlu1 %6855  ;;  %v6858_v43 = vpop.permute.xlu0 %6857 }
 0xee2   : > { %v6926_v45 = vmul.f32 %v6856_v57, %v6766_v12  ;;  %8036 = vmatmul.mubr.msk.bf16.gmra.mrb[84].mxu0 %vm6956_vm4, %v6944_v34  ;;  %v6927_v49 = vmul.f32 %v6858_v43, %v6767_v27  ;;  %v14711_v34 = vld [vmem:[#allocation80_spill] sm:$0xff]  ;;  %v14713_v43 = vld [vmem:[#allocation83_spill] sm:$0xff] }
 0xee4   : > { %v6945_v60 = vpack.c.bf16 %v6926_v45, %v6925_v5  ;;  %v14714_v45 = vld [vmem:[#allocation85_spill] sm:$0xff] }
 0xee5   : > { %v6860_v39 = vpop.permute.xlu1 %6859  ;;  %v6862_v40 = vpop.permute.xlu0 %6861 }
 0xee6   : > { %v6928_v58 = vmul.f32 %v6860_v39, %v6768_v41  ;;  %8039 = vmatprep.mubr.msk.bf16.mxu0 %vm6956_vm4, %v6945_v60  ;;  %v6929_v21 = vmul.f32 %v6862_v40, %v6769_v13  ;;  %v14717_v39 = vld [vmem:[#allocation87_spill] sm:$0xff]  ;;  %v14718_v40 = vld [vmem:[#allocation89_spill] sm:$0xff] }
 0xee8   : > { %v6946_v7 = vpack.c.bf16 %v6928_v58, %v6927_v49  ;;  %v14719_v58 = vld [vmem:[#allocation88_spill] sm:$0xff] }
 0xee9   : > { %v6864_v32 = vpop.permute.xlu1 %6863  ;;  %v6866_v30 = vpop.permute.xlu0 %6865 }
 0xeea   : > { %v6930_v38 = vmul.f32 %v6864_v32, %v6770_v35  ;;  %8040 = vmatmul.mubr.msk.bf16.gmra.mrb[88].mxu0 %vm6956_vm4, %v6946_v7  ;;  %v6931_v61 = vmul.f32 %v6866_v30, %v6771_v14  ;;  %v14720_v7 = vld [vmem:[#allocation90_spill] sm:$0xff]  ;;  %v14723_v30 = vld [vmem:[#allocation40_spill] sm:$0xff] }
 0xeeb   : > { %v14724_v14 = vld [vmem:[#allocation42_spill] sm:$0xff] }
 0xeec   : > { %v6947_v0 = vpack.c.bf16 %v6930_v38, %v6929_v21 }
 0xeed   : > { %v6868_v33 = vpop.permute.xlu1 %6867 }
 0xeee   : > { %v6932_v50 = vmul.f32 %v6868_v33, %v6772_v10  ;;  %8043 = vmatprep.mubr.msk.bf16.mxu0 %vm6956_vm4, %v6947_v0 }
 0xef0   : > { %v6948_v1 = vpack.c.bf16 %v6932_v50, %v6931_v61  ;;  %v14725_v50 = vld [vmem:[#allocation43_spill] sm:$0xff] }
 0xef2   : > { %8044 = vmatmul.mubr.msk.bf16.gmra.mrb[92].mxu0 %vm6956_vm4, %v6948_v1 }
 0xf5e   : > { %v8017_v4 = vpop.f32.mrb[64].mxu0 }
 0xf5f   : > { %v7043_v24 = vpop.f32.mrb[65].mxu0  ;;  %v7172_v31 = vadd.f32 %v8017_v4, %v14707_v16  ;;  %v14728_v16 = vld [vmem:[#allocation46_spill] sm:$0xff] }
 0xf60   : > { %v7170_v15 = vadd.f32 %v7043_v24, %v14705_v46  ;;  %v8018_v20 = vpop.f32.mrb[66].mxu0  ;;  %v14726_v46 = vld [vmem:[#allocation45_spill] sm:$0xff] }
 0xf61   : > { %v7046_v56 = vpop.f32.mrb[67].mxu0  ;;  %v7173_v55 = vadd.f32 %v8018_v20, %v14708_v17  ;;  %v14729_v17 = vld [vmem:[#allocation47_spill] sm:$0xff] }
 0xf62   : > { %7202 = vxpose.xlu0.b32.start [1/16] (narrow) %v7170_v15, 8  ;;  %v7171_v19 = vadd.f32 %v7046_v56, %v14706_v29  ;;  %v14727_v29 = vld [vmem:[#allocation44_spill] sm:$0xff] }
 0xf66   : > { %7203 = vxpose.xlu0.b32.cont [2/16] (narrow) %v7171_v19, 8  ;;  %v8021_v48 = vpop.f32.mrb[68].mxu0 }
 0xf67   : > { %v7059_v53 = vpop.f32.mrb[69].mxu0  ;;  %v7176_v12 = vadd.f32 %v8021_v48, %v14711_v34  ;;  %v14732_v34 = vld [vmem:[#allocation50_spill] sm:$0xff] }
 0xf68   : > { %v8022_v9 = vpop.f32.mrb[70].mxu0  ;;  %v7174_v22 = vadd.f32 %v7059_v53, %v14709_v25 }
 0xf69   : > { %v7062_v62 = vpop.f32.mrb[71].mxu0  ;;  %v7177_v57 = vadd.f32 %v8022_v9, %v14712_v28  ;;  %v14734_v28 = vld [vmem:[#allocation53_spill] sm:$0xff] }
 0xf6a   : > { %7204 = vxpose.xlu0.b32.cont [3/16] (narrow) %v7172_v31, 8  ;;  %v7175_v3 = vadd.f32 %v7062_v62, %v14710_v6  ;;  %v14730_v6 = vld [vmem:[#allocation49_spill] sm:$0xff] }
 0xf6e   : > { %7205 = vxpose.xlu0.b32.cont [4/16] (narrow) %v7173_v55, 8 }
 0xf72   : > { %7206 = vxpose.xlu0.b32.cont [5/16] (narrow) %v7174_v22, 8 }
 0xf74   : > { %v8025_v8 = vpop.f32.mrb[72].mxu0 }
 0xf75   : > { %v7075_v42 = vpop.f32.mrb[73].mxu0  ;;  %v7180_v54 = vadd.f32 %v8025_v8, %v14715_v26  ;;  %v14731_v8 = vld [vmem:[#allocation48_spill] sm:$0xff] }
 0xf76   : > { %7207 = vxpose.xlu0.b32.cont [6/16] (narrow) %v7175_v3, 8  ;;  %v8026_v37 = vpop.f32.mrb[74].mxu0  ;;  %v7178_v5 = vadd.f32 %v7075_v42, %v14713_v43  ;;  %v14735_v43 = vld [vmem:[#allocation52_spill] sm:$0xff] }
 0xf77   : > { %v7078_v51 = vpop.f32.mrb[75].mxu0  ;;  %v7181_v63 = vadd.f32 %v8026_v37, %v14716_v44  ;;  %v14733_v37 = vld [vmem:[#allocation51_spill] sm:$0xff] }
 0xf78   : > { %v7179_v18 = vadd.f32 %v7078_v51, %v14714_v45  ;;  %v14736_v45 = vld [vmem:[#allocation54_spill] sm:$0xff] }
 0xf7a   : > { %7208 = vxpose.xlu0.b32.cont [7/16] (narrow) %v7176_v12, 8 }
 0xf7e   : > { %7209 = vxpose.xlu0.b32.cont [8/16] (narrow) %v7177_v57, 8 }
 0xf82   : > { %7210 = vxpose.xlu0.b32.cont [9/16] (narrow) %v7178_v5, 8 }
 0xf86   : > { %7211 = vxpose.xlu0.b32.cont [10/16] (narrow) %v7179_v18, 8 }
 0xf89   : > { %v8029_v2 = vpop.f32.mrb[76].mxu0 }
 0xf8a   : > { %v7091_v60 = vpop.f32.mrb[77].mxu0  ;;  %7212 = vxpose.xlu0.b32.cont [11/16] (narrow) %v7180_v54, 8  ;;  %v7184_v47 = vadd.f32 %v8029_v2, %v14719_v58 }
 0xf8b   : > { %v8030_v27 = vpop.f32.mrb[78].mxu0  ;;  %v7182_v11 = vadd.f32 %v7091_v60, %v14717_v39 }
 0xf8c   : > { %v7094_v41 = vpop.f32.mrb[79].mxu0  ;;  %v7185_v35 = vadd.f32 %v8030_v27, %v14720_v7 }
 0xf8d   : > { %v7183_v49 = vadd.f32 %v7094_v41, %v14718_v40 }
 0xf8e   : > { %7213 = vxpose.xlu0.b32.cont [12/16] (narrow) %v7181_v63, 8 }
 0xf92   : > { %7214 = vxpose.xlu0.b32.cont [13/16] (narrow) %v7182_v11, 8 }
 0xf96   : > { %7215 = vxpose.xlu0.b32.cont [14/16] (narrow) %v7183_v49, 8 }
 0xf9a   : > { %7216 = vxpose.xlu0.b32.cont [15/16] (narrow) %v7184_v47, 8 }
 0xf9d   : > { %v8033_v13 = vpop.f32.mrb[80].mxu0 }
 0xf9e   : > { %v7107_v23 = vpop.f32.mrb[81].mxu0  ;;  %7217 = vxpose.xlu0.b32.end [16/16] (narrow) %v7185_v35, 8  ;;  %v7188_v0 = vadd.f32 %v8033_v13, %v14723_v30 }
 0xf9f   : > { %v7186_v32 = vadd.f32 %v7107_v23, %v14721_v52  ;;  %v8034_v21 = vpop.f32.mrb[82].mxu0 }
 0xfa0   : > { %v7110_v38 = vpop.f32.mrb[83].mxu0  ;;  %v7189_v10 = vadd.f32 %v8034_v21, %v14724_v14 }
 0xfa1   : > { %7234 = vxpose.xlu1.b32.start [1/16] (narrow) %v7186_v32, 8  ;;  %v7187_v36 = vadd.f32 %v7110_v38, %v14722_v59 }
 0xfa5   : > { %7235 = vxpose.xlu1.b32.cont [2/16] (narrow) %v7187_v36, 8 }
 0xfa9   : > { %7236 = vxpose.xlu1.b32.cont [3/16] (narrow) %v7188_v0, 8 }
 0xfad   : > { %7237 = vxpose.xlu1.b32.cont [4/16] (narrow) %v7189_v10, 8 }
 0xfb5   : > { %v8037_v33 = vpop.f32.mrb[84].mxu0 }
 0xfb6   : > { %v7123_v61 = vpop.f32.mrb[85].mxu0  ;;  %v7192_v19 = vadd.f32 %v8037_v33, %v14727_v29 }
 0xfb7   : > { %v7190_v1 = vadd.f32 %v7123_v61, %v14725_v50  ;;  %v8038_v4 = vpop.f32.mrb[86].mxu0 }
 0xfb8   : > { %v7126_v24 = vpop.f32.mrb[87].mxu0  ;;  %v7193_v31 = vadd.f32 %v8038_v4, %v14728_v16 }
 0xfb9   : > { %7238 = vxpose.xlu1.b32.cont [5/16] (narrow) %v7190_v1, 8  ;;  %v7191_v15 = vadd.f32 %v7126_v24, %v14726_v46 }
 0xfbd   : > { %v8041_v20 = vpop.f32.mrb[88].mxu0  ;;  %7239 = vxpose.xlu1.b32.cont [6/16] (narrow) %v7191_v15, 8 }
 0xfbe   : > { %v7139_v56 = vpop.f32.mrb[89].mxu0  ;;  %v7196_v42 = vadd.f32 %v8041_v20, %v14731_v8 }
 0xfbf   : > { %v8042_v48 = vpop.f32.mrb[90].mxu0  ;;  %v7194_v55 = vadd.f32 %v7139_v56, %v14729_v17 }
 0xfc0   : > { %v7142_v53 = vpop.f32.mrb[91].mxu0  ;;  %v7197_v12 = vadd.f32 %v8042_v48, %v14732_v34 }
 0xfc1   : > { %7240 = vxpose.xlu1.b32.cont [7/16] (narrow) %v7192_v19, 8  ;;  %v7195_v3 = vadd.f32 %v7142_v53, %v14730_v6 }
 0xfc5   : > { %v8045_v9 = vpop.f32.mrb[92].mxu0  ;;  %7241 = vxpose.xlu1.b32.cont [8/16] (narrow) %v7193_v31, 8 }
 0xfc6   : > { %v7155_v62 = vpop.f32.mrb[93].mxu0  ;;  %v7200_v5 = vadd.f32 %v8045_v9, %v14735_v43 }
 0xfc7   : > { %v8046_v25 = vpop.f32.mrb[94].mxu0  ;;  %v7198_v51 = vadd.f32 %v7155_v62, %v14733_v37 }
 0xfc8   : > { %v7158_v22 = vpop.f32.mrb[95].mxu0  ;;  %v7201_v18 = vadd.f32 %v8046_v25, %v14736_v45 }
 0xfc9   : > { %7242 = vxpose.xlu1.b32.cont [9/16] (narrow) %v7194_v55, 8  ;;  %v7199_v57 = vadd.f32 %v7158_v22, %v14734_v28 }
 0xfcd   : > { %7243 = vxpose.xlu1.b32.cont [10/16] (narrow) %v7195_v3, 8 }
 0xfd1   : > { %7244 = vxpose.xlu1.b32.cont [11/16] (narrow) %v7196_v42, 8 }
 0xfd5   : > { %7245 = vxpose.xlu1.b32.cont [12/16] (narrow) %v7197_v12, 8 }
 0xfd9   : > { %7246 = vxpose.xlu1.b32.cont [13/16] (narrow) %v7198_v51, 8 }
 0xfdd   : > { %7247 = vxpose.xlu1.b32.cont [14/16] (narrow) %v7199_v57, 8 }
 0xfe1   : > { %7248 = vxpose.xlu1.b32.cont [15/16] (narrow) %v7200_v5, 8 }
 0xfe2   : > { %v7218_v2 = vpop.trf.xlu0 }
 0xfe5   : > { %7249 = vxpose.xlu1.b32.end [16/16] (narrow) %v7201_v18, 8 }
0x1029   : > { %v7250_v26 = vpop.trf.xlu1 }
0x102a   : > { %v7268_v54 = vcombine.low %v7218_v2, %v7250_v26 }
0x102c   : > { %7270 = vst [vmem:[%s750_s3] sm:$0xff] %v7268_v54 }
0x102d   : > { %9128 = shalt.err (!%p9125_p2)
}
0x102e   : > { %s9129_s21 = scalar_lea.hbm %s14199_s8, 128  ;;  %s9133_s7 = scalar_lea.hbm %s14737_s6, 256 }
0x102f   : > { %p9130_p6 = scmp.ne.s32.totalorder %s14199_s8, %s9129_s21  ;;  %p9134_p9 = scmp.lt.u32.totalorder %s14199_s8, %s14737_s6 }
0x1030   : > { %p9135_p10 = scmp.lt.u32.totalorder %s9133_s7, %s9129_s21  ;;  %p9137_p12 = scmp.lt.u32.totalorder %s9129_s21, %s14199_s8 }
0x1031   : > { %p9131_p11 = pnand %p9130_p6, %p14738_p0 }
0x1032   : > { %p9136_p8 = por %p9135_p10, %p9134_p9 }
0x1033   : > { %p9132_p5 = pneg %p9131_p11 }
0x1034   : > { %p9138_p4 = por %p9137_p12, %p9136_p8 }
0x1036   : > { %p9139_p13 = pnand %p9138_p4, %p9132_p5 }
0x1038   : > { %9142 = shalt.err (!%p9139_p13)
}
0x1039   : > { %8109 = dma.vmem_to_hbm [thread:$0]  (%p14738_p0), %s14201_s27, 128, %s14199_s8, %s7272_s29  }
0x103a PF: > { %s7298_s3 = sand.u32 1, %s9201_s23   ;;  %p14739_p1 = scmp.ne.s32.totalorder %s14466_s16, 0 }
0x103b   : > { %p14740_p3 = scmp.ge.s32.totalorder %s9213_s26, 2  ;;  %s7299_s5 = scalar_lea.sflag [#allocation5], %s7298_s3 }
0x103d   : > { %p8159_p7 = pnand %p14740_p3, %p14739_p1 }
0x103f   : > { %9196 = dma.done.wait (!%p8159_p7), %s7299_s5, 128  }
0x1040   : > { %9198 = vsyncadd (!%p8159_p7), %s7299_s5, 4294967168  ;;  %p39_p2 = scmp.ge.s32.totalorder %s9678_s1, 4   ;;  %s14741_s23 = smov %s9205_s24 }
0x1041   : > { %s14742_s24 = smov %s9209_s25  ;;  %s14743_s25 = smov %s9690_s20 }
0x1042   : > { %s14744_s26 = smov %s9678_s1  ;;  %41 = sbr.rel (!%p39_p2) target bundleno = 27 (0x1b), region = 210 }
0x1049   :  { %7304 = vsyncpa [#allocation4], 1 }
0x104a   :  { %7306 = vsyncpa [#allocation4 + $0x1], 1 }
0x104b   :  { %7307 = vsyncpa [#allocation7], 1 }
0x104c   :  { %7309 = vsyncpa [#allocation7 + $0x1], 1 }
0x104d   :  { %7310 = vsyncpa [#allocation10], 1 }
0x104e   :  { %7311 = vsyncpa [#allocation13], 1 }
0x104f   :  { %7312 = vsyncpa [#allocation16], 1 }
0x1050   :  { %7313 = vsyncpa [#allocation19], 1 }
0x1051   :  { %7314 = vsyncpa [#allocation22], 1 }
0x1052   :  { %7315 = vsyncpa [#allocation25], 1 }
0x1053   :  { %7316 = vsyncpa [#allocation5], 1 }
0x1054   :  { %7318 = vsyncpa [#allocation5 + $0x1], 1 }

</bundles_post_ra>
